<compile_context>
chip_gen: v5e
topology: v5e:2x2
jax: 0.10.0
libtpu: 0.0.40
codegen_flags: <defaults>
</compile_context>

<pallas_src>
import numpy as np

import jax
import jax.numpy as jnp
from jax.experimental import pallas as pl
from jax.experimental.pallas import tpu as pltpu


# ---------------------------------------------------------------------------
# Static network geometry (MNIST: 1x28x28 -> Conv16 -> pool -> Conv16 -> pool
# -> Linear(400,64) -> Linear(64,10))
# ---------------------------------------------------------------------------
C1, C2 = 16, 16
OW1 = 26          # conv1 output width/height (28 - 3 + 1)
PW1 = 13          # after 2x2 max pool
OW2 = 11          # conv2 output width/height (13 - 3 + 1)
PW2 = 5           # after 2x2 max pool
L1 = C1 * OW1     # 416 conv1 output lanes  (lane = c*26 + col)
L2 = C2 * OW2     # 176 conv2 output lanes  (lane = c*11 + col)
KIN = 96          # conv1 folded contraction: 3 kernel rows x 32 padded cols


# ---------------------------------------------------------------------------
# Fused forward kernel (one batch tile of T images per grid step)
# ---------------------------------------------------------------------------
# Activation layout inside the kernel:
#   conv activations : 2-D, rows = spatial_row * T + image_in_tile,
#                      lanes = channel * width + column ("c-major")
def make_net_kernel(T):
    R2 = OW2 * T                       # conv2 output rows per tile
    f32, bf16 = jnp.float32, jnp.bfloat16

    def net_kernel(x_ref, w1a_ref, w1b_ref, b1_ref, w2_ref, s2_ref, b2_ref,
                   wfc1_ref, bfc1_ref, wfc2_ref, bfc2_ref, out_ref, h1p_ref):
        # ---- conv1 (1->16 ch, 3x3 valid): one K=96 bf16 matmul per pooling
        # column ("a" = column 2t, "b" = column 2t+1).
        x = x_ref[...]                                               # (26T, 96) bf16
        acc_a = jnp.dot(x, w1a_ref[...], preferred_element_type=f32)  # (26T, 416)
        acc_b = jnp.dot(x, w1b_ref[...], preferred_element_type=f32)
        b1 = b1_ref[...]                                             # (1, 416) f32
        # column pool + ReLU (relu commutes with max); odd lanes are junk but
        # never read downstream (see header comment).
        lane_pooled = jnp.maximum(jnp.maximum(acc_a + b1, acc_b + b1), 0.0)
        # row pool -> bf16 scratch; row t*T + n = pooled row t of image n.
        for t in range(PW1):
            h1p_ref[t * T:(t + 1) * T, :] = jnp.maximum(
                lane_pooled[(2 * t) * T:(2 * t + 1) * T, :],
                lane_pooled[(2 * t + 1) * T:(2 * t + 2) * T, :]).astype(bf16)

        # ---- conv2 (16->16 ch, 3x3 valid): 3 accumulating K=416 matmuls.
        acc2 = jnp.dot(h1p_ref[0:R2, :], w2_ref[0], preferred_element_type=f32)
        for di in range(1, 3):
            acc2 = acc2 + jnp.dot(h1p_ref[di * T: di * T + R2, :], w2_ref[di],
                                  preferred_element_type=f32)
        z = acc2 + b2_ref[...]                                       # (11T, 176)
        # Right-hand pooling neighbour via a tiny permutation matmul:
        # zb[:, c*11+ow] = z[:, c*11+ow+1] (ow<=9); lane c*11+10 -> 0 (unused).
        zb = jnp.dot(z.astype(bf16), s2_ref[...], preferred_element_type=f32)
        lp2 = jnp.maximum(jnp.maximum(z, zb), 0.0)                   # col pool + relu

        # ---- pool2 rows fused into the fc1 accumulation ----------------------
        h = None
        for s in range(PW2):
            piece = jnp.maximum(lp2[(2 * s) * T:(2 * s + 1) * T, :],
                                lp2[(2 * s + 1) * T:(2 * s + 2) * T, :])  # (T,176)
            d = jnp.dot(piece.astype(bf16), wfc1_ref[s], preferred_element_type=f32)
            h = d if h is None else h + d
        h = jnp.maximum(h + bfc1_ref[...], 0.0)                      # (T, 64)

        # ---- fc2 + log_softmax (padded lanes carry a -1e30 f32 bias) ---------
        logits = jnp.dot(h.astype(bf16), wfc2_ref[...], preferred_element_type=f32)
        logits = logits + bfc2_ref[...]                              # (T, 128) f32
        m = jnp.max(logits, axis=-1, keepdims=True)
        shifted = logits - m
        lse = jnp.log(jnp.sum(jnp.exp(shifted), axis=-1, keepdims=True))
        out_ref[...] = shifted - lse                                 # lane-dense

    return net_kernel


# ---------------------------------------------------------------------------
# Host-side packing of the PyTorch-layout parameters into structured matrices
# ---------------------------------------------------------------------------
def pack_params(p):
    w1 = np.asarray(p["w_conv1"], np.float32)   # (16, 1, 3, 3)
    b1 = np.asarray(p["b_conv1"], np.float32)   # (16,)
    w2 = np.asarray(p["w_conv2"], np.float32)   # (16, 16, 3, 3)
    b2 = np.asarray(p["b_conv2"], np.float32)   # (16,)
    wf1 = np.asarray(p["w_fc1"], np.float32)    # (64, 400)  (out, in)
    bf1 = np.asarray(p["b_fc1"], np.float32)    # (64,)
    wf2 = np.asarray(p["w_fc2"], np.float32)    # (10, 64)
    bf2 = np.asarray(p["b_fc2"], np.float32)    # (10,)

    cols1 = np.arange(C1) * OW1
    # conv1, K folded over the 3 kernel rows: LHS lane = di*32 + input_col.
    # "a" writes output column ow, "b" writes output column ow+1 (pool partner;
    # taps that would read input col >= 28 are dropped -> lane 25 is junk).
    w1a = np.zeros((KIN, L1), np.float32)
    w1b = np.zeros((KIN, L1), np.float32)
    for di in range(3):
        for ow in range(OW1):
            for dj in range(3):
                w1a[di * 32 + ow + dj, cols1 + ow] = w1[:, 0, di, dj]
                iw = ow + 1 + dj
                if iw < 28:
                    w1b[di * 32 + iw, cols1 + ow] = w1[:, 0, di, dj]
    b1row = np.repeat(b1, OW1)[None, :]          # (1, 416)

    # conv2: valid input lanes are c1*26 + 2*t (t = pooled column 0..12);
    # one (416, 176) matrix per kernel row, accumulated in the kernel.
    cols2 = np.arange(C2) * OW2
    w2k = np.zeros((3, L1, L2), np.float32)
    for di in range(3):
        for c1 in range(C1):
            for ow in range(OW2):
                for dj in range(3):
                    w2k[di, c1 * OW1 + 2 * (ow + dj), cols2 + ow] = w2[:, c1, di, dj]
    b2row = np.repeat(b2, OW2)[None, :]          # (1, 176)

    # Per-channel lane-shift permutation (right pooling neighbour for conv2):
    # s2[c*11+ow+1, c*11+ow] = 1 for ow in 0..9; column c*11+10 stays empty.
    s2 = np.zeros((L2, L2), np.float32)
    for c in range(C2):
        for ow in range(OW2 - 1):
            s2[c * OW2 + ow + 1, c * OW2 + ow] = 1.0

    # fc1: pooled feature (y, c, x) lives at row-block y, lane c*11 + 2*x;
    # PyTorch flatten index is c*25 + y*5 + x (Flatten keeps C-major order).
    wfc1 = np.zeros((PW2, L2, 64), np.float32)
    for y in range(PW2):
        for c in range(C2):
            for xcol in range(PW2):
                wfc1[y, c * OW2 + 2 * xcol, :] = wf1[:, c * 25 + y * 5 + xcol]
    bfc1 = bf1[None, :]                          # (1, 64)

    # fc2: zero-pad the 10 classes to 128 lanes; padded lanes get a -1e30 bias
    # (kept in f32 so the log_softmax padding trick stays exact).
    wfc2 = np.zeros((64, 128), np.float32)
    wfc2[:, :10] = wf2.T
    bfc2 = np.full((1, 128), -1e30, np.float32)
    bfc2[0, :10] = bf2

    bf16 = lambda a: jnp.asarray(a, jnp.bfloat16)
    f32 = lambda a: jnp.asarray(a, jnp.float32)
    return dict(w1a=bf16(w1a), w1b=bf16(w1b), b1=f32(b1row),
                w2=bf16(w2k), s2=bf16(s2), b2=f32(b2row),
                wfc1=bf16(wfc1), bfc1=f32(bfc1),
                wfc2=bf16(wfc2), bfc2=f32(bfc2))


# ---------------------------------------------------------------------------
# Wrapper: one fused pallas_call with a "parallel" batch-tile grid
# ---------------------------------------------------------------------------
def _choose_tile(n):
    # 32 images/step for large batches (fills MXU M, amortizes per-step
    # overhead, keeps G >= 2 on v7x), 16 otherwise.  Both keep every in-kernel
    # row slice aligned to the bf16 sublane packing (multiples of 16 rows).
    return 32 if n >= 64 else 16


@jax.jit
def net_forward(packed, x):
    # x: (N, 1, 28, 28) float32 (PyTorch NCHW); dropout is identity in eval.
    N = x.shape[0]
    T = _choose_tile(N)
    G = (N + T - 1) // T
    Np = G * T

    # Build the conv1 LHS directly in its in-kernel layout (single XLA pass
    # over the tiny input, consumed as bf16 by the kernel):
    #   row  = tile*26*T + out_row*T + image_in_tile
    #   lane = kernel_row*32 + input_col   (28 cols zero-padded to 32)
    xr = jnp.pad(x.reshape(N, 28, 28).astype(jnp.float32),
                 ((0, Np - N), (0, 0), (0, 4)))                       # (Np, 28, 32)
    lhs = jnp.stack([xr[:, d:d + OW1, :] for d in range(3)], axis=2)  # (Np,26,3,32)
    lhs = lhs.reshape(G, T, OW1, KIN).transpose(0, 2, 1, 3)
    lhs = lhs.reshape(G * OW1 * T, KIN).astype(jnp.bfloat16)
    # TODO(synk): callers that can supply x already in this layout would skip
    # the pad/stack/transpose HBM pass entirely.

    out = pl.pallas_call(
        make_net_kernel(T),
        out_shape=jax.ShapeDtypeStruct((Np, 128), jnp.float32),
        grid_spec=pltpu.PrefetchScalarGridSpec(
            num_scalar_prefetch=0,
            grid=(G,),
            in_specs=[
                pl.BlockSpec((OW1 * T, KIN), lambda i: (i, 0)),       # conv1 LHS tile
                pl.BlockSpec((KIN, L1), lambda i: (0, 0)),            # w1a
                pl.BlockSpec((KIN, L1), lambda i: (0, 0)),            # w1b
                pl.BlockSpec((1, L1), lambda i: (0, 0)),              # b1
                pl.BlockSpec((3, L1, L2), lambda i: (0, 0, 0)),       # w2 (3 row taps)
                pl.BlockSpec((L2, L2), lambda i: (0, 0)),             # s2 lane shift
                pl.BlockSpec((1, L2), lambda i: (0, 0)),              # b2
                pl.BlockSpec((PW2, L2, 64), lambda i: (0, 0, 0)),     # fc1 (by row)
                pl.BlockSpec((1, 64), lambda i: (0, 0)),              # b_fc1
                pl.BlockSpec((64, 128), lambda i: (0, 0)),            # fc2 (padded)
                pl.BlockSpec((1, 128), lambda i: (0, 0)),             # b_fc2 (padded)
            ],
            out_specs=pl.BlockSpec((T, 128), lambda i: (i, 0)),
            scratch_shapes=[pltpu.VMEM((PW1 * T, L1), jnp.bfloat16)],  # pooled conv1
        ),
        compiler_params=pltpu.CompilerParams(
            dimension_semantics=("parallel",),
            vmem_limit_bytes=32 * 1024 * 1024),
    )(lhs, packed["w1a"], packed["w1b"], packed["b1"],
      packed["w2"], packed["s2"], packed["b2"],
      packed["wfc1"], packed["bfc1"], packed["wfc2"], packed["bfc2"])
    return out[:N, :10]


# ---------------------------------------------------------------------------
# Parameter init (PyTorch layout) and a pure-JAX reference for sanity checking
# ---------------------------------------------------------------------------
def init_params(key):
    ks = jax.random.split(key, 8)

    def u(k, shape, fan_in):
        bound = 1.0 / np.sqrt(float(fan_in))
        return jax.random.uniform(k, shape, jnp.float32, -bound, bound)

    return dict(
        w_conv1=u(ks[0], (16, 1, 3, 3), 9),    b_conv1=u(ks[1], (16,), 9),
        w_conv2=u(ks[2], (16, 16, 3, 3), 144), b_conv2=u(ks[3], (16,), 144),
        w_fc1=u(ks[4], (64, 400), 400),        b_fc1=u(ks[5], (64,), 400),
        w_fc2=u(ks[6], (10, 64), 64),          b_fc2=u(ks[7], (10,), 64),
    )


def reference_forward(p, x):
    # Plain XLA reference of the PyTorch Net in eval mode (dropout = identity).
    def conv(x, w, b):
        y = jax.lax.conv_general_dilated(
            x, w, (1, 1), "VALID", dimension_numbers=("NCHW", "OIHW", "NCHW"))
        return jax.nn.relu(y + b[None, :, None, None])

    def pool(x):
        return jax.lax.reduce_window(x, -jnp.inf, jax.lax.max,
                                     (1, 1, 2, 2), (1, 1, 2, 2), "VALID")

    x = pool(conv(x, p["w_conv1"], p["b_conv1"]))
    x = pool(conv(x, p["w_conv2"], p["b_conv2"]))
    x = x.reshape(x.shape[0], -1)
    x = jax.nn.relu(x @ p["w_fc1"].T + p["b_fc1"])
    x = x @ p["w_fc2"].T + p["b_fc2"]
    return jax.nn.log_softmax(x, axis=-1)


if __name__ == "__main__":
    key = jax.random.PRNGKey(0)
    pkey, xkey = jax.random.split(key)
    params = init_params(pkey)
    packed = pack_params(params)

    # MNIST-shaped input: Linear(400, 64) implies 28x28x1 inputs.
    x = jax.random.normal(xkey, (2, 1, 28, 28), jnp.float32)

    out = jax.block_until_ready(net_forward(packed, x))
    assert out.shape == (2, 10)
    # log_softmax sanity: exp(rows) sum to 1
    assert jnp.allclose(jnp.sum(jnp.exp(out), axis=1), 1.0, atol=1e-4)
    # end-to-end check against the XLA reference (bf16 MXU operands, f32 accum)
    ref = reference_forward(params, x)
    max_diff = float(jnp.max(jnp.abs(out - ref)))
    assert max_diff < 5e-2, max_diff
    print("KERNEL_OK")
</pallas_src>

<mosaic_0001>
module attributes {stable_mosaic.version = 11 : i64} {
  func.func @net_kernel(%arg0: i32, %arg1: memref<416x96xbf16, #tpu.memory_space<vmem>>, %arg2: memref<96x416xbf16, #tpu.memory_space<vmem>>, %arg3: memref<96x416xbf16, #tpu.memory_space<vmem>>, %arg4: memref<1x416xf32, #tpu.memory_space<vmem>>, %arg5: memref<3x416x176xbf16, #tpu.memory_space<vmem>>, %arg6: memref<176x176xbf16, #tpu.memory_space<vmem>>, %arg7: memref<1x176xf32, #tpu.memory_space<vmem>>, %arg8: memref<5x176x64xbf16, #tpu.memory_space<vmem>>, %arg9: memref<1x64xf32, #tpu.memory_space<vmem>>, %arg10: memref<64x128xbf16, #tpu.memory_space<vmem>>, %arg11: memref<1x128xf32, #tpu.memory_space<vmem>>, %arg12: memref<16x128xf32, #tpu.memory_space<vmem>>, %arg13: memref<208x416xbf16, #tpu.memory_space<vmem>>) attributes {dimension_semantics = [#tpu.dimension_semantics<parallel>], iteration_bounds = array<i64: 1>, scalar_prefetch = 0 : i64, scratch_operands = 1 : i64, tpu.core_type = #tpu.core_type<tc>, window_params = [{transform_indices = @transform_0, window_bounds = array<i64: 416, 96>}, {pipeline_mode = #tpu.pipeline_mode<synchronous>, transform_indices = @transform_1, window_bounds = array<i64: 96, 416>}, {pipeline_mode = #tpu.pipeline_mode<synchronous>, transform_indices = @transform_2, window_bounds = array<i64: 96, 416>}, {pipeline_mode = #tpu.pipeline_mode<synchronous>, transform_indices = @transform_3, window_bounds = array<i64: 1, 416>}, {pipeline_mode = #tpu.pipeline_mode<synchronous>, transform_indices = @transform_4, window_bounds = array<i64: 3, 416, 176>}, {pipeline_mode = #tpu.pipeline_mode<synchronous>, transform_indices = @transform_5, window_bounds = array<i64: 176, 176>}, {pipeline_mode = #tpu.pipeline_mode<synchronous>, transform_indices = @transform_6, window_bounds = array<i64: 1, 176>}, {pipeline_mode = #tpu.pipeline_mode<synchronous>, transform_indices = @transform_7, window_bounds = array<i64: 5, 176, 64>}, {pipeline_mode = #tpu.pipeline_mode<synchronous>, transform_indices = @transform_8, window_bounds = array<i64: 1, 64>}, {pipeline_mode = #tpu.pipeline_mode<synchronous>, transform_indices = @transform_9, window_bounds = array<i64: 64, 128>}, {pipeline_mode = #tpu.pipeline_mode<synchronous>, transform_indices = @transform_10, window_bounds = array<i64: 1, 128>}, {transform_indices = @transform_11, window_bounds = array<i64: 16, 128>}]} {
    %c0 = arith.constant 0 : index
    %c0_0 = arith.constant 0 : index
    %0 = vector.load %arg1[%c0, %c0_0] : memref<416x96xbf16, #tpu.memory_space<vmem>>, vector<416x96xbf16>
    %c0_1 = arith.constant 0 : index
    %c0_2 = arith.constant 0 : index
    %1 = vector.load %arg2[%c0_1, %c0_2] : memref<96x416xbf16, #tpu.memory_space<vmem>>, vector<96x416xbf16>
    %cst = arith.constant dense<0.000000e+00> : vector<416x416xf32>
    %2 = tpu.matmul %0, %1, %cst {dimension_numbers = #tpu.dot_dimension_numbers<[1], [0], [0], [1], [0, 0, 1, 1], [], []>} : vector<416x96xbf16>, vector<96x416xbf16>, vector<416x416xf32> -> vector<416x416xf32>
    %c0_3 = arith.constant 0 : index
    %c0_4 = arith.constant 0 : index
    %3 = vector.load %arg3[%c0_3, %c0_4] : memref<96x416xbf16, #tpu.memory_space<vmem>>, vector<96x416xbf16>
    %cst_5 = arith.constant dense<0.000000e+00> : vector<416x416xf32>
    %4 = tpu.matmul %0, %3, %cst_5 {dimension_numbers = #tpu.dot_dimension_numbers<[1], [0], [0], [1], [0, 0, 1, 1], [], []>} : vector<416x96xbf16>, vector<96x416xbf16>, vector<416x416xf32> -> vector<416x416xf32>
    %c0_6 = arith.constant 0 : index
    %c0_7 = arith.constant 0 : index
    %5 = vector.load %arg4[%c0_6, %c0_7] : memref<1x416xf32, #tpu.memory_space<vmem>>, vector<1x416xf32>
    %6 = vector.broadcast %5 : vector<1x416xf32> to vector<416x416xf32>
    %7 = arith.addf %2, %6 : vector<416x416xf32>
    %8 = vector.broadcast %5 : vector<1x416xf32> to vector<416x416xf32>
    %9 = arith.addf %4, %8 : vector<416x416xf32>
    %10 = arith.maximumf %7, %9 : vector<416x416xf32>
    %cst_8 = arith.constant 0.000000e+00 : f32
    %11 = vector.broadcast %cst_8 : f32 to vector<416x416xf32>
    %12 = arith.maximumf %10, %11 : vector<416x416xf32>
    %13 = vector.extract_strided_slice %12 {offsets = [0, 0], sizes = [16, 416], strides = [1, 1]} : vector<416x416xf32> to vector<16x416xf32>
    %14 = vector.extract_strided_slice %12 {offsets = [16, 0], sizes = [16, 416], strides = [1, 1]} : vector<416x416xf32> to vector<16x416xf32>
    %15 = arith.maximumf %13, %14 : vector<16x416xf32>
    %16 = arith.truncf %15 : vector<16x416xf32> to vector<16x416xbf16>
    %c0_9 = arith.constant 0 : index
    %c0_10 = arith.constant 0 : index
    %17 = vector.load %arg13[%c0_9, %c0_10] : memref<208x416xbf16, #tpu.memory_space<vmem>>, vector<16x416xbf16>
    tpu.vector_store %arg13[%c0_9, %c0_10], %16 {strides = array<i32>} : memref<208x416xbf16, #tpu.memory_space<vmem>>, vector<16x416xbf16>,
    %18 = vector.extract_strided_slice %12 {offsets = [32, 0], sizes = [16, 416], strides = [1, 1]} : vector<416x416xf32> to vector<16x416xf32>
    %19 = vector.extract_strided_slice %12 {offsets = [48, 0], sizes = [16, 416], strides = [1, 1]} : vector<416x416xf32> to vector<16x416xf32>
    %20 = arith.maximumf %18, %19 : vector<16x416xf32>
    %21 = arith.truncf %20 : vector<16x416xf32> to vector<16x416xbf16>
    %c16 = arith.constant 16 : index
    %c0_11 = arith.constant 0 : index
    %22 = vector.load %arg13[%c16, %c0_11] : memref<208x416xbf16, #tpu.memory_space<vmem>>, vector<16x416xbf16>
    tpu.vector_store %arg13[%c16, %c0_11], %21 {strides = array<i32>} : memref<208x416xbf16, #tpu.memory_space<vmem>>, vector<16x416xbf16>,
    %23 = vector.extract_strided_slice %12 {offsets = [64, 0], sizes = [16, 416], strides = [1, 1]} : vector<416x416xf32> to vector<16x416xf32>
    %24 = vector.extract_strided_slice %12 {offsets = [80, 0], sizes = [16, 416], strides = [1, 1]} : vector<416x416xf32> to vector<16x416xf32>
    %25 = arith.maximumf %23, %24 : vector<16x416xf32>
    %26 = arith.truncf %25 : vector<16x416xf32> to vector<16x416xbf16>
    %c32 = arith.constant 32 : index
    %c0_12 = arith.constant 0 : index
    %27 = vector.load %arg13[%c32, %c0_12] : memref<208x416xbf16, #tpu.memory_space<vmem>>, vector<16x416xbf16>
    tpu.vector_store %arg13[%c32, %c0_12], %26 {strides = array<i32>} : memref<208x416xbf16, #tpu.memory_space<vmem>>, vector<16x416xbf16>,
    %28 = vector.extract_strided_slice %12 {offsets = [96, 0], sizes = [16, 416], strides = [1, 1]} : vector<416x416xf32> to vector<16x416xf32>
    %29 = vector.extract_strided_slice %12 {offsets = [112, 0], sizes = [16, 416], strides = [1, 1]} : vector<416x416xf32> to vector<16x416xf32>
    %30 = arith.maximumf %28, %29 : vector<16x416xf32>
    %31 = arith.truncf %30 : vector<16x416xf32> to vector<16x416xbf16>
    %c48 = arith.constant 48 : index
    %c0_13 = arith.constant 0 : index
    %32 = vector.load %arg13[%c48, %c0_13] : memref<208x416xbf16, #tpu.memory_space<vmem>>, vector<16x416xbf16>
    tpu.vector_store %arg13[%c48, %c0_13], %31 {strides = array<i32>} : memref<208x416xbf16, #tpu.memory_space<vmem>>, vector<16x416xbf16>,
    %33 = vector.extract_strided_slice %12 {offsets = [128, 0], sizes = [16, 416], strides = [1, 1]} : vector<416x416xf32> to vector<16x416xf32>
    %34 = vector.extract_strided_slice %12 {offsets = [144, 0], sizes = [16, 416], strides = [1, 1]} : vector<416x416xf32> to vector<16x416xf32>
    %35 = arith.maximumf %33, %34 : vector<16x416xf32>
    %36 = arith.truncf %35 : vector<16x416xf32> to vector<16x416xbf16>
    %c64 = arith.constant 64 : index
    %c0_14 = arith.constant 0 : index
    %37 = vector.load %arg13[%c64, %c0_14] : memref<208x416xbf16, #tpu.memory_space<vmem>>, vector<16x416xbf16>
    tpu.vector_store %arg13[%c64, %c0_14], %36 {strides = array<i32>} : memref<208x416xbf16, #tpu.memory_space<vmem>>, vector<16x416xbf16>,
    %38 = vector.extract_strided_slice %12 {offsets = [160, 0], sizes = [16, 416], strides = [1, 1]} : vector<416x416xf32> to vector<16x416xf32>
    %39 = vector.extract_strided_slice %12 {offsets = [176, 0], sizes = [16, 416], strides = [1, 1]} : vector<416x416xf32> to vector<16x416xf32>
    %40 = arith.maximumf %38, %39 : vector<16x416xf32>
    %41 = arith.truncf %40 : vector<16x416xf32> to vector<16x416xbf16>
    %c80 = arith.constant 80 : index
    %c0_15 = arith.constant 0 : index
    %42 = vector.load %arg13[%c80, %c0_15] : memref<208x416xbf16, #tpu.memory_space<vmem>>, vector<16x416xbf16>
    tpu.vector_store %arg13[%c80, %c0_15], %41 {strides = array<i32>} : memref<208x416xbf16, #tpu.memory_space<vmem>>, vector<16x416xbf16>,
    %43 = vector.extract_strided_slice %12 {offsets = [192, 0], sizes = [16, 416], strides = [1, 1]} : vector<416x416xf32> to vector<16x416xf32>
    %44 = vector.extract_strided_slice %12 {offsets = [208, 0], sizes = [16, 416], strides = [1, 1]} : vector<416x416xf32> to vector<16x416xf32>
    %45 = arith.maximumf %43, %44 : vector<16x416xf32>
    %46 = arith.truncf %45 : vector<16x416xf32> to vector<16x416xbf16>
    %c96 = arith.constant 96 : index
    %c0_16 = arith.constant 0 : index
    %47 = vector.load %arg13[%c96, %c0_16] : memref<208x416xbf16, #tpu.memory_space<vmem>>, vector<16x416xbf16>
    tpu.vector_store %arg13[%c96, %c0_16], %46 {strides = array<i32>} : memref<208x416xbf16, #tpu.memory_space<vmem>>, vector<16x416xbf16>,
    %48 = vector.extract_strided_slice %12 {offsets = [224, 0], sizes = [16, 416], strides = [1, 1]} : vector<416x416xf32> to vector<16x416xf32>
    %49 = vector.extract_strided_slice %12 {offsets = [240, 0], sizes = [16, 416], strides = [1, 1]} : vector<416x416xf32> to vector<16x416xf32>
    %50 = arith.maximumf %48, %49 : vector<16x416xf32>
    %51 = arith.truncf %50 : vector<16x416xf32> to vector<16x416xbf16>
    %c112 = arith.constant 112 : index
    %c0_17 = arith.constant 0 : index
    %52 = vector.load %arg13[%c112, %c0_17] : memref<208x416xbf16, #tpu.memory_space<vmem>>, vector<16x416xbf16>
    tpu.vector_store %arg13[%c112, %c0_17], %51 {strides = array<i32>} : memref<208x416xbf16, #tpu.memory_space<vmem>>, vector<16x416xbf16>,
    %53 = vector.extract_strided_slice %12 {offsets = [256, 0], sizes = [16, 416], strides = [1, 1]} : vector<416x416xf32> to vector<16x416xf32>
    %54 = vector.extract_strided_slice %12 {offsets = [272, 0], sizes = [16, 416], strides = [1, 1]} : vector<416x416xf32> to vector<16x416xf32>
    %55 = arith.maximumf %53, %54 : vector<16x416xf32>
    %56 = arith.truncf %55 : vector<16x416xf32> to vector<16x416xbf16>
    %c128 = arith.constant 128 : index
    %c0_18 = arith.constant 0 : index
    %57 = vector.load %arg13[%c128, %c0_18] : memref<208x416xbf16, #tpu.memory_space<vmem>>, vector<16x416xbf16>
    tpu.vector_store %arg13[%c128, %c0_18], %56 {strides = array<i32>} : memref<208x416xbf16, #tpu.memory_space<vmem>>, vector<16x416xbf16>,
    %58 = vector.extract_strided_slice %12 {offsets = [288, 0], sizes = [16, 416], strides = [1, 1]} : vector<416x416xf32> to vector<16x416xf32>
    %59 = vector.extract_strided_slice %12 {offsets = [304, 0], sizes = [16, 416], strides = [1, 1]} : vector<416x416xf32> to vector<16x416xf32>
    %60 = arith.maximumf %58, %59 : vector<16x416xf32>
    %61 = arith.truncf %60 : vector<16x416xf32> to vector<16x416xbf16>
    %c144 = arith.constant 144 : index
    %c0_19 = arith.constant 0 : index
    %62 = vector.load %arg13[%c144, %c0_19] : memref<208x416xbf16, #tpu.memory_space<vmem>>, vector<16x416xbf16>
    tpu.vector_store %arg13[%c144, %c0_19], %61 {strides = array<i32>} : memref<208x416xbf16, #tpu.memory_space<vmem>>, vector<16x416xbf16>,
    %63 = vector.extract_strided_slice %12 {offsets = [320, 0], sizes = [16, 416], strides = [1, 1]} : vector<416x416xf32> to vector<16x416xf32>
    %64 = vector.extract_strided_slice %12 {offsets = [336, 0], sizes = [16, 416], strides = [1, 1]} : vector<416x416xf32> to vector<16x416xf32>
    %65 = arith.maximumf %63, %64 : vector<16x416xf32>
    %66 = arith.truncf %65 : vector<16x416xf32> to vector<16x416xbf16>
    %c160 = arith.constant 160 : index
    %c0_20 = arith.constant 0 : index
    %67 = vector.load %arg13[%c160, %c0_20] : memref<208x416xbf16, #tpu.memory_space<vmem>>, vector<16x416xbf16>
    tpu.vector_store %arg13[%c160, %c0_20], %66 {strides = array<i32>} : memref<208x416xbf16, #tpu.memory_space<vmem>>, vector<16x416xbf16>,
    %68 = vector.extract_strided_slice %12 {offsets = [352, 0], sizes = [16, 416], strides = [1, 1]} : vector<416x416xf32> to vector<16x416xf32>
    %69 = vector.extract_strided_slice %12 {offsets = [368, 0], sizes = [16, 416], strides = [1, 1]} : vector<416x416xf32> to vector<16x416xf32>
    %70 = arith.maximumf %68, %69 : vector<16x416xf32>
    %71 = arith.truncf %70 : vector<16x416xf32> to vector<16x416xbf16>
    %c176 = arith.constant 176 : index
    %c0_21 = arith.constant 0 : index
    %72 = vector.load %arg13[%c176, %c0_21] : memref<208x416xbf16, #tpu.memory_space<vmem>>, vector<16x416xbf16>
    tpu.vector_store %arg13[%c176, %c0_21], %71 {strides = array<i32>} : memref<208x416xbf16, #tpu.memory_space<vmem>>, vector<16x416xbf16>,
    %73 = vector.extract_strided_slice %12 {offsets = [384, 0], sizes = [16, 416], strides = [1, 1]} : vector<416x416xf32> to vector<16x416xf32>
    %74 = vector.extract_strided_slice %12 {offsets = [400, 0], sizes = [16, 416], strides = [1, 1]} : vector<416x416xf32> to vector<16x416xf32>
    %75 = arith.maximumf %73, %74 : vector<16x416xf32>
    %76 = arith.truncf %75 : vector<16x416xf32> to vector<16x416xbf16>
    %c192 = arith.constant 192 : index
    %c0_22 = arith.constant 0 : index
    %77 = vector.load %arg13[%c192, %c0_22] : memref<208x416xbf16, #tpu.memory_space<vmem>>, vector<16x416xbf16>
    tpu.vector_store %arg13[%c192, %c0_22], %76 {strides = array<i32>} : memref<208x416xbf16, #tpu.memory_space<vmem>>, vector<16x416xbf16>,
    %c0_23 = arith.constant 0 : index
    %c0_24 = arith.constant 0 : index
    %78 = vector.load %arg13[%c0_23, %c0_24] : memref<208x416xbf16, #tpu.memory_space<vmem>>, vector<176x416xbf16>
    %c0_25 = arith.constant 0 : index
    %c0_26 = arith.constant 0 : index
    %c0_27 = arith.constant 0 : index
    %79 = vector.load %arg5[%c0_25, %c0_26, %c0_27] : memref<3x416x176xbf16, #tpu.memory_space<vmem>>, vector<1x416x176xbf16>
    %80 = vector.shape_cast %79 : vector<1x416x176xbf16> to vector<416x176xbf16>
    %cst_28 = arith.constant dense<0.000000e+00> : vector<176x176xf32>
    %81 = tpu.matmul %78, %80, %cst_28 {dimension_numbers = #tpu.dot_dimension_numbers<[1], [0], [0], [1], [0, 0, 1, 1], [], []>} : vector<176x416xbf16>, vector<416x176xbf16>, vector<176x176xf32> -> vector<176x176xf32>
    %c16_29 = arith.constant 16 : index
    %c0_30 = arith.constant 0 : index
    %82 = vector.load %arg13[%c16_29, %c0_30] : memref<208x416xbf16, #tpu.memory_space<vmem>>, vector<176x416xbf16>
    %c1 = arith.constant 1 : index
    %c0_31 = arith.constant 0 : index
    %c0_32 = arith.constant 0 : index
    %83 = vector.load %arg5[%c1, %c0_31, %c0_32] : memref<3x416x176xbf16, #tpu.memory_space<vmem>>, vector<1x416x176xbf16>
    %84 = vector.shape_cast %83 : vector<1x416x176xbf16> to vector<416x176xbf16>
    %cst_33 = arith.constant dense<0.000000e+00> : vector<176x176xf32>
    %85 = tpu.matmul %82, %84, %cst_33 {dimension_numbers = #tpu.dot_dimension_numbers<[1], [0], [0], [1], [0, 0, 1, 1], [], []>} : vector<176x416xbf16>, vector<416x176xbf16>, vector<176x176xf32> -> vector<176x176xf32>
    %86 = arith.addf %81, %85 : vector<176x176xf32>
    %c32_34 = arith.constant 32 : index
    %c0_35 = arith.constant 0 : index
    %87 = vector.load %arg13[%c32_34, %c0_35] : memref<208x416xbf16, #tpu.memory_space<vmem>>, vector<176x416xbf16>
    %c2 = arith.constant 2 : index
    %c0_36 = arith.constant 0 : index
    %c0_37 = arith.constant 0 : index
    %88 = vector.load %arg5[%c2, %c0_36, %c0_37] : memref<3x416x176xbf16, #tpu.memory_space<vmem>>, vector<1x416x176xbf16>
    %89 = vector.shape_cast %88 : vector<1x416x176xbf16> to vector<416x176xbf16>
    %cst_38 = arith.constant dense<0.000000e+00> : vector<176x176xf32>
    %90 = tpu.matmul %87, %89, %cst_38 {dimension_numbers = #tpu.dot_dimension_numbers<[1], [0], [0], [1], [0, 0, 1, 1], [], []>} : vector<176x416xbf16>, vector<416x176xbf16>, vector<176x176xf32> -> vector<176x176xf32>
    %91 = arith.addf %86, %90 : vector<176x176xf32>
    %c0_39 = arith.constant 0 : index
    %c0_40 = arith.constant 0 : index
    %92 = vector.load %arg7[%c0_39, %c0_40] : memref<1x176xf32, #tpu.memory_space<vmem>>, vector<1x176xf32>
    %93 = vector.broadcast %92 : vector<1x176xf32> to vector<176x176xf32>
    %94 = arith.addf %91, %93 : vector<176x176xf32>
    %95 = arith.truncf %94 : vector<176x176xf32> to vector<176x176xbf16>
    %c0_41 = arith.constant 0 : index
    %c0_42 = arith.constant 0 : index
    %96 = vector.load %arg6[%c0_41, %c0_42] : memref<176x176xbf16, #tpu.memory_space<vmem>>, vector<176x176xbf16>
    %cst_43 = arith.constant dense<0.000000e+00> : vector<176x176xf32>
    %97 = tpu.matmul %95, %96, %cst_43 {dimension_numbers = #tpu.dot_dimension_numbers<[1], [0], [0], [1], [0, 0, 1, 1], [], []>} : vector<176x176xbf16>, vector<176x176xbf16>, vector<176x176xf32> -> vector<176x176xf32>
    %98 = arith.maximumf %94, %97 : vector<176x176xf32>
    %cst_44 = arith.constant 0.000000e+00 : f32
    %99 = vector.broadcast %cst_44 : f32 to vector<176x176xf32>
    %100 = arith.maximumf %98, %99 : vector<176x176xf32>
    %101 = vector.extract_strided_slice %100 {offsets = [0, 0], sizes = [16, 176], strides = [1, 1]} : vector<176x176xf32> to vector<16x176xf32>
    %102 = vector.extract_strided_slice %100 {offsets = [16, 0], sizes = [16, 176], strides = [1, 1]} : vector<176x176xf32> to vector<16x176xf32>
    %103 = arith.maximumf %101, %102 : vector<16x176xf32>
    %104 = arith.truncf %103 : vector<16x176xf32> to vector<16x176xbf16>
    %c0_45 = arith.constant 0 : index
    %c0_46 = arith.constant 0 : index
    %c0_47 = arith.constant 0 : index
    %105 = vector.load %arg8[%c0_45, %c0_46, %c0_47] : memref<5x176x64xbf16, #tpu.memory_space<vmem>>, vector<1x176x64xbf16>
    %106 = vector.shape_cast %105 : vector<1x176x64xbf16> to vector<176x64xbf16>
    %cst_48 = arith.constant dense<0.000000e+00> : vector<16x64xf32>
    %107 = tpu.matmul %104, %106, %cst_48 {dimension_numbers = #tpu.dot_dimension_numbers<[1], [0], [0], [1], [0, 0, 1, 1], [], []>} : vector<16x176xbf16>, vector<176x64xbf16>, vector<16x64xf32> -> vector<16x64xf32>
    %108 = vector.extract_strided_slice %100 {offsets = [32, 0], sizes = [16, 176], strides = [1, 1]} : vector<176x176xf32> to vector<16x176xf32>
    %109 = vector.extract_strided_slice %100 {offsets = [48, 0], sizes = [16, 176], strides = [1, 1]} : vector<176x176xf32> to vector<16x176xf32>
    %110 = arith.maximumf %108, %109 : vector<16x176xf32>
    %111 = arith.truncf %110 : vector<16x176xf32> to vector<16x176xbf16>
    %c1_49 = arith.constant 1 : index
    %c0_50 = arith.constant 0 : index
    %c0_51 = arith.constant 0 : index
    %112 = vector.load %arg8[%c1_49, %c0_50, %c0_51] : memref<5x176x64xbf16, #tpu.memory_space<vmem>>, vector<1x176x64xbf16>
    %113 = vector.shape_cast %112 : vector<1x176x64xbf16> to vector<176x64xbf16>
    %cst_52 = arith.constant dense<0.000000e+00> : vector<16x64xf32>
    %114 = tpu.matmul %111, %113, %cst_52 {dimension_numbers = #tpu.dot_dimension_numbers<[1], [0], [0], [1], [0, 0, 1, 1], [], []>} : vector<16x176xbf16>, vector<176x64xbf16>, vector<16x64xf32> -> vector<16x64xf32>
    %115 = arith.addf %107, %114 : vector<16x64xf32>
    %116 = vector.extract_strided_slice %100 {offsets = [64, 0], sizes = [16, 176], strides = [1, 1]} : vector<176x176xf32> to vector<16x176xf32>
    %117 = vector.extract_strided_slice %100 {offsets = [80, 0], sizes = [16, 176], strides = [1, 1]} : vector<176x176xf32> to vector<16x176xf32>
    %118 = arith.maximumf %116, %117 : vector<16x176xf32>
    %119 = arith.truncf %118 : vector<16x176xf32> to vector<16x176xbf16>
    %c2_53 = arith.constant 2 : index
    %c0_54 = arith.constant 0 : index
    %c0_55 = arith.constant 0 : index
    %120 = vector.load %arg8[%c2_53, %c0_54, %c0_55] : memref<5x176x64xbf16, #tpu.memory_space<vmem>>, vector<1x176x64xbf16>
    %121 = vector.shape_cast %120 : vector<1x176x64xbf16> to vector<176x64xbf16>
    %cst_56 = arith.constant dense<0.000000e+00> : vector<16x64xf32>
    %122 = tpu.matmul %119, %121, %cst_56 {dimension_numbers = #tpu.dot_dimension_numbers<[1], [0], [0], [1], [0, 0, 1, 1], [], []>} : vector<16x176xbf16>, vector<176x64xbf16>, vector<16x64xf32> -> vector<16x64xf32>
    %123 = arith.addf %115, %122 : vector<16x64xf32>
    %124 = vector.extract_strided_slice %100 {offsets = [96, 0], sizes = [16, 176], strides = [1, 1]} : vector<176x176xf32> to vector<16x176xf32>
    %125 = vector.extract_strided_slice %100 {offsets = [112, 0], sizes = [16, 176], strides = [1, 1]} : vector<176x176xf32> to vector<16x176xf32>
    %126 = arith.maximumf %124, %125 : vector<16x176xf32>
    %127 = arith.truncf %126 : vector<16x176xf32> to vector<16x176xbf16>
    %c3 = arith.constant 3 : index
    %c0_57 = arith.constant 0 : index
    %c0_58 = arith.constant 0 : index
    %128 = vector.load %arg8[%c3, %c0_57, %c0_58] : memref<5x176x64xbf16, #tpu.memory_space<vmem>>, vector<1x176x64xbf16>
    %129 = vector.shape_cast %128 : vector<1x176x64xbf16> to vector<176x64xbf16>
    %cst_59 = arith.constant dense<0.000000e+00> : vector<16x64xf32>
    %130 = tpu.matmul %127, %129, %cst_59 {dimension_numbers = #tpu.dot_dimension_numbers<[1], [0], [0], [1], [0, 0, 1, 1], [], []>} : vector<16x176xbf16>, vector<176x64xbf16>, vector<16x64xf32> -> vector<16x64xf32>
    %131 = arith.addf %123, %130 : vector<16x64xf32>
    %132 = vector.extract_strided_slice %100 {offsets = [128, 0], sizes = [16, 176], strides = [1, 1]} : vector<176x176xf32> to vector<16x176xf32>
    %133 = vector.extract_strided_slice %100 {offsets = [144, 0], sizes = [16, 176], strides = [1, 1]} : vector<176x176xf32> to vector<16x176xf32>
    %134 = arith.maximumf %132, %133 : vector<16x176xf32>
    %135 = arith.truncf %134 : vector<16x176xf32> to vector<16x176xbf16>
    %c4 = arith.constant 4 : index
    %c0_60 = arith.constant 0 : index
    %c0_61 = arith.constant 0 : index
    %136 = vector.load %arg8[%c4, %c0_60, %c0_61] : memref<5x176x64xbf16, #tpu.memory_space<vmem>>, vector<1x176x64xbf16>
    %137 = vector.shape_cast %136 : vector<1x176x64xbf16> to vector<176x64xbf16>
    %cst_62 = arith.constant dense<0.000000e+00> : vector<16x64xf32>
    %138 = tpu.matmul %135, %137, %cst_62 {dimension_numbers = #tpu.dot_dimension_numbers<[1], [0], [0], [1], [0, 0, 1, 1], [], []>} : vector<16x176xbf16>, vector<176x64xbf16>, vector<16x64xf32> -> vector<16x64xf32>
    %139 = arith.addf %131, %138 : vector<16x64xf32>
    %c0_63 = arith.constant 0 : index
    %c0_64 = arith.constant 0 : index
    %140 = vector.load %arg9[%c0_63, %c0_64] : memref<1x64xf32, #tpu.memory_space<vmem>>, vector<1x64xf32>
    %141 = vector.broadcast %140 : vector<1x64xf32> to vector<16x64xf32>
    %142 = arith.addf %139, %141 : vector<16x64xf32>
    %cst_65 = arith.constant 0.000000e+00 : f32
    %143 = vector.broadcast %cst_65 : f32 to vector<16x64xf32>
    %144 = arith.maximumf %142, %143 : vector<16x64xf32>
    %145 = arith.truncf %144 : vector<16x64xf32> to vector<16x64xbf16>
    %c0_66 = arith.constant 0 : index
    %c0_67 = arith.constant 0 : index
    %146 = vector.load %arg10[%c0_66, %c0_67] : memref<64x128xbf16, #tpu.memory_space<vmem>>, vector<64x128xbf16>
    %cst_68 = arith.constant dense<0.000000e+00> : vector<16x128xf32>
    %147 = tpu.matmul %145, %146, %cst_68 {dimension_numbers = #tpu.dot_dimension_numbers<[1], [0], [0], [1], [0, 0, 1, 1], [], []>} : vector<16x64xbf16>, vector<64x128xbf16>, vector<16x128xf32> -> vector<16x128xf32>
    %c0_69 = arith.constant 0 : index
    %c0_70 = arith.constant 0 : index
    %148 = vector.load %arg11[%c0_69, %c0_70] : memref<1x128xf32, #tpu.memory_space<vmem>>, vector<1x128xf32>
    %149 = vector.broadcast %148 : vector<1x128xf32> to vector<16x128xf32>
    %150 = arith.addf %147, %149 : vector<16x128xf32>
    %cst_71 = arith.constant dense<0xFF800000> : vector<16xf32>
    %151 = vector.multi_reduction <maximumf>, %150, %cst_71 [1] : vector<16x128xf32> to vector<16xf32>
    %152 = vector.shape_cast %151 : vector<16xf32> to vector<16x1xf32>
    %153 = vector.broadcast %152 : vector<16x1xf32> to vector<16x128xf32>
    %154 = arith.subf %150, %153 : vector<16x128xf32>
    %155 = math.exp %154 : vector<16x128xf32>
    %cst_72 = arith.constant dense<0.000000e+00> : vector<16xf32>
    %156 = vector.multi_reduction <add>, %155, %cst_72 [1] : vector<16x128xf32> to vector<16xf32>
    %157 = vector.shape_cast %156 : vector<16xf32> to vector<16x1xf32>
    %158 = math.log %157 : vector<16x1xf32>
    %159 = vector.broadcast %158 : vector<16x1xf32> to vector<16x128xf32>
    %160 = arith.subf %154, %159 : vector<16x128xf32>
    %c0_73 = arith.constant 0 : index
    %c0_74 = arith.constant 0 : index
    %161 = vector.load %arg12[%c0_73, %c0_74] : memref<16x128xf32, #tpu.memory_space<vmem>>, vector<16x128xf32>
    tpu.vector_store %arg12[%c0_73, %c0_74], %160 {strides = array<i32>} : memref<16x128xf32, #tpu.memory_space<vmem>>, vector<16x128xf32>,
    return
  }
  func.func @transform_0(%arg0: i32) -> (i32, i32) {
    %c0_i32 = arith.constant 0 : i32
    %c0_i32_0 = arith.constant 0 : i32
    return %arg0, %c0_i32 : i32, i32
  }
  func.func @transform_1(%arg0: i32) -> (i32, i32) {
    %c0_i32 = arith.constant 0 : i32
    %c0_i32_0 = arith.constant 0 : i32
    %c0_i32_1 = arith.constant 0 : i32
    return %c0_i32, %c0_i32_0 : i32, i32
  }
  func.func @transform_2(%arg0: i32) -> (i32, i32) {
    %c0_i32 = arith.constant 0 : i32
    %c0_i32_0 = arith.constant 0 : i32
    %c0_i32_1 = arith.constant 0 : i32
    return %c0_i32, %c0_i32_0 : i32, i32
  }
  func.func @transform_3(%arg0: i32) -> (i32, i32) {
    %c0_i32 = arith.constant 0 : i32
    %c0_i32_0 = arith.constant 0 : i32
    %c0_i32_1 = arith.constant 0 : i32
    return %c0_i32, %c0_i32_0 : i32, i32
  }
  func.func @transform_4(%arg0: i32) -> (i32, i32, i32) {
    %c0_i32 = arith.constant 0 : i32
    %c0_i32_0 = arith.constant 0 : i32
    %c0_i32_1 = arith.constant 0 : i32
    %c0_i32_2 = arith.constant 0 : i32
    return %c0_i32, %c0_i32_0, %c0_i32_1 : i32, i32, i32
  }
  func.func @transform_5(%arg0: i32) -> (i32, i32) {
    %c0_i32 = arith.constant 0 : i32
    %c0_i32_0 = arith.constant 0 : i32
    %c0_i32_1 = arith.constant 0 : i32
    return %c0_i32, %c0_i32_0 : i32, i32
  }
  func.func @transform_6(%arg0: i32) -> (i32, i32) {
    %c0_i32 = arith.constant 0 : i32
    %c0_i32_0 = arith.constant 0 : i32
    %c0_i32_1 = arith.constant 0 : i32
    return %c0_i32, %c0_i32_0 : i32, i32
  }
  func.func @transform_7(%arg0: i32) -> (i32, i32, i32) {
    %c0_i32 = arith.constant 0 : i32
    %c0_i32_0 = arith.constant 0 : i32
    %c0_i32_1 = arith.constant 0 : i32
    %c0_i32_2 = arith.constant 0 : i32
    return %c0_i32, %c0_i32_0, %c0_i32_1 : i32, i32, i32
  }
  func.func @transform_8(%arg0: i32) -> (i32, i32) {
    %c0_i32 = arith.constant 0 : i32
    %c0_i32_0 = arith.constant 0 : i32
    %c0_i32_1 = arith.constant 0 : i32
    return %c0_i32, %c0_i32_0 : i32, i32
  }
  func.func @transform_9(%arg0: i32) -> (i32, i32) {
    %c0_i32 = arith.constant 0 : i32
    %c0_i32_0 = arith.constant 0 : i32
    %c0_i32_1 = arith.constant 0 : i32
    return %c0_i32, %c0_i32_0 : i32, i32
  }
  func.func @transform_10(%arg0: i32) -> (i32, i32) {
    %c0_i32 = arith.constant 0 : i32
    %c0_i32_0 = arith.constant 0 : i32
    %c0_i32_1 = arith.constant 0 : i32
    return %c0_i32, %c0_i32_0 : i32, i32
  }
  func.func @transform_11(%arg0: i32) -> (i32, i32) {
    %c0_i32 = arith.constant 0 : i32
    %c0_i32_0 = arith.constant 0 : i32
    return %arg0, %c0_i32 : i32, i32
  }
}

</mosaic_0001>

<bundles_post_ra>
// kernel: net_forward.1
= control target key start
LH: loop header
LB: loop body
LE: loop exit
PB: predicated region body
PF: predicated region fallthrough
CT: control target
= control target key end

     0   :  { %vm399_vm0 = vcmask 785408   ;;  %vm2139_vm1 = vcmask 1043456   ;;  %vm2140_vm2 = vcmask 261124   ;;  %vm2959_vm4 = vcmask 261120   ;;  %s13573_s1 = inlined_call_operand.vmem [shape: bf16[96,416], index: 1, kind: input, shape index: {}]   ;;  %s13574_s2 = inlined_call_operand.vmem [shape: bf16[96,416], index: 2, kind: input, shape index: {}]   ;;  %s13575_s0 = inlined_call_operand.vmem [shape: bf16[416,96], index: 0, kind: input, shape index: {}]   ;;  %s13576_s4 = inlined_call_operand.vmem [shape: bf16[3,416,176], index: 4, kind: input, shape index: {}]   ;;  %s13577_s3 = inlined_call_operand.vmem [shape: f32[1,416], index: 3, kind: input, shape index: {}]   ;;  %s13578_s5 = inlined_call_operand.vmem [shape: bf16[176,176], index: 5, kind: input, shape index: {}]   ;;  %s13579_s6 = inlined_call_operand.vmem [shape: f32[1,176], index: 6, kind: input, shape index: {}]   ;;  %s13580_s7 = inlined_call_operand.vmem [shape: bf16[5,176,64], index: 7, kind: input, shape index: {}]   ;;  %s13581_s8 = inlined_call_operand.vmem [shape: f32[1,64], index: 8, kind: input, shape index: {}]   ;;  %s13582_s10 = inlined_call_operand.vmem [shape: f32[1,128], index: 10, kind: input, shape index: {}]   ;;  %s13583_s9 = inlined_call_operand.vmem [shape: bf16[64,128], index: 9, kind: input, shape index: {}]   ;;  %s13584_s11 = inlined_call_operand.vmem [shape: f32[16,128], index: 11, kind: output, shape index: {}]  }
   0x1   :  { %v6930_v0 = vld [vmem:[%s13573_s1 + $0xa0] sm:$0xf]  ;;  %v8898_v1 = vld [vmem:[%s13573_s1 + $0xac] sm:$0xf0]  ;;  %v8896_v2 = vld [vmem:[%s13573_s1 + $0xa4] sm:$0xf] }
   0x2   :  { %v6931_v3 = vor.u32 %v8898_v1, %v6930_v0  ;;  %v6932_v4 = vld [vmem:[%s13573_s1 + $0xb0] sm:$0xf0]  ;;  %v6938_v5 = vld [vmem:[%s13573_s1 + $0xa8] sm:$0xf]  ;;  %v8899_v6 = vld [vmem:[%s13573_s1 + $0xb4] sm:$0xf0] }
   0x3   :  { %v6935_v7 = vor.u32 %v8896_v2, %v6932_v4  ;;  %v6939_v8 = vor.u32 %v8899_v6, %v6938_v5  ;;  %v8897_v9 = vld [vmem:[%s13573_s1 + $0xac] sm:$0xf]  ;;  %v6940_v10 = vld [vmem:[%s13573_s1 + $0xb8] sm:$0xf0]  ;;  %v6914_v11 = vld [vmem:[%s13573_s1 + $0x80] sm:$0xf] }
   0x4   :  { %480 = vmatpush.bf16.msra.mxu0 %v6931_v3  ;;  %v6943_v12 = vor.u32 %v8897_v9, %v6940_v10  ;;  %v8894_v13 = vld [vmem:[%s13573_s1 + $0x8c] sm:$0xf0]  ;;  %v8892_v14 = vld [vmem:[%s13573_s1 + $0x84] sm:$0xf]  ;;  %v6916_v15 = vld [vmem:[%s13573_s1 + $0x90] sm:$0xf0] }
   0x5   :  { %619 = vmatpush.bf16.msra.mxu1 %v6935_v7  ;;  %758 = vmatpush.bf16.msra.mxu2 %v6939_v8  ;;  %v6915_v16 = vor.u32 %v8894_v13, %v6914_v11  ;;  %v6919_v17 = vor.u32 %v8892_v14, %v6916_v15  ;;  %v6922_v18 = vld [vmem:[%s13573_s1 + $0x88] sm:$0xf]  ;;  %v8895_v19 = vld [vmem:[%s13573_s1 + $0x94] sm:$0xf0]  ;;  %v8893_v20 = vld [vmem:[%s13573_s1 + $0x8c] sm:$0xf] }
   0x6   :  { %897 = vmatpush.bf16.msra.mxu3 %v6943_v12  ;;  %v6923_v21 = vor.u32 %v8895_v19, %v6922_v18  ;;  %v6924_v22 = vld [vmem:[%s13573_s1 + $0x98] sm:$0xf0]  ;;  %v6898_v23 = vld [vmem:[%s13573_s1 + $0x60] sm:$0xf]  ;;  %v8890_v24 = vld [vmem:[%s13573_s1 + $0x6c] sm:$0xf0] }
   0x7   :  { %v6927_v25 = vor.u32 %v8893_v20, %v6924_v22  ;;  %v8888_v26 = vld [vmem:[%s13573_s1 + $0x64] sm:$0xf]  ;;  %v6900_v27 = vld [vmem:[%s13573_s1 + $0x70] sm:$0xf0]  ;;  %v6906_v28 = vld [vmem:[%s13573_s1 + $0x68] sm:$0xf]  ;;  %v6899_v29 = vor.u32 %v8890_v24, %v6898_v23 }
   0x8   :  { %481 = vmatpush.bf16.msra.mxu0 %v6915_v16  ;;  %v8891_v30 = vld [vmem:[%s13573_s1 + $0x74] sm:$0xf0]  ;;  %v8889_v31 = vld [vmem:[%s13573_s1 + $0x6c] sm:$0xf]  ;;  %v6908_v32 = vld [vmem:[%s13573_s1 + $0x78] sm:$0xf0]  ;;  %v6903_v33 = vor.u32 %v8888_v26, %v6900_v27 }
   0x9   :  { %620 = vmatpush.bf16.msra.mxu1 %v6919_v17  ;;  %759 = vmatpush.bf16.msra.mxu2 %v6923_v21  ;;  %v6907_v34 = vor.u32 %v8891_v30, %v6906_v28  ;;  %v6882_v35 = vld [vmem:[%s13573_s1 + $0x40] sm:$0xf]  ;;  %v8886_v36 = vld [vmem:[%s13573_s1 + $0x4c] sm:$0xf0]  ;;  %v8884_v37 = vld [vmem:[%s13573_s1 + $0x44] sm:$0xf]  ;;  %v6911_v38 = vor.u32 %v8889_v31, %v6908_v32 }
   0xa   :  { %898 = vmatpush.bf16.msra.mxu3 %v6927_v25  ;;  %v6884_v39 = vld [vmem:[%s13573_s1 + $0x50] sm:$0xf0]  ;;  %v6890_v40 = vld [vmem:[%s13573_s1 + $0x48] sm:$0xf]  ;;  %v8887_v41 = vld [vmem:[%s13573_s1 + $0x54] sm:$0xf0]  ;;  %v6883_v44 = vor.u32 %v8886_v36, %v6882_v35 }
   0xb   :  { %v8885_v42 = vld [vmem:[%s13573_s1 + $0x4c] sm:$0xf]  ;;  %v6892_v43 = vld [vmem:[%s13573_s1 + $0x58] sm:$0xf0]  ;;  %v6887_v45 = vor.u32 %v8884_v37, %v6884_v39  ;;  %v6891_v46 = vor.u32 %v8887_v41, %v6890_v40  ;;  %v6866_v47 = vld [vmem:[%s13573_s1 + $0x20] sm:$0xf] }
   0xc   :  { %482 = vmatpush.bf16.msra.mxu0 %v6899_v29  ;;  %v8882_v48 = vld [vmem:[%s13573_s1 + $0x2c] sm:$0xf0]  ;;  %v8880_v49 = vld [vmem:[%s13573_s1 + $0x24] sm:$0xf]  ;;  %v6895_v50 = vor.u32 %v8885_v42, %v6892_v43  ;;  %v6868_v51 = vld [vmem:[%s13573_s1 + $0x30] sm:$0xf0] }
   0xd   :  { %621 = vmatpush.bf16.msra.mxu1 %v6903_v33  ;;  %760 = vmatpush.bf16.msra.mxu2 %v6907_v34  ;;  %v6874_v52 = vld [vmem:[%s13573_s1 + $0x28] sm:$0xf]  ;;  %v8883_v53 = vld [vmem:[%s13573_s1 + $0x34] sm:$0xf0]  ;;  %v8881_v54 = vld [vmem:[%s13573_s1 + $0x2c] sm:$0xf]  ;;  %v6867_v56 = vor.u32 %v8882_v48, %v6866_v47  ;;  %v6871_v58 = vor.u32 %v8880_v49, %v6868_v51 }
   0xe   :  { %899 = vmatpush.bf16.msra.mxu3 %v6911_v38  ;;  %v6876_v55 = vld [vmem:[%s13573_s1 + $0x38] sm:$0xf0]  ;;  %v6850_v57 = vld [vmem:[%s13573_s1] sm:$0xf]  ;;  %v6875_v59 = vor.u32 %v8883_v53, %v6874_v52  ;;  %v8878_v60 = vld [vmem:[%s13573_s1 + $0xc] sm:$0xf0] }
   0xf   :  { %v8876_v61 = vld [vmem:[%s13573_s1 + $0x4] sm:$0xf]  ;;  %v6852_v62 = vld [vmem:[%s13573_s1 + $0x10] sm:$0xf0]  ;;  %v6879_v63 = vor.u32 %v8881_v54, %v6876_v55  ;;  %v6858_v0 = vld [vmem:[%s13573_s1 + $0x8] sm:$0xf]  ;;  %v6851_v6 = vor.u32 %v8878_v60, %v6850_v57 }
  0x10   :  { %483 = vmatpush.bf16.msra.mxu0 %v6883_v44  ;;  %v8879_v1 = vld [vmem:[%s13573_s1 + $0x14] sm:$0xf0]  ;;  %v8877_v2 = vld [vmem:[%s13573_s1 + $0xc] sm:$0xf]  ;;  %v6860_v3 = vld [vmem:[%s13573_s1 + $0x18] sm:$0xf0]  ;;  %v6855_v9 = vor.u32 %v8876_v61, %v6852_v62 }
  0x11   :  { %622 = vmatpush.bf16.msra.mxu1 %v6887_v45  ;;  %761 = vmatpush.bf16.msra.mxu2 %v6891_v46  ;;  %v7138_v4 = vld [vmem:[%s13574_s2 + $0xa8] sm:$0xf]  ;;  %v8923_v5 = vld [vmem:[%s13574_s2 + $0xb4] sm:$0xf0]  ;;  %v8921_v7 = vld [vmem:[%s13574_s2 + $0xac] sm:$0xf]  ;;  %v6859_v10 = vor.u32 %v8879_v1, %v6858_v0  ;;  %v6863_v11 = vor.u32 %v8877_v2, %v6860_v3 }
  0x12   :  { %900 = vmatpush.bf16.msra.mxu3 %v6895_v50  ;;  %v7140_v8 = vld [vmem:[%s13574_s2 + $0xb8] sm:$0xf0]  ;;  %v7139_v12 = vor.u32 %v8923_v5, %v7138_v4  ;;  %v7130_v13 = vld [vmem:[%s13574_s2 + $0xa0] sm:$0xf]  ;;  %v8922_v14 = vld [vmem:[%s13574_s2 + $0xac] sm:$0xf0] }
  0x13   :  { %v9504_v15 = vld [vmem:[%s13575_s0] sm:$0xff]  ;;  %v7143_v16 = vor.u32 %v8921_v7, %v7140_v8  ;;  %v7132_v18 = vld [vmem:[%s13574_s2 + $0xb0] sm:$0xf0]  ;;  %v7131_v19 = vor.u32 %v8922_v14, %v7130_v13  ;;  %v9523_v21 = vld [vmem:[%s13575_s0 + $0x8] sm:$0xff]  ;;  %vm5658_vm5 = vcmask 392192   ;;  %vm6700_vm6 = vcmask 523264  }
  0x14   :  { %484 = vmatpush.bf16.msra.mxu0 %v6867_v56  ;;  %v8920_v17 = vld [vmem:[%s13574_s2 + $0xa4] sm:$0xf]  ;;  %v9536_v22 = vld [vmem:[%s13575_s0 + $0x10] sm:$0xff]  ;;  %v7122_v23 = vld [vmem:[%s13574_s2 + $0x88] sm:$0xf] }
  0x15   :  { %623 = vmatpush.bf16.msra.mxu1 %v6871_v58  ;;  %762 = vmatpush.bf16.msra.mxu2 %v6875_v59  ;;  %v7135_v20 = vor.u32 %v8920_v17, %v7132_v18  ;;  %v8919_v24 = vld [vmem:[%s13574_s2 + $0x94] sm:$0xf0]  ;;  %v8917_v25 = vld [vmem:[%s13574_s2 + $0x8c] sm:$0xf]  ;;  %v7124_v27 = vld [vmem:[%s13574_s2 + $0x98] sm:$0xf0] }
  0x16   :  { %901 = vmatpush.bf16.msra.mxu3 %v6879_v63  ;;  %v7123_v26 = vor.u32 %v8919_v24, %v7122_v23  ;;  %v7127_v28 = vor.u32 %v8917_v25, %v7124_v27  ;;  %v9561_v29 = vld [vmem:[%s13575_s0 + $0x18] sm:$0xff]  ;;  %v7114_v30 = vld [vmem:[%s13574_s2 + $0x80] sm:$0xf]  ;;  %v8918_v31 = vld [vmem:[%s13574_s2 + $0x8c] sm:$0xf0] }
  0x17   :  { %v8916_v32 = vld [vmem:[%s13574_s2 + $0x84] sm:$0xf]  ;;  %v7115_v33 = vor.u32 %v8918_v31, %v7114_v30  ;;  %v7116_v34 = vld [vmem:[%s13574_s2 + $0x90] sm:$0xf0]  ;;  %v9599_v37 = vld [vmem:[%s13575_s0 + $0x28] sm:$0xff] }
  0x18   :  { %485 = vmatpush.bf16.msra.mxu0 %v6851_v6  ;;  %v7119_v35 = vor.u32 %v8916_v32, %v7116_v34  ;;  %v9586_v36 = vld [vmem:[%s13575_s0 + $0x20] sm:$0xff]  ;;  %v9612_v38 = vld [vmem:[%s13575_s0 + $0x30] sm:$0xff]  ;;  %v9625_v39 = vld [vmem:[%s13575_s0 + $0x38] sm:$0xff] }
  0x19   :  { %624 = vmatpush.bf16.msra.mxu1 %v6855_v9  ;;  %763 = vmatpush.bf16.msra.mxu2 %v6859_v10  ;;  %v7106_v40 = vld [vmem:[%s13574_s2 + $0x68] sm:$0xf]  ;;  %v8915_v41 = vld [vmem:[%s13574_s2 + $0x74] sm:$0xf0]  ;;  %v8913_v42 = vld [vmem:[%s13574_s2 + $0x6c] sm:$0xf] }
  0x1a   :  { %902 = vmatpush.bf16.msra.mxu3 %v6863_v11  ;;  %v7107_v43 = vor.u32 %v8915_v41, %v7106_v40  ;;  %v7108_v44 = vld [vmem:[%s13574_s2 + $0x78] sm:$0xf0]  ;;  %v7098_v46 = vld [vmem:[%s13574_s2 + $0x60] sm:$0xf]  ;;  %v8914_v47 = vld [vmem:[%s13574_s2 + $0x6c] sm:$0xf0] }
  0x1b   :  { %6944 = vmatmul.msk.bf16.vlgmr.msra.gmra.mxu0 %vm399_vm0, %v9504_v15  ;;  %v7111_v45 = vor.u32 %v8913_v42, %v7108_v44  ;;  %v8912_v48 = vld [vmem:[%s13574_s2 + $0x64] sm:$0xf]  ;;  %v7099_v49 = vor.u32 %v8914_v47, %v7098_v46  ;;  %v7100_v50 = vld [vmem:[%s13574_s2 + $0x70] sm:$0xf0]  ;;  %v9689_v60 = vld [vmem:[%s13575_s0 + $0x48] sm:$0xff] }
  0x1c   :  { %6970 = vmatmul.msk.bf16.vlgmr.msra.gmra.mxu1 %vm399_vm0, %v9504_v15  ;;  %6996 = vmatmul.msk.bf16.vlgmr.msra.gmra.mxu2 %vm399_vm0, %v9504_v15  ;;  %v7103_v51 = vor.u32 %v8912_v48, %v7100_v50  ;;  %v9662_v52 = vld [vmem:[%s13575_s0 + $0x40] sm:$0xff]  ;;  %v8860_v5 = vld [vmem:[%s13575_s0 + $0x50] sm:$0xff]  ;;  %v8861_v14 = vld [vmem:[%s13575_s0 + $0x58] sm:$0xff] }
  0x1d   :  { %1434 = vmatpush.bf16.msrb.mxu2 %v7139_v12  ;;  %7022 = vmatmul.msk.bf16.vlgmr.msra.gmra.mxu3 %vm399_vm0, %v9504_v15  ;;  %v8909_v23 = vld [vmem:[%s13574_s2 + $0x4c] sm:$0xf]  ;;  %v7092_v25 = vld [vmem:[%s13574_s2 + $0x58] sm:$0xf0]  ;;  %v7082_v41 = vld [vmem:[%s13574_s2 + $0x40] sm:$0xf] }
  0x1e   :  { %1573 = vmatpush.bf16.msrb.mxu3 %v7143_v16  ;;  %1156 = vmatpush.bf16.msrb.mxu0 %v7131_v19  ;;  %v7090_v19 = vld [vmem:[%s13574_s2 + $0x48] sm:$0xf]  ;;  %v7095_v27 = vor.u32 %v8909_v23, %v7092_v25  ;;  %v8910_v42 = vld [vmem:[%s13574_s2 + $0x4c] sm:$0xf0]  ;;  %vm10500_vm3 = vmor %vm2140_vm2, %vm2139_vm1 }
  0x1f   :  { %1295 = vmatpush.bf16.msrb.mxu1 %v7135_v20  ;;  %v8911_v20 = vld [vmem:[%s13574_s2 + $0x54] sm:$0xf0]  ;;  %v7083_v44 = vor.u32 %v8910_v42, %v7082_v41  ;;  %v8864_v41 = vld [vmem:[%s13575_s0 + $0x70] sm:$0xff] }
  0x20   :  { %v7091_v24 = vor.u32 %v8911_v20, %v7090_v19 }
  0x21   :  { %1435 = vmatpush.bf16.msrb.mxu2 %v7123_v26 }
  0x22   :  { %1574 = vmatpush.bf16.msrb.mxu3 %v7127_v28  ;;  %1157 = vmatpush.bf16.msrb.mxu0 %v7115_v33  ;;  %v8862_v33 = vld [vmem:[%s13575_s0 + $0x60] sm:$0xff] }
  0x23   :  { %1296 = vmatpush.bf16.msrb.mxu1 %v7119_v35 }
  0x25   :  { %1436 = vmatpush.bf16.msrb.mxu2 %v7107_v43  ;;  %v8908_v43 = vld [vmem:[%s13574_s2 + $0x44] sm:$0xf] }
  0x26   :  { %1575 = vmatpush.bf16.msrb.mxu3 %v7111_v45  ;;  %1158 = vmatpush.bf16.msrb.mxu0 %v7099_v49  ;;  %v7084_v45 = vld [vmem:[%s13574_s2 + $0x50] sm:$0xf0] }
  0x27   :  { %1297 = vmatpush.bf16.msrb.mxu1 %v7103_v51  ;;  %v7087_v46 = vor.u32 %v8908_v43, %v7084_v45 }
  0x29   :  { %1437 = vmatpush.bf16.msrb.mxu2 %v7091_v24 }
  0x2a   :  { %1576 = vmatpush.bf16.msrb.mxu3 %v7095_v27  ;;  %1159 = vmatpush.bf16.msrb.mxu0 %v7083_v44 }
  0x2b   :  { %6945 = vmatmul.msk.bf16.gmra.mxu0 %vm399_vm0, %v9523_v21  ;;  %1298 = vmatpush.bf16.msrb.mxu1 %v7087_v46 }
  0x2c   :  { %6971 = vmatmul.msk.bf16.gmra.mxu1 %vm399_vm0, %v9523_v21  ;;  %6997 = vmatmul.msk.bf16.gmra.mxu2 %vm399_vm0, %v9523_v21 }
  0x2d   :  { %7023 = vmatmul.msk.bf16.gmra.mxu3 %vm399_vm0, %v9523_v21 }
  0x3b   :  { %6946 = vmatmul.msk.bf16.gmra.mxu0 %vm399_vm0, %v9536_v22 }
  0x3c   :  { %6972 = vmatmul.msk.bf16.gmra.mxu1 %vm399_vm0, %v9536_v22  ;;  %6998 = vmatmul.msk.bf16.gmra.mxu2 %vm399_vm0, %v9536_v22 }
  0x3d   :  { %7024 = vmatmul.msk.bf16.gmra.mxu3 %vm399_vm0, %v9536_v22 }
  0x4b   :  { %6947 = vmatmul.msk.bf16.gmra.mxu0 %vm399_vm0, %v9561_v29 }
  0x4c   :  { %6973 = vmatmul.msk.bf16.gmra.mxu1 %vm399_vm0, %v9561_v29  ;;  %6999 = vmatmul.msk.bf16.gmra.mxu2 %vm399_vm0, %v9561_v29 }
  0x4d   :  { %7025 = vmatmul.msk.bf16.gmra.mxu3 %vm399_vm0, %v9561_v29 }
  0x5b   :  { %6948 = vmatmul.msk.bf16.gmra.mxu0 %vm399_vm0, %v9586_v36 }
  0x5c   :  { %6974 = vmatmul.msk.bf16.gmra.mxu1 %vm399_vm0, %v9586_v36  ;;  %7000 = vmatmul.msk.bf16.gmra.mxu2 %vm399_vm0, %v9586_v36 }
  0x5d   :  { %7026 = vmatmul.msk.bf16.gmra.mxu3 %vm399_vm0, %v9586_v36 }
  0x6b   :  { %6949 = vmatmul.msk.bf16.gmra.mxu0 %vm399_vm0, %v9599_v37 }
  0x6c   :  { %6975 = vmatmul.msk.bf16.gmra.mxu1 %vm399_vm0, %v9599_v37  ;;  %7001 = vmatmul.msk.bf16.gmra.mxu2 %vm399_vm0, %v9599_v37 }
  0x6d   :  { %7027 = vmatmul.msk.bf16.gmra.mxu3 %vm399_vm0, %v9599_v37 }
  0x7b   :  { %6950 = vmatmul.msk.bf16.gmra.mxu0 %vm399_vm0, %v9612_v38 }
  0x7c   :  { %6976 = vmatmul.msk.bf16.gmra.mxu1 %vm399_vm0, %v9612_v38  ;;  %7002 = vmatmul.msk.bf16.gmra.mxu2 %vm399_vm0, %v9612_v38 }
  0x7d   :  { %7028 = vmatmul.msk.bf16.gmra.mxu3 %vm399_vm0, %v9612_v38 }
  0x8b   :  { %6951 = vmatmul.msk.bf16.gmra.mxu0 %vm399_vm0, %v9625_v39 }
  0x8c   :  { %6977 = vmatmul.msk.bf16.gmra.mxu1 %vm399_vm0, %v9625_v39  ;;  %7003 = vmatmul.msk.bf16.gmra.mxu2 %vm399_vm0, %v9625_v39 }
  0x8d   :  { %7029 = vmatmul.msk.bf16.gmra.mxu3 %vm399_vm0, %v9625_v39 }
  0x98   :  { %v9664_v53 = vpop.f32.mrf.mxu0 }
  0x99   :  { %v9666_v54 = vpop.f32.mrf.mxu1 }
  0x9b   :  { %6952 = vmatmul.msk.bf16.gmra.mxu0 %vm399_vm0, %v9662_v52 }
  0x9c   :  { %6978 = vmatmul.msk.bf16.gmra.mxu1 %vm399_vm0, %v9662_v52  ;;  %7004 = vmatmul.msk.bf16.gmra.mxu2 %vm399_vm0, %v9662_v52 }
  0x9d   :  { %7030 = vmatmul.msk.bf16.gmra.mxu3 %vm399_vm0, %v9662_v52 }
  0x9f   :  { %v9676_v55 = vpop.f32.mrf.mxu2 }
  0xa0   :  { %v9678_v56 = vpop.f32.mrf.mxu3  ;;  %v9680_v57 = vpop.f32.mrf.mxu0 }
  0xa1   :  { %v9682_v58 = vpop.f32.mrf.mxu1 }
  0xa7   :  { %v9684_v59 = vpop.f32.mrf.mxu2 }
  0xa8   :  { %v9691_v61 = vpop.f32.mrf.mxu3  ;;  %v9693_v62 = vpop.f32.mrf.mxu0 }
  0xa9   :  { %v9695_v63 = vpop.f32.mrf.mxu1 }
  0xab   :  { %6953 = vmatmul.msk.bf16.gmra.mxu0 %vm399_vm0, %v9689_v60 }
  0xac   :  { %6979 = vmatmul.msk.bf16.gmra.mxu1 %vm399_vm0, %v9689_v60  ;;  %7005 = vmatmul.msk.bf16.gmra.mxu2 %vm399_vm0, %v9689_v60 }
  0xad   :  { %7031 = vmatmul.msk.bf16.gmra.mxu3 %vm399_vm0, %v9689_v60 }
  0xaf   :  { %v9705_v0 = vpop.f32.mrf.mxu2 }
  0xb0   :  { %v9707_v1 = vpop.f32.mrf.mxu3  ;;  %v9709_v2 = vpop.f32.mrf.mxu0 }
  0xb1   :  { %v9711_v3 = vpop.f32.mrf.mxu1 }
  0xb7   :  { %v9713_v4 = vpop.f32.mrf.mxu2 }
  0xb8   :  { %v9718_v6 = vpop.f32.mrf.mxu3  ;;  %v9720_v7 = vpop.f32.mrf.mxu0 }
  0xb9   :  { %v9722_v8 = vpop.f32.mrf.mxu1 }
  0xbb   :  { %6954 = vmatmul.msk.bf16.gmra.mxu0 %vm399_vm0, %v8860_v5 }
  0xbc   :  { %6980 = vmatmul.msk.bf16.gmra.mxu1 %vm399_vm0, %v8860_v5  ;;  %7006 = vmatmul.msk.bf16.gmra.mxu2 %vm399_vm0, %v8860_v5 }
  0xbd   :  { %7032 = vmatmul.msk.bf16.gmra.mxu3 %vm399_vm0, %v8860_v5  ;;  %v8863_v5 = vld [vmem:[%s13575_s0 + $0x68] sm:$0xff] }
  0xbf   :  { %v9728_v9 = vpop.f32.mrf.mxu2 }
  0xc0   :  { %v9730_v10 = vpop.f32.mrf.mxu3  ;;  %v9732_v11 = vpop.f32.mrf.mxu0 }
  0xc1   :  { %v9734_v12 = vpop.f32.mrf.mxu1 }
  0xc7   :  { %v9736_v13 = vpop.f32.mrf.mxu2 }
  0xc8   :  { %v9741_v16 = vpop.f32.mrf.mxu3  ;;  %v9743_v17 = vpop.f32.mrf.mxu0 }
  0xc9   :  { %v9745_v18 = vpop.f32.mrf.mxu1 }
  0xcb   :  { %6955 = vmatmul.msk.bf16.gmra.mxu0 %vm399_vm0, %v8861_v14 }
  0xcc   :  { %6981 = vmatmul.msk.bf16.gmra.mxu1 %vm399_vm0, %v8861_v14  ;;  %7007 = vmatmul.msk.bf16.gmra.mxu2 %vm399_vm0, %v8861_v14 }
  0xcd   :  { %7033 = vmatmul.msk.bf16.gmra.mxu3 %vm399_vm0, %v8861_v14 }
  0xcf   :  { %v9763_v26 = vpop.f32.mrf.mxu2 }
  0xd0   :  { %v9765_v28 = vpop.f32.mrf.mxu3  ;;  %v9767_v30 = vpop.f32.mrf.mxu0 }
  0xd1   :  { %v9769_v31 = vpop.f32.mrf.mxu1 }
  0xd7   :  { %v9771_v32 = vpop.f32.mrf.mxu2 }
  0xd8   :  { %v9776_v34 = vpop.f32.mrf.mxu3  ;;  %v9778_v35 = vpop.f32.mrf.mxu0 }
  0xd9   :  { %v9780_v40 = vpop.f32.mrf.mxu1 }
  0xdb   :  { %6956 = vmatmul.msk.bf16.gmra.mxu0 %vm399_vm0, %v8862_v33 }
  0xdc   :  { %6982 = vmatmul.msk.bf16.gmra.mxu1 %vm399_vm0, %v8862_v33  ;;  %7008 = vmatmul.msk.bf16.gmra.mxu2 %vm399_vm0, %v8862_v33 }
  0xdd   :  { %7034 = vmatmul.msk.bf16.gmra.mxu3 %vm399_vm0, %v8862_v33 }
  0xdf   :  { %v9798_v47 = vpop.f32.mrf.mxu2 }
  0xe0   :  { %v9800_v48 = vpop.f32.mrf.mxu3  ;;  %v9802_v49 = vpop.f32.mrf.mxu0 }
  0xe1   :  { %13620 = vst [vmem:[#allocation3_spill] sm:$0xff] %v9802_v49  ;;  %v9804_v50 = vpop.f32.mrf.mxu1 }
  0xe2   :  { %13621 = vst [vmem:[#allocation4_spill] sm:$0xff] %v9804_v50 }
  0xe7   :  { %v9806_v51 = vpop.f32.mrf.mxu2 }
  0xe8   :  { %13622 = vst [vmem:[#allocation5_spill] sm:$0xff] %v9806_v51  ;;  %v9811_v14 = vpop.f32.mrf.mxu3  ;;  %v9813_v19 = vpop.f32.mrf.mxu0 }
  0xe9   :  { %13623 = vst [vmem:[#allocation6_spill] sm:$0xff] %v9811_v14  ;;  %v9815_v20 = vpop.f32.mrf.mxu1 }
  0xeb   :  { %6957 = vmatmul.msk.bf16.gmra.mxu0 %vm399_vm0, %v8863_v5 }
  0xec   :  { %6983 = vmatmul.msk.bf16.gmra.mxu1 %vm399_vm0, %v8863_v5  ;;  %7009 = vmatmul.msk.bf16.gmra.mxu2 %vm399_vm0, %v8863_v5 }
  0xed   :  { %7035 = vmatmul.msk.bf16.gmra.mxu3 %vm399_vm0, %v8863_v5 }
  0xef   :  { %v9821_v23 = vpop.f32.mrf.mxu2 }
  0xf0   :  { %13624 = vst [vmem:[#allocation7_spill] sm:$0xff] %v9821_v23  ;;  %v9823_v24 = vpop.f32.mrf.mxu3  ;;  %v9825_v25 = vpop.f32.mrf.mxu0 }
  0xf1   :  { %13625 = vst [vmem:[#allocation8_spill] sm:$0xff] %v9823_v24  ;;  %v9827_v27 = vpop.f32.mrf.mxu1 }
  0xf2   :  { %13626 = vst [vmem:[#allocation9_spill] sm:$0xff] %v9825_v25 }
  0xf3   :  { %13627 = vst [vmem:[#allocation10_spill] sm:$0xff] %v9827_v27 }
  0xf7   :  { %v9829_v33 = vpop.f32.mrf.mxu2 }
  0xf8   :  { %13628 = vst [vmem:[#allocation11_spill] sm:$0xff] %v9829_v33  ;;  %v9834_v42 = vpop.f32.mrf.mxu3  ;;  %v9836_v43 = vpop.f32.mrf.mxu0 }
  0xf9   :  { %13629 = vst [vmem:[#allocation12_spill] sm:$0xff] %v9834_v42  ;;  %v9838_v44 = vpop.f32.mrf.mxu1 }
  0xfa   :  { %13630 = vst [vmem:[#allocation13_spill] sm:$0xff] %v9836_v43 }
  0xfb   :  { %13631 = vst [vmem:[#allocation14_spill] sm:$0xff] %v9838_v44  ;;  %6958 = vmatmul.msk.bf16.gmra.mxu0 %vm399_vm0, %v8864_v41  ;;  %v8865_v44 = vld [vmem:[%s13575_s0 + $0x78] sm:$0xff] }
  0xfc   :  { %6984 = vmatmul.msk.bf16.gmra.mxu1 %vm399_vm0, %v8864_v41  ;;  %7010 = vmatmul.msk.bf16.gmra.mxu2 %vm399_vm0, %v8864_v41 }
  0xfd   :  { %7036 = vmatmul.msk.bf16.gmra.mxu3 %vm399_vm0, %v8864_v41 }
  0xff   :  { %v9844_v45 = vpop.f32.mrf.mxu2 }
 0x100   :  { %13632 = vst [vmem:[#allocation15_spill] sm:$0xff] %v9844_v45  ;;  %v9846_v46 = vpop.f32.mrf.mxu3  ;;  %v9848_v5 = vpop.f32.mrf.mxu0 }
 0x101   :  { %13633 = vst [vmem:[#allocation16_spill] sm:$0xff] %v9846_v46  ;;  %v9850_v33 = vpop.f32.mrf.mxu1  ;;  %v8907_v46 = vld [vmem:[%s13574_s2 + $0x34] sm:$0xf0] }
 0x102   :  { %13634 = vst [vmem:[#allocation17_spill] sm:$0xff] %v9848_v5 }
 0x103   :  { %13635 = vst [vmem:[#allocation18_spill] sm:$0xff] %v9850_v33 }
 0x107   :  { %v9852_v42 = vpop.f32.mrf.mxu2 }
 0x108   :  { %13636 = vst [vmem:[#allocation19_spill] sm:$0xff] %v9852_v42  ;;  %v9857_v43 = vpop.f32.mrf.mxu3  ;;  %v9859_v14 = vpop.f32.mrf.mxu0 }
 0x109   :  { %13637 = vst [vmem:[#allocation20_spill] sm:$0xff] %v9857_v43  ;;  %v9861_v51 = vpop.f32.mrf.mxu1  ;;  %v7074_v43 = vld [vmem:[%s13574_s2 + $0x28] sm:$0xf] }
 0x10a   :  { %13638 = vst [vmem:[#allocation21_spill] sm:$0xff] %v9859_v14  ;;  %v7075_v45 = vor.u32 %v8907_v46, %v7074_v43  ;;  %v8904_v43 = vld [vmem:[%s13574_s2 + $0x24] sm:$0xf]  ;;  %v7068_v46 = vld [vmem:[%s13574_s2 + $0x30] sm:$0xf0] }
 0x10b   :  { %13639 = vst [vmem:[#allocation22_spill] sm:$0xff] %v9861_v51  ;;  %6959 = vmatmul.msk.bf16.gmra.mxu0 %vm399_vm0, %v8865_v44 }
 0x10c   :  { %6985 = vmatmul.msk.bf16.gmra.mxu1 %vm399_vm0, %v8865_v44  ;;  %7011 = vmatmul.msk.bf16.gmra.mxu2 %vm399_vm0, %v8865_v44 }
 0x10d   :  { %7037 = vmatmul.msk.bf16.gmra.mxu3 %vm399_vm0, %v8865_v44  ;;  %v8905_v44 = vld [vmem:[%s13574_s2 + $0x2c] sm:$0xf]  ;;  %1438 = vmatpush.bf16.msrb.mxu2 %v7075_v45 }
 0x10f   :  { %v9867_v41 = vpop.f32.mrf.mxu2 }
 0x110   :  { %13640 = vst [vmem:[#allocation23_spill] sm:$0xff] %v9867_v41  ;;  %v9869_v42 = vpop.f32.mrf.mxu3  ;;  %v9871_v33 = vpop.f32.mrf.mxu0  ;;  %v8866_v41 = vld [vmem:[%s13575_s0 + $0x80] sm:$0xff] }
 0x111   :  { %13641 = vst [vmem:[#allocation24_spill] sm:$0xff] %v9869_v42  ;;  %v9873_v5 = vpop.f32.mrf.mxu1  ;;  %v7076_v42 = vld [vmem:[%s13574_s2 + $0x38] sm:$0xf0] }
 0x112   :  { %13642 = vst [vmem:[#allocation25_spill] sm:$0xff] %v9871_v33  ;;  %v7079_v33 = vor.u32 %v8905_v44, %v7076_v42  ;;  %v8906_v42 = vld [vmem:[%s13574_s2 + $0x2c] sm:$0xf0] }
 0x113   :  { %13643 = vst [vmem:[#allocation26_spill] sm:$0xff] %v9873_v5 }
 0x114   :  { %1577 = vmatpush.bf16.msrb.mxu3 %v7079_v33  ;;  %v7066_v33 = vld [vmem:[%s13574_s2 + $0x20] sm:$0xf] }
 0x115   :  { %v7067_v45 = vor.u32 %v8906_v42, %v7066_v33  ;;  %v8867_v33 = vld [vmem:[%s13575_s0 + $0x88] sm:$0xff] }
 0x117   :  { %v9887_v5 = vpop.f32.mrf.mxu2  ;;  %1160 = vmatpush.bf16.msrb.mxu0 %v7067_v45 }
 0x118   :  { %13644 = vst [vmem:[#allocation27_spill] sm:$0xff] %v9887_v5  ;;  %v9892_v51 = vpop.f32.mrf.mxu3  ;;  %v9894_v14 = vpop.f32.mrf.mxu0 }
 0x119   :  { %13645 = vst [vmem:[#allocation28_spill] sm:$0xff] %v9892_v51  ;;  %v9896_v27 = vpop.f32.mrf.mxu1 }
 0x11a   :  { %13646 = vst [vmem:[#allocation29_spill] sm:$0xff] %v9894_v14 }
 0x11b   :  { %13647 = vst [vmem:[#allocation30_spill] sm:$0xff] %v9896_v27  ;;  %6960 = vmatmul.msk.bf16.gmra.mxu0 %vm399_vm0, %v8866_v41 }
 0x11c   :  { %6986 = vmatmul.msk.bf16.gmra.mxu1 %vm399_vm0, %v8866_v41  ;;  %7012 = vmatmul.msk.bf16.gmra.mxu2 %vm399_vm0, %v8866_v41 }
 0x11d   :  { %7038 = vmatmul.msk.bf16.gmra.mxu3 %vm399_vm0, %v8866_v41  ;;  %v7071_v41 = vor.u32 %v8904_v43, %v7068_v46 }
 0x11f   :  { %v9914_v44 = vpop.f32.mrf.mxu2  ;;  %1299 = vmatpush.bf16.msrb.mxu1 %v7071_v41 }
 0x120   :  { %13648 = vst [vmem:[#allocation31_spill] sm:$0xff] %v9914_v44  ;;  %v9916_v27 = vpop.f32.mrf.mxu3  ;;  %v9918_v14 = vpop.f32.mrf.mxu0 }
 0x121   :  { %13649 = vst [vmem:[#allocation32_spill] sm:$0xff] %v9916_v27  ;;  %v9920_v51 = vpop.f32.mrf.mxu1 }
 0x122   :  { %13650 = vst [vmem:[#allocation33_spill] sm:$0xff] %v9918_v14 }
 0x123   :  { %13651 = vst [vmem:[#allocation34_spill] sm:$0xff] %v9920_v51 }
 0x127   :  { %v9922_v5 = vpop.f32.mrf.mxu2 }
 0x128   :  { %13652 = vst [vmem:[#allocation35_spill] sm:$0xff] %v9922_v5  ;;  %v9927_v42 = vpop.f32.mrf.mxu3  ;;  %v9929_v25 = vpop.f32.mrf.mxu0  ;;  %v8868_v5 = vld [vmem:[%s13575_s0 + $0x90] sm:$0xff] }
 0x129   :  { %13653 = vst [vmem:[#allocation36_spill] sm:$0xff] %v9927_v42  ;;  %v9931_v44 = vpop.f32.mrf.mxu1 }
 0x12a   :  { %13654 = vst [vmem:[#allocation37_spill] sm:$0xff] %v9929_v25 }
 0x12b   :  { %13655 = vst [vmem:[#allocation38_spill] sm:$0xff] %v9931_v44  ;;  %6961 = vmatmul.msk.bf16.gmra.mxu0 %vm399_vm0, %v8867_v33 }
 0x12c   :  { %6987 = vmatmul.msk.bf16.gmra.mxu1 %vm399_vm0, %v8867_v33  ;;  %7013 = vmatmul.msk.bf16.gmra.mxu2 %vm399_vm0, %v8867_v33 }
 0x12d   :  { %7039 = vmatmul.msk.bf16.gmra.mxu3 %vm399_vm0, %v8867_v33 }
 0x12f   :  { %v9937_v43 = vpop.f32.mrf.mxu2 }
 0x130   :  { %13656 = vst [vmem:[#allocation39_spill] sm:$0xff] %v9937_v43  ;;  %v9939_v45 = vpop.f32.mrf.mxu3  ;;  %v9941_v46 = vpop.f32.mrf.mxu0 }
 0x131   :  { %13657 = vst [vmem:[#allocation40_spill] sm:$0xff] %v9939_v45  ;;  %v9943_v41 = vpop.f32.mrf.mxu1 }
 0x132   :  { %13658 = vst [vmem:[#allocation41_spill] sm:$0xff] %v9941_v46 }
 0x133   :  { %13659 = vst [vmem:[#allocation42_spill] sm:$0xff] %v9943_v41 }
 0x137   :  { %v9945_v42 = vpop.f32.mrf.mxu2 }
 0x138   :  { %13660 = vst [vmem:[#allocation43_spill] sm:$0xff] %v9945_v42  ;;  %v9950_v51 = vpop.f32.mrf.mxu3  ;;  %v9952_v14 = vpop.f32.mrf.mxu0 }
 0x139   :  { %13661 = vst [vmem:[#allocation44_spill] sm:$0xff] %v9950_v51  ;;  %v9954_v27 = vpop.f32.mrf.mxu1 }
 0x13a   :  { %13662 = vst [vmem:[#allocation45_spill] sm:$0xff] %v9952_v14 }
 0x13b   :  { %13663 = vst [vmem:[#allocation46_spill] sm:$0xff] %v9954_v27  ;;  %6962 = vmatmul.msk.bf16.gmra.mxu0 %vm399_vm0, %v8868_v5  ;;  %v8869_v27 = vld [vmem:[%s13575_s0 + $0x98] sm:$0xff] }
 0x13c   :  { %6988 = vmatmul.msk.bf16.gmra.mxu1 %vm399_vm0, %v8868_v5  ;;  %7014 = vmatmul.msk.bf16.gmra.mxu2 %vm399_vm0, %v8868_v5 }
 0x13d   :  { %7040 = vmatmul.msk.bf16.gmra.mxu3 %vm399_vm0, %v8868_v5 }
 0x13f   :  { %v9960_v33 = vpop.f32.mrf.mxu2 }
 0x140   :  { %13664 = vst [vmem:[#allocation47_spill] sm:$0xff] %v9960_v33  ;;  %v9962_v42 = vpop.f32.mrf.mxu3  ;;  %v9964_v41 = vpop.f32.mrf.mxu0 }
 0x141   :  { %13665 = vst [vmem:[#allocation48_spill] sm:$0xff] %v9962_v42  ;;  %v9966_v46 = vpop.f32.mrf.mxu1  ;;  %v8870_v42 = vld [vmem:[%s13575_s0 + $0xa0] sm:$0xff] }
 0x142   :  { %13666 = vst [vmem:[#allocation49_spill] sm:$0xff] %v9964_v41 }
 0x143   :  { %13667 = vst [vmem:[#allocation50_spill] sm:$0xff] %v9966_v46 }
 0x147   :  { %v9968_v51 = vpop.f32.mrf.mxu2 }
 0x148   :  { %13668 = vst [vmem:[#allocation51_spill] sm:$0xff] %v9968_v51  ;;  %v9973_v14 = vpop.f32.mrf.mxu3  ;;  %v9975_v45 = vpop.f32.mrf.mxu0 }
 0x149   :  { %13669 = vst [vmem:[#allocation52_spill] sm:$0xff] %v9973_v14  ;;  %v9977_v43 = vpop.f32.mrf.mxu1 }
 0x14a   :  { %13670 = vst [vmem:[#allocation53_spill] sm:$0xff] %v9975_v45 }
 0x14b   :  { %13671 = vst [vmem:[#allocation54_spill] sm:$0xff] %v9977_v43  ;;  %6963 = vmatmul.msk.bf16.gmra.mxu0 %vm399_vm0, %v8869_v27 }
 0x14c   :  { %6989 = vmatmul.msk.bf16.gmra.mxu1 %vm399_vm0, %v8869_v27  ;;  %7015 = vmatmul.msk.bf16.gmra.mxu2 %vm399_vm0, %v8869_v27 }
 0x14d   :  { %7041 = vmatmul.msk.bf16.gmra.mxu3 %vm399_vm0, %v8869_v27  ;;  %v7058_v27 = vld [vmem:[%s13574_s2 + $0x8] sm:$0xf] }
 0x14f   :  { %v9983_v5 = vpop.f32.mrf.mxu2 }
 0x150   :  { %13672 = vst [vmem:[#allocation55_spill] sm:$0xff] %v9983_v5  ;;  %v9985_v51 = vpop.f32.mrf.mxu3  ;;  %v9987_v46 = vpop.f32.mrf.mxu0 }
 0x151   :  { %13673 = vst [vmem:[#allocation56_spill] sm:$0xff] %v9985_v51  ;;  %v9989_v41 = vpop.f32.mrf.mxu1 }
 0x152   :  { %13674 = vst [vmem:[#allocation57_spill] sm:$0xff] %v9987_v46 }
 0x153   :  { %13675 = vst [vmem:[#allocation58_spill] sm:$0xff] %v9989_v41  ;;  %v8903_v41 = vld [vmem:[%s13574_s2 + $0x14] sm:$0xf0] }
 0x154   :  { %v7059_v46 = vor.u32 %v8903_v41, %v7058_v27 }
 0x156   :  { %1439 = vmatpush.bf16.msrb.mxu2 %v7059_v46  ;;  %v7052_v46 = vld [vmem:[%s13574_s2 + $0x10] sm:$0xf0] }
 0x157   :  { %v9991_v14 = vpop.f32.mrf.mxu2 }
 0x158   :  { %13676 = vst [vmem:[#allocation59_spill] sm:$0xff] %v9991_v14  ;;  %v9996_v33 = vpop.f32.mrf.mxu3  ;;  %v9998_v43 = vpop.f32.mrf.mxu0  ;;  %v8901_v14 = vld [vmem:[%s13574_s2 + $0xc] sm:$0xf] }
 0x159   :  { %13677 = vst [vmem:[#allocation60_spill] sm:$0xff] %v9996_v33  ;;  %v10000_v45 = vpop.f32.mrf.mxu1  ;;  %v7060_v33 = vld [vmem:[%s13574_s2 + $0x18] sm:$0xf0] }
 0x15a   :  { %13678 = vst [vmem:[#allocation61_spill] sm:$0xff] %v9998_v43 }
 0x15b   :  { %13679 = vst [vmem:[#allocation62_spill] sm:$0xff] %v10000_v45  ;;  %6964 = vmatmul.msk.bf16.gmra.mxu0 %vm399_vm0, %v8870_v42  ;;  %v7063_v45 = vor.u32 %v8901_v14, %v7060_v33  ;;  %v7050_v14 = vld [vmem:[%s13574_s2] sm:$0xf]  ;;  %v8902_v33 = vld [vmem:[%s13574_s2 + $0xc] sm:$0xf0] }
 0x15c   :  { %6990 = vmatmul.msk.bf16.gmra.mxu1 %vm399_vm0, %v8870_v42  ;;  %7016 = vmatmul.msk.bf16.gmra.mxu2 %vm399_vm0, %v8870_v42 }
 0x15d   :  { %7042 = vmatmul.msk.bf16.gmra.mxu3 %vm399_vm0, %v8870_v42  ;;  %v8900_v42 = vld [vmem:[%s13574_s2 + $0x4] sm:$0xf] }
 0x15e   :  { %1578 = vmatpush.bf16.msrb.mxu3 %v7063_v45  ;;  %v7051_v45 = vor.u32 %v8902_v33, %v7050_v14 }
 0x15f   :  { %v10018_v43 = vpop.f32.mrf.mxu2 }
 0x160   :  { %13680 = vst [vmem:[#allocation63_spill] sm:$0xff] %v10018_v43  ;;  %v10020_v51 = vpop.f32.mrf.mxu3  ;;  %v10022_v41 = vpop.f32.mrf.mxu0  ;;  %1161 = vmatpush.bf16.msrb.mxu0 %v7051_v45 }
 0x161   :  { %13681 = vst [vmem:[#allocation64_spill] sm:$0xff] %v10020_v51  ;;  %v10024_v27 = vpop.f32.mrf.mxu1  ;;  %v8871_v51 = vld [vmem:[%s13575_s0 + $0xa8] sm:$0xff] }
 0x162   :  { %13682 = vst [vmem:[#allocation65_spill] sm:$0xff] %v10022_v41  ;;  %v7055_v41 = vor.u32 %v8900_v42, %v7052_v46  ;;  %v8872_v46 = vld [vmem:[%s13575_s0 + $0xb0] sm:$0xff] }
 0x163   :  { %13683 = vst [vmem:[#allocation66_spill] sm:$0xff] %v10024_v27 }
 0x164   :  { %1300 = vmatpush.bf16.msrb.mxu1 %v7055_v41 }
 0x167   :  { %v10038_v27 = vpop.f32.mrf.mxu2 }
 0x168   :  { %13684 = vst [vmem:[#allocation67_spill] sm:$0xff] %v10038_v27  ;;  %v10043_v43 = vpop.f32.mrf.mxu3  ;;  %v10045_v5 = vpop.f32.mrf.mxu0 }
 0x169   :  { %13685 = vst [vmem:[#allocation68_spill] sm:$0xff] %v10043_v43  ;;  %v10047_v44 = vpop.f32.mrf.mxu1 }
 0x16a   :  { %13686 = vst [vmem:[#allocation69_spill] sm:$0xff] %v10045_v5 }
 0x16b   :  { %13687 = vst [vmem:[#allocation70_spill] sm:$0xff] %v10047_v44  ;;  %6965 = vmatmul.msk.bf16.gmra.mxu0 %vm399_vm0, %v8871_v51 }
 0x16c   :  { %6991 = vmatmul.msk.bf16.gmra.mxu1 %vm399_vm0, %v8871_v51  ;;  %7017 = vmatmul.msk.bf16.gmra.mxu2 %vm399_vm0, %v8871_v51 }
 0x16d   :  { %7043 = vmatmul.msk.bf16.gmra.mxu3 %vm399_vm0, %v8871_v51 }
 0x16f   :  { %v10053_v41 = vpop.f32.mrf.mxu2 }
 0x170   :  { %13688 = vst [vmem:[#allocation71_spill] sm:$0xff] %v10053_v41  ;;  %v10055_v14 = vpop.f32.mrf.mxu3  ;;  %v10057_v33 = vpop.f32.mrf.mxu0 }
 0x171   :  { %13689 = vst [vmem:[#allocation72_spill] sm:$0xff] %v10055_v14  ;;  %v10059_v42 = vpop.f32.mrf.mxu1 }
 0x172   :  { %13690 = vst [vmem:[#allocation73_spill] sm:$0xff] %v10057_v33 }
 0x173   :  { %13691 = vst [vmem:[#allocation74_spill] sm:$0xff] %v10059_v42 }
 0x177   :  { %v10061_v45 = vpop.f32.mrf.mxu2 }
 0x178   :  { %13692 = vst [vmem:[#allocation75_spill] sm:$0xff] %v10061_v45  ;;  %v10066_v43 = vpop.f32.mrf.mxu3  ;;  %v10068_v27 = vpop.f32.mrf.mxu0 }
 0x179   :  { %13693 = vst [vmem:[#allocation76_spill] sm:$0xff] %v10066_v43  ;;  %v10070_v44 = vpop.f32.mrf.mxu1 }
 0x17a   :  { %13694 = vst [vmem:[#allocation77_spill] sm:$0xff] %v10068_v27 }
 0x17b   :  { %13695 = vst [vmem:[#allocation78_spill] sm:$0xff] %v10070_v44  ;;  %6966 = vmatmul.msk.bf16.gmra.mxu0 %vm399_vm0, %v8872_v46  ;;  %v8873_v44 = vld [vmem:[%s13575_s0 + $0xb8] sm:$0xff] }
 0x17c   :  { %6992 = vmatmul.msk.bf16.gmra.mxu1 %vm399_vm0, %v8872_v46  ;;  %7018 = vmatmul.msk.bf16.gmra.mxu2 %vm399_vm0, %v8872_v46 }
 0x17d   :  { %7044 = vmatmul.msk.bf16.gmra.mxu3 %vm399_vm0, %v8872_v46 }
 0x17f   :  { %v10076_v51 = vpop.f32.mrf.mxu2 }
 0x180   :  { %13696 = vst [vmem:[#allocation79_spill] sm:$0xff] %v10076_v51  ;;  %v10078_v45 = vpop.f32.mrf.mxu3  ;;  %v10080_v42 = vpop.f32.mrf.mxu0 }
 0x181   :  { %13697 = vst [vmem:[#allocation80_spill] sm:$0xff] %v10078_v45  ;;  %v10082_v33 = vpop.f32.mrf.mxu1  ;;  %v8874_v45 = vld [vmem:[%s13575_s0 + $0xc0] sm:$0xff] }
 0x182   :  { %13698 = vst [vmem:[#allocation81_spill] sm:$0xff] %v10080_v42 }
 0x183   :  { %13699 = vst [vmem:[#allocation82_spill] sm:$0xff] %v10082_v33 }
 0x187   :  { %v10084_v43 = vpop.f32.mrf.mxu2 }
 0x188   :  { %13700 = vst [vmem:[#allocation83_spill] sm:$0xff] %v10084_v43  ;;  %v10089_v27 = vpop.f32.mrf.mxu3  ;;  %v10091_v14 = vpop.f32.mrf.mxu0 }
 0x189   :  { %13701 = vst [vmem:[#allocation84_spill] sm:$0xff] %v10089_v27  ;;  %v10093_v41 = vpop.f32.mrf.mxu1 }
 0x18a   :  { %13702 = vst [vmem:[#allocation85_spill] sm:$0xff] %v10091_v14 }
 0x18b   :  { %13703 = vst [vmem:[#allocation86_spill] sm:$0xff] %v10093_v41  ;;  %6967 = vmatmul.msk.bf16.gmra.mxu0 %vm399_vm0, %v8873_v44 }
 0x18c   :  { %6993 = vmatmul.msk.bf16.gmra.mxu1 %vm399_vm0, %v8873_v44  ;;  %7019 = vmatmul.msk.bf16.gmra.mxu2 %vm399_vm0, %v8873_v44 }
 0x18d   :  { %7045 = vmatmul.msk.bf16.gmra.mxu3 %vm399_vm0, %v8873_v44  ;;  %v7662_v44 = vld [vmem:[%s13576_s4 + $0x310] sm:$0xf] }
 0x18f   :  { %v10099_v46 = vpop.f32.mrf.mxu2 }
 0x190   :  { %13704 = vst [vmem:[#allocation87_spill] sm:$0xff] %v10099_v46  ;;  %v10101_v43 = vpop.f32.mrf.mxu3  ;;  %v10103_v33 = vpop.f32.mrf.mxu0 }
 0x191   :  { %13705 = vst [vmem:[#allocation88_spill] sm:$0xff] %v10101_v43  ;;  %v10105_v42 = vpop.f32.mrf.mxu1 }
 0x192   :  { %13706 = vst [vmem:[#allocation89_spill] sm:$0xff] %v10103_v33 }
 0x193   :  { %13707 = vst [vmem:[#allocation90_spill] sm:$0xff] %v10105_v42 }
 0x197   :  { %v10107_v27 = vpop.f32.mrf.mxu2 }
 0x198   :  { %13708 = vst [vmem:[#allocation91_spill] sm:$0xff] %v10107_v27  ;;  %v10112_v51 = vpop.f32.mrf.mxu3  ;;  %v10114_v41 = vpop.f32.mrf.mxu0  ;;  %v9075_v27 = vld [vmem:[%s13576_s4 + $0x334] sm:$0xf0] }
 0x199   :  { %13709 = vst [vmem:[#allocation92_spill] sm:$0xff] %v10112_v51  ;;  %v10116_v14 = vpop.f32.mrf.mxu1  ;;  %v9071_v51 = vld [vmem:[%s13576_s4 + $0x314] sm:$0xf0] }
 0x19a   :  { %13710 = vst [vmem:[#allocation93_spill] sm:$0xff] %v10114_v41  ;;  %v7663_v41 = vor.u32 %v9071_v51, %v7662_v44  ;;  %v8875_v51 = vld [vmem:[%s13575_s0 + $0xc8] sm:$0xff] }
 0x19b   :  { %13711 = vst [vmem:[#allocation94_spill] sm:$0xff] %v10116_v14  ;;  %6968 = vmatmul.msk.bf16.gmra.mxu0 %vm399_vm0, %v8874_v45  ;;  %v7678_v14 = vld [vmem:[%s13576_s4 + $0x330] sm:$0xf] }
 0x19c   :  { %6994 = vmatmul.msk.bf16.gmra.mxu1 %vm399_vm0, %v8874_v45  ;;  %7020 = vmatmul.msk.bf16.gmra.mxu2 %vm399_vm0, %v8874_v45 }
 0x19d   :  { %7046 = vmatmul.msk.bf16.gmra.mxu3 %vm399_vm0, %v8874_v45  ;;  %v7679_v45 = vor.u32 %v9075_v27, %v7678_v14  ;;  %3121 = vmatpush.bf16.msra.mxu2 %v7663_v41  ;;  %v7534_v27 = vld [vmem:[%s13576_s4 + $0x210] sm:$0xf]  ;;  %v9039_v41 = vld [vmem:[%s13576_s4 + $0x214] sm:$0xf0] }
 0x19e   :  { %v7598_v14 = vld [vmem:[%s13576_s4 + $0x290] sm:$0xf] }
 0x19f   :  { %v10134_v42 = vpop.f32.mrf.mxu2  ;;  %3191 = vmatpush.bf16.msra.mxu3 %v7679_v45  ;;  %v7535_v45 = vor.u32 %v9039_v41, %v7534_v27 }
 0x1a0   :  { %13712 = vst [vmem:[#allocation95_spill] sm:$0xff] %v10134_v42  ;;  %v10136_v33 = vpop.f32.mrf.mxu3  ;;  %v10138_v43 = vpop.f32.mrf.mxu0 }
 0x1a1   :  { %13713 = vst [vmem:[#allocation96_spill] sm:$0xff] %v10136_v33  ;;  %v10140_v46 = vpop.f32.mrf.mxu1  ;;  %2993 = vmatpush.bf16.msra.mxu0 %v7535_v45 }
 0x1a2   :  { %13714 = vst [vmem:[#allocation97_spill] sm:$0xff] %v10138_v43 }
 0x1a3   :  { %13715 = vst [vmem:[#allocation98_spill] sm:$0xff] %v10140_v46 }
 0x1a7   :  { %v10142_v5 = vpop.f32.mrf.mxu2 }
 0x1a8   :  { %13716 = vst [vmem:[#allocation99_spill] sm:$0xff] %v10142_v5  ;;  %v10147_v44 = vpop.f32.mrf.mxu3  ;;  %v10149_v25 = vpop.f32.mrf.mxu0 }
 0x1a9   :  { %13717 = vst [vmem:[#allocation100_spill] sm:$0xff] %v10147_v44  ;;  %v10151_v42 = vpop.f32.mrf.mxu1  ;;  %v9055_v44 = vld [vmem:[%s13576_s4 + $0x294] sm:$0xf0] }
 0x1aa   :  { %13718 = vst [vmem:[#allocation101_spill] sm:$0xff] %v10149_v25  ;;  %v7599_v5 = vor.u32 %v9055_v44, %v7598_v14 }
 0x1ab   :  { %13719 = vst [vmem:[#allocation102_spill] sm:$0xff] %v10151_v42  ;;  %6969 = vmatmul.msk.bf16.gmra.mxu0 %vm399_vm0, %v8875_v51 }
 0x1ac   :  { %6995 = vmatmul.msk.bf16.gmra.mxu1 %vm399_vm0, %v8875_v51  ;;  %7021 = vmatmul.msk.bf16.gmra.mxu2 %vm399_vm0, %v8875_v51 }
 0x1ad   :  { %7047 = vmatmul.msk.bf16.gmra.mxu3 %vm399_vm0, %v8875_v51  ;;  %3057 = vmatpush.bf16.msra.mxu1 %v7599_v5 }
 0x1af   :  { %v10169_v46 = vpop.f32.mrf.mxu2 }
 0x1b0   :  { %13720 = vst [vmem:[#allocation103_spill] sm:$0xff] %v10169_v46  ;;  %v10171_v43 = vpop.f32.mrf.mxu3  ;;  %v10173_v27 = vpop.f32.mrf.mxu0 }
 0x1b1   :  { %13721 = vst [vmem:[#allocation104_spill] sm:$0xff] %v10171_v43  ;;  %v10175_v41 = vpop.f32.mrf.mxu1 }
 0x1b2   :  { %13722 = vst [vmem:[#allocation105_spill] sm:$0xff] %v10173_v27 }
 0x1b3   :  { %13723 = vst [vmem:[#allocation106_spill] sm:$0xff] %v10175_v41 }
 0x1b7   :  { %v10177_v33 = vpop.f32.mrf.mxu2 }
 0x1b8   :  { %13724 = vst [vmem:[#allocation107_spill] sm:$0xff] %v10177_v33  ;;  %v10179_v42 = vpop.f32.mrf.mxu3  ;;  %v10181_v44 = vpop.f32.mrf.mxu0 }
 0x1b9   :  { %13725 = vst [vmem:[#allocation108_spill] sm:$0xff] %v10179_v42  ;;  %v10183_v14 = vpop.f32.mrf.mxu1 }
 0x1ba   :  { %13726 = vst [vmem:[#allocation109_spill] sm:$0xff] %v10181_v44 }
 0x1bb   :  { %13727 = vst [vmem:[#allocation110_spill] sm:$0xff] %v10183_v14  ;;  %7144 = vmatmul.msk.bf16.vlgmr.msrb.gmra.mxu0 %vm399_vm0, %v9504_v15 }
 0x1bc   :  { %7170 = vmatmul.msk.bf16.vlgmr.msrb.gmra.mxu1 %vm399_vm0, %v9504_v15  ;;  %7196 = vmatmul.msk.bf16.vlgmr.msrb.gmra.mxu2 %vm399_vm0, %v9504_v15 }
 0x1bd   :  { %7222 = vmatmul.msk.bf16.vlgmr.msrb.gmra.mxu3 %vm399_vm0, %v9504_v15 }
 0x1bf   :  { %v10193_v5 = vpop.f32.mrf.mxu2 }
 0x1c0   :  { %13728 = vst [vmem:[#allocation111_spill] sm:$0xff] %v10193_v5  ;;  %v10195_v51 = vpop.f32.mrf.mxu3  ;;  %v10197_v45 = vpop.f32.mrf.mxu0 }
 0x1c1   :  { %13729 = vst [vmem:[#allocation112_spill] sm:$0xff] %v10195_v51  ;;  %v10199_v44 = vpop.f32.mrf.mxu1  ;;  %v9069_v51 = vld [vmem:[%s13576_s4 + $0x304] sm:$0xf0] }
 0x1c2   :  { %13730 = vst [vmem:[#allocation113_spill] sm:$0xff] %v10197_v45  ;;  %v7654_v45 = vld [vmem:[%s13576_s4 + $0x300] sm:$0xf] }
 0x1c3   :  { %13731 = vst [vmem:[#allocation114_spill] sm:$0xff] %v10199_v44 }
 0x1c7   :  { %v10201_v14 = vpop.f32.mrf.mxu2 }
 0x1c8   :  { %13732 = vst [vmem:[#allocation115_spill] sm:$0xff] %v10201_v14  ;;  %v10203_v42 = vpop.f32.mrf.mxu3  ;;  %v10205_v33 = vpop.f32.mrf.mxu0 }
 0x1c9   :  { %13733 = vst [vmem:[#allocation116_spill] sm:$0xff] %v10203_v42  ;;  %v10207_v41 = vpop.f32.mrf.mxu1 }
 0x1ca   :  { %13734 = vst [vmem:[#allocation117_spill] sm:$0xff] %v10205_v33 }
 0x1cb   :  { %13735 = vst [vmem:[#allocation118_spill] sm:$0xff] %v10207_v41  ;;  %7145 = vmatmul.msk.bf16.gmra.mxu0 %vm399_vm0, %v9523_v21  ;;  %v7655_v41 = vor.u32 %v9069_v51, %v7654_v45  ;;  %v9037_v51 = vld [vmem:[%s13576_s4 + $0x204] sm:$0xf0]  ;;  %v7590_v45 = vld [vmem:[%s13576_s4 + $0x280] sm:$0xf] }
 0x1cc   :  { %7171 = vmatmul.msk.bf16.gmra.mxu1 %vm399_vm0, %v9523_v21  ;;  %7197 = vmatmul.msk.bf16.gmra.mxu2 %vm399_vm0, %v9523_v21 }
 0x1cd   :  { %7223 = vmatmul.msk.bf16.gmra.mxu3 %vm399_vm0, %v9523_v21  ;;  %3122 = vmatpush.bf16.msra.mxu2 %v7655_v41  ;;  %v7526_v41 = vld [vmem:[%s13576_s4 + $0x200] sm:$0xf] }
 0x1cf   :  { %v10217_v15 = vpop.f32.mrf.mxu2 }
 0x1d0   :  { %13736 = vst [vmem:[#allocation119_spill] sm:$0xff] %v10217_v15  ;;  %v10219_v14 = vpop.f32.mrf.mxu3  ;;  %v10221_v42 = vpop.f32.mrf.mxu0 }
 0x1d1   :  { %13737 = vst [vmem:[#allocation120_spill] sm:$0xff] %v10219_v14  ;;  %v10223_v44 = vpop.f32.mrf.mxu1 }
 0x1d2   :  { %13738 = vst [vmem:[#allocation121_spill] sm:$0xff] %v10221_v42 }
 0x1d3   :  { %13739 = vst [vmem:[#allocation122_spill] sm:$0xff] %v10223_v44 }
 0x1d7   :  { %v10231_v33 = vpop.f32.mrf.mxu2 }
 0x1d8   :  { %13740 = vst [vmem:[#allocation123_spill] sm:$0xff] %v10231_v33  ;;  %v10233_v21 = vpop.f32.mrf.mxu3  ;;  %v10235_v15 = vpop.f32.mrf.mxu0 }
 0x1d9   :  { %13741 = vst [vmem:[#allocation124_spill] sm:$0xff] %v10233_v21  ;;  %v10237_v14 = vpop.f32.mrf.mxu1 }
 0x1da   :  { %13742 = vst [vmem:[#allocation125_spill] sm:$0xff] %v10235_v15  ;;  %v9053_v15 = vld [vmem:[%s13576_s4 + $0x284] sm:$0xf0] }
 0x1db   :  { %13743 = vst [vmem:[#allocation126_spill] sm:$0xff] %v10237_v14  ;;  %7146 = vmatmul.msk.bf16.gmra.mxu0 %vm399_vm0, %v9536_v22  ;;  %v7527_v14 = vor.u32 %v9037_v51, %v7526_v41 }
 0x1dc   :  { %7172 = vmatmul.msk.bf16.gmra.mxu1 %vm399_vm0, %v9536_v22  ;;  %7198 = vmatmul.msk.bf16.gmra.mxu2 %vm399_vm0, %v9536_v22 }
 0x1dd   :  { %7224 = vmatmul.msk.bf16.gmra.mxu3 %vm399_vm0, %v9536_v22  ;;  %v7591_v22 = vor.u32 %v9053_v15, %v7590_v45  ;;  %2994 = vmatpush.bf16.msra.mxu0 %v7527_v14 }
 0x1df   :  { %v10259_v21 = vpop.f32.mrf.mxu2  ;;  %3058 = vmatpush.bf16.msra.mxu1 %v7591_v22 }
 0x1e0   :  { %13744 = vst [vmem:[#allocation127_spill] sm:$0xff] %v10259_v21  ;;  %v10261_v33 = vpop.f32.mrf.mxu3  ;;  %v10263_v44 = vpop.f32.mrf.mxu0  ;;  %v9033_v21 = vld [vmem:[%s13576_s4 + $0x1e4] sm:$0xf0] }
 0x1e1   :  { %13745 = vst [vmem:[#allocation128_spill] sm:$0xff] %v10261_v33  ;;  %v10265_v42 = vpop.f32.mrf.mxu1  ;;  %v7510_v33 = vld [vmem:[%s13576_s4 + $0x1e0] sm:$0xf] }
 0x1e2   :  { %13746 = vst [vmem:[#allocation129_spill] sm:$0xff] %v10263_v44 }
 0x1e3   :  { %13747 = vst [vmem:[#allocation130_spill] sm:$0xff] %v10265_v42 }
 0x1e7   :  { %v10267_v5 = vpop.f32.mrf.mxu2 }
 0x1e8   :  { %13748 = vst [vmem:[#allocation131_spill] sm:$0xff] %v10267_v5  ;;  %v10269_v27 = vpop.f32.mrf.mxu3  ;;  %v10271_v41 = vpop.f32.mrf.mxu0 }
 0x1e9   :  { %13749 = vst [vmem:[#allocation132_spill] sm:$0xff] %v10269_v27  ;;  %v10273_v51 = vpop.f32.mrf.mxu1 }
 0x1ea   :  { %13750 = vst [vmem:[#allocation133_spill] sm:$0xff] %v10271_v41 }
 0x1eb   :  { %13751 = vst [vmem:[#allocation134_spill] sm:$0xff] %v10273_v51  ;;  %7147 = vmatmul.msk.bf16.gmra.mxu0 %vm399_vm0, %v9561_v29 }
 0x1ec   :  { %7173 = vmatmul.msk.bf16.gmra.mxu1 %vm399_vm0, %v9561_v29  ;;  %7199 = vmatmul.msk.bf16.gmra.mxu2 %vm399_vm0, %v9561_v29 }
 0x1ed   :  { %7225 = vmatmul.msk.bf16.gmra.mxu3 %vm399_vm0, %v9561_v29 }
 0x1ef   :  { %v10283_v14 = vpop.f32.mrf.mxu2 }
 0x1f0   :  { %13752 = vst [vmem:[#allocation135_spill] sm:$0xff] %v10283_v14  ;;  %v10285_v15 = vpop.f32.mrf.mxu3  ;;  %v10287_v45 = vpop.f32.mrf.mxu0 }
 0x1f1   :  { %13753 = vst [vmem:[#allocation136_spill] sm:$0xff] %v10285_v15  ;;  %v10289_v22 = vpop.f32.mrf.mxu1 }
 0x1f2   :  { %13754 = vst [vmem:[#allocation137_spill] sm:$0xff] %v10287_v45 }
 0x1f3   :  { %13755 = vst [vmem:[#allocation138_spill] sm:$0xff] %v10289_v22  ;;  %v9067_v22 = vld [vmem:[%s13576_s4 + $0x2f4] sm:$0xf0] }
 0x1f7   :  { %v10291_v27 = vpop.f32.mrf.mxu2 }
 0x1f8   :  { %13756 = vst [vmem:[#allocation139_spill] sm:$0xff] %v10291_v27  ;;  %v10293_v5 = vpop.f32.mrf.mxu3  ;;  %v10295_v42 = vpop.f32.mrf.mxu0 }
 0x1f9   :  { %13757 = vst [vmem:[#allocation140_spill] sm:$0xff] %v10293_v5  ;;  %v10297_v44 = vpop.f32.mrf.mxu1 }
 0x1fa   :  { %13758 = vst [vmem:[#allocation141_spill] sm:$0xff] %v10295_v42 }
 0x1fb   :  { %13759 = vst [vmem:[#allocation142_spill] sm:$0xff] %v10297_v44  ;;  %7148 = vmatmul.msk.bf16.gmra.mxu0 %vm399_vm0, %v9586_v36  ;;  %v7646_v44 = vld [vmem:[%s13576_s4 + $0x2f0] sm:$0xf] }
 0x1fc   :  { %7174 = vmatmul.msk.bf16.gmra.mxu1 %vm399_vm0, %v9586_v36  ;;  %7200 = vmatmul.msk.bf16.gmra.mxu2 %vm399_vm0, %v9586_v36  ;;  %v7647_v45 = vor.u32 %v9067_v22, %v7646_v44 }
 0x1fd   :  { %7226 = vmatmul.msk.bf16.gmra.mxu3 %vm399_vm0, %v9586_v36 }
 0x1fe   :  { %3123 = vmatpush.bf16.msra.mxu2 %v7647_v45 }
 0x1ff   :  { %v10307_v29 = vpop.f32.mrf.mxu2 }
 0x200   :  { %13760 = vst [vmem:[#allocation143_spill] sm:$0xff] %v10307_v29  ;;  %v10309_v27 = vpop.f32.mrf.mxu3  ;;  %v10311_v5 = vpop.f32.mrf.mxu0 }
 0x201   :  { %13761 = vst [vmem:[#allocation144_spill] sm:$0xff] %v10309_v27  ;;  %v10313_v42 = vpop.f32.mrf.mxu1 }
 0x202   :  { %13762 = vst [vmem:[#allocation145_spill] sm:$0xff] %v10311_v5 }
 0x203   :  { %13763 = vst [vmem:[#allocation146_spill] sm:$0xff] %v10313_v42  ;;  %v9035_v42 = vld [vmem:[%s13576_s4 + $0x1f4] sm:$0xf0] }
 0x207   :  { %v10321_v15 = vpop.f32.mrf.mxu2 }
 0x208   :  { %13764 = vst [vmem:[#allocation147_spill] sm:$0xff] %v10321_v15  ;;  %v10323_v36 = vpop.f32.mrf.mxu3  ;;  %v10325_v29 = vpop.f32.mrf.mxu0  ;;  %v7518_v15 = vld [vmem:[%s13576_s4 + $0x1f0] sm:$0xf] }
 0x209   :  { %13765 = vst [vmem:[#allocation148_spill] sm:$0xff] %v10323_v36  ;;  %v10327_v27 = vpop.f32.mrf.mxu1  ;;  %v7519_v5 = vor.u32 %v9035_v42, %v7518_v15 }
 0x20a   :  { %13766 = vst [vmem:[#allocation149_spill] sm:$0xff] %v10325_v29 }
 0x20b   :  { %13767 = vst [vmem:[#allocation150_spill] sm:$0xff] %v10327_v27  ;;  %7149 = vmatmul.msk.bf16.gmra.mxu0 %vm399_vm0, %v9599_v37 }
 0x20c   :  { %7175 = vmatmul.msk.bf16.gmra.mxu1 %vm399_vm0, %v9599_v37  ;;  %7201 = vmatmul.msk.bf16.gmra.mxu2 %vm399_vm0, %v9599_v37 }
 0x20d   :  { %7227 = vmatmul.msk.bf16.gmra.mxu3 %vm399_vm0, %v9599_v37  ;;  %v7582_v37 = vld [vmem:[%s13576_s4 + $0x270] sm:$0xf]  ;;  %2995 = vmatpush.bf16.msra.mxu0 %v7519_v5 }
 0x20f   :  { %v10337_v44 = vpop.f32.mrf.mxu2 }
 0x210   :  { %13768 = vst [vmem:[#allocation151_spill] sm:$0xff] %v10337_v44  ;;  %v10339_v45 = vpop.f32.mrf.mxu3  ;;  %v10341_v22 = vpop.f32.mrf.mxu0 }
 0x211   :  { %13769 = vst [vmem:[#allocation152_spill] sm:$0xff] %v10339_v45  ;;  %v10343_v36 = vpop.f32.mrf.mxu1  ;;  %v9051_v45 = vld [vmem:[%s13576_s4 + $0x274] sm:$0xf0] }
 0x212   :  { %13770 = vst [vmem:[#allocation153_spill] sm:$0xff] %v10341_v22  ;;  %v7583_v22 = vor.u32 %v9051_v45, %v7582_v37 }
 0x213   :  { %13771 = vst [vmem:[#allocation154_spill] sm:$0xff] %v10343_v36 }
 0x214   :  { %3059 = vmatpush.bf16.msra.mxu1 %v7583_v22 }
 0x217   :  { %v10357_v36 = vpop.f32.mrf.mxu2 }
 0x218   :  { %13772 = vst [vmem:[#allocation155_spill] sm:$0xff] %v10357_v36  ;;  %v10359_v44 = vpop.f32.mrf.mxu3  ;;  %v10361_v27 = vpop.f32.mrf.mxu0 }
 0x219   :  { %13773 = vst [vmem:[#allocation156_spill] sm:$0xff] %v10359_v44  ;;  %v10363_v29 = vpop.f32.mrf.mxu1 }
 0x21a   :  { %13774 = vst [vmem:[#allocation157_spill] sm:$0xff] %v10361_v27 }
 0x21b   :  { %13775 = vst [vmem:[#allocation158_spill] sm:$0xff] %v10363_v29  ;;  %7150 = vmatmul.msk.bf16.gmra.mxu0 %vm399_vm0, %v9612_v38 }
 0x21c   :  { %7176 = vmatmul.msk.bf16.gmra.mxu1 %vm399_vm0, %v9612_v38  ;;  %7202 = vmatmul.msk.bf16.gmra.mxu2 %vm399_vm0, %v9612_v38 }
 0x21d   :  { %7228 = vmatmul.msk.bf16.gmra.mxu3 %vm399_vm0, %v9612_v38 }
 0x21f   :  { %v10373_v42 = vpop.f32.mrf.mxu2 }
 0x220   :  { %13776 = vst [vmem:[#allocation159_spill] sm:$0xff] %v10373_v42  ;;  %v10375_v5 = vpop.f32.mrf.mxu3  ;;  %v10377_v15 = vpop.f32.mrf.mxu0  ;;  %v9065_v42 = vld [vmem:[%s13576_s4 + $0x2e4] sm:$0xf0] }
 0x221   :  { %13777 = vst [vmem:[#allocation160_spill] sm:$0xff] %v10375_v5  ;;  %v10379_v45 = vpop.f32.mrf.mxu1 }
 0x222   :  { %13778 = vst [vmem:[#allocation161_spill] sm:$0xff] %v10377_v15 }
 0x223   :  { %13779 = vst [vmem:[#allocation162_spill] sm:$0xff] %v10379_v45 }
 0x227   :  { %v10381_v22 = vpop.f32.mrf.mxu2 }
 0x228   :  { %13780 = vst [vmem:[#allocation163_spill] sm:$0xff] %v10381_v22  ;;  %v10383_v37 = vpop.f32.mrf.mxu3  ;;  %v10385_v29 = vpop.f32.mrf.mxu0 }
 0x229   :  { %13781 = vst [vmem:[#allocation164_spill] sm:$0xff] %v10383_v37  ;;  %v10387_v27 = vpop.f32.mrf.mxu1 }
 0x22a   :  { %13782 = vst [vmem:[#allocation165_spill] sm:$0xff] %v10385_v29 }
 0x22b   :  { %13783 = vst [vmem:[#allocation166_spill] sm:$0xff] %v10387_v27  ;;  %7151 = vmatmul.msk.bf16.gmra.mxu0 %vm399_vm0, %v9625_v39 }
 0x22c   :  { %7177 = vmatmul.msk.bf16.gmra.mxu1 %vm399_vm0, %v9625_v39  ;;  %7203 = vmatmul.msk.bf16.gmra.mxu2 %vm399_vm0, %v9625_v39 }
 0x22d   :  { %7229 = vmatmul.msk.bf16.gmra.mxu3 %vm399_vm0, %v9625_v39 }
 0x22f   :  { %v10397_v38 = vpop.f32.mrf.mxu2 }
 0x230   :  { %13784 = vst [vmem:[#allocation167_spill] sm:$0xff] %v10397_v38  ;;  %v10399_v22 = vpop.f32.mrf.mxu3  ;;  %v10401_v37 = vpop.f32.mrf.mxu0  ;;  %v7638_v38 = vld [vmem:[%s13576_s4 + $0x2e0] sm:$0xf] }
 0x231   :  { %13785 = vst [vmem:[#allocation168_spill] sm:$0xff] %v10399_v22  ;;  %v10403_v45 = vpop.f32.mrf.mxu1 }
 0x232   :  { %13786 = vst [vmem:[#allocation169_spill] sm:$0xff] %v10401_v37 }
 0x233   :  { %13787 = vst [vmem:[#allocation170_spill] sm:$0xff] %v10403_v45 }
 0x237   :  { %v10405_v27 = vpop.f32.mrf.mxu2 }
 0x238   :  { %13788 = vst [vmem:[#allocation171_spill] sm:$0xff] %v10405_v27  ;;  %v10407_v29 = vpop.f32.mrf.mxu3  ;;  %v1163_v15 = vpop.f32.mrf.mxu0 }
 0x239   :  { %13789 = vst [vmem:[#allocation172_spill] sm:$0xff] %v10407_v29  ;;  %v1302_v5 = vpop.f32.mrf.mxu1  ;;  %v139_v29 = vld [vmem:[%s13577_s3] sm:$0xf] }
 0x23a   :  { %v10420_v22 = vperm.slane %v139_v29, 0  ;;  %v10428_v44 = vperm.slane %v139_v29, 1  ;;  %v10440_v41 = vperm.slane %v139_v29, 2  ;;  %v10442_v43 = vperm.slane %v139_v29, 3 }
 0x23b   :  { %7152 = vmatmul.msk.bf16.gmra.mxu0 %vm399_vm0, %v9662_v52 }
 0x23c   :  { %7178 = vmatmul.msk.bf16.gmra.mxu1 %vm399_vm0, %v9662_v52  ;;  %7204 = vmatmul.msk.bf16.gmra.mxu2 %vm399_vm0, %v9662_v52  ;;  %v1164_v36 = vadd.f32 %v1163_v15, %v10420_v22  ;;  %v1303_v14 = vadd.f32 %v1302_v5, %v10428_v44  ;;  %v488_v51 = vadd.f32 %v9664_v53, %v10420_v22  ;;  %v7574_v5 = vld [vmem:[%s13576_s4 + $0x260] sm:$0xf] }
 0x23d   :  { %7230 = vmatmul.msk.bf16.gmra.mxu3 %vm399_vm0, %v9662_v52  ;;  %v7639_v52 = vor.u32 %v9065_v42, %v7638_v38  ;;  %v7511_v15 = vor.u32 %v9033_v21, %v7510_v33  ;;  %v9049_v38 = vld [vmem:[%s13576_s4 + $0x264] sm:$0xf0]  ;;  %v493_v29 = vadd.f32 %v9693_v62, %v10420_v22  ;;  %v632_v23 = vadd.f32 %v9695_v63, %v10428_v44 }
 0x23e   :  { %v7575_v53 = vor.u32 %v9049_v38, %v7574_v5  ;;  %v1710_v24 = vmax.f32 %v488_v51, %v1164_v36  ;;  %v905_v5 = vadd.f32 %v9678_v56, %v10442_v43 }
 0x23f   :  { %v1441_v39 = vpop.f32.mrf.mxu2  ;;  %3124 = vmatpush.bf16.msra.mxu2 %v7639_v52  ;;  %v627_v52 = vadd.f32 %v9666_v54, %v10428_v44  ;;  %2996 = vmatpush.bf16.msra.mxu0 %v7511_v15  ;;  %v766_v54 = vadd.f32 %v9676_v55, %v10440_v41  ;;  %v629_v55 = vadd.f32 %v9682_v58, %v10428_v44 }
 0x240   :  { %v1580_v45 = vpop.f32.mrf.mxu3  ;;  %v1165_v37 = vpop.f32.mrf.mxu0  ;;  %3060 = vmatpush.bf16.msra.mxu1 %v7575_v53  ;;  %v1442_v62 = vadd.f32 %v1441_v39, %v10440_v41  ;;  %v1918_v56 = vmax.f32 %v1710_v24, 0.0  ;;  %v910_v15 = vadd.f32 %v9707_v1, %v10442_v43  ;;  %v495_v58 = vadd.f32 %v9709_v2, %v10420_v22 }
 0x241   :  { %v1304_v27 = vpop.f32.mrf.mxu1  ;;  %v1711_v50 = vmax.f32 %v627_v52, %v1303_v14  ;;  %v1581_v63 = vadd.f32 %v1580_v45, %v10442_v43  ;;  %v1166_v36 = vadd.f32 %v1165_v37, %v10420_v22  ;;  %v634_v52 = vadd.f32 %v9711_v3, %v10428_v44 }
 0x242   :  { %v1712_v24 = vmax.f32 %v766_v54, %v1442_v62 }
 0x247   :  { %v1443_v42 = vpop.f32.mrf.mxu2 }
 0x248   :  { %v1582_v46 = vpop.f32.mrf.mxu3  ;;  %v1168_v25 = vpop.f32.mrf.mxu0 }
 0x249   :  { %v1169_v33 = vadd.f32 %v1168_v25, %v10420_v22  ;;  %v1307_v21 = vpop.f32.mrf.mxu1  ;;  %v490_v25 = vadd.f32 %v9680_v57, %v10420_v22  ;;  %v771_v57 = vadd.f32 %v9705_v0, %v10440_v41 }
 0x24a   :  { %v1308_v49 = vadd.f32 %v1307_v21, %v10428_v44 }
 0x24b   :  { %v1718_v51 = vmax.f32 %v493_v29, %v1169_v33  ;;  %7153 = vmatmul.msk.bf16.gmra.mxu0 %vm399_vm0, %v9689_v60 }
 0x24c   :  { %v1719_v14 = vmax.f32 %v632_v23, %v1308_v49  ;;  %7179 = vmatmul.msk.bf16.gmra.mxu1 %vm399_vm0, %v9689_v60  ;;  %7205 = vmatmul.msk.bf16.gmra.mxu2 %vm399_vm0, %v9689_v60  ;;  %v1919_v49 = vmax.f32 %v1711_v50, 0.0  ;;  %v1305_v23 = vadd.f32 %v1304_v27, %v10428_v44  ;;  %v1714_v27 = vmax.f32 %v490_v25, %v1166_v36 }
 0x24d   :  { %v1926_v39 = vmax.f32 %v1718_v51, 0.0  ;;  %7231 = vmatmul.msk.bf16.gmra.mxu3 %vm399_vm0, %v9689_v60  ;;  %v1713_v60 = vmax.f32 %v905_v5, %v1581_v63 }
 0x24e   :  { %v1927_v45 = vmax.f32 %v1719_v14, 0.0  ;;  %v1715_v2 = vmax.f32 %v629_v55, %v1305_v23  ;;  %v1920_v14 = vmax.f32 %v1712_v24, 0.0  ;;  %v768_v55 = vadd.f32 %v9684_v59, %v10440_v41 }
 0x24f   :  { %v2126_v38 = vmax.f32 %v1918_v56, %v1926_v39  ;;  %v1446_v37 = vpop.f32.mrf.mxu2  ;;  %v1921_v63 = vmax.f32 %v1713_v60, 0.0  ;;  %v1444_v56 = vadd.f32 %v1443_v42, %v10440_v41  ;;  %v1922_v39 = vmax.f32 %v1714_v27, 0.0 }
 0x250   :  { %v2127_v53 = vmax.f32 %v1919_v49, %v1927_v45  ;;  %v1447_v0 = vadd.f32 %v1446_v37, %v10440_v41  ;;  %v1585_v50 = vpop.f32.mrf.mxu3  ;;  %v1170_v29 = vpop.f32.mrf.mxu0  ;;  %v1583_v49 = vadd.f32 %v1582_v46, %v10442_v43 }
 0x251   :  { %v1586_v33 = vadd.f32 %v1585_v50, %v10442_v43  ;;  %v1171_v1 = vadd.f32 %v1170_v29, %v10420_v22  ;;  %v1309_v21 = vpop.f32.mrf.mxu1  ;;  %v1716_v60 = vmax.f32 %v768_v55, %v1444_v56 }
 0x252   :  { %v2134_v54 = vpack.c.bf16 %v2127_v53, %v2126_v38  ;;  %v1720_v62 = vmax.f32 %v771_v57, %v1447_v0  ;;  %v1310_v51 = vadd.f32 %v1309_v21, %v10428_v44  ;;  %v1923_v57 = vmax.f32 %v1715_v2, 0.0 }
 0x253   :  { %v1721_v3 = vmax.f32 %v910_v15, %v1586_v33  ;;  %v1722_v5 = vmax.f32 %v495_v58, %v1171_v1  ;;  %v907_v15 = vadd.f32 %v9691_v61, %v10442_v43  ;;  %v912_v61 = vadd.f32 %v9718_v6, %v10442_v43 }
 0x254   :  { %2138 = vst [vmem:[#allocation2] sm:$0xff] %v2134_v54  ;;  %v1928_v25 = vmax.f32 %v1720_v62, 0.0  ;;  %v1723_v36 = vmax.f32 %v634_v52, %v1310_v51  ;;  %v773_v52 = vadd.f32 %v9713_v4, %v10440_v41  ;;  %v9263_v54 = vld [vmem:[%s13575_s0 + $0x50] sm:$0xff]  ;;  %v1924_v62 = vmax.f32 %v1716_v60, 0.0 }
 0x255   :  { %v1929_v45 = vmax.f32 %v1721_v3, 0.0  ;;  %v1930_v37 = vmax.f32 %v1722_v5, 0.0  ;;  %v1717_v29 = vmax.f32 %v907_v15, %v1583_v49  ;;  %v503_v15 = vadd.f32 %v9743_v17, %v10420_v22 }
 0x256   :  { %v2128_v23 = vmax.f32 %v1920_v14, %v1928_v25  ;;  %v1931_v24 = vmax.f32 %v1723_v36, 0.0  ;;  %v642_v60 = vadd.f32 %v9745_v18, %v10428_v44  ;;  %v915_v18 = vadd.f32 %v9730_v10, %v10442_v43 }
 0x257   :  { %v2129_v58 = vmax.f32 %v1921_v63, %v1929_v45  ;;  %v2130_v38 = vmax.f32 %v1922_v39, %v1930_v37  ;;  %v1448_v42 = vpop.f32.mrf.mxu2  ;;  %v1925_v51 = vmax.f32 %v1717_v29, 0.0  ;;  %v498_v37 = vadd.f32 %v9720_v7, %v10420_v22 }
 0x258   :  { %v2131_v59 = vmax.f32 %v1923_v57, %v1931_v24  ;;  %v1449_v53 = vadd.f32 %v1448_v42, %v10440_v41  ;;  %v1587_v0 = vpop.f32.mrf.mxu3  ;;  %v1173_v50 = vpop.f32.mrf.mxu0  ;;  %v637_v57 = vadd.f32 %v9722_v8, %v10428_v44  ;;  %v776_v8 = vadd.f32 %v9728_v9, %v10440_v41 }
 0x259   :  { %v2135_v27 = vpack.c.bf16 %v2129_v58, %v2128_v23  ;;  %v1588_v33 = vadd.f32 %v1587_v0, %v10442_v43  ;;  %v1312_v4 = vpop.f32.mrf.mxu1  ;;  %v1174_v49 = vadd.f32 %v1173_v50, %v10420_v22  ;;  %v9264_v50 = vld [vmem:[%s13575_s0 + $0x58] sm:$0xff]  ;;  %v500_v9 = vadd.f32 %v9732_v11, %v10420_v22 }
 0x25a   :  { %v2136_v1 = vpack.c.bf16 %v2131_v59, %v2130_v38  ;;  %v1724_v21 = vmax.f32 %v773_v52, %v1449_v53  ;;  %v1313_v45 = vadd.f32 %v1312_v4, %v10428_v44  ;;  %v639_v4 = vadd.f32 %v9734_v12, %v10428_v44 }
 0x25b   :  { %2142 = vst.msk [vmem:[#allocation2 + $0x8] sm:$0xff] %vm10500_vm3, %v2135_v27  ;;  %v1725_v2 = vmax.f32 %v912_v61, %v1588_v33  ;;  %7154 = vmatmul.msk.bf16.gmra.mxu0 %vm399_vm0, %v9263_v54  ;;  %v1726_v58 = vmax.f32 %v498_v37, %v1174_v49  ;;  %v920_v11 = vadd.f32 %v9765_v28, %v10442_v43 }
 0x25c   :  { %2143 = vst [vmem:[#allocation2 + $0x10] sm:$0xff] %v2136_v1  ;;  %v1932_v6 = vmax.f32 %v1724_v21, 0.0  ;;  %7180 = vmatmul.msk.bf16.gmra.mxu1 %vm399_vm0, %v9263_v54  ;;  %7206 = vmatmul.msk.bf16.gmra.mxu2 %vm399_vm0, %v9263_v54  ;;  %v1727_v59 = vmax.f32 %v637_v57, %v1313_v45 }
 0x25d   :  { %v1933_v14 = vmax.f32 %v1725_v2, 0.0  ;;  %7232 = vmatmul.msk.bf16.gmra.mxu3 %vm399_vm0, %v9263_v54  ;;  %v1934_v29 = vmax.f32 %v1726_v58, 0.0  ;;  %v781_v2 = vadd.f32 %v9763_v26, %v10440_v41  ;;  %v778_v58 = vadd.f32 %v9736_v13, %v10440_v41  ;;  %v7670_v13 = vld [vmem:[%s13576_s4 + $0x320] sm:$0xf] }
 0x25e   :  { %v2132_v3 = vmax.f32 %v1924_v62, %v1932_v6  ;;  %v1935_v1 = vmax.f32 %v1727_v59, 0.0 }
 0x25f   :  { %v2133_v5 = vmax.f32 %v1925_v51, %v1933_v14  ;;  %v1451_v63 = vpop.f32.mrf.mxu2  ;;  %v505_v14 = vadd.f32 %v9767_v30, %v10420_v22 }
 0x260   :  { %v1590_v56 = vpop.f32.mrf.mxu3  ;;  %v1175_v25 = vpop.f32.mrf.mxu0  ;;  %v1452_v38 = vadd.f32 %v1451_v63, %v10440_v41 }
 0x261   :  { %v2137_v36 = vpack.c.bf16 %v2133_v5, %v2132_v3  ;;  %v1314_v39 = vpop.f32.mrf.mxu1  ;;  %v1591_v53 = vadd.f32 %v1590_v56, %v10442_v43  ;;  %v1176_v0 = vadd.f32 %v1175_v25, %v10420_v22  ;;  %v644_v56 = vadd.f32 %v9769_v31, %v10428_v44 }
 0x262   :  { %v1728_v27 = vmax.f32 %v776_v8, %v1452_v38  ;;  %v1315_v21 = vadd.f32 %v1314_v39, %v10428_v44 }
 0x263   :  { %2144 = vst.msk [vmem:[#allocation2 + $0x18] sm:$0xff] %vm10500_vm3, %v2137_v36  ;;  %v1729_v54 = vmax.f32 %v915_v18, %v1591_v53  ;;  %v1730_v62 = vmax.f32 %v500_v9, %v1176_v0 }
 0x264   :  { %v1936_v25 = vmax.f32 %v1728_v27, 0.0  ;;  %v1731_v49 = vmax.f32 %v639_v4, %v1315_v21  ;;  %v783_v27 = vadd.f32 %v9771_v32, %v10440_v41 }
 0x265   :  { %v1937_v30 = vmax.f32 %v1729_v54, 0.0  ;;  %v1938_v57 = vmax.f32 %v1730_v62, 0.0 }
 0x266   :  { %v1939_v0 = vmax.f32 %v1731_v49, 0.0 }
 0x267   :  { %v1453_v55 = vpop.f32.mrf.mxu2 }
 0x268   :  { %v1592_v23 = vpop.f32.mrf.mxu3  ;;  %v1178_v24 = vpop.f32.mrf.mxu0  ;;  %v1454_v31 = vadd.f32 %v1453_v55, %v10440_v41  ;;  %v9073_v55 = vld [vmem:[%s13576_s4 + $0x324] sm:$0xf0] }
 0x269   :  { %v1179_v42 = vadd.f32 %v1178_v24, %v10420_v22  ;;  %v1317_v52 = vpop.f32.mrf.mxu1  ;;  %v1593_v59 = vadd.f32 %v1592_v23, %v10442_v43  ;;  %v7671_v18 = vor.u32 %v9073_v55, %v7670_v13  ;;  %v652_v13 = vadd.f32 %v9815_v20, %v10428_v44 }
 0x26a   :  { %v1318_v7 = vadd.f32 %v1317_v52, %v10428_v44  ;;  %v7630_v52 = vld [vmem:[%s13576_s4 + $0x2d0] sm:$0xf] }
 0x26b   :  { %v1734_v17 = vmax.f32 %v503_v15, %v1179_v42  ;;  %7155 = vmatmul.msk.bf16.gmra.mxu0 %vm399_vm0, %v9264_v50  ;;  %3192 = vmatpush.bf16.msra.mxu3 %v7671_v18 }
 0x26c   :  { %v1735_v61 = vmax.f32 %v642_v60, %v1318_v7  ;;  %7181 = vmatmul.msk.bf16.gmra.mxu1 %vm399_vm0, %v9264_v50  ;;  %7207 = vmatmul.msk.bf16.gmra.mxu2 %vm399_vm0, %v9264_v50  ;;  %v9063_v60 = vld [vmem:[%s13576_s4 + $0x2d4] sm:$0xf0] }
 0x26d   :  { %v1942_v33 = vmax.f32 %v1734_v17, 0.0  ;;  %7233 = vmatmul.msk.bf16.gmra.mxu3 %vm399_vm0, %v9264_v50  ;;  %v7631_v53 = vor.u32 %v9063_v60, %v7630_v52 }
 0x26e   :  { %v1943_v10 = vmax.f32 %v1735_v61, 0.0  ;;  %v917_v61 = vadd.f32 %v9741_v16, %v10442_v43 }
 0x26f   :  { %v2145_v6 = vmax.f32 %v1934_v29, %v1942_v33  ;;  %v1456_v51 = vpop.f32.mrf.mxu2  ;;  %3125 = vmatpush.bf16.msra.mxu2 %v7631_v53  ;;  %v1732_v33 = vmax.f32 %v778_v58, %v1454_v31  ;;  %v508_v31 = vadd.f32 %v9778_v35, %v10420_v22 }
 0x270   :  { %v2146_v3 = vmax.f32 %v1935_v1, %v1943_v10  ;;  %v1457_v12 = vadd.f32 %v1456_v51, %v10440_v41  ;;  %v1595_v5 = vpop.f32.mrf.mxu3  ;;  %v1180_v63 = vpop.f32.mrf.mxu0  ;;  %v1733_v54 = vmax.f32 %v917_v61, %v1593_v59  ;;  %v513_v59 = vadd.f32 %v9813_v19, %v10420_v22  ;;  %v9266_v19 = vld [vmem:[%s13575_s0 + $0x68] sm:$0xff] }
 0x271   :  { %v1596_v26 = vadd.f32 %v1595_v5, %v10442_v43  ;;  %v1181_v36 = vadd.f32 %v1180_v63, %v10420_v22  ;;  %v1319_v39 = vpop.f32.mrf.mxu1 }
 0x272   :  { %v2153_v45 = vpack.c.bf16 %v2146_v3, %v2145_v6  ;;  %v1736_v28 = vmax.f32 %v781_v2, %v1457_v12  ;;  %v1320_v37 = vadd.f32 %v1319_v39, %v10428_v44  ;;  %v922_v2 = vadd.f32 %v9776_v34, %v10442_v43 }
 0x273   :  { %v1737_v24 = vmax.f32 %v920_v11, %v1596_v26  ;;  %v1738_v15 = vmax.f32 %v505_v14, %v1181_v36  ;;  %v9265_v14 = vld [vmem:[%s13575_s0 + $0x60] sm:$0xff]  ;;  %v1940_v3 = vmax.f32 %v1732_v33, 0.0  ;;  %v1941_v12 = vmax.f32 %v1733_v54, 0.0 }
 0x274   :  { %2157 = vst [vmem:[#allocation2 + $0x20] sm:$0xff] %v2153_v45  ;;  %v1944_v38 = vmax.f32 %v1736_v28, 0.0  ;;  %v1739_v42 = vmax.f32 %v644_v56, %v1320_v37  ;;  %v7502_v45 = vld [vmem:[%s13576_s4 + $0x1d0] sm:$0xf]  ;;  %v9031_v28 = vld [vmem:[%s13576_s4 + $0x1d4] sm:$0xf0] }
 0x275   :  { %v1945_v7 = vmax.f32 %v1737_v24, 0.0  ;;  %v1946_v8 = vmax.f32 %v1738_v15, 0.0  ;;  %v7503_v37 = vor.u32 %v9031_v28, %v7502_v45 }
 0x276   :  { %v2147_v17 = vmax.f32 %v1936_v25, %v1944_v38  ;;  %v1947_v50 = vmax.f32 %v1739_v42, 0.0  ;;  %v647_v42 = vadd.f32 %v9780_v40, %v10428_v44 }
 0x277   :  { %v2148_v9 = vmax.f32 %v1937_v30, %v1945_v7  ;;  %v2149_v23 = vmax.f32 %v1938_v57, %v1946_v8  ;;  %v1458_v29 = vpop.f32.mrf.mxu2  ;;  %v7566_v30 = vld [vmem:[%s13576_s4 + $0x250] sm:$0xf]  ;;  %v9047_v57 = vld [vmem:[%s13576_s4 + $0x254] sm:$0xf0]  ;;  %2997 = vmatpush.bf16.msra.mxu0 %v7503_v37 }
 0x278   :  { %v2150_v4 = vmax.f32 %v1939_v0, %v1947_v50  ;;  %v1459_v1 = vadd.f32 %v1458_v29, %v10440_v41  ;;  %v1597_v21 = vpop.f32.mrf.mxu3  ;;  %v1183_v10 = vpop.f32.mrf.mxu0  ;;  %v7567_v15 = vor.u32 %v9047_v57, %v7566_v30  ;;  %v786_v0 = vadd.f32 %v9798_v47, %v10440_v41  ;;  %v13792_v47 = vld [vmem:[#allocation3_spill] sm:$0xff] }
 0x279   :  { %v2154_v62 = vpack.c.bf16 %v2148_v9, %v2147_v17  ;;  %v1598_v16 = vadd.f32 %v1597_v21, %v10442_v43  ;;  %v1322_v6 = vpop.f32.mrf.mxu1  ;;  %v1184_v24 = vadd.f32 %v1183_v10, %v10420_v22  ;;  %v925_v50 = vadd.f32 %v9800_v48, %v10442_v43  ;;  %v13794_v21 = vld [vmem:[#allocation7_spill] sm:$0xff] }
 0x27a   :  { %v2155_v51 = vpack.c.bf16 %v2150_v4, %v2149_v23  ;;  %v1740_v11 = vmax.f32 %v783_v27, %v1459_v1  ;;  %v1323_v58 = vadd.f32 %v1322_v6, %v10428_v44  ;;  %3061 = vmatpush.bf16.msra.mxu1 %v7567_v15  ;;  %v510_v61 = vadd.f32 %v13792_v47, %v10420_v22  ;;  %v13793_v27 = vld [vmem:[#allocation4_spill] sm:$0xff] }
 0x27b   :  { %2158 = vst.msk [vmem:[#allocation2 + $0x28] sm:$0xff] %vm10500_vm3, %v2154_v62  ;;  %v1741_v32 = vmax.f32 %v922_v2, %v1598_v16  ;;  %7156 = vmatmul.msk.bf16.gmra.mxu0 %vm399_vm0, %v9265_v14  ;;  %v1742_v7 = vmax.f32 %v508_v31, %v1184_v24  ;;  %v649_v33 = vadd.f32 %v13793_v27, %v10428_v44  ;;  %v13795_v2 = vld [vmem:[#allocation8_spill] sm:$0xff] }
 0x27c   :  { %2159 = vst [vmem:[#allocation2 + $0x30] sm:$0xff] %v2155_v51  ;;  %v1948_v34 = vmax.f32 %v1740_v11, 0.0  ;;  %7182 = vmatmul.msk.bf16.gmra.mxu1 %vm399_vm0, %v9265_v14  ;;  %7208 = vmatmul.msk.bf16.gmra.mxu2 %vm399_vm0, %v9265_v14  ;;  %v1743_v55 = vmax.f32 %v647_v42, %v1323_v58  ;;  %v791_v10 = vadd.f32 %v13794_v21, %v10440_v41  ;;  %v13796_v51 = vld [vmem:[#allocation9_spill] sm:$0xff] }
 0x27d   :  { %v1949_v5 = vmax.f32 %v1741_v32, 0.0  ;;  %7234 = vmatmul.msk.bf16.gmra.mxu3 %vm399_vm0, %v9265_v14  ;;  %v1950_v9 = vmax.f32 %v1742_v7, 0.0  ;;  %v930_v54 = vadd.f32 %v13795_v2, %v10442_v43  ;;  %v515_v11 = vadd.f32 %v13796_v51, %v10420_v22  ;;  %v9267_v2 = vld [vmem:[%s13575_s0 + $0x70] sm:$0xff] }
 0x27e   :  { %v2151_v63 = vmax.f32 %v1940_v3, %v1948_v34  ;;  %v1951_v48 = vmax.f32 %v1743_v55, 0.0 }
 0x27f   :  { %v2152_v56 = vmax.f32 %v1941_v12, %v1949_v5  ;;  %v1461_v25 = vpop.f32.mrf.mxu2  ;;  %v13797_v5 = vld [vmem:[#allocation10_spill] sm:$0xff] }
 0x280   :  { %v1600_v26 = vpop.f32.mrf.mxu3  ;;  %v1185_v36 = vpop.f32.mrf.mxu0  ;;  %v1462_v40 = vadd.f32 %v1461_v25, %v10440_v41 }
 0x281   :  { %v2156_v39 = vpack.c.bf16 %v2152_v56, %v2151_v63  ;;  %v1324_v49 = vpop.f32.mrf.mxu1  ;;  %v1601_v20 = vadd.f32 %v1600_v26, %v10442_v43  ;;  %v1186_v23 = vadd.f32 %v1185_v36, %v10420_v22  ;;  %v654_v63 = vadd.f32 %v13797_v5, %v10428_v44 }
 0x282   :  { %v1325_v4 = vadd.f32 %v1324_v49, %v10428_v44  ;;  %v1744_v62 = vmax.f32 %v786_v0, %v1462_v40  ;;  %v13799_v0 = vld [vmem:[#allocation6_spill] sm:$0xff] }
 0x283   :  { %2160 = vst.msk [vmem:[#allocation2 + $0x38] sm:$0xff] %vm10500_vm3, %v2156_v39  ;;  %v1745_v32 = vmax.f32 %v925_v50, %v1601_v20  ;;  %v1746_v56 = vmax.f32 %v510_v61, %v1186_v23  ;;  %v927_v40 = vadd.f32 %v13799_v0, %v10442_v43  ;;  %v13800_v50 = vld [vmem:[#allocation11_spill] sm:$0xff]  ;;  %v13801_v23 = vld [vmem:[#allocation12_spill] sm:$0xff] }
 0x284   :  { %v1747_v39 = vmax.f32 %v649_v33, %v1325_v4  ;;  %v1952_v37 = vmax.f32 %v1744_v62, 0.0  ;;  %v793_v20 = vadd.f32 %v13800_v50, %v10440_v41  ;;  %v13808_v50 = vld [vmem:[#allocation17_spill] sm:$0xff] }
 0x285   :  { %v1953_v24 = vmax.f32 %v1745_v32, 0.0  ;;  %v1954_v42 = vmax.f32 %v1746_v56, 0.0  ;;  %v9061_v56 = vld [vmem:[%s13576_s4 + $0x2c4] sm:$0xf0] }
 0x287   :  { %v1463_v38 = vpop.f32.mrf.mxu2 }
 0x288   :  { %v1602_v52 = vpop.f32.mrf.mxu3  ;;  %v1188_v60 = vpop.f32.mrf.mxu0  ;;  %v1464_v15 = vadd.f32 %v1463_v38, %v10440_v41 }
 0x289   :  { %v1189_v8 = vadd.f32 %v1188_v60, %v10420_v22  ;;  %v1327_v53 = vpop.f32.mrf.mxu1  ;;  %v1603_v60 = vadd.f32 %v1602_v52, %v10442_v43 }
 0x28a   :  { %v1328_v35 = vadd.f32 %v1327_v53, %v10428_v44 }
 0x28b   :  { %v1750_v17 = vmax.f32 %v513_v59, %v1189_v8  ;;  %7157 = vmatmul.msk.bf16.gmra.mxu0 %vm399_vm0, %v9266_v19  ;;  %v13798_v8 = vld [vmem:[#allocation5_spill] sm:$0xff]  ;;  %v1749_v27 = vmax.f32 %v927_v40, %v1603_v60  ;;  %v13805_v60 = vld [vmem:[#allocation22_spill] sm:$0xff] }
 0x28c   :  { %v1751_v18 = vmax.f32 %v652_v13, %v1328_v35  ;;  %7183 = vmatmul.msk.bf16.gmra.mxu1 %vm399_vm0, %v9266_v19  ;;  %7209 = vmatmul.msk.bf16.gmra.mxu2 %vm399_vm0, %v9266_v19  ;;  %v788_v53 = vadd.f32 %v13798_v8, %v10440_v41  ;;  %v1955_v13 = vmax.f32 %v1747_v39, 0.0  ;;  %v9268_v40 = vld [vmem:[%s13575_s0 + $0x78] sm:$0xff] }
 0x28d   :  { %v1958_v29 = vmax.f32 %v1750_v17, 0.0  ;;  %7235 = vmatmul.msk.bf16.gmra.mxu3 %vm399_vm0, %v9266_v19 }
 0x28e   :  { %v1959_v1 = vmax.f32 %v1751_v18, 0.0  ;;  %v1748_v18 = vmax.f32 %v788_v53, %v1464_v15  ;;  %v13806_v53 = vld [vmem:[#allocation15_spill] sm:$0xff] }
 0x28f   :  { %v2161_v16 = vmax.f32 %v1950_v9, %v1958_v29  ;;  %v1466_v6 = vpop.f32.mrf.mxu2  ;;  %v932_v29 = vadd.f32 %v13801_v23, %v10442_v43 }
 0x290   :  { %v2162_v14 = vmax.f32 %v1951_v48, %v1959_v1  ;;  %v1467_v3 = vadd.f32 %v1466_v6, %v10440_v41  ;;  %v1605_v34 = vpop.f32.mrf.mxu3  ;;  %v1190_v12 = vpop.f32.mrf.mxu0 }
 0x291   :  { %v1606_v25 = vadd.f32 %v1605_v34, %v10442_v43  ;;  %v1191_v26 = vadd.f32 %v1190_v12, %v10420_v22  ;;  %v1329_v36 = vpop.f32.mrf.mxu1 }
 0x292   :  { %v2169_v49 = vpack.c.bf16 %v2162_v14, %v2161_v16  ;;  %v1752_v45 = vmax.f32 %v791_v10, %v1467_v3  ;;  %v1330_v28 = vadd.f32 %v1329_v36, %v10428_v44  ;;  %v1957_v16 = vmax.f32 %v1749_v27, 0.0  ;;  %v13802_v36 = vld [vmem:[#allocation13_spill] sm:$0xff] }
 0x293   :  { %v1753_v30 = vmax.f32 %v930_v54, %v1606_v25  ;;  %v1754_v57 = vmax.f32 %v515_v11, %v1191_v26  ;;  %v1956_v54 = vmax.f32 %v1748_v18, 0.0  ;;  %v518_v39 = vadd.f32 %v13802_v36, %v10420_v22 }
 0x294   :  { %2173 = vst [vmem:[#allocation2 + $0x40] sm:$0xff] %v2169_v49  ;;  %v1960_v58 = vmax.f32 %v1752_v45, 0.0  ;;  %v1755_v31 = vmax.f32 %v654_v63, %v1330_v28  ;;  %v7622_v63 = vld [vmem:[%s13576_s4 + $0x2c0] sm:$0xf]  ;;  %v13803_v45 = vld [vmem:[#allocation14_spill] sm:$0xff] }
 0x295   :  { %v1961_v59 = vmax.f32 %v1753_v30, 0.0  ;;  %v1962_v7 = vmax.f32 %v1754_v57, 0.0  ;;  %v7623_v26 = vor.u32 %v9061_v56, %v7622_v63  ;;  %v657_v28 = vadd.f32 %v13803_v45, %v10428_v44  ;;  %v13804_v57 = vld [vmem:[#allocation21_spill] sm:$0xff] }
 0x296   :  { %v2163_v55 = vmax.f32 %v1952_v37, %v1960_v58  ;;  %v1963_v35 = vmax.f32 %v1755_v31, 0.0 }
 0x297   :  { %v2164_v17 = vmax.f32 %v1953_v24, %v1961_v59  ;;  %v2165_v19 = vmax.f32 %v1954_v42, %v1962_v7  ;;  %v1468_v38 = vpop.f32.mrf.mxu2  ;;  %3126 = vmatpush.bf16.msra.mxu2 %v7623_v26  ;;  %v523_v24 = vadd.f32 %v13804_v57, %v10420_v22  ;;  %v662_v59 = vadd.f32 %v13805_v60, %v10428_v44  ;;  %v13814_v57 = vld [vmem:[#allocation19_spill] sm:$0xff]  ;;  %v9029_v60 = vld [vmem:[%s13576_s4 + $0x1c4] sm:$0xf0] }
 0x298   :  { %v2166_v47 = vmax.f32 %v1955_v13, %v1963_v35  ;;  %v1469_v52 = vadd.f32 %v1468_v38, %v10440_v41  ;;  %v1607_v61 = vpop.f32.mrf.mxu3  ;;  %v1193_v9 = vpop.f32.mrf.mxu0  ;;  %v796_v13 = vadd.f32 %v13806_v53, %v10440_v41 }
 0x299   :  { %v2170_v33 = vpack.c.bf16 %v2164_v17, %v2163_v55  ;;  %v1608_v48 = vadd.f32 %v1607_v61, %v10442_v43  ;;  %v1332_v4 = vpop.f32.mrf.mxu1  ;;  %v1194_v5 = vadd.f32 %v1193_v9, %v10420_v22  ;;  %v13807_v17 = vld [vmem:[#allocation16_spill] sm:$0xff]  ;;  %v13809_v61 = vld [vmem:[#allocation18_spill] sm:$0xff] }
 0x29a   :  { %v2171_v1 = vpack.c.bf16 %v2166_v47, %v2165_v19  ;;  %v1756_v21 = vmax.f32 %v793_v20, %v1469_v52  ;;  %v1333_v25 = vadd.f32 %v1332_v4, %v10428_v44  ;;  %v935_v19 = vadd.f32 %v13807_v17, %v10442_v43  ;;  %v13815_v17 = vld [vmem:[#allocation20_spill] sm:$0xff] }
 0x29b   :  { %2174 = vst.msk [vmem:[#allocation2 + $0x48] sm:$0xff] %vm10500_vm3, %v2170_v33  ;;  %v1757_v10 = vmax.f32 %v932_v29, %v1608_v48  ;;  %7158 = vmatmul.msk.bf16.gmra.mxu0 %vm399_vm0, %v9267_v2  ;;  %v1758_v15 = vmax.f32 %v518_v39, %v1194_v5  ;;  %v520_v20 = vadd.f32 %v13808_v50, %v10420_v22  ;;  %v13810_v33 = vld [vmem:[#allocation23_spill] sm:$0xff] }
 0x29c   :  { %2175 = vst [vmem:[#allocation2 + $0x50] sm:$0xff] %v2171_v1  ;;  %v1964_v62 = vmax.f32 %v1756_v21, 0.0  ;;  %7184 = vmatmul.msk.bf16.gmra.mxu1 %vm399_vm0, %v9267_v2  ;;  %7210 = vmatmul.msk.bf16.gmra.mxu2 %vm399_vm0, %v9267_v2  ;;  %v1759_v7 = vmax.f32 %v657_v28, %v1333_v25  ;;  %v659_v9 = vadd.f32 %v13809_v61, %v10428_v44 }
 0x29d   :  { %v1965_v6 = vmax.f32 %v1757_v10, 0.0  ;;  %7236 = vmatmul.msk.bf16.gmra.mxu3 %vm399_vm0, %v9267_v2  ;;  %v1966_v18 = vmax.f32 %v1758_v15, 0.0  ;;  %v801_v48 = vadd.f32 %v13810_v33, %v10440_v41  ;;  %v13811_v2 = vld [vmem:[#allocation24_spill] sm:$0xff] }
 0x29e   :  { %v2167_v51 = vmax.f32 %v1956_v54, %v1964_v62  ;;  %v1967_v23 = vmax.f32 %v1759_v7, 0.0  ;;  %v940_v54 = vadd.f32 %v13811_v2, %v10442_v43  ;;  %v13812_v62 = vld [vmem:[#allocation25_spill] sm:$0xff] }
 0x29f   :  { %v2168_v11 = vmax.f32 %v1957_v16, %v1965_v6  ;;  %v1471_v32 = vpop.f32.mrf.mxu2  ;;  %v525_v16 = vadd.f32 %v13812_v62, %v10420_v22 }
 0x2a0   :  { %v1610_v14 = vpop.f32.mrf.mxu3  ;;  %v1195_v3 = vpop.f32.mrf.mxu0  ;;  %v1472_v58 = vadd.f32 %v1471_v32, %v10440_v41 }
 0x2a1   :  { %v2172_v34 = vpack.c.bf16 %v2168_v11, %v2167_v51  ;;  %v1334_v12 = vpop.f32.mrf.mxu1  ;;  %v1611_v55 = vadd.f32 %v1610_v14, %v10442_v43  ;;  %v1196_v35 = vadd.f32 %v1195_v3, %v10420_v22  ;;  %v13813_v14 = vld [vmem:[#allocation26_spill] sm:$0xff] }
 0x2a2   :  { %v1760_v47 = vmax.f32 %v796_v13, %v1472_v58  ;;  %v1335_v29 = vadd.f32 %v1334_v12, %v10428_v44  ;;  %v664_v3 = vadd.f32 %v13813_v14, %v10428_v44  ;;  %v9045_v13 = vld [vmem:[%s13576_s4 + $0x244] sm:$0xf0] }
 0x2a3   :  { %2176 = vst.msk [vmem:[#allocation2 + $0x58] sm:$0xff] %vm10500_vm3, %v2172_v34  ;;  %v1761_v4 = vmax.f32 %v935_v19, %v1611_v55  ;;  %v1762_v1 = vmax.f32 %v520_v20, %v1196_v35  ;;  %v937_v19 = vadd.f32 %v13815_v17, %v10442_v43  ;;  %v13816_v20 = vld [vmem:[#allocation27_spill] sm:$0xff] }
 0x2a4   :  { %v1968_v34 = vmax.f32 %v1760_v47, 0.0  ;;  %v1763_v56 = vmax.f32 %v659_v9, %v1335_v29  ;;  %v13817_v29 = vld [vmem:[#allocation28_spill] sm:$0xff] }
 0x2a5   :  { %v1969_v39 = vmax.f32 %v1761_v4, 0.0  ;;  %v1970_v45 = vmax.f32 %v1762_v1, 0.0 }
 0x2a6   :  { %v1971_v55 = vmax.f32 %v1763_v56, 0.0 }
 0x2a7   :  { %v1473_v49 = vpop.f32.mrf.mxu2 }
 0x2a8   :  { %v1612_v37 = vpop.f32.mrf.mxu3  ;;  %v1198_v30 = vpop.f32.mrf.mxu0  ;;  %v1474_v15 = vadd.f32 %v1473_v49, %v10440_v41  ;;  %v7558_v49 = vld [vmem:[%s13576_s4 + $0x240] sm:$0xf] }
 0x2a9   :  { %v1199_v31 = vadd.f32 %v1198_v30, %v10420_v22  ;;  %v1337_v42 = vpop.f32.mrf.mxu1 }
 0x2aa   :  { %v1338_v8 = vadd.f32 %v1337_v42, %v10428_v44  ;;  %v7494_v42 = vld [vmem:[%s13576_s4 + $0x1c0] sm:$0xf] }
 0x2ab   :  { %v1766_v0 = vmax.f32 %v523_v24, %v1199_v31  ;;  %7159 = vmatmul.msk.bf16.gmra.mxu0 %vm399_vm0, %v9268_v40  ;;  %v798_v24 = vadd.f32 %v13814_v57, %v10440_v41  ;;  %v7495_v53 = vor.u32 %v9029_v60, %v7494_v42  ;;  %v13820_v57 = vld [vmem:[#allocation37_spill] sm:$0xff]  ;;  %v13821_v42 = vld [vmem:[#allocation38_spill] sm:$0xff] }
 0x2ac   :  { %v1767_v38 = vmax.f32 %v662_v59, %v1338_v8  ;;  %7185 = vmatmul.msk.bf16.gmra.mxu1 %vm399_vm0, %v9268_v40  ;;  %7211 = vmatmul.msk.bf16.gmra.mxu2 %vm399_vm0, %v9268_v40  ;;  %v1613_v59 = vadd.f32 %v1612_v37, %v10442_v43  ;;  %v672_v60 = vadd.f32 %v13821_v42, %v10428_v44 }
 0x2ad   :  { %v1974_v52 = vmax.f32 %v1766_v0, 0.0  ;;  %7237 = vmatmul.msk.bf16.gmra.mxu3 %vm399_vm0, %v9268_v40  ;;  %v7559_v40 = vor.u32 %v9045_v13, %v7558_v49  ;;  %2998 = vmatpush.bf16.msra.mxu0 %v7495_v53  ;;  %v1764_v47 = vmax.f32 %v798_v24, %v1474_v15  ;;  %v533_v24 = vadd.f32 %v13820_v57, %v10420_v22  ;;  %v13823_v49 = vld [vmem:[#allocation32_spill] sm:$0xff] }
 0x2ae   :  { %v1975_v27 = vmax.f32 %v1767_v38, 0.0  ;;  %v1765_v33 = vmax.f32 %v937_v19, %v1613_v59  ;;  %v945_v13 = vadd.f32 %v13823_v49, %v10442_v43  ;;  %v13824_v19 = vld [vmem:[#allocation33_spill] sm:$0xff]  ;;  %v13831_v49 = vld [vmem:[#allocation36_spill] sm:$0xff] }
 0x2af   :  { %v2177_v21 = vmax.f32 %v1966_v18, %v1974_v52  ;;  %v1476_v10 = vpop.f32.mrf.mxu2  ;;  %v803_v18 = vadd.f32 %v13816_v20, %v10440_v41  ;;  %3062 = vmatpush.bf16.msra.mxu1 %v7559_v40  ;;  %v1972_v62 = vmax.f32 %v1764_v47, 0.0 }
 0x2b0   :  { %v2178_v6 = vmax.f32 %v1967_v23, %v1975_v27  ;;  %v1477_v51 = vadd.f32 %v1476_v10, %v10440_v41  ;;  %v1615_v11 = vpop.f32.mrf.mxu3  ;;  %v1200_v32 = vpop.f32.mrf.mxu0  ;;  %v942_v27 = vadd.f32 %v13817_v29, %v10442_v43 }
 0x2b1   :  { %v1616_v12 = vadd.f32 %v1615_v11, %v10442_v43  ;;  %v1201_v5 = vadd.f32 %v1200_v32, %v10420_v22  ;;  %v1339_v63 = vpop.f32.mrf.mxu1 }
 0x2b2   :  { %v2185_v25 = vpack.c.bf16 %v2178_v6, %v2177_v21  ;;  %v1768_v26 = vmax.f32 %v801_v48, %v1477_v51  ;;  %v1340_v36 = vadd.f32 %v1339_v63, %v10428_v44  ;;  %v1973_v6 = vmax.f32 %v1765_v33, 0.0 }
 0x2b3   :  { %v1769_v28 = vmax.f32 %v940_v54, %v1616_v12  ;;  %v1770_v30 = vmax.f32 %v525_v16, %v1201_v5  ;;  %v9269_v54 = vld [vmem:[%s13575_s0 + $0x80] sm:$0xff] }
 0x2b4   :  { %2189 = vst [vmem:[#allocation2 + $0x60] sm:$0xff] %v2185_v25  ;;  %v1976_v58 = vmax.f32 %v1768_v26, 0.0  ;;  %v1771_v31 = vmax.f32 %v664_v3, %v1340_v36  ;;  %v13818_v25 = vld [vmem:[#allocation29_spill] sm:$0xff] }
 0x2b5   :  { %v1977_v7 = vmax.f32 %v1769_v28, 0.0  ;;  %v1978_v8 = vmax.f32 %v1770_v30, 0.0  ;;  %v528_v26 = vadd.f32 %v13818_v25, %v10420_v22  ;;  %v13830_v25 = vld [vmem:[#allocation35_spill] sm:$0xff] }
 0x2b6   :  { %v2179_v35 = vmax.f32 %v1968_v34, %v1976_v58  ;;  %v1979_v0 = vmax.f32 %v1771_v31, 0.0 }
 0x2b7   :  { %v2180_v38 = vmax.f32 %v1969_v39, %v1977_v7  ;;  %v2181_v37 = vmax.f32 %v1970_v45, %v1978_v8  ;;  %v1478_v50 = vpop.f32.mrf.mxu2  ;;  %v13819_v39 = vld [vmem:[#allocation30_spill] sm:$0xff]  ;;  %v13822_v8 = vld [vmem:[#allocation31_spill] sm:$0xff] }
 0x2b8   :  { %v2182_v52 = vmax.f32 %v1971_v55, %v1979_v0  ;;  %v1479_v61 = vadd.f32 %v1478_v50, %v10440_v41  ;;  %v1617_v9 = vpop.f32.mrf.mxu3  ;;  %v1203_v23 = vpop.f32.mrf.mxu0  ;;  %v667_v45 = vadd.f32 %v13819_v39, %v10428_v44  ;;  %v806_v53 = vadd.f32 %v13822_v8, %v10440_v41 }
 0x2b9   :  { %v2186_v48 = vpack.c.bf16 %v2180_v38, %v2179_v35  ;;  %v1618_v4 = vadd.f32 %v1617_v9, %v10442_v43  ;;  %v1342_v1 = vpop.f32.mrf.mxu1  ;;  %v1204_v63 = vadd.f32 %v1203_v23, %v10420_v22  ;;  %v9270_v35 = vld [vmem:[%s13575_s0 + $0x88] sm:$0xff]  ;;  %v530_v38 = vadd.f32 %v13824_v19, %v10420_v22  ;;  %v13826_v23 = vld [vmem:[#allocation39_spill] sm:$0xff] }
 0x2ba   :  { %v2187_v21 = vpack.c.bf16 %v2182_v52, %v2181_v37  ;;  %v1772_v10 = vmax.f32 %v803_v18, %v1479_v61  ;;  %v1343_v56 = vadd.f32 %v1342_v1, %v10428_v44  ;;  %v13825_v18 = vld [vmem:[#allocation34_spill] sm:$0xff]  ;;  %v811_v29 = vadd.f32 %v13826_v23, %v10440_v41 }
 0x2bb   :  { %2190 = vst.msk [vmem:[#allocation2 + $0x68] sm:$0xff] %vm10500_vm3, %v2186_v48  ;;  %v1773_v2 = vmax.f32 %v942_v27, %v1618_v4  ;;  %7160 = vmatmul.msk.bf16.gmra.mxu0 %vm399_vm0, %v9269_v54  ;;  %v1774_v15 = vmax.f32 %v528_v26, %v1204_v63  ;;  %v669_v47 = vadd.f32 %v13825_v18, %v10428_v44  ;;  %v13827_v27 = vld [vmem:[#allocation40_spill] sm:$0xff]  ;;  %v13828_v48 = vld [vmem:[#allocation41_spill] sm:$0xff] }
 0x2bc   :  { %2191 = vst [vmem:[#allocation2 + $0x70] sm:$0xff] %v2187_v21  ;;  %v1980_v16 = vmax.f32 %v1772_v10, 0.0  ;;  %7186 = vmatmul.msk.bf16.gmra.mxu1 %vm399_vm0, %v9269_v54  ;;  %7212 = vmatmul.msk.bf16.gmra.mxu2 %vm399_vm0, %v9269_v54  ;;  %v1775_v59 = vmax.f32 %v667_v45, %v1343_v56  ;;  %v950_v33 = vadd.f32 %v13827_v27, %v10442_v43 }
 0x2bd   :  { %v1981_v51 = vmax.f32 %v1773_v2, 0.0  ;;  %7238 = vmatmul.msk.bf16.gmra.mxu3 %vm399_vm0, %v9269_v54  ;;  %v1982_v37 = vmax.f32 %v1774_v15, 0.0  ;;  %v535_v4 = vadd.f32 %v13828_v48, %v10420_v22  ;;  %v808_v26 = vadd.f32 %v13830_v25, %v10440_v41  ;;  %v13834_v25 = vld [vmem:[#allocation45_spill] sm:$0xff] }
 0x2be   :  { %v2183_v11 = vmax.f32 %v1972_v62, %v1980_v16  ;;  %v1983_v52 = vmax.f32 %v1775_v59, 0.0 }
 0x2bf   :  { %v2184_v32 = vmax.f32 %v1973_v6, %v1981_v51  ;;  %v1481_v14 = vpop.f32.mrf.mxu2  ;;  %v13829_v51 = vld [vmem:[#allocation42_spill] sm:$0xff] }
 0x2c0   :  { %v1620_v3 = vpop.f32.mrf.mxu3  ;;  %v1205_v34 = vpop.f32.mrf.mxu0  ;;  %v1482_v0 = vadd.f32 %v1481_v14, %v10440_v41 }
 0x2c1   :  { %v2188_v12 = vpack.c.bf16 %v2184_v32, %v2183_v11  ;;  %v1344_v5 = vpop.f32.mrf.mxu1  ;;  %v1621_v40 = vadd.f32 %v1620_v3, %v10442_v43  ;;  %v1206_v50 = vadd.f32 %v1205_v34, %v10420_v22  ;;  %v674_v11 = vadd.f32 %v13829_v51, %v10428_v44 }
 0x2c2   :  { %v1345_v61 = vadd.f32 %v1344_v5, %v10428_v44  ;;  %v1776_v10 = vmax.f32 %v806_v53, %v1482_v0 }
 0x2c3   :  { %2192 = vst.msk [vmem:[#allocation2 + $0x78] sm:$0xff] %vm10500_vm3, %v2188_v12  ;;  %v1777_v2 = vmax.f32 %v945_v13, %v1621_v40  ;;  %v1778_v32 = vmax.f32 %v530_v38, %v1206_v50  ;;  %v947_v13 = vadd.f32 %v13831_v49, %v10442_v43  ;;  %v13832_v40 = vld [vmem:[#allocation43_spill] sm:$0xff]  ;;  %v13833_v50 = vld [vmem:[#allocation44_spill] sm:$0xff] }
 0x2c4   :  { %v1779_v12 = vmax.f32 %v669_v47, %v1345_v61  ;;  %v1984_v57 = vmax.f32 %v1776_v10, 0.0 }
 0x2c7   :  { %v1483_v36 = vpop.f32.mrf.mxu2 }
 0x2c8   :  { %v1622_v28 = vpop.f32.mrf.mxu3  ;;  %v1208_v30 = vpop.f32.mrf.mxu0  ;;  %v1484_v39 = vadd.f32 %v1483_v36, %v10440_v41 }
 0x2c9   :  { %v1209_v58 = vadd.f32 %v1208_v30, %v10420_v22  ;;  %v1347_v31 = vpop.f32.mrf.mxu1  ;;  %v1623_v42 = vadd.f32 %v1622_v28, %v10442_v43 }
 0x2ca   :  { %v1348_v7 = vadd.f32 %v1347_v31, %v10428_v44  ;;  %v1986_v31 = vmax.f32 %v1778_v32, 0.0 }
 0x2cb   :  { %v1782_v55 = vmax.f32 %v533_v24, %v1209_v58  ;;  %7161 = vmatmul.msk.bf16.gmra.mxu0 %vm399_vm0, %v9270_v35  ;;  %v1985_v24 = vmax.f32 %v1777_v2, 0.0  ;;  %v1781_v18 = vmax.f32 %v947_v13, %v1623_v42  ;;  %v13838_v13 = vld [vmem:[#allocation47_spill] sm:$0xff] }
 0x2cc   :  { %v1783_v17 = vmax.f32 %v672_v60, %v1348_v7  ;;  %7187 = vmatmul.msk.bf16.gmra.mxu1 %vm399_vm0, %v9270_v35  ;;  %7213 = vmatmul.msk.bf16.gmra.mxu2 %vm399_vm0, %v9270_v35  ;;  %v1987_v7 = vmax.f32 %v1779_v12, 0.0 }
 0x2cd   :  { %v1990_v20 = vmax.f32 %v1782_v55, 0.0  ;;  %7239 = vmatmul.msk.bf16.gmra.mxu3 %vm399_vm0, %v9270_v35  ;;  %v1780_v55 = vmax.f32 %v808_v26, %v1484_v39  ;;  %v538_v26 = vadd.f32 %v13834_v25, %v10420_v22 }
 0x2ce   :  { %v1991_v9 = vmax.f32 %v1783_v17, 0.0  ;;  %v813_v17 = vadd.f32 %v13832_v40, %v10440_v41  ;;  %v13839_v40 = vld [vmem:[#allocation48_spill] sm:$0xff] }
 0x2cf   :  { %v2193_v1 = vmax.f32 %v1982_v37, %v1990_v20  ;;  %v1486_v21 = vpop.f32.mrf.mxu2  ;;  %v952_v20 = vadd.f32 %v13833_v50, %v10442_v43 }
 0x2d0   :  { %v2194_v54 = vmax.f32 %v1983_v52, %v1991_v9  ;;  %v1487_v62 = vadd.f32 %v1486_v21, %v10440_v41  ;;  %v1625_v16 = vpop.f32.mrf.mxu3  ;;  %v1210_v6 = vpop.f32.mrf.mxu0  ;;  %v1989_v21 = vmax.f32 %v1781_v18, 0.0 }
 0x2d1   :  { %v1626_v14 = vadd.f32 %v1625_v16, %v10442_v43  ;;  %v1211_v3 = vadd.f32 %v1210_v6, %v10420_v22  ;;  %v1349_v34 = vpop.f32.mrf.mxu1 }
 0x2d2   :  { %v2201_v5 = vpack.c.bf16 %v2194_v54, %v2193_v1  ;;  %v1784_v63 = vmax.f32 %v811_v29, %v1487_v62  ;;  %v1350_v56 = vadd.f32 %v1349_v34, %v10428_v44  ;;  %v1988_v29 = vmax.f32 %v1780_v55, 0.0  ;;  %v9059_v1 = vld [vmem:[%s13576_s4 + $0x2b4] sm:$0xf0] }
 0x2d3   :  { %v1785_v45 = vmax.f32 %v950_v33, %v1626_v14  ;;  %v1786_v30 = vmax.f32 %v535_v4, %v1211_v3  ;;  %v9271_v33 = vld [vmem:[%s13575_s0 + $0x90] sm:$0xff]  ;;  %v9027_v34 = vld [vmem:[%s13576_s4 + $0x1b4] sm:$0xf0]  ;;  %v816_v55 = vadd.f32 %v13838_v13, %v10440_v41 }
 0x2d4   :  { %2205 = vst [vmem:[#allocation2 + $0x80] sm:$0xff] %v2201_v5  ;;  %v1992_v15 = vmax.f32 %v1784_v63, 0.0  ;;  %v1787_v58 = vmax.f32 %v674_v11, %v1350_v56  ;;  %v7614_v4 = vld [vmem:[%s13576_s4 + $0x2b0] sm:$0xf]  ;;  %v9043_v56 = vld [vmem:[%s13576_s4 + $0x234] sm:$0xf0] }
 0x2d5   :  { %v1993_v60 = vmax.f32 %v1785_v45, 0.0  ;;  %v1994_v59 = vmax.f32 %v1786_v30, 0.0  ;;  %v7615_v2 = vor.u32 %v9059_v1, %v7614_v4  ;;  %v7486_v3 = vld [vmem:[%s13576_s4 + $0x1b0] sm:$0xf]  ;;  %v13835_v30 = vld [vmem:[#allocation46_spill] sm:$0xff] }
 0x2d6   :  { %v2195_v8 = vmax.f32 %v1984_v57, %v1992_v15  ;;  %v1995_v53 = vmax.f32 %v1787_v58, 0.0  ;;  %v7487_v5 = vor.u32 %v9027_v34, %v7486_v3  ;;  %v7550_v63 = vld [vmem:[%s13576_s4 + $0x230] sm:$0xf]  ;;  %v677_v57 = vadd.f32 %v13835_v30, %v10428_v44 }
 0x2d7   :  { %v2196_v36 = vmax.f32 %v1985_v24, %v1993_v60  ;;  %v2197_v35 = vmax.f32 %v1986_v31, %v1994_v59  ;;  %v1488_v0 = vpop.f32.mrf.mxu2  ;;  %3127 = vmatpush.bf16.msra.mxu2 %v7615_v2  ;;  %v7551_v45 = vor.u32 %v9043_v56, %v7550_v63  ;;  %v13836_v58 = vld [vmem:[#allocation53_spill] sm:$0xff] }
 0x2d8   :  { %v2198_v19 = vmax.f32 %v1987_v7, %v1995_v53  ;;  %v1489_v38 = vadd.f32 %v1488_v0, %v10440_v41  ;;  %v1627_v37 = vpop.f32.mrf.mxu3  ;;  %v1213_v28 = vpop.f32.mrf.mxu0  ;;  %2999 = vmatpush.bf16.msra.mxu0 %v7487_v5  ;;  %v543_v31 = vadd.f32 %v13836_v58, %v10420_v22  ;;  %v13837_v7 = vld [vmem:[#allocation54_spill] sm:$0xff] }
 0x2d9   :  { %v2202_v47 = vpack.c.bf16 %v2196_v36, %v2195_v8  ;;  %v1628_v52 = vadd.f32 %v1627_v37, %v10442_v43  ;;  %v1352_v61 = vpop.f32.mrf.mxu1  ;;  %v1214_v14 = vadd.f32 %v1213_v28, %v10420_v22  ;;  %3063 = vmatpush.bf16.msra.mxu1 %v7551_v45  ;;  %v682_v8 = vadd.f32 %v13837_v7, %v10428_v44  ;;  %v9272_v0 = vld [vmem:[%s13575_s0 + $0x98] sm:$0xff]  ;;  %v13840_v37 = vld [vmem:[#allocation49_spill] sm:$0xff] }
 0x2da   :  { %v2203_v9 = vpack.c.bf16 %v2198_v19, %v2197_v35  ;;  %v1788_v23 = vmax.f32 %v813_v17, %v1489_v38  ;;  %v1353_v12 = vadd.f32 %v1352_v61, %v10428_v44  ;;  %v955_v17 = vadd.f32 %v13839_v40, %v10442_v43 }
 0x2db   :  { %2206 = vst.msk [vmem:[#allocation2 + $0x88] sm:$0xff] %vm10500_vm3, %v2202_v47  ;;  %v1789_v27 = vmax.f32 %v952_v20, %v1628_v52  ;;  %7162 = vmatmul.msk.bf16.gmra.mxu0 %vm399_vm0, %v9271_v33  ;;  %v1790_v42 = vmax.f32 %v538_v26, %v1214_v14  ;;  %v540_v28 = vadd.f32 %v13840_v37, %v10420_v22  ;;  %v13841_v47 = vld [vmem:[#allocation50_spill] sm:$0xff] }
 0x2dc   :  { %2207 = vst [vmem:[#allocation2 + $0x90] sm:$0xff] %v2203_v9  ;;  %v1996_v48 = vmax.f32 %v1788_v23, 0.0  ;;  %7188 = vmatmul.msk.bf16.gmra.mxu1 %vm399_vm0, %v9271_v33  ;;  %7214 = vmatmul.msk.bf16.gmra.mxu2 %vm399_vm0, %v9271_v33  ;;  %v1791_v53 = vmax.f32 %v677_v57, %v1353_v12  ;;  %v679_v52 = vadd.f32 %v13841_v47, %v10428_v44 }
 0x2dd   :  { %v1997_v10 = vmax.f32 %v1789_v27, 0.0  ;;  %7240 = vmatmul.msk.bf16.gmra.mxu3 %vm399_vm0, %v9271_v33  ;;  %v1998_v50 = vmax.f32 %v1790_v42, 0.0  ;;  %v13843_v33 = vld [vmem:[#allocation56_spill] sm:$0xff] }
 0x2de   :  { %v2199_v54 = vmax.f32 %v1988_v29, %v1996_v48  ;;  %v1999_v61 = vmax.f32 %v1791_v53, 0.0  ;;  %v13842_v29 = vld [vmem:[#allocation55_spill] sm:$0xff]  ;;  %v960_v48 = vadd.f32 %v13843_v33, %v10442_v43 }
 0x2df   :  { %v2200_v62 = vmax.f32 %v1989_v21, %v1997_v10  ;;  %v1491_v16 = vpop.f32.mrf.mxu2  ;;  %v821_v27 = vadd.f32 %v13842_v29, %v10440_v41  ;;  %v13844_v10 = vld [vmem:[#allocation57_spill] sm:$0xff]  ;;  %v9273_v33 = vld [vmem:[%s13575_s0 + $0xa0] sm:$0xff] }
 0x2e0   :  { %v1630_v6 = vpop.f32.mrf.mxu3  ;;  %v1215_v51 = vpop.f32.mrf.mxu0  ;;  %v1492_v36 = vadd.f32 %v1491_v16, %v10440_v41  ;;  %v545_v2 = vadd.f32 %v13844_v10, %v10420_v22 }
 0x2e1   :  { %v2204_v11 = vpack.c.bf16 %v2200_v62, %v2199_v54  ;;  %v1354_v32 = vpop.f32.mrf.mxu1  ;;  %v1631_v19 = vadd.f32 %v1630_v6, %v10442_v43  ;;  %v1216_v20 = vadd.f32 %v1215_v51, %v10420_v22 }
 0x2e2   :  { %v1355_v9 = vadd.f32 %v1354_v32, %v10428_v44  ;;  %v1792_v4 = vmax.f32 %v816_v55, %v1492_v36  ;;  %v13847_v36 = vld [vmem:[#allocation52_spill] sm:$0xff] }
 0x2e3   :  { %2208 = vst.msk [vmem:[#allocation2 + $0x98] sm:$0xff] %vm10500_vm3, %v2204_v11  ;;  %v1793_v54 = vmax.f32 %v955_v17, %v1631_v19  ;;  %v13845_v11 = vld [vmem:[#allocation58_spill] sm:$0xff]  ;;  %v1794_v14 = vmax.f32 %v540_v28, %v1216_v20  ;;  %v13848_v17 = vld [vmem:[#allocation59_spill] sm:$0xff]  ;;  %v13849_v20 = vld [vmem:[#allocation60_spill] sm:$0xff] }
 0x2e4   :  { %v684_v32 = vadd.f32 %v13845_v11, %v10428_v44  ;;  %v1795_v5 = vmax.f32 %v679_v52, %v1355_v9  ;;  %v2000_v26 = vmax.f32 %v1792_v4, 0.0  ;;  %v823_v19 = vadd.f32 %v13848_v17, %v10440_v41 }
 0x2e5   :  { %v2001_v57 = vmax.f32 %v1793_v54, 0.0  ;;  %v2002_v42 = vmax.f32 %v1794_v14, 0.0  ;;  %v13850_v14 = vld [vmem:[#allocation61_spill] sm:$0xff] }
 0x2e7   :  { %v1493_v39 = vpop.f32.mrf.mxu2 }
 0x2e8   :  { %v1632_v24 = vpop.f32.mrf.mxu3  ;;  %v1218_v15 = vpop.f32.mrf.mxu0 }
 0x2e9   :  { %v1219_v60 = vadd.f32 %v1218_v15, %v10420_v22  ;;  %v1357_v59 = vpop.f32.mrf.mxu1  ;;  %v1494_v15 = vadd.f32 %v1493_v39, %v10440_v41 }
 0x2ea   :  { %v1358_v49 = vadd.f32 %v1357_v59, %v10428_v44 }
 0x2eb   :  { %v1798_v35 = vmax.f32 %v543_v31, %v1219_v60  ;;  %7163 = vmatmul.msk.bf16.gmra.mxu0 %vm399_vm0, %v9272_v0  ;;  %v1633_v60 = vadd.f32 %v1632_v24, %v10442_v43 }
 0x2ec   :  { %v1799_v38 = vmax.f32 %v682_v8, %v1358_v49  ;;  %7189 = vmatmul.msk.bf16.gmra.mxu1 %vm399_vm0, %v9272_v0  ;;  %7215 = vmatmul.msk.bf16.gmra.mxu2 %vm399_vm0, %v9272_v0  ;;  %v13846_v8 = vld [vmem:[#allocation51_spill] sm:$0xff]  ;;  %v2003_v49 = vmax.f32 %v1795_v5, 0.0 }
 0x2ed   :  { %v2006_v18 = vmax.f32 %v1798_v35, 0.0  ;;  %7241 = vmatmul.msk.bf16.gmra.mxu3 %vm399_vm0, %v9272_v0  ;;  %v818_v53 = vadd.f32 %v13846_v8, %v10440_v41  ;;  %v957_v35 = vadd.f32 %v13847_v36, %v10442_v43 }
 0x2ee   :  { %v2007_v23 = vmax.f32 %v1799_v38, 0.0 }
 0x2ef   :  { %v2209_v1 = vmax.f32 %v1998_v50, %v2006_v18  ;;  %v1496_v21 = vpop.f32.mrf.mxu2  ;;  %v1796_v38 = vmax.f32 %v818_v53, %v1494_v15  ;;  %v962_v18 = vadd.f32 %v13849_v20, %v10442_v43  ;;  %v1797_v47 = vmax.f32 %v957_v35, %v1633_v60  ;;  %v13853_v15 = vld [vmem:[#allocation70_spill] sm:$0xff]  ;;  %v13854_v60 = vld [vmem:[#allocation63_spill] sm:$0xff]  ;;  %v13856_v53 = vld [vmem:[#allocation65_spill] sm:$0xff] }
 0x2f0   :  { %v2210_v62 = vmax.f32 %v1999_v61, %v2007_v23  ;;  %v1497_v16 = vadd.f32 %v1496_v21, %v10440_v41  ;;  %v1635_v6 = vpop.f32.mrf.mxu3  ;;  %v1220_v51 = vpop.f32.mrf.mxu0 }
 0x2f1   :  { %v1636_v3 = vadd.f32 %v1635_v6, %v10442_v43  ;;  %v1221_v34 = vadd.f32 %v1220_v51, %v10420_v22  ;;  %v1359_v12 = vpop.f32.mrf.mxu1 }
 0x2f2   :  { %v2217_v63 = vpack.c.bf16 %v2210_v62, %v2209_v1  ;;  %v1800_v56 = vmax.f32 %v821_v27, %v1497_v16  ;;  %v1360_v25 = vadd.f32 %v1359_v12, %v10428_v44  ;;  %v2005_v1 = vmax.f32 %v1797_v47, 0.0  ;;  %v13851_v12 = vld [vmem:[#allocation62_spill] sm:$0xff]  ;;  %v13858_v47 = vld [vmem:[#allocation71_spill] sm:$0xff] }
 0x2f3   :  { %v1801_v45 = vmax.f32 %v960_v48, %v1636_v3  ;;  %v1802_v30 = vmax.f32 %v545_v2, %v1221_v34  ;;  %v2004_v48 = vmax.f32 %v1796_v38, 0.0  ;;  %v548_v3 = vadd.f32 %v13850_v14, %v10420_v22 }
 0x2f4   :  { %2221 = vst [vmem:[#allocation2 + $0xa0] sm:$0xff] %v2217_v63  ;;  %v2008_v58 = vmax.f32 %v1800_v56, 0.0  ;;  %v1803_v31 = vmax.f32 %v684_v32, %v1360_v25  ;;  %v687_v5 = vadd.f32 %v13851_v12, %v10428_v44  ;;  %v13852_v25 = vld [vmem:[#allocation69_spill] sm:$0xff] }
 0x2f5   :  { %v2009_v59 = vmax.f32 %v1801_v45, 0.0  ;;  %v2010_v7 = vmax.f32 %v1802_v30, 0.0 }
 0x2f6   :  { %v2211_v13 = vmax.f32 %v2000_v26, %v2008_v58  ;;  %v2011_v55 = vmax.f32 %v1803_v31, 0.0  ;;  %v553_v26 = vadd.f32 %v13852_v25, %v10420_v22  ;;  %v692_v58 = vadd.f32 %v13853_v15, %v10428_v44 }
 0x2f7   :  { %v2212_v0 = vmax.f32 %v2001_v57, %v2009_v59  ;;  %v2213_v40 = vmax.f32 %v2002_v42, %v2010_v7  ;;  %v1498_v39 = vpop.f32.mrf.mxu2  ;;  %v826_v59 = vadd.f32 %v13854_v60, %v10440_v41  ;;  %v13855_v7 = vld [vmem:[#allocation64_spill] sm:$0xff] }
 0x2f8   :  { %v2214_v37 = vmax.f32 %v2003_v49, %v2011_v55  ;;  %v1499_v24 = vadd.f32 %v1498_v39, %v10440_v41  ;;  %v1637_v28 = vpop.f32.mrf.mxu3  ;;  %v1223_v50 = vpop.f32.mrf.mxu0  ;;  %v965_v8 = vadd.f32 %v13855_v7, %v10442_v43  ;;  %v550_v49 = vadd.f32 %v13856_v53, %v10420_v22  ;;  %v9274_v55 = vld [vmem:[%s13575_s0 + $0xa8] sm:$0xff] }
 0x2f9   :  { %v2218_v52 = vpack.c.bf16 %v2212_v0, %v2211_v13  ;;  %v1638_v61 = vadd.f32 %v1637_v28, %v10442_v43  ;;  %v1362_v9 = vpop.f32.mrf.mxu1  ;;  %v1224_v11 = vadd.f32 %v1223_v50, %v10420_v22 }
 0x2fa   :  { %v2219_v23 = vpack.c.bf16 %v2214_v37, %v2213_v40  ;;  %v1804_v29 = vmax.f32 %v823_v19, %v1499_v24  ;;  %v1363_v32 = vadd.f32 %v1362_v9, %v10428_v44  ;;  %v13857_v40 = vld [vmem:[#allocation66_spill] sm:$0xff]  ;;  %v7606_v37 = vld [vmem:[%s13576_s4 + $0x2a0] sm:$0xf]  ;;  %v9057_v24 = vld [vmem:[%s13576_s4 + $0x2a4] sm:$0xf0] }
 0x2fb   :  { %2222 = vst.msk [vmem:[#allocation2 + $0xa8] sm:$0xff] %vm10500_vm3, %v2218_v52  ;;  %v1805_v27 = vmax.f32 %v962_v18, %v1638_v61  ;;  %7164 = vmatmul.msk.bf16.gmra.mxu0 %vm399_vm0, %v9273_v33  ;;  %v1806_v45 = vmax.f32 %v548_v3, %v1224_v11  ;;  %v689_v39 = vadd.f32 %v13857_v40, %v10428_v44  ;;  %v13859_v61 = vld [vmem:[#allocation72_spill] sm:$0xff] }
 0x2fc   :  { %2223 = vst [vmem:[#allocation2 + $0xb0] sm:$0xff] %v2219_v23  ;;  %v2012_v4 = vmax.f32 %v1804_v29, 0.0  ;;  %7190 = vmatmul.msk.bf16.gmra.mxu1 %vm399_vm0, %v9273_v33  ;;  %7216 = vmatmul.msk.bf16.gmra.mxu2 %vm399_vm0, %v9273_v33  ;;  %v1807_v31 = vmax.f32 %v687_v5, %v1363_v32  ;;  %v7607_v18 = vor.u32 %v9057_v24, %v7606_v37  ;;  %v13860_v23 = vld [vmem:[#allocation73_spill] sm:$0xff]  ;;  %v13862_v5 = vld [vmem:[#allocation67_spill] sm:$0xff] }
 0x2fd   :  { %v2013_v21 = vmax.f32 %v1805_v27, 0.0  ;;  %7242 = vmatmul.msk.bf16.gmra.mxu3 %vm399_vm0, %v9273_v33  ;;  %v2014_v17 = vmax.f32 %v1806_v45, 0.0  ;;  %v831_v52 = vadd.f32 %v13858_v47, %v10440_v41  ;;  %v970_v9 = vadd.f32 %v13859_v61, %v10442_v43 }
 0x2fe   :  { %v2215_v10 = vmax.f32 %v2004_v48, %v2012_v4  ;;  %v2015_v28 = vmax.f32 %v1807_v31, 0.0  ;;  %v555_v29 = vadd.f32 %v13860_v23, %v10420_v22  ;;  %3128 = vmatpush.bf16.msra.mxu2 %v7607_v18 }
 0x2ff   :  { %v2216_v2 = vmax.f32 %v2005_v1, %v2013_v21  ;;  %v1501_v54 = vpop.f32.mrf.mxu2 }
 0x300   :  { %v1640_v62 = vpop.f32.mrf.mxu3  ;;  %v1225_v16 = vpop.f32.mrf.mxu0  ;;  %v1502_v36 = vadd.f32 %v1501_v54, %v10440_v41  ;;  %v13861_v54 = vld [vmem:[#allocation74_spill] sm:$0xff] }
 0x301   :  { %v2220_v6 = vpack.c.bf16 %v2216_v2, %v2215_v10  ;;  %v1364_v51 = vpop.f32.mrf.mxu1  ;;  %v1641_v35 = vadd.f32 %v1640_v62, %v10442_v43  ;;  %v1226_v19 = vadd.f32 %v1225_v16, %v10420_v22  ;;  %v694_v62 = vadd.f32 %v13861_v54, %v10428_v44 }
 0x302   :  { %v1365_v50 = vadd.f32 %v1364_v51, %v10428_v44  ;;  %v1808_v48 = vmax.f32 %v826_v59, %v1502_v36 }
 0x303   :  { %2224 = vst.msk [vmem:[#allocation2 + $0xb8] sm:$0xff] %vm10500_vm3, %v2220_v6  ;;  %v1809_v4 = vmax.f32 %v965_v8, %v1641_v35  ;;  %v1810_v16 = vmax.f32 %v550_v49, %v1226_v19  ;;  %v13863_v49 = vld [vmem:[#allocation68_spill] sm:$0xff] }
 0x304   :  { %v1811_v32 = vmax.f32 %v689_v39, %v1365_v50 }
 0x305   :  { %v2018_v31 = vmax.f32 %v1810_v16, 0.0 }
 0x306   :  { %v2019_v7 = vmax.f32 %v1811_v32, 0.0 }
 0x307   :  { %v1503_v34 = vpop.f32.mrf.mxu2 }
 0x308   :  { %v1642_v63 = vpop.f32.mrf.mxu3  ;;  %v1228_v56 = vpop.f32.mrf.mxu0  ;;  %v1504_v25 = vadd.f32 %v1503_v34, %v10440_v41 }
 0x309   :  { %v1229_v30 = vadd.f32 %v1228_v56, %v10420_v22  ;;  %v1367_v57 = vpop.f32.mrf.mxu1  ;;  %v828_v56 = vadd.f32 %v13862_v5, %v10440_v41 }
 0x30a   :  { %v1368_v42 = vadd.f32 %v1367_v57, %v10428_v44  ;;  %v2017_v57 = vmax.f32 %v1809_v4, 0.0 }
 0x30b   :  { %v1814_v13 = vmax.f32 %v553_v26, %v1229_v30  ;;  %7165 = vmatmul.msk.bf16.gmra.mxu0 %vm399_vm0, %v9274_v55  ;;  %v2016_v30 = vmax.f32 %v1808_v48, 0.0 }
 0x30c   :  { %v1815_v0 = vmax.f32 %v692_v58, %v1368_v42  ;;  %7191 = vmatmul.msk.bf16.gmra.mxu1 %vm399_vm0, %v9274_v55  ;;  %7217 = vmatmul.msk.bf16.gmra.mxu2 %vm399_vm0, %v9274_v55  ;;  %v1643_v42 = vadd.f32 %v1642_v63, %v10442_v43 }
 0x30d   :  { %v2022_v38 = vmax.f32 %v1814_v13, 0.0  ;;  %7243 = vmatmul.msk.bf16.gmra.mxu3 %vm399_vm0, %v9274_v55  ;;  %v967_v13 = vadd.f32 %v13863_v49, %v10442_v43  ;;  %v1812_v55 = vmax.f32 %v828_v56, %v1504_v25  ;;  %v13867_v56 = vld [vmem:[#allocation78_spill] sm:$0xff] }
 0x30e   :  { %v2023_v20 = vmax.f32 %v1815_v0, 0.0  ;;  %v13864_v0 = vld [vmem:[#allocation75_spill] sm:$0xff]  ;;  %v697_v25 = vadd.f32 %v13867_v56, %v10428_v44 }
 0x30f   :  { %v2225_v27 = vmax.f32 %v2014_v17, %v2022_v38  ;;  %v1506_v33 = vpop.f32.mrf.mxu2  ;;  %v833_v40 = vadd.f32 %v13864_v0, %v10440_v41  ;;  %v13865_v38 = vld [vmem:[#allocation76_spill] sm:$0xff]  ;;  %v1813_v24 = vmax.f32 %v967_v13, %v1643_v42  ;;  %v13869_v42 = vld [vmem:[#allocation86_spill] sm:$0xff] }
 0x310   :  { %v2226_v1 = vmax.f32 %v2015_v28, %v2023_v20  ;;  %v1507_v21 = vadd.f32 %v1506_v33, %v10440_v41  ;;  %v1645_v10 = vpop.f32.mrf.mxu3  ;;  %v1230_v2 = vpop.f32.mrf.mxu0  ;;  %v972_v37 = vadd.f32 %v13865_v38, %v10442_v43  ;;  %v13873_v38 = vld [vmem:[#allocation82_spill] sm:$0xff] }
 0x311   :  { %v1646_v6 = vadd.f32 %v1645_v10, %v10442_v43  ;;  %v1231_v51 = vadd.f32 %v1230_v2, %v10420_v22  ;;  %v1369_v11 = vpop.f32.mrf.mxu1  ;;  %v2021_v33 = vmax.f32 %v1813_v24, 0.0 }
 0x312   :  { %v2233_v14 = vpack.c.bf16 %v2226_v1, %v2225_v27  ;;  %v1816_v3 = vmax.f32 %v831_v52, %v1507_v21  ;;  %v1370_v12 = vadd.f32 %v1369_v11, %v10428_v44  ;;  %v2020_v52 = vmax.f32 %v1812_v55, 0.0  ;;  %v9025_v27 = vld [vmem:[%s13576_s4 + $0x1a4] sm:$0xf0]  ;;  %v7542_v1 = vld [vmem:[%s13576_s4 + $0x220] sm:$0xf]  ;;  %v9276_v55 = vld [vmem:[%s13575_s0 + $0xb8] sm:$0xff] }
 0x313   :  { %v1817_v26 = vmax.f32 %v970_v9, %v1646_v6  ;;  %v1818_v45 = vmax.f32 %v555_v29, %v1231_v51  ;;  %v9275_v9 = vld [vmem:[%s13575_s0 + $0xb0] sm:$0xff]  ;;  %v7478_v29 = vld [vmem:[%s13576_s4 + $0x1a0] sm:$0xf]  ;;  %v9041_v21 = vld [vmem:[%s13576_s4 + $0x224] sm:$0xf0] }
 0x314   :  { %2237 = vst [vmem:[#allocation2 + $0xc0] sm:$0xff] %v2233_v14  ;;  %v2024_v15 = vmax.f32 %v1816_v3, 0.0  ;;  %v1819_v58 = vmax.f32 %v694_v62, %v1370_v12  ;;  %v7479_v4 = vor.u32 %v9025_v27, %v7478_v29  ;;  %v7543_v2 = vor.u32 %v9041_v21, %v7542_v1  ;;  %v13866_v3 = vld [vmem:[#allocation77_spill] sm:$0xff] }
 0x315   :  { %v2025_v60 = vmax.f32 %v1817_v26, 0.0  ;;  %v2026_v59 = vmax.f32 %v1818_v45, 0.0  ;;  %v558_v12 = vadd.f32 %v13866_v3, %v10420_v22  ;;  %v13876_v29 = vld [vmem:[#allocation89_spill] sm:$0xff] }
 0x316   :  { %v2227_v8 = vmax.f32 %v2016_v30, %v2024_v15  ;;  %v2027_v53 = vmax.f32 %v1819_v58, 0.0  ;;  %3000 = vmatpush.bf16.msra.mxu0 %v7479_v4  ;;  %3064 = vmatpush.bf16.msra.mxu1 %v7543_v2  ;;  %v13868_v30 = vld [vmem:[#allocation85_spill] sm:$0xff]  ;;  %v565_v27 = vadd.f32 %v13876_v29, %v10420_v22 }
 0x317   :  { %v2228_v34 = vmax.f32 %v2017_v57, %v2025_v60  ;;  %v2229_v36 = vmax.f32 %v2018_v31, %v2026_v59  ;;  %v1508_v35 = vpop.f32.mrf.mxu2  ;;  %v563_v57 = vadd.f32 %v13868_v30, %v10420_v22  ;;  %v702_v60 = vadd.f32 %v13869_v42, %v10428_v44 }
 0x318   :  { %v2230_v39 = vmax.f32 %v2019_v7, %v2027_v53  ;;  %v1509_v17 = vadd.f32 %v1508_v35, %v10440_v41  ;;  %v1647_v19 = vpop.f32.mrf.mxu3  ;;  %v1233_v63 = vpop.f32.mrf.mxu0 }
 0x319   :  { %v2234_v28 = vpack.c.bf16 %v2228_v34, %v2227_v8  ;;  %v1648_v50 = vadd.f32 %v1647_v19, %v10442_v43  ;;  %v1372_v20 = vpop.f32.mrf.mxu1  ;;  %v1234_v32 = vadd.f32 %v1233_v63, %v10420_v22  ;;  %v13870_v8 = vld [vmem:[#allocation79_spill] sm:$0xff]  ;;  %v13871_v34 = vld [vmem:[#allocation80_spill] sm:$0xff] }
 0x31a   :  { %v2235_v18 = vpack.c.bf16 %v2230_v39, %v2229_v36  ;;  %v1820_v47 = vmax.f32 %v833_v40, %v1509_v17  ;;  %v1373_v14 = vadd.f32 %v1372_v20, %v10428_v44  ;;  %v836_v53 = vadd.f32 %v13870_v8, %v10440_v41  ;;  %v13872_v40 = vld [vmem:[#allocation81_spill] sm:$0xff]  ;;  %v13874_v20 = vld [vmem:[#allocation87_spill] sm:$0xff] }
 0x31b   :  { %2238 = vst.msk [vmem:[#allocation2 + $0xc8] sm:$0xff] %vm10500_vm3, %v2234_v28  ;;  %v1821_v61 = vmax.f32 %v972_v37, %v1648_v50  ;;  %7166 = vmatmul.msk.bf16.gmra.mxu0 %vm399_vm0, %v9275_v9  ;;  %v1822_v15 = vmax.f32 %v558_v12, %v1234_v32  ;;  %v975_v36 = vadd.f32 %v13871_v34, %v10442_v43 }
 0x31c   :  { %2239 = vst [vmem:[#allocation2 + $0xd0] sm:$0xff] %v2235_v18  ;;  %v2028_v23 = vmax.f32 %v1820_v47, 0.0  ;;  %7192 = vmatmul.msk.bf16.gmra.mxu1 %vm399_vm0, %v9275_v9  ;;  %7218 = vmatmul.msk.bf16.gmra.mxu2 %vm399_vm0, %v9275_v9  ;;  %v1823_v59 = vmax.f32 %v697_v25, %v1373_v14  ;;  %v560_v39 = vadd.f32 %v13872_v40, %v10420_v22  ;;  %v13875_v47 = vld [vmem:[#allocation88_spill] sm:$0xff] }
 0x31d   :  { %v2029_v48 = vmax.f32 %v1821_v61, 0.0  ;;  %7244 = vmatmul.msk.bf16.gmra.mxu3 %vm399_vm0, %v9275_v9  ;;  %v2030_v17 = vmax.f32 %v1822_v15, 0.0  ;;  %v699_v37 = vadd.f32 %v13873_v38, %v10428_v44  ;;  %v841_v18 = vadd.f32 %v13874_v20, %v10440_v41 }
 0x31e   :  { %v2231_v10 = vmax.f32 %v2020_v52, %v2028_v23  ;;  %v2031_v24 = vmax.f32 %v1823_v59, 0.0  ;;  %v980_v52 = vadd.f32 %v13875_v47, %v10442_v43  ;;  %v9277_v47 = vld [vmem:[%s13575_s0 + $0xc0] sm:$0xff] }
 0x31f   :  { %v2232_v54 = vmax.f32 %v2021_v33, %v2029_v48  ;;  %v1511_v62 = vpop.f32.mrf.mxu2 }
 0x320   :  { %v1650_v16 = vpop.f32.mrf.mxu3  ;;  %v1235_v6 = vpop.f32.mrf.mxu0  ;;  %v1512_v49 = vadd.f32 %v1511_v62, %v10440_v41 }
 0x321   :  { %v2236_v51 = vpack.c.bf16 %v2232_v54, %v2231_v10  ;;  %v1374_v11 = vpop.f32.mrf.mxu1  ;;  %v1651_v35 = vadd.f32 %v1650_v16, %v10442_v43  ;;  %v1236_v19 = vadd.f32 %v1235_v6, %v10420_v22  ;;  %v13877_v10 = vld [vmem:[#allocation90_spill] sm:$0xff] }
 0x322   :  { %v1375_v28 = vadd.f32 %v1374_v11, %v10428_v44  ;;  %v1824_v61 = vmax.f32 %v836_v53, %v1512_v49  ;;  %v704_v2 = vadd.f32 %v13877_v10, %v10428_v44  ;;  %v13879_v49 = vld [vmem:[#allocation84_spill] sm:$0xff]  ;;  %v9070_v10 = vld [vmem:[%s13576_s4 + $0x314] sm:$0xf] }
 0x323   :  { %2240 = vst.msk [vmem:[#allocation2 + $0xd8] sm:$0xff] %vm10500_vm3, %v2236_v51  ;;  %v1825_v33 = vmax.f32 %v975_v36, %v1651_v35  ;;  %v1826_v54 = vmax.f32 %v560_v39, %v1236_v19  ;;  %v13880_v36 = vld [vmem:[#allocation91_spill] sm:$0xff]  ;;  %v13881_v19 = vld [vmem:[#allocation92_spill] sm:$0xff] }
 0x324   :  { %v1827_v51 = vmax.f32 %v699_v37, %v1375_v28  ;;  %v2032_v3 = vmax.f32 %v1824_v61, 0.0  ;;  %v843_v35 = vadd.f32 %v13880_v36, %v10440_v41 }
 0x325   :  { %v2033_v25 = vmax.f32 %v1825_v33, 0.0  ;;  %v2034_v15 = vmax.f32 %v1826_v54, 0.0 }
 0x327   :  { %v1513_v5 = vpop.f32.mrf.mxu2 }
 0x328   :  { %v1652_v26 = vpop.f32.mrf.mxu3  ;;  %v1238_v45 = vpop.f32.mrf.mxu0 }
 0x329   :  { %v1239_v58 = vadd.f32 %v1238_v45, %v10420_v22  ;;  %v1377_v31 = vpop.f32.mrf.mxu1  ;;  %v1514_v45 = vadd.f32 %v1513_v5, %v10440_v41 }
 0x32a   :  { %v1378_v7 = vadd.f32 %v1377_v31, %v10428_v44 }
 0x32b   :  { %v1830_v13 = vmax.f32 %v563_v57, %v1239_v58  ;;  %7167 = vmatmul.msk.bf16.gmra.mxu0 %vm399_vm0, %v9276_v55  ;;  %v1653_v58 = vadd.f32 %v1652_v26, %v10442_v43 }
 0x32c   :  { %v1831_v0 = vmax.f32 %v702_v60, %v1378_v7  ;;  %7193 = vmatmul.msk.bf16.gmra.mxu1 %vm399_vm0, %v9276_v55  ;;  %7219 = vmatmul.msk.bf16.gmra.mxu2 %vm399_vm0, %v9276_v55  ;;  %v13878_v60 = vld [vmem:[#allocation83_spill] sm:$0xff]  ;;  %v2035_v7 = vmax.f32 %v1827_v51, 0.0 }
 0x32d   :  { %v2038_v63 = vmax.f32 %v1830_v13, 0.0  ;;  %7245 = vmatmul.msk.bf16.gmra.mxu3 %vm399_vm0, %v9276_v55  ;;  %v838_v59 = vadd.f32 %v13878_v60, %v10440_v41  ;;  %v977_v13 = vadd.f32 %v13879_v49, %v10442_v43  ;;  %v13887_v49 = vld [vmem:[#allocation96_spill] sm:$0xff] }
 0x32e   :  { %v2039_v50 = vmax.f32 %v1831_v0, 0.0 }
 0x32f   :  { %v2241_v9 = vmax.f32 %v2030_v17, %v2038_v63  ;;  %v1516_v23 = vpop.f32.mrf.mxu2  ;;  %v1828_v0 = vmax.f32 %v838_v59, %v1514_v45  ;;  %v982_v63 = vadd.f32 %v13881_v19, %v10442_v43  ;;  %v1829_v38 = vmax.f32 %v977_v13, %v1653_v58  ;;  %v13886_v59 = vld [vmem:[#allocation102_spill] sm:$0xff] }
 0x330   :  { %v2242_v48 = vmax.f32 %v2031_v24, %v2039_v50  ;;  %v1517_v4 = vadd.f32 %v1516_v23, %v10440_v41  ;;  %v1655_v1 = vpop.f32.mrf.mxu3  ;;  %v1240_v21 = vpop.f32.mrf.mxu0  ;;  %v985_v13 = vadd.f32 %v13887_v49, %v10442_v43 }
 0x331   :  { %v1656_v62 = vadd.f32 %v1655_v1, %v10442_v43  ;;  %v1241_v16 = vadd.f32 %v1240_v21, %v10420_v22  ;;  %v1379_v6 = vpop.f32.mrf.mxu1 }
 0x332   :  { %v2249_v11 = vpack.c.bf16 %v2242_v48, %v2241_v9  ;;  %v1832_v32 = vmax.f32 %v841_v18, %v1517_v4  ;;  %v1380_v14 = vadd.f32 %v1379_v6, %v10428_v44  ;;  %v2037_v9 = vmax.f32 %v1829_v38, 0.0 }
 0x333   :  { %v1833_v12 = vmax.f32 %v980_v52, %v1656_v62  ;;  %v1834_v56 = vmax.f32 %v565_v27, %v1241_v16  ;;  %v2036_v52 = vmax.f32 %v1828_v0, 0.0  ;;  %v9074_v62 = vld [vmem:[%s13576_s4 + $0x334] sm:$0xf]  ;;  %v7680_v16 = vld [vmem:[%s13576_s4 + $0x338] sm:$0xf0]  ;;  %v9278_v0 = vld [vmem:[%s13575_s0 + $0xc8] sm:$0xff] }
 0x334   :  { %2253 = vst [vmem:[#allocation2 + $0xe0] sm:$0xff] %v2249_v11  ;;  %v2040_v30 = vmax.f32 %v1832_v32, 0.0  ;;  %v1835_v57 = vmax.f32 %v704_v2, %v1380_v14  ;;  %v7664_v2 = vld [vmem:[%s13576_s4 + $0x318] sm:$0xf0]  ;;  %v7683_v51 = vor.u32 %v9074_v62, %v7680_v16  ;;  %v13882_v32 = vld [vmem:[#allocation93_spill] sm:$0xff] }
 0x335   :  { %v2041_v31 = vmax.f32 %v1833_v12, 0.0  ;;  %v2042_v42 = vmax.f32 %v1834_v56, 0.0  ;;  %v7667_v54 = vor.u32 %v9070_v10, %v7664_v2  ;;  %v568_v14 = vadd.f32 %v13882_v32, %v10420_v22  ;;  %v13883_v12 = vld [vmem:[#allocation94_spill] sm:$0xff] }
 0x336   :  { %v2243_v8 = vmax.f32 %v2032_v3, %v2040_v30  ;;  %v2043_v53 = vmax.f32 %v1835_v57, 0.0  ;;  %3447 = vmatpush.bf16.msrb.mxu3 %v7683_v51  ;;  %v707_v56 = vadd.f32 %v13883_v12, %v10428_v44  ;;  %v13884_v30 = vld [vmem:[#allocation101_spill] sm:$0xff]  ;;  %v13893_v16 = vld [vmem:[#allocation106_spill] sm:$0xff] }
 0x337   :  { %v2244_v55 = vmax.f32 %v2033_v25, %v2041_v31  ;;  %v2245_v34 = vmax.f32 %v2034_v15, %v2042_v42  ;;  %v1518_v5 = vpop.f32.mrf.mxu2  ;;  %3377 = vmatpush.bf16.msrb.mxu2 %v7667_v54  ;;  %v573_v57 = vadd.f32 %v13884_v30, %v10420_v22  ;;  %v13885_v42 = vld [vmem:[#allocation95_spill] sm:$0xff] }
 0x338   :  { %v2246_v40 = vmax.f32 %v2035_v7, %v2043_v53  ;;  %v1519_v26 = vadd.f32 %v1518_v5, %v10440_v41  ;;  %v1657_v39 = vpop.f32.mrf.mxu3  ;;  %v1243_v17 = vpop.f32.mrf.mxu0  ;;  %v846_v60 = vadd.f32 %v13885_v42, %v10440_v41  ;;  %v712_v7 = vadd.f32 %v13886_v59, %v10428_v44  ;;  %v13889_v5 = vld [vmem:[#allocation98_spill] sm:$0xff] }
 0x339   :  { %v2250_v37 = vpack.c.bf16 %v2244_v55, %v2243_v8  ;;  %v1658_v24 = vadd.f32 %v1657_v39, %v10442_v43  ;;  %v1382_v28 = vpop.f32.mrf.mxu1  ;;  %v1244_v6 = vadd.f32 %v1243_v17, %v10420_v22  ;;  %v13888_v55 = vld [vmem:[#allocation97_spill] sm:$0xff]  ;;  %v709_v36 = vadd.f32 %v13889_v5, %v10428_v44  ;;  %v13890_v17 = vld [vmem:[#allocation103_spill] sm:$0xff]  ;;  %v13895_v5 = vld [vmem:[#allocation100_spill] sm:$0xff] }
 0x33a   :  { %v2251_v50 = vpack.c.bf16 %v2246_v40, %v2245_v34  ;;  %v1836_v20 = vmax.f32 %v843_v35, %v1519_v26  ;;  %v1383_v11 = vadd.f32 %v1382_v28, %v10428_v44  ;;  %v570_v34 = vadd.f32 %v13888_v55, %v10420_v22  ;;  %v7536_v28 = vld [vmem:[%s13576_s4 + $0x218] sm:$0xf0] }
 0x33b   :  { %2254 = vst.msk [vmem:[#allocation2 + $0xe8] sm:$0xff] %vm10500_vm3, %v2250_v37  ;;  %v1837_v18 = vmax.f32 %v982_v63, %v1658_v24  ;;  %7168 = vmatmul.msk.bf16.gmra.mxu0 %vm399_vm0, %v9277_v47  ;;  %v1838_v15 = vmax.f32 %v568_v14, %v1244_v6  ;;  %v851_v19 = vadd.f32 %v13890_v17, %v10440_v41  ;;  %v9038_v24 = vld [vmem:[%s13576_s4 + $0x214] sm:$0xf] }
 0x33c   :  { %2255 = vst [vmem:[#allocation2 + $0xf0] sm:$0xff] %v2251_v50  ;;  %v2044_v61 = vmax.f32 %v1836_v20, 0.0  ;;  %7194 = vmatmul.msk.bf16.gmra.mxu1 %vm399_vm0, %v9277_v47  ;;  %7220 = vmatmul.msk.bf16.gmra.mxu2 %vm399_vm0, %v9277_v47  ;;  %v1839_v8 = vmax.f32 %v707_v56, %v1383_v11  ;;  %v714_v6 = vadd.f32 %v13893_v16, %v10428_v44 }
 0x33d   :  { %v2045_v23 = vmax.f32 %v1837_v18, 0.0  ;;  %7246 = vmatmul.msk.bf16.gmra.mxu3 %vm399_vm0, %v9277_v47  ;;  %v2046_v63 = vmax.f32 %v1838_v15, 0.0  ;;  %v7539_v47 = vor.u32 %v9038_v24, %v7536_v28  ;;  %v8931_v24 = vld [vmem:[#allocation2 + $0x34] sm:$0xf0] }
 0x33e   :  { %v2247_v29 = vmax.f32 %v2036_v52, %v2044_v61  ;;  %v2047_v50 = vmax.f32 %v1839_v8, 0.0  ;;  %v9054_v52 = vld [vmem:[%s13576_s4 + $0x294] sm:$0xf]  ;;  %v7600_v61 = vld [vmem:[%s13576_s4 + $0x298] sm:$0xf0] }
 0x33f   :  { %v2248_v27 = vmax.f32 %v2037_v9, %v2045_v23  ;;  %v1521_v33 = vpop.f32.mrf.mxu2  ;;  %v13891_v9 = vld [vmem:[#allocation104_spill] sm:$0xff]  ;;  %3249 = vmatpush.bf16.msrb.mxu0 %v7539_v47 }
 0x340   :  { %v1660_v48 = vpop.f32.mrf.mxu3  ;;  %v1245_v4 = vpop.f32.mrf.mxu0  ;;  %v1522_v40 = vadd.f32 %v1521_v33, %v10440_v41  ;;  %v990_v23 = vadd.f32 %v13891_v9, %v10442_v43  ;;  %v7312_v9 = vld [vmem:[#allocation2 + $0x38] sm:$0xf0] }
 0x341   :  { %v2252_v1 = vpack.c.bf16 %v2248_v27, %v2247_v29  ;;  %v1384_v21 = vpop.f32.mrf.mxu1  ;;  %v1661_v26 = vadd.f32 %v1660_v48, %v10442_v43  ;;  %v1246_v38 = vadd.f32 %v1245_v4, %v10420_v22  ;;  %v13892_v29 = vld [vmem:[#allocation105_spill] sm:$0xff]  ;;  %v7603_v4 = vor.u32 %v9054_v52, %v7600_v61  ;;  %v8928_v61 = vld [vmem:[#allocation2 + $0x24] sm:$0xf] }
 0x342   :  { %v1385_v20 = vadd.f32 %v1384_v21, %v10428_v44  ;;  %v575_v27 = vadd.f32 %v13892_v29, %v10420_v22 }
 0x343   :  { %2256 = vst.msk [vmem:[#allocation2 + $0xf8] sm:$0xff] %vm10500_vm3, %v2252_v1  ;;  %v1840_v1 = vmax.f32 %v846_v60, %v1522_v40  ;;  %v1841_v21 = vmax.f32 %v985_v13, %v1661_v26  ;;  %v1842_v51 = vmax.f32 %v570_v34, %v1246_v38  ;;  %3313 = vmatpush.bf16.msrb.mxu1 %v7603_v4  ;;  %v8930_v34 = vld [vmem:[#allocation2 + $0x2c] sm:$0xf0]  ;;  %v7304_v40 = vld [vmem:[#allocation2 + $0x30] sm:$0xf0]  ;;  %v13896_v26 = vld [vmem:[#allocation107_spill] sm:$0xff] }
 0x344   :  { %v1843_v12 = vmax.f32 %v709_v36, %v1385_v20  ;;  %v987_v36 = vadd.f32 %v13895_v5, %v10442_v43  ;;  %v7310_v4 = vld [vmem:[#allocation2 + $0x28] sm:$0xf] }
 0x345   :  { %v2048_v60 = vmax.f32 %v1840_v1, 0.0  ;;  %v2049_v59 = vmax.f32 %v1841_v21, 0.0 }
 0x347   :  { %v1523_v3 = vpop.f32.mrf.mxu2 }
 0x348   :  { %v11077_v25 = vpop.f32.mrf.mxu3  ;;  %v1248_v45 = vpop.f32.mrf.mxu0 }
 0x349   :  { %v1249_v58 = vadd.f32 %v1248_v45, %v10420_v22  ;;  %v1387_v31 = vpop.f32.mrf.mxu1  ;;  %v1663_v49 = vadd.f32 %v11077_v25, %v10442_v43  ;;  %v13897_v25 = vld [vmem:[#allocation108_spill] sm:$0xff] }
 0x34a   :  { %v1388_v53 = vadd.f32 %v1387_v31, %v10428_v44  ;;  %v992_v28 = vadd.f32 %v13897_v25, %v10442_v43  ;;  %v13902_v25 = vld [vmem:[#allocation118_spill] sm:$0xff] }
 0x34b   :  { %v1846_v35 = vmax.f32 %v573_v57, %v1249_v58  ;;  %7169 = vmatmul.msk.bf16.gmra.mxu0 %vm399_vm0, %v9278_v0  ;;  %v13894_v57 = vld [vmem:[#allocation99_spill] sm:$0xff]  ;;  %v1524_v58 = vadd.f32 %v1523_v3, %v10440_v41 }
 0x34c   :  { %v1847_v39 = vmax.f32 %v712_v7, %v1388_v53  ;;  %7195 = vmatmul.msk.bf16.gmra.mxu1 %vm399_vm0, %v9278_v0  ;;  %7221 = vmatmul.msk.bf16.gmra.mxu2 %vm399_vm0, %v9278_v0  ;;  %v848_v15 = vadd.f32 %v13894_v57, %v10440_v41  ;;  %v2050_v53 = vmax.f32 %v1842_v51, 0.0  ;;  %v9068_v51 = vld [vmem:[%s13576_s4 + $0x304] sm:$0xf] }
 0x34d   :  { %v2054_v37 = vmax.f32 %v1846_v35, 0.0  ;;  %7247 = vmatmul.msk.bf16.gmra.mxu3 %vm399_vm0, %v9278_v0  ;;  %v2051_v35 = vmax.f32 %v1843_v12, 0.0 }
 0x34e   :  { %v2055_v18 = vmax.f32 %v1847_v39, 0.0  ;;  %v853_v39 = vadd.f32 %v13896_v26, %v10440_v41  ;;  %v1844_v17 = vmax.f32 %v848_v15, %v1524_v58  ;;  %v13900_v26 = vld [vmem:[#allocation111_spill] sm:$0xff] }
 0x34f   :  { %v2257_v33 = vmax.f32 %v2046_v63, %v2054_v37  ;;  %v1526_v48 = vpop.f32.mrf.mxu2  ;;  %v7302_v37 = vld [vmem:[#allocation2 + $0x20] sm:$0xf] }
 0x350   :  { %v2258_v10 = vmax.f32 %v2047_v50, %v2055_v18  ;;  %v1527_v2 = vadd.f32 %v1526_v48, %v10440_v41  ;;  %v1665_v54 = vpop.f32.mrf.mxu3  ;;  %v1250_v62 = vpop.f32.mrf.mxu0  ;;  %v11140_v52 = vor.u32 %v8930_v34, %v7302_v37  ;;  %v11143_v48 = vor.u32 %v8928_v61, %v7304_v40  ;;  %v13898_v34 = vld [vmem:[#allocation109_spill] sm:$0xff]  ;;  %v7318_v37 = vld [vmem:[#allocation2 + $0x40] sm:$0xf]  ;;  %v8932_v61 = vld [vmem:[#allocation2 + $0x44] sm:$0xf] }
 0x351   :  { %v1666_v11 = vadd.f32 %v1665_v54, %v10442_v43  ;;  %v1251_v32 = vadd.f32 %v1250_v62, %v10420_v22  ;;  %v1389_v14 = vpop.f32.mrf.mxu1  ;;  %v2052_v54 = vmax.f32 %v1844_v17, 0.0  ;;  %v578_v5 = vadd.f32 %v13898_v34, %v10420_v22  ;;  %v13901_v17 = vld [vmem:[#allocation117_spill] sm:$0xff] }
 0x352   :  { %v2265_v56 = vpack.c.bf16 %v2258_v10, %v2257_v33  ;;  %v1848_v45 = vmax.f32 %v851_v19, %v1527_v2  ;;  %v1390_v30 = vadd.f32 %v1389_v14, %v10428_v44  ;;  %v11145_v10 = vor.u32 %v8931_v24, %v7310_v4  ;;  %v8929_v2 = vld [vmem:[#allocation2 + $0x2c] sm:$0xf]  ;;  %v7328_v24 = vld [vmem:[#allocation2 + $0x58] sm:$0xf0] }
 0x353   :  { %v1849_v31 = vmax.f32 %v990_v23, %v1666_v11  ;;  %v1850_v42 = vmax.f32 %v575_v27, %v1251_v32  ;;  %v1845_v23 = vmax.f32 %v987_v36, %v1663_v49  ;;  %v11150_v16 = vor.u32 %v8929_v2, %v7312_v9  ;;  %v7656_v11 = vld [vmem:[%s13576_s4 + $0x308] sm:$0xf0]  ;;  %v7326_v9 = vld [vmem:[#allocation2 + $0x48] sm:$0xf]  ;;  %v13904_v2 = vld [vmem:[#allocation113_spill] sm:$0xff] }
 0x354   :  { %2269 = vst [vmem:[#allocation2 + $0x100] sm:$0xff] %v2265_v56  ;;  %v2056_v7 = vmax.f32 %v1848_v45, 0.0  ;;  %v1851_v8 = vmax.f32 %v714_v6, %v1390_v30  ;;  %v7659_v12 = vor.u32 %v9068_v51, %v7656_v11  ;;  %v8933_v4 = vld [vmem:[#allocation2 + $0x4c] sm:$0xf] }
 0x355   :  { %v2057_v13 = vmax.f32 %v1849_v31, 0.0  ;;  %v2058_v55 = vmax.f32 %v1850_v42, 0.0  ;;  %v2053_v32 = vmax.f32 %v1845_v23, 0.0  ;;  %v9036_v42 = vld [vmem:[%s13576_s4 + $0x204] sm:$0xf] }
 0x356   :  { %v2259_v0 = vmax.f32 %v2048_v60, %v2056_v7  ;;  %v2059_v3 = vmax.f32 %v1851_v8, 0.0  ;;  %3378 = vmatpush.bf16.msrb.mxu2 %v7659_v12  ;;  %v7528_v60 = vld [vmem:[%s13576_s4 + $0x208] sm:$0xf0]  ;;  %v9052_v7 = vld [vmem:[%s13576_s4 + $0x284] sm:$0xf] }
 0x357   :  { %v2260_v19 = vmax.f32 %v2049_v59, %v2057_v13  ;;  %v2261_v63 = vmax.f32 %v2050_v53, %v2058_v55  ;;  %v1528_v38 = vpop.f32.mrf.mxu2  ;;  %v7531_v59 = vor.u32 %v9036_v42, %v7528_v60  ;;  %v7592_v8 = vld [vmem:[%s13576_s4 + $0x288] sm:$0xf0]  ;;  %v8934_v55 = vld [vmem:[#allocation2 + $0x4c] sm:$0xf0] }
 0x358   :  { %v2262_v50 = vmax.f32 %v2051_v35, %v2059_v3  ;;  %v1529_v20 = vadd.f32 %v1528_v38, %v10440_v41  ;;  %v1667_v18 = vpop.f32.mrf.mxu3  ;;  %v1253_v47 = vpop.f32.mrf.mxu0  ;;  %v7595_v49 = vor.u32 %v9052_v7, %v7592_v8  ;;  %v7320_v35 = vld [vmem:[#allocation2 + $0x50] sm:$0xf0]  ;;  %v13899_v3 = vld [vmem:[#allocation110_spill] sm:$0xff]  ;;  %v13906_v8 = vld [vmem:[#allocation119_spill] sm:$0xff] }
 0x359   :  { %v2266_v29 = vpack.c.bf16 %v2260_v19, %v2259_v0  ;;  %v1668_v27 = vadd.f32 %v1667_v18, %v10442_v43  ;;  %v1392_v33 = vpop.f32.mrf.mxu1  ;;  %v1254_v53 = vadd.f32 %v1253_v47, %v10420_v22  ;;  %3250 = vmatpush.bf16.msrb.mxu0 %v7531_v59  ;;  %v8935_v0 = vld [vmem:[#allocation2 + $0x54] sm:$0xf0]  ;;  %v717_v40 = vadd.f32 %v13899_v3, %v10428_v44 }
 0x35a   :  { %v2267_v1 = vpack.c.bf16 %v2262_v50, %v2261_v63  ;;  %v1852_v21 = vmax.f32 %v853_v39, %v1529_v20  ;;  %v1393_v13 = vadd.f32 %v1392_v33, %v10428_v44  ;;  %3314 = vmatpush.bf16.msrb.mxu1 %v7595_v49  ;;  %v11186_v39 = vadd.f32 %v13900_v26, %v10440_v41 }
 0x35b   :  { %2270 = vst.msk [vmem:[#allocation2 + $0x108] sm:$0xff] %vm10500_vm3, %v2266_v29  ;;  %v1853_v62 = vmax.f32 %v992_v28, %v1668_v27  ;;  %3001 = vmatmul.bf16.vlgmr.msra.gmra.mxu0 %v11140_v52  ;;  %v583_v19 = vadd.f32 %v13901_v17, %v10420_v22  ;;  %v722_v28 = vadd.f32 %v13902_v25, %v10428_v44  ;;  %v13909_v17 = vld [vmem:[#allocation122_spill] sm:$0xff] }
 0x35c   :  { %2271 = vst [vmem:[#allocation2 + $0x110] sm:$0xff] %v2267_v1  ;;  %v2060_v6 = vmax.f32 %v1852_v21, 0.0  ;;  %3065 = vmatmul.bf16.vlgmr.msra.gmra.mxu1 %v11143_v48  ;;  %3129 = vmatmul.bf16.vlgmr.msra.gmra.mxu2 %v11145_v10  ;;  %v1854_v50 = vmax.f32 %v578_v5, %v1254_v53  ;;  %v11195_v47 = vor.u32 %v8934_v55, %v7318_v37  ;;  %v13903_v1 = vld [vmem:[#allocation112_spill] sm:$0xff] }
 0x35d   :  { %v2061_v14 = vmax.f32 %v1853_v62, 0.0  ;;  %7684 = vmatmul.msk.bf16.vlgmr.msra.gmra.mxu3 %vm2959_vm4, %v11150_v16  ;;  %v1855_v23 = vmax.f32 %v717_v40, %v1393_v13  ;;  %v11198_v27 = vor.u32 %v8932_v61, %v7320_v35  ;;  %v11200_v33 = vor.u32 %v8935_v0, %v7326_v9  ;;  %v13907_v53 = vld [vmem:[#allocation120_spill] sm:$0xff]  ;;  %v13908_v13 = vld [vmem:[#allocation121_spill] sm:$0xff] }
 0x35e   :  { %v2263_v56 = vmax.f32 %v2052_v54, %v2060_v6  ;;  %v995_v21 = vadd.f32 %v13903_v1, %v10442_v43  ;;  %v580_v54 = vadd.f32 %v13904_v2, %v10420_v22  ;;  %v11207_v6 = vor.u32 %v8933_v4, %v7328_v24 }
 0x35f   :  { %v2264_v45 = vmax.f32 %v2053_v32, %v2061_v14  ;;  %v1531_v30 = vpop.f32.mrf.mxu2  ;;  %v13905_v14 = vld [vmem:[#allocation114_spill] sm:$0xff]  ;;  %v2063_v42 = vmax.f32 %v1855_v23, 0.0  ;;  %v1000_v49 = vadd.f32 %v13907_v53, %v10442_v43  ;;  %v585_v55 = vadd.f32 %v13908_v13, %v10420_v22 }
 0x360   :  { %v1670_v57 = vpop.f32.mrf.mxu3  ;;  %v1255_v15 = vpop.f32.mrf.mxu0  ;;  %v1532_v51 = vadd.f32 %v1531_v30, %v10440_v41  ;;  %v719_v12 = vadd.f32 %v13905_v14, %v10428_v44  ;;  %v9066_v30 = vld [vmem:[%s13576_s4 + $0x2f4] sm:$0xf] }
 0x361   :  { %v2268_v58 = vpack.c.bf16 %v2264_v45, %v2263_v56  ;;  %v1394_v31 = vpop.f32.mrf.mxu1  ;;  %v1671_v11 = vadd.f32 %v1670_v57, %v10442_v43  ;;  %v2062_v56 = vmax.f32 %v1854_v50, 0.0  ;;  %v1256_v45 = vadd.f32 %v1255_v15, %v10420_v22  ;;  %v7648_v57 = vld [vmem:[%s13576_s4 + $0x2f8] sm:$0xf0] }
 0x362   :  { %v1395_v60 = vadd.f32 %v1394_v31, %v10428_v44  ;;  %v7651_v7 = vor.u32 %v9066_v30, %v7648_v57  ;;  %v861_v15 = vadd.f32 %v13906_v8, %v10440_v41  ;;  %v1856_v35 = vmax.f32 %v11186_v39, %v1532_v51 }
 0x363   :  { %2272 = vst.msk [vmem:[#allocation2 + $0x118] sm:$0xff] %vm10500_vm3, %v2268_v58  ;;  %v1857_v0 = vmax.f32 %v995_v21, %v1671_v11 }
 0x364   :  { %3379 = vmatpush.bf16.msrb.mxu2 %v7651_v7  ;;  %v2064_v4 = vmax.f32 %v1856_v35, 0.0  ;;  %v13912_v7 = vld [vmem:[#allocation123_spill] sm:$0xff] }
 0x365   :  { %v2065_v1 = vmax.f32 %v1857_v0, 0.0  ;;  %v863_v8 = vadd.f32 %v13912_v7, %v10440_v41  ;;  %v7350_v7 = vld [vmem:[#allocation2 + $0x80] sm:$0xf] }
 0x367   :  { %v11180_v36 = vpop.f32.mrf.mxu2 }
 0x368   :  { %v11190_v63 = vpop.f32.mrf.mxu3  ;;  %v1258_v38 = vpop.f32.mrf.mxu0  ;;  %v1534_v9 = vadd.f32 %v11180_v36, %v10440_v41 }
 0x369   :  { %v1259_v20 = vadd.f32 %v1258_v38, %v10420_v22  ;;  %v1397_v18 = vpop.f32.mrf.mxu1  ;;  %v1858_v38 = vmax.f32 %v580_v54, %v1256_v45  ;;  %v13911_v45 = vld [vmem:[#allocation116_spill] sm:$0xff] }
 0x36a   :  { %v1398_v29 = vadd.f32 %v1397_v18, %v10428_v44  ;;  %v13910_v18 = vld [vmem:[#allocation115_spill] sm:$0xff]  ;;  %v997_v36 = vadd.f32 %v13911_v45, %v10442_v43 }
 0x36b   :  { %v1862_v62 = vmax.f32 %v583_v19, %v1259_v20  ;;  %3006 = vmatmul.bf16.gmra.mxu0 %v11195_v47  ;;  %v724_v19 = vadd.f32 %v13909_v17, %v10428_v44  ;;  %v858_v61 = vadd.f32 %v13910_v18, %v10440_v41  ;;  %v2066_v54 = vmax.f32 %v1858_v38, 0.0  ;;  %v7342_v17 = vld [vmem:[#allocation2 + $0x68] sm:$0xf]  ;;  %v9034_v18 = vld [vmem:[%s13576_s4 + $0x1f4] sm:$0xf] }
 0x36c   :  { %v1863_v32 = vmax.f32 %v722_v28, %v1398_v29  ;;  %3070 = vmatmul.bf16.gmra.mxu1 %v11198_v27  ;;  %3134 = vmatmul.bf16.gmra.mxu2 %v11200_v33  ;;  %v1859_v28 = vmax.f32 %v719_v12, %v1395_v60  ;;  %v7336_v60 = vld [vmem:[#allocation2 + $0x70] sm:$0xf0] }
 0x36d   :  { %v2070_v58 = vmax.f32 %v1862_v62, 0.0  ;;  %7685 = vmatmul.msk.bf16.gmra.mxu3 %vm2959_vm4, %v11207_v6  ;;  %v1673_v62 = vadd.f32 %v11190_v63, %v10442_v43  ;;  %v13913_v63 = vld [vmem:[#allocation124_spill] sm:$0xff] }
 0x36e   :  { %v2071_v59 = vmax.f32 %v1863_v32, 0.0  ;;  %v2067_v32 = vmax.f32 %v1859_v28, 0.0 }
 0x36f   :  { %v2273_v34 = vmax.f32 %v2062_v56, %v2070_v58  ;;  %v1536_v5 = vpop.f32.mrf.mxu2  ;;  %v8938_v56 = vld [vmem:[#allocation2 + $0x6c] sm:$0xf0]  ;;  %v1860_v58 = vmax.f32 %v858_v61, %v1534_v9  ;;  %v1861_v35 = vmax.f32 %v997_v36, %v1673_v62  ;;  %v7520_v61 = vld [vmem:[%s13576_s4 + $0x1f8] sm:$0xf0] }
 0x370   :  { %v2274_v3 = vmax.f32 %v2063_v42, %v2071_v59  ;;  %v1537_v40 = vadd.f32 %v1536_v5, %v10440_v41  ;;  %v1675_v31 = vpop.f32.mrf.mxu3  ;;  %v1260_v26 = vpop.f32.mrf.mxu0  ;;  %v8939_v59 = vld [vmem:[#allocation2 + $0x74] sm:$0xf0]  ;;  %v7344_v5 = vld [vmem:[#allocation2 + $0x78] sm:$0xf0] }
 0x371   :  { %v1676_v37 = vadd.f32 %v1675_v31, %v10442_v43  ;;  %v1261_v24 = vadd.f32 %v1260_v26, %v10420_v22  ;;  %v1399_v25 = vpop.f32.mrf.mxu1  ;;  %v8936_v26 = vld [vmem:[#allocation2 + $0x64] sm:$0xf]  ;;  %v2068_v28 = vmax.f32 %v1860_v58, 0.0  ;;  %v2069_v9 = vmax.f32 %v1861_v35, 0.0  ;;  %v8942_v58 = vld [vmem:[#allocation2 + $0x8c] sm:$0xf0] }
 0x372   :  { %v2281_v50 = vpack.c.bf16 %v2274_v3, %v2273_v34  ;;  %v1864_v20 = vmax.f32 %v861_v15, %v1537_v40  ;;  %v1400_v39 = vadd.f32 %v1399_v25, %v10428_v44  ;;  %v1002_v15 = vadd.f32 %v13913_v63, %v10442_v43  ;;  %v7334_v34 = vld [vmem:[#allocation2 + $0x60] sm:$0xf]  ;;  %v8937_v25 = vld [vmem:[#allocation2 + $0x6c] sm:$0xf]  ;;  %v13915_v63 = vld [vmem:[#allocation126_spill] sm:$0xff] }
 0x373   :  { %v1865_v23 = vmax.f32 %v1000_v49, %v1676_v37  ;;  %v1866_v29 = vmax.f32 %v585_v55, %v1261_v24  ;;  %v11252_v31 = vor.u32 %v8938_v56, %v7334_v34  ;;  %v11254_v37 = vor.u32 %v8936_v26, %v7336_v60  ;;  %v7640_v56 = vld [vmem:[%s13576_s4 + $0x2e8] sm:$0xf0] }
 0x374   :  { %2285 = vst [vmem:[#allocation2 + $0x120] sm:$0xff] %v2281_v50  ;;  %v2072_v21 = vmax.f32 %v1864_v20, 0.0  ;;  %v1867_v2 = vmax.f32 %v724_v19, %v1400_v39  ;;  %v11256_v24 = vor.u32 %v8939_v59, %v7342_v17  ;;  %v11261_v20 = vor.u32 %v8937_v25, %v7344_v5  ;;  %v7358_v25 = vld [vmem:[#allocation2 + $0x88] sm:$0xf] }
 0x375   :  { %v2073_v51 = vmax.f32 %v1865_v23, 0.0  ;;  %v2074_v11 = vmax.f32 %v1866_v29, 0.0  ;;  %v7523_v29 = vor.u32 %v9034_v18, %v7520_v61  ;;  %v11299_v35 = vor.u32 %v8942_v58, %v7350_v7  ;;  %v8941_v61 = vld [vmem:[#allocation2 + $0x8c] sm:$0xf] }
 0x376   :  { %v2275_v14 = vmax.f32 %v2064_v4, %v2072_v21  ;;  %v2075_v12 = vmax.f32 %v1867_v2, 0.0  ;;  %v9050_v4 = vld [vmem:[%s13576_s4 + $0x274] sm:$0xf]  ;;  %v13923_v7 = vld [vmem:[#allocation136_spill] sm:$0xff] }
 0x377   :  { %v2276_v30 = vmax.f32 %v2065_v1, %v2073_v51  ;;  %v2277_v57 = vmax.f32 %v2066_v54, %v2074_v11  ;;  %v1538_v42 = vpop.f32.mrf.mxu2  ;;  %v7584_v1 = vld [vmem:[%s13576_s4 + $0x278] sm:$0xf0]  ;;  %3251 = vmatpush.bf16.msrb.mxu0 %v7523_v29 }
 0x378   :  { %v2278_v53 = vmax.f32 %v2067_v32, %v2075_v12  ;;  %v1539_v49 = vadd.f32 %v1538_v42, %v10440_v41  ;;  %v1677_v13 = vpop.f32.mrf.mxu3  ;;  %v1263_v55 = vpop.f32.mrf.mxu0  ;;  %v7587_v2 = vor.u32 %v9050_v4, %v7584_v1  ;;  %v9064_v12 = vld [vmem:[%s13576_s4 + $0x2e4] sm:$0xf]  ;;  %v13914_v42 = vld [vmem:[#allocation125_spill] sm:$0xff] }
 0x379   :  { %v2282_v0 = vpack.c.bf16 %v2276_v30, %v2275_v14  ;;  %v1678_v3 = vadd.f32 %v1677_v13, %v10442_v43  ;;  %v1402_v40 = vpop.f32.mrf.mxu1  ;;  %v7643_v45 = vor.u32 %v9064_v12, %v7640_v56  ;;  %v1264_v36 = vadd.f32 %v1263_v55, %v10420_v22  ;;  %v13917_v13 = vld [vmem:[#allocation134_spill] sm:$0xff] }
 0x37a   :  { %v2283_v19 = vpack.c.bf16 %v2278_v53, %v2277_v57  ;;  %v1868_v38 = vmax.f32 %v863_v8, %v1539_v49  ;;  %3315 = vmatpush.bf16.msrb.mxu1 %v7587_v2  ;;  %v1403_v30 = vadd.f32 %v1402_v40, %v10428_v44  ;;  %v7352_v57 = vld [vmem:[#allocation2 + $0x90] sm:$0xf0]  ;;  %v588_v60 = vadd.f32 %v13914_v42, %v10420_v22  ;;  %v8943_v8 = vld [vmem:[#allocation2 + $0x94] sm:$0xf0]  ;;  %v13922_v42 = vld [vmem:[#allocation135_spill] sm:$0xff] }
 0x37b   :  { %2286 = vst.msk [vmem:[#allocation2 + $0x128] sm:$0xff] %vm10500_vm3, %v2282_v0  ;;  %v1869_v50 = vmax.f32 %v1002_v15, %v1678_v3  ;;  %3011 = vmatmul.bf16.gmra.mxu0 %v11252_v31  ;;  %3380 = vmatpush.bf16.msrb.mxu2 %v7643_v45  ;;  %v727_v15 = vadd.f32 %v13915_v63, %v10428_v44  ;;  %v13916_v53 = vld [vmem:[#allocation133_spill] sm:$0xff]  ;;  %v8940_v0 = vld [vmem:[#allocation2 + $0x84] sm:$0xf]  ;;  %v7360_v3 = vld [vmem:[#allocation2 + $0x98] sm:$0xf0] }
 0x37c   :  { %2287 = vst [vmem:[#allocation2 + $0x130] sm:$0xff] %v2283_v19  ;;  %v2076_v39 = vmax.f32 %v1868_v38, 0.0  ;;  %3075 = vmatmul.bf16.gmra.mxu1 %v11254_v37  ;;  %3139 = vmatmul.bf16.gmra.mxu2 %v11256_v24  ;;  %v593_v49 = vadd.f32 %v13916_v53, %v10420_v22  ;;  %v732_v55 = vadd.f32 %v13917_v13, %v10428_v44  ;;  %v13921_v45 = vld [vmem:[#allocation130_spill] sm:$0xff] }
 0x37d   :  { %v2077_v23 = vmax.f32 %v1869_v50, 0.0  ;;  %7686 = vmatmul.msk.bf16.gmra.mxu3 %vm2959_vm4, %v11261_v20  ;;  %v1870_v40 = vmax.f32 %v588_v60, %v1264_v36  ;;  %v11303_v38 = vor.u32 %v8940_v0, %v7352_v57  ;;  %v11307_v18 = vor.u32 %v8943_v8, %v7358_v25  ;;  %v13925_v13 = vld [vmem:[#allocation138_spill] sm:$0xff] }
 0x37e   :  { %v2279_v21 = vmax.f32 %v2068_v28, %v2076_v39  ;;  %v1871_v28 = vmax.f32 %v727_v15, %v1403_v30  ;;  %v11313_v1 = vor.u32 %v8941_v61, %v7360_v3  ;;  %v729_v36 = vadd.f32 %v13921_v45, %v10428_v44 }
 0x37f   :  { %v2280_v54 = vmax.f32 %v2069_v9, %v2077_v23  ;;  %v1541_v62 = vpop.f32.mrf.mxu2  ;;  %v13918_v9 = vld [vmem:[#allocation127_spill] sm:$0xff]  ;;  %v871_v60 = vadd.f32 %v13922_v42, %v10440_v41  ;;  %v1010_v8 = vadd.f32 %v13923_v7, %v10442_v43 }
 0x380   :  { %v1680_v51 = vpop.f32.mrf.mxu3  ;;  %v1265_v11 = vpop.f32.mrf.mxu0  ;;  %v1542_v26 = vadd.f32 %v1541_v62, %v10440_v41  ;;  %v866_v23 = vadd.f32 %v13918_v9, %v10440_v41  ;;  %v2079_v58 = vmax.f32 %v1871_v28, 0.0 }
 0x381   :  { %v2284_v32 = vpack.c.bf16 %v2280_v54, %v2279_v21  ;;  %v1404_v14 = vpop.f32.mrf.mxu1  ;;  %v1681_v50 = vadd.f32 %v1680_v51, %v10442_v43  ;;  %v1266_v29 = vadd.f32 %v1265_v11, %v10420_v22  ;;  %v13919_v21 = vld [vmem:[#allocation128_spill] sm:$0xff]  ;;  %v13920_v54 = vld [vmem:[#allocation129_spill] sm:$0xff] }
 0x382   :  { %v1005_v2 = vadd.f32 %v13919_v21, %v10442_v43  ;;  %v590_v62 = vadd.f32 %v13920_v54, %v10420_v22  ;;  %v1872_v12 = vmax.f32 %v866_v23, %v1542_v26  ;;  %v1405_v11 = vadd.f32 %v1404_v14, %v10428_v44  ;;  %v13924_v14 = vld [vmem:[#allocation137_spill] sm:$0xff] }
 0x383   :  { %2288 = vst.msk [vmem:[#allocation2 + $0x138] sm:$0xff] %vm10500_vm3, %v2284_v32  ;;  %v2078_v32 = vmax.f32 %v1870_v40, 0.0 }
 0x384   :  { %v1873_v30 = vmax.f32 %v1005_v2, %v1681_v50  ;;  %v1874_v63 = vmax.f32 %v590_v62, %v1266_v29  ;;  %v2080_v26 = vmax.f32 %v1872_v12, 0.0  ;;  %v13926_v2 = vld [vmem:[#allocation131_spill] sm:$0xff]  ;;  %v7512_v12 = vld [vmem:[%s13576_s4 + $0x1e8] sm:$0xf0] }
 0x385   :  { %v868_v54 = vadd.f32 %v13926_v2, %v10440_v41 }
 0x386   :  { %v2081_v50 = vmax.f32 %v1873_v30, 0.0  ;;  %v2082_v23 = vmax.f32 %v1874_v63, 0.0 }
 0x387   :  { %v1543_v59 = vpop.f32.mrf.mxu2 }
 0x388   :  { %v11297_v34 = vpop.f32.mrf.mxu3  ;;  %v1268_v5 = vpop.f32.mrf.mxu0  ;;  %v1544_v29 = vadd.f32 %v1543_v59, %v10440_v41 }
 0x389   :  { %v1269_v17 = vadd.f32 %v1268_v5, %v10420_v22  ;;  %v1407_v19 = vpop.f32.mrf.mxu1 }
 0x38a   :  { %v1408_v39 = vadd.f32 %v1407_v19, %v10428_v44 }
 0x38b   :  { %v1878_v4 = vmax.f32 %v593_v49, %v1269_v17  ;;  %3016 = vmatmul.bf16.gmra.mxu0 %v11299_v35  ;;  %v595_v49 = vadd.f32 %v13924_v14, %v10420_v22  ;;  %v1875_v17 = vmax.f32 %v729_v36, %v1405_v11  ;;  %v1683_v11 = vadd.f32 %v11297_v34, %v10442_v43  ;;  %v9048_v36 = vld [vmem:[%s13576_s4 + $0x264] sm:$0xf] }
 0x38c   :  { %v1879_v51 = vmax.f32 %v732_v55, %v1408_v39  ;;  %3080 = vmatmul.bf16.gmra.mxu1 %v11303_v38  ;;  %3144 = vmatmul.bf16.gmra.mxu2 %v11307_v18  ;;  %v734_v55 = vadd.f32 %v13925_v13, %v10428_v44  ;;  %v1876_v34 = vmax.f32 %v868_v54, %v1544_v29  ;;  %v8947_v13 = vld [vmem:[#allocation2 + $0xb4] sm:$0xf0]  ;;  %v8944_v29 = vld [vmem:[#allocation2 + $0xa4] sm:$0xf] }
 0x38d   :  { %v2086_v56 = vmax.f32 %v1878_v4, 0.0  ;;  %7687 = vmatmul.msk.bf16.gmra.mxu3 %vm2959_vm4, %v11313_v1  ;;  %v2083_v30 = vmax.f32 %v1875_v17, 0.0 }
 0x38e   :  { %v2087_v57 = vmax.f32 %v1879_v51, 0.0 }
 0x38f   :  { %v2289_v15 = vmax.f32 %v2078_v32, %v2086_v56  ;;  %v1546_v53 = vpop.f32.mrf.mxu2  ;;  %v9032_v32 = vld [vmem:[%s13576_s4 + $0x1e4] sm:$0xf] }
 0x390   :  { %v2290_v5 = vmax.f32 %v2079_v58, %v2087_v57  ;;  %v1547_v0 = vadd.f32 %v1546_v53, %v10440_v41  ;;  %v1685_v3 = vpop.f32.mrf.mxu3  ;;  %v1270_v40 = vpop.f32.mrf.mxu0  ;;  %v7515_v45 = vor.u32 %v9032_v32, %v7512_v12  ;;  %v7576_v58 = vld [vmem:[%s13576_s4 + $0x268] sm:$0xf0]  ;;  %v2084_v32 = vmax.f32 %v1876_v34, 0.0 }
 0x391   :  { %v1686_v19 = vadd.f32 %v1685_v3, %v10442_v43  ;;  %v1271_v25 = vadd.f32 %v1270_v40, %v10420_v22  ;;  %v1409_v28 = vpop.f32.mrf.mxu1  ;;  %v7579_v7 = vor.u32 %v9048_v36, %v7576_v58 }
 0x392   :  { %v2297_v39 = vpack.c.bf16 %v2290_v5, %v2289_v15  ;;  %v1880_v61 = vmax.f32 %v871_v60, %v1547_v0  ;;  %v1410_v9 = vadd.f32 %v1409_v28, %v10428_v44  ;;  %v8946_v60 = vld [vmem:[#allocation2 + $0xac] sm:$0xf0]  ;;  %3252 = vmatpush.bf16.msrb.mxu0 %v7515_v45  ;;  %v13929_v0 = vld [vmem:[#allocation140_spill] sm:$0xff]  ;;  %v7376_v28 = vld [vmem:[#allocation2 + $0xb8] sm:$0xf0] }
 0x393   :  { %v1881_v4 = vmax.f32 %v1010_v8, %v1686_v19  ;;  %v1882_v21 = vmax.f32 %v595_v49, %v1271_v25  ;;  %v13927_v8 = vld [vmem:[#allocation132_spill] sm:$0xff]  ;;  %v7368_v49 = vld [vmem:[#allocation2 + $0xb0] sm:$0xf0]  ;;  %v1012_v3 = vadd.f32 %v13929_v0, %v10442_v43  ;;  %v7366_v25 = vld [vmem:[#allocation2 + $0xa0] sm:$0xf]  ;;  %3316 = vmatpush.bf16.msrb.mxu1 %v7579_v7 }
 0x394   :  { %2301 = vst [vmem:[#allocation2 + $0x140] sm:$0xff] %v2297_v39  ;;  %v2088_v62 = vmax.f32 %v1880_v61, 0.0  ;;  %v1883_v51 = vmax.f32 %v734_v55, %v1410_v9  ;;  %v1007_v63 = vadd.f32 %v13927_v8, %v10442_v43  ;;  %v13928_v55 = vld [vmem:[#allocation139_spill] sm:$0xff]  ;;  %v11365_v54 = vor.u32 %v8944_v29, %v7368_v49  ;;  %v7632_v45 = vld [vmem:[%s13576_s4 + $0x2d8] sm:$0xf0] }
 0x395   :  { %v2089_v59 = vmax.f32 %v1881_v4, 0.0  ;;  %v2090_v56 = vmax.f32 %v1882_v21, 0.0  ;;  %v873_v5 = vadd.f32 %v13928_v55, %v10440_v41  ;;  %v7374_v4 = vld [vmem:[#allocation2 + $0xa8] sm:$0xf]  ;;  %v9030_v55 = vld [vmem:[%s13576_s4 + $0x1d4] sm:$0xf] }
 0x396   :  { %v2291_v57 = vmax.f32 %v2080_v26, %v2088_v62  ;;  %v2091_v42 = vmax.f32 %v1883_v51, 0.0  ;;  %v11367_v62 = vor.u32 %v8947_v13, %v7374_v4  ;;  %v8945_v51 = vld [vmem:[#allocation2 + $0xac] sm:$0xf]  ;;  %v8950_v13 = vld [vmem:[#allocation2 + $0xcc] sm:$0xf0] }
 0x397   :  { %v2292_v15 = vmax.f32 %v2081_v50, %v2089_v59  ;;  %v2293_v53 = vmax.f32 %v2082_v23, %v2090_v56  ;;  %v1548_v14 = vpop.f32.mrf.mxu2  ;;  %v1877_v50 = vmax.f32 %v1007_v63, %v1683_v11  ;;  %v11363_v23 = vor.u32 %v8946_v60, %v7366_v25  ;;  %v9062_v56 = vld [vmem:[%s13576_s4 + $0x2d4] sm:$0xf] }
 0x398   :  { %v2294_v40 = vmax.f32 %v2083_v30, %v2091_v42  ;;  %v1549_v26 = vadd.f32 %v1548_v14, %v10440_v41  ;;  %v1687_v17 = vpop.f32.mrf.mxu3  ;;  %v1273_v19 = vpop.f32.mrf.mxu0  ;;  %v11372_v11 = vor.u32 %v8945_v51, %v7376_v28  ;;  %v7635_v30 = vor.u32 %v9062_v56, %v7632_v45  ;;  %v7672_v42 = vld [vmem:[%s13576_s4 + $0x328] sm:$0xf0]  ;;  %v13932_v4 = vld [vmem:[#allocation149_spill] sm:$0xff]  ;;  %v8948_v56 = vld [vmem:[#allocation2 + $0xc4] sm:$0xf] }
 0x399   :  { %v2298_v39 = vpack.c.bf16 %v2292_v15, %v2291_v57  ;;  %v1688_v61 = vadd.f32 %v1687_v17, %v10442_v43  ;;  %v1412_v9 = vpop.f32.mrf.mxu1  ;;  %v2085_v36 = vmax.f32 %v1877_v50, 0.0  ;;  %v9072_v57 = vld [vmem:[%s13576_s4 + $0x324] sm:$0xf]  ;;  %v1274_v49 = vadd.f32 %v1273_v19, %v10420_v22  ;;  %v7568_v17 = vld [vmem:[%s13576_s4 + $0x258] sm:$0xf0]  ;;  %v13930_v19 = vld [vmem:[#allocation141_spill] sm:$0xff] }
 0x39a   :  { %v2299_v21 = vpack.c.bf16 %v2294_v40, %v2293_v53  ;;  %v1884_v2 = vmax.f32 %v873_v5, %v1549_v26  ;;  %v7675_v7 = vor.u32 %v9072_v57, %v7672_v42  ;;  %3381 = vmatpush.bf16.msrb.mxu2 %v7635_v30  ;;  %v7504_v5 = vld [vmem:[%s13576_s4 + $0x1d8] sm:$0xf0]  ;;  %v1413_v0 = vadd.f32 %v1412_v9, %v10428_v44  ;;  %v9046_v26 = vld [vmem:[%s13576_s4 + $0x254] sm:$0xf]  ;;  %v7382_v50 = vld [vmem:[#allocation2 + $0xc0] sm:$0xf] }
 0x39b   :  { %2302 = vst.msk [vmem:[#allocation2 + $0x148] sm:$0xff] %vm10500_vm3, %v2298_v39  ;;  %v1885_v12 = vmax.f32 %v1012_v3, %v1688_v61  ;;  %3021 = vmatmul.bf16.gmra.mxu0 %v11363_v23  ;;  %v7384_v3 = vld [vmem:[#allocation2 + $0xd0] sm:$0xf0]  ;;  %v7507_v40 = vor.u32 %v9030_v55, %v7504_v5  ;;  %v598_v25 = vadd.f32 %v13930_v19, %v10420_v22  ;;  %v8951_v39 = vld [vmem:[#allocation2 + $0xd4] sm:$0xf0]  ;;  %v13934_v5 = vld [vmem:[#allocation143_spill] sm:$0xff] }
 0x39c   :  { %2303 = vst [vmem:[#allocation2 + $0x150] sm:$0xff] %v2299_v21  ;;  %v2092_v59 = vmax.f32 %v1884_v2, 0.0  ;;  %3085 = vmatmul.bf16.gmra.mxu1 %v11365_v54  ;;  %3149 = vmatmul.bf16.gmra.mxu2 %v11367_v62  ;;  %v7571_v61 = vor.u32 %v9046_v26, %v7568_v17  ;;  %v13931_v9 = vld [vmem:[#allocation142_spill] sm:$0xff]  ;;  %v603_v21 = vadd.f32 %v13932_v4, %v10420_v22  ;;  %v8949_v55 = vld [vmem:[#allocation2 + $0xcc] sm:$0xf] }
 0x39d   :  { %v2093_v58 = vmax.f32 %v1885_v12, 0.0  ;;  %7688 = vmatmul.msk.bf16.gmra.mxu3 %vm2959_vm4, %v11372_v11  ;;  %v737_v29 = vadd.f32 %v13931_v9, %v10428_v44  ;;  %v13933_v2 = vld [vmem:[#allocation150_spill] sm:$0xff]  ;;  %3253 = vmatpush.bf16.msrb.mxu0 %v7507_v40  ;;  %v11422_v42 = vor.u32 %v8948_v56, %v7384_v3  ;;  %v13935_v26 = vld [vmem:[#allocation144_spill] sm:$0xff] }
 0x39e   :  { %v2295_v60 = vmax.f32 %v2084_v32, %v2092_v59  ;;  %3448 = vmatpush.bf16.msrb.mxu3 %v7675_v7  ;;  %v742_v51 = vadd.f32 %v13933_v2, %v10428_v44  ;;  %v11418_v59 = vor.u32 %v8950_v13, %v7382_v50  ;;  %v7392_v45 = vld [vmem:[#allocation2 + $0xd8] sm:$0xf0]  ;;  %3317 = vmatpush.bf16.msrb.mxu1 %v7571_v61  ;;  %v13938_v2 = vld [vmem:[#allocation151_spill] sm:$0xff] }
 0x39f   :  { %v2296_v8 = vmax.f32 %v2085_v36, %v2093_v58  ;;  %v1551_v63 = vpop.f32.mrf.mxu2  ;;  %v1886_v36 = vmax.f32 %v598_v25, %v1274_v49  ;;  %v1887_v7 = vmax.f32 %v737_v29, %v1413_v0  ;;  %v876_v49 = vadd.f32 %v13934_v5, %v10440_v41  ;;  %v13937_v61 = vld [vmem:[#allocation146_spill] sm:$0xff] }
 0x3a0   :  { %v1690_v34 = vpop.f32.mrf.mxu3  ;;  %v1275_v15 = vpop.f32.mrf.mxu0  ;;  %v1552_v58 = vadd.f32 %v1551_v63, %v10440_v41  ;;  %v11432_v3 = vor.u32 %v8949_v55, %v7392_v45  ;;  %v1015_v0 = vadd.f32 %v13935_v26, %v10442_v43  ;;  %v739_v9 = vadd.f32 %v13937_v61, %v10428_v44 }
 0x3a1   :  { %v2300_v53 = vpack.c.bf16 %v2296_v8, %v2295_v60  ;;  %v1414_v14 = vpop.f32.mrf.mxu1  ;;  %v7390_v60 = vld [vmem:[#allocation2 + $0xc8] sm:$0xf]  ;;  %v1691_v8 = vadd.f32 %v1690_v34, %v10442_v43  ;;  %v1276_v63 = vadd.f32 %v1275_v15, %v10420_v22  ;;  %v13936_v34 = vld [vmem:[#allocation145_spill] sm:$0xff]  ;;  %v2094_v25 = vmax.f32 %v1886_v36, 0.0 }
 0x3a2   :  { %v11426_v13 = vor.u32 %v8951_v39, %v7390_v60  ;;  %v600_v17 = vadd.f32 %v13936_v34, %v10420_v22  ;;  %v1888_v50 = vmax.f32 %v876_v49, %v1552_v58  ;;  %v1415_v15 = vadd.f32 %v1414_v14, %v10428_v44  ;;  %v13940_v14 = vld [vmem:[#allocation153_spill] sm:$0xff] }
 0x3a3   :  { %2304 = vst.msk [vmem:[#allocation2 + $0x158] sm:$0xff] %vm10500_vm3, %v2300_v53  ;;  %v2095_v29 = vmax.f32 %v1887_v7, 0.0  ;;  %v1889_v4 = vmax.f32 %v1015_v0, %v1691_v8 }
 0x3a4   :  { %v1890_v45 = vmax.f32 %v600_v17, %v1276_v63  ;;  %v2096_v5 = vmax.f32 %v1888_v50, 0.0  ;;  %v1891_v49 = vmax.f32 %v739_v9, %v1415_v15 }
 0x3a5   :  { %v2097_v0 = vmax.f32 %v1889_v4, 0.0  ;;  %v9060_v4 = vld [vmem:[%s13576_s4 + $0x2c4] sm:$0xf] }
 0x3a7   :  { %v11408_v28 = vpop.f32.mrf.mxu2 }
 0x3a8   :  { %v11416_v32 = vpop.f32.mrf.mxu3  ;;  %v1278_v12 = vpop.f32.mrf.mxu0 }
 0x3a9   :  { %v1279_v30 = vadd.f32 %v1278_v12, %v10420_v22  ;;  %v1417_v57 = vpop.f32.mrf.mxu1  ;;  %v13939_v12 = vld [vmem:[#allocation152_spill] sm:$0xff] }
 0x3aa   :  { %v1418_v53 = vadd.f32 %v1417_v57, %v10428_v44  ;;  %v1020_v56 = vadd.f32 %v13939_v12, %v10442_v43  ;;  %v13941_v57 = vld [vmem:[#allocation154_spill] sm:$0xff] }
 0x3ab   :  { %v1894_v40 = vmax.f32 %v603_v21, %v1279_v30  ;;  %3026 = vmatmul.bf16.gmra.mxu0 %v11418_v59  ;;  %v605_v30 = vadd.f32 %v13940_v14, %v10420_v22  ;;  %v744_v60 = vadd.f32 %v13941_v57, %v10428_v44  ;;  %v8954_v14 = vld [vmem:[#allocation2 + $0xec] sm:$0xf0] }
 0x3ac   :  { %v1895_v19 = vmax.f32 %v742_v51, %v1418_v53  ;;  %3090 = vmatmul.bf16.gmra.mxu1 %v11422_v42  ;;  %3154 = vmatmul.bf16.gmra.mxu2 %v11426_v13  ;;  %v881_v51 = vadd.f32 %v13938_v2, %v10440_v41  ;;  %v7624_v2 = vld [vmem:[%s13576_s4 + $0x2c8] sm:$0xf0] }
 0x3ad   :  { %v2102_v39 = vmax.f32 %v1894_v40, 0.0  ;;  %7689 = vmatmul.msk.bf16.gmra.mxu3 %vm2959_vm4, %v11432_v3 }
 0x3ae   :  { %v2103_v21 = vmax.f32 %v1895_v19, 0.0 }
 0x3af   :  { %v2305_v36 = vmax.f32 %v2094_v25, %v2102_v39  ;;  %v1556_v58 = vpop.f32.mrf.mxu2  ;;  %v2098_v25 = vmax.f32 %v1890_v45, 0.0  ;;  %v1554_v39 = vadd.f32 %v11408_v28, %v10440_v41  ;;  %v2099_v45 = vmax.f32 %v1891_v49, 0.0 }
 0x3b0   :  { %v2306_v53 = vmax.f32 %v2095_v29, %v2103_v21  ;;  %v1557_v7 = vadd.f32 %v1556_v58, %v10440_v41  ;;  %v1695_v8 = vpop.f32.mrf.mxu3  ;;  %v1280_v55 = vpop.f32.mrf.mxu0  ;;  %v13942_v21 = vld [vmem:[#allocation147_spill] sm:$0xff] }
 0x3b1   :  { %v1696_v40 = vadd.f32 %v1695_v8, %v10442_v43  ;;  %v1281_v26 = vadd.f32 %v1280_v55, %v10420_v22  ;;  %v1419_v63 = vpop.f32.mrf.mxu1  ;;  %v878_v50 = vadd.f32 %v13942_v21, %v10440_v41  ;;  %v7400_v55 = vld [vmem:[#allocation2 + $0xf0] sm:$0xf0] }
 0x3b2   :  { %v2313_v34 = vpack.c.bf16 %v2306_v53, %v2305_v36  ;;  %v1896_v17 = vmax.f32 %v881_v51, %v1557_v7  ;;  %v1420_v19 = vadd.f32 %v1419_v63, %v10428_v44  ;;  %v1693_v51 = vadd.f32 %v11416_v32, %v10442_v43  ;;  %v13945_v63 = vld [vmem:[#allocation156_spill] sm:$0xff] }
 0x3b3   :  { %v1897_v61 = vmax.f32 %v1020_v56, %v1696_v40  ;;  %v1898_v29 = vmax.f32 %v605_v30, %v1281_v26  ;;  %v7627_v56 = vor.u32 %v9060_v4, %v7624_v2  ;;  %v13943_v30 = vld [vmem:[#allocation148_spill] sm:$0xff]  ;;  %v8955_v40 = vld [vmem:[#allocation2 + $0xf4] sm:$0xf0]  ;;  %v13944_v26 = vld [vmem:[#allocation155_spill] sm:$0xff] }
 0x3b4   :  { %2317 = vst [vmem:[#allocation2 + $0x160] sm:$0xff] %v2313_v34  ;;  %v2104_v15 = vmax.f32 %v1896_v17, 0.0  ;;  %v1899_v9 = vmax.f32 %v744_v60, %v1420_v19  ;;  %v1017_v57 = vadd.f32 %v13943_v30, %v10442_v43  ;;  %v1892_v60 = vmax.f32 %v878_v50, %v1554_v39  ;;  %v7496_v30 = vld [vmem:[%s13576_s4 + $0x1c8] sm:$0xf0] }
 0x3b5   :  { %v2105_v28 = vmax.f32 %v1897_v61, 0.0  ;;  %v2106_v12 = vmax.f32 %v1898_v29, 0.0  ;;  %3382 = vmatpush.bf16.msrb.mxu2 %v7627_v56  ;;  %v883_v32 = vadd.f32 %v13944_v26, %v10440_v41  ;;  %v1022_v34 = vadd.f32 %v13945_v63, %v10442_v43  ;;  %v7398_v61 = vld [vmem:[#allocation2 + $0xe0] sm:$0xf]  ;;  %v7408_v29 = vld [vmem:[#allocation2 + $0xf8] sm:$0xf0] }
 0x3b6   :  { %v2307_v36 = vmax.f32 %v2096_v5, %v2104_v15  ;;  %v2107_v58 = vmax.f32 %v1899_v9, 0.0  ;;  %v1893_v39 = vmax.f32 %v1017_v57, %v1693_v51  ;;  %v11477_v50 = vor.u32 %v8954_v14, %v7398_v61  ;;  %v8952_v15 = vld [vmem:[#allocation2 + $0xe4] sm:$0xf]  ;;  %v7406_v9 = vld [vmem:[#allocation2 + $0xe8] sm:$0xf] }
 0x3b7   :  { %v2308_v53 = vmax.f32 %v2097_v0, %v2105_v28  ;;  %v2309_v7 = vmax.f32 %v2098_v25, %v2106_v12  ;;  %v1558_v8 = vpop.f32.mrf.mxu2  ;;  %v11479_v28 = vor.u32 %v8952_v15, %v7400_v55  ;;  %v11481_v12 = vor.u32 %v8955_v40, %v7406_v9  ;;  %v8953_v56 = vld [vmem:[#allocation2 + $0xec] sm:$0xf]  ;;  %v9028_v14 = vld [vmem:[%s13576_s4 + $0x1c4] sm:$0xf]  ;;  %v7616_v61 = vld [vmem:[%s13576_s4 + $0x2b8] sm:$0xf0] }
 0x3b8   :  { %v2310_v49 = vmax.f32 %v2099_v45, %v2107_v58  ;;  %v1559_v5 = vadd.f32 %v1558_v8, %v10440_v41  ;;  %v1697_v17 = vpop.f32.mrf.mxu3  ;;  %v1283_v19 = vpop.f32.mrf.mxu0  ;;  %13946 = vst [vmem:[#allocation3_spill] sm:$0xff] %v11477_v50  ;;  %v2100_v45 = vmax.f32 %v1892_v60, 0.0  ;;  %v2101_v57 = vmax.f32 %v1893_v39, 0.0  ;;  %v7560_v8 = vld [vmem:[%s13576_s4 + $0x248] sm:$0xf0]  ;;  %v13950_v15 = vld [vmem:[#allocation157_spill] sm:$0xff] }
 0x3b9   :  { %v2314_v0 = vpack.c.bf16 %v2308_v53, %v2307_v36  ;;  %v1698_v25 = vadd.f32 %v1697_v17, %v10442_v43  ;;  %v1422_v21 = vpop.f32.mrf.mxu1  ;;  %13947 = vst [vmem:[#allocation4_spill] sm:$0xff] %v11479_v28  ;;  %v11486_v36 = vor.u32 %v8953_v56, %v7408_v29  ;;  %v7499_v53 = vor.u32 %v9028_v14, %v7496_v30  ;;  %v9058_v17 = vld [vmem:[%s13576_s4 + $0x2b4] sm:$0xf] }
 0x3ba   :  { %v2315_v4 = vpack.c.bf16 %v2310_v49, %v2309_v7  ;;  %v1900_v2 = vmax.f32 %v883_v32, %v1559_v5  ;;  %13948 = vst [vmem:[#allocation7_spill] sm:$0xff] %v11481_v12  ;;  %v9044_v7 = vld [vmem:[%s13576_s4 + $0x244] sm:$0xf]  ;;  %v7619_v29 = vor.u32 %v9058_v17, %v7616_v61  ;;  %v1284_v39 = vadd.f32 %v1283_v19, %v10420_v22  ;;  %v13953_v19 = vld [vmem:[#allocation160_spill] sm:$0xff] }
 0x3bb   :  { %2318 = vst.msk [vmem:[#allocation2 + $0x168] sm:$0xff] %vm10500_vm3, %v2314_v0  ;;  %v1901_v51 = vmax.f32 %v1022_v34, %v1698_v25  ;;  %3031 = vmatmul.bf16.gmra.mxu0 %v11477_v50  ;;  %v7563_v40 = vor.u32 %v9044_v7, %v7560_v8  ;;  %v1423_v0 = vadd.f32 %v1422_v21, %v10428_v44  ;;  %v8958_v25 = vld [vmem:[#allocation2 + $0x10c] sm:$0xf0] }
 0x3bc   :  { %13949 = vst [vmem:[#allocation8_spill] sm:$0xff] %v11486_v36  ;;  %v2108_v58 = vmax.f32 %v1900_v2, 0.0  ;;  %3095 = vmatmul.bf16.gmra.mxu1 %v11479_v28  ;;  %3159 = vmatmul.bf16.gmra.mxu2 %v11481_v12  ;;  %v608_v9 = vadd.f32 %v13950_v15, %v10420_v22  ;;  %v11526_v30 = vadd.f32 %v13953_v19, %v10442_v43  ;;  %v13954_v21 = vld [vmem:[#allocation161_spill] sm:$0xff]  ;;  %v8957_v12 = vld [vmem:[#allocation2 + $0x10c] sm:$0xf]  ;;  %v13959_v28 = vld [vmem:[#allocation162_spill] sm:$0xff] }
 0x3bd   :  { %2319 = vst [vmem:[#allocation2 + $0x170] sm:$0xff] %v2315_v4  ;;  %v2109_v60 = vmax.f32 %v1901_v51, 0.0  ;;  %7690 = vmatmul.msk.bf16.gmra.mxu3 %vm2959_vm4, %v11486_v36  ;;  %3254 = vmatpush.bf16.msrb.mxu0 %v7499_v53  ;;  %v13951_v4 = vld [vmem:[#allocation158_spill] sm:$0xff]  ;;  %v11548_v50 = vadd.f32 %v13959_v28, %v10428_v44  ;;  %v13962_v28 = vld [vmem:[#allocation167_spill] sm:$0xff] }
 0x3be   :  { %v2311_v55 = vmax.f32 %v2100_v45, %v2108_v58  ;;  %3318 = vmatpush.bf16.msrb.mxu1 %v7563_v40  ;;  %3383 = vmatpush.bf16.msrb.mxu2 %v7619_v29  ;;  %v747_v2 = vadd.f32 %v13951_v4, %v10428_v44  ;;  %v7416_v45 = vld [vmem:[#allocation2 + $0x110] sm:$0xf0]  ;;  %v8959_v51 = vld [vmem:[#allocation2 + $0x114] sm:$0xf0]  ;;  %v13952_v58 = vld [vmem:[#allocation159_spill] sm:$0xff]  ;;  %v1902_v17 = vmax.f32 %v608_v9, %v1284_v39 }
 0x3bf   :  { %v2312_v26 = vmax.f32 %v2101_v57, %v2109_v60  ;;  %v1561_v32 = vpop.f32.mrf.mxu2  ;;  %v11522_v14 = vadd.f32 %v13952_v58, %v10440_v41  ;;  %v11530_v57 = vadd.f32 %v13954_v21, %v10420_v22  ;;  %v13955_v60 = vld [vmem:[#allocation165_spill] sm:$0xff]  ;;  %v7424_v40 = vld [vmem:[#allocation2 + $0x118] sm:$0xf0]  ;;  %v8956_v4 = vld [vmem:[#allocation2 + $0x104] sm:$0xf] }
 0x3c0   :  { %v1700_v63 = vpop.f32.mrf.mxu3  ;;  %v1285_v34 = vpop.f32.mrf.mxu0  ;;  %v613_v53 = vadd.f32 %v13955_v60, %v10420_v22  ;;  %v7422_v58 = vld [vmem:[#allocation2 + $0x108] sm:$0xf]  ;;  %v1903_v19 = vmax.f32 %v747_v2, %v1423_v0  ;;  %v11542_v60 = vor.u32 %v8956_v4, %v7416_v45  ;;  %v1562_v39 = vadd.f32 %v1561_v32, %v10440_v41  ;;  %v13961_v0 = vld [vmem:[#allocation163_spill] sm:$0xff] }
 0x3c1   :  { %v2316_v49 = vpack.c.bf16 %v2312_v26, %v2311_v55  ;;  %v1424_v5 = vpop.f32.mrf.mxu1  ;;  %v7414_v55 = vld [vmem:[#allocation2 + $0x100] sm:$0xf]  ;;  %v13956_v26 = vld [vmem:[#allocation166_spill] sm:$0xff]  ;;  %v11544_v36 = vor.u32 %v8959_v51, %v7422_v58  ;;  %v11556_v2 = vadd.f32 %v13961_v0, %v10440_v41  ;;  %v1701_v45 = vadd.f32 %v1700_v63, %v10442_v43 }
 0x3c2   :  { %v11539_v15 = vor.u32 %v8958_v25, %v7414_v55  ;;  %13957 = vst [vmem:[#allocation9_spill] sm:$0xff] %v11542_v60  ;;  %v11552_v25 = vor.u32 %v8957_v12, %v7424_v40  ;;  %v2110_v32 = vmax.f32 %v1902_v17, 0.0  ;;  %v9026_v12 = vld [vmem:[%s13576_s4 + $0x1b4] sm:$0xf]  ;;  %v7488_v63 = vld [vmem:[%s13576_s4 + $0x1b8] sm:$0xf0]  ;;  %v1904_v58 = vmax.f32 %v11522_v14, %v1562_v39 }
 0x3c3   :  { %2320 = vst.msk [vmem:[#allocation2 + $0x178] sm:$0xff] %vm10500_vm3, %v2316_v49  ;;  %v752_v49 = vadd.f32 %v13956_v26, %v10428_v44  ;;  %v2111_v40 = vmax.f32 %v1903_v19, 0.0  ;;  %v1425_v26 = vadd.f32 %v1424_v5, %v10428_v44  ;;  %v7552_v17 = vld [vmem:[%s13576_s4 + $0x238] sm:$0xf0]  ;;  %v13964_v5 = vld [vmem:[#allocation169_spill] sm:$0xff] }
 0x3c4   :  { %13958 = vst [vmem:[#allocation10_spill] sm:$0xff] %v11544_v36  ;;  %v615_v0 = vadd.f32 %v13964_v5, %v10420_v22 }
 0x3c5   :  { %13960 = vst [vmem:[#allocation5_spill] sm:$0xff] %v11552_v25 }
 0x3c7   :  { %v11518_v56 = vpop.f32.mrf.mxu2 }
 0x3c8   :  { %v11534_v7 = vpop.f32.mrf.mxu3  ;;  %v1288_v8 = vpop.f32.mrf.mxu0 }
 0x3c9   :  { %v1289_v61 = vadd.f32 %v1288_v8, %v10420_v22  ;;  %v1427_v29 = vpop.f32.mrf.mxu1  ;;  %v891_v8 = vadd.f32 %v13962_v28, %v10440_v41 }
 0x3ca   :  { %v1428_v21 = vadd.f32 %v1427_v29, %v10428_v44  ;;  %v13963_v29 = vld [vmem:[#allocation168_spill] sm:$0xff] }
 0x3cb   :  { %v1910_v9 = vmax.f32 %v613_v53, %v1289_v61  ;;  %3036 = vmatmul.bf16.gmra.mxu0 %v11539_v15  ;;  %v1286_v53 = vadd.f32 %v1285_v34, %v10420_v22  ;;  %v7491_v61 = vor.u32 %v9026_v12, %v7488_v63  ;;  %v9042_v34 = vld [vmem:[%s13576_s4 + $0x234] sm:$0xf]  ;;  %v1030_v4 = vadd.f32 %v13963_v29, %v10442_v43 }
 0x3cc   :  { %v1911_v51 = vmax.f32 %v752_v49, %v1428_v21  ;;  %3100 = vmatmul.bf16.gmra.mxu1 %v11542_v60  ;;  %3164 = vmatmul.bf16.gmra.mxu2 %v11544_v36  ;;  %v7555_v19 = vor.u32 %v9042_v34, %v7552_v17  ;;  %v13965_v36 = vld [vmem:[#allocation170_spill] sm:$0xff]  ;;  %v1703_v34 = vadd.f32 %v11534_v7, %v10442_v43 }
 0x3cd   :  { %v2118_v55 = vmax.f32 %v1910_v9, 0.0  ;;  %7691 = vmatmul.msk.bf16.gmra.mxu3 %vm2959_vm4, %v11552_v25  ;;  %3255 = vmatpush.bf16.msrb.mxu0 %v7491_v61  ;;  %v754_v60 = vadd.f32 %v13965_v36, %v10428_v44  ;;  %v1906_v29 = vmax.f32 %v11530_v57, %v1286_v53  ;;  %v7608_v36 = vld [vmem:[%s13576_s4 + $0x2a8] sm:$0xf0]  ;;  %v2112_v57 = vmax.f32 %v1904_v58, 0.0 }
 0x3ce   :  { %v2119_v49 = vmax.f32 %v1911_v51, 0.0  ;;  %v1905_v51 = vmax.f32 %v11526_v30, %v1701_v45  ;;  %3319 = vmatpush.bf16.msrb.mxu1 %v7555_v19  ;;  %v13966_v58 = vld [vmem:[#allocation164_spill] sm:$0xff] }
 0x3cf   :  { %v2321_v21 = vmax.f32 %v2110_v32, %v2118_v55  ;;  %v1566_v9 = vpop.f32.mrf.mxu2  ;;  %v1907_v55 = vmax.f32 %v11548_v50, %v1425_v26  ;;  %v1564_v50 = vadd.f32 %v11518_v56, %v10440_v41  ;;  %v13967_v56 = vld [vmem:[#allocation171_spill] sm:$0xff] }
 0x3d0   :  { %v2322_v28 = vmax.f32 %v2111_v40, %v2119_v49  ;;  %v1567_v12 = vadd.f32 %v1566_v9, %v10440_v41  ;;  %v1705_v63 = vpop.f32.mrf.mxu3  ;;  %v1290_v25 = vpop.f32.mrf.mxu0  ;;  %v9056_v49 = vld [vmem:[%s13576_s4 + $0x2a4] sm:$0xf]  ;;  %v8962_v9 = vld [vmem:[#allocation2 + $0x12c] sm:$0xf0] }
 0x3d1   :  { %v1706_v14 = vadd.f32 %v1705_v63, %v10442_v43  ;;  %v1291_v39 = vadd.f32 %v1290_v25, %v10420_v22  ;;  %v1429_v32 = vpop.f32.mrf.mxu1  ;;  %v7611_v22 = vor.u32 %v9056_v49, %v7608_v36  ;;  %v2113_v25 = vmax.f32 %v1905_v51, 0.0  ;;  %v7432_v51 = vld [vmem:[#allocation2 + $0x130] sm:$0xf0]  ;;  %v8960_v36 = vld [vmem:[#allocation2 + $0x124] sm:$0xf] }
 0x3d2   :  { %v2329_v30 = vpack.c.bf16 %v2322_v28, %v2321_v21  ;;  %v1912_v45 = vmax.f32 %v891_v8, %v1567_v12  ;;  %v1430_v40 = vadd.f32 %v1429_v32, %v10428_v44  ;;  %v2114_v44 = vmax.f32 %v1906_v29, 0.0 }
 0x3d3   :  { %v1913_v53 = vmax.f32 %v1030_v4, %v1706_v14  ;;  %v1914_v61 = vmax.f32 %v615_v0, %v1291_v39  ;;  %3384 = vmatpush.bf16.msrb.mxu2 %v7611_v22  ;;  %v1027_v4 = vadd.f32 %v13966_v58, %v10442_v43  ;;  %v2115_v19 = vmax.f32 %v1907_v55, 0.0  ;;  %v7430_v14 = vld [vmem:[#allocation2 + $0x120] sm:$0xf]  ;;  %v8963_v39 = vld [vmem:[#allocation2 + $0x134] sm:$0xf0] }
 0x3d4   :  { %2333 = vst [vmem:[#allocation2 + $0x180] sm:$0xff] %v2329_v30  ;;  %v2120_v8 = vmax.f32 %v1912_v45, 0.0  ;;  %v1915_v26 = vmax.f32 %v754_v60, %v1430_v40  ;;  %v893_v28 = vadd.f32 %v13967_v56, %v10440_v41  ;;  %v13968_v60 = vld [vmem:[#allocation172_spill] sm:$0xff]  ;;  %v1908_v32 = vmax.f32 %v11556_v2, %v1564_v50 }
 0x3d5   :  { %v2121_v17 = vmax.f32 %v1913_v53, 0.0  ;;  %v2122_v21 = vmax.f32 %v1914_v61, 0.0  ;;  %v1032_v12 = vadd.f32 %v13968_v60, %v10442_v43  ;;  %v11611_v49 = vor.u32 %v8962_v9, %v7430_v14  ;;  %v7480_v14 = vld [vmem:[%s13576_s4 + $0x1a8] sm:$0xf0] }
 0x3d6   :  { %v2323_v5 = vmax.f32 %v2112_v57, %v2120_v8  ;;  %v2123_v0 = vmax.f32 %v1915_v26, 0.0  ;;  %v7440_v57 = vld [vmem:[#allocation2 + $0x138] sm:$0xf0]  ;;  %v1909_v53 = vmax.f32 %v1027_v4, %v1703_v34  ;;  %v11614_v8 = vor.u32 %v8960_v36, %v7432_v51  ;;  %v7438_v26 = vld [vmem:[#allocation2 + $0x128] sm:$0xf] }
 0x3d7   :  { %v2324_v63 = vmax.f32 %v2113_v25, %v2121_v17  ;;  %v2325_v29 = vmax.f32 %v2114_v44, %v2122_v21  ;;  %v1568_v7 = vpop.f32.mrf.mxu2  ;;  %v11616_v50 = vor.u32 %v8963_v39, %v7438_v26  ;;  %v2116_v9 = vmax.f32 %v1908_v32, 0.0  ;;  %v9040_v39 = vld [vmem:[%s13576_s4 + $0x224] sm:$0xf]  ;;  %v7448_v36 = vld [vmem:[#allocation2 + $0x150] sm:$0xf0] }
 0x3d8   :  { %v2326_v30 = vmax.f32 %v2115_v19, %v2123_v0  ;;  %v1569_v45 = vadd.f32 %v1568_v7, %v10440_v41  ;;  %v1707_v55 = vpop.f32.mrf.mxu3  ;;  %v3002_v40 = vpop.f32.mrf.mxu0  ;;  %v8961_v41 = vld [vmem:[#allocation2 + $0x12c] sm:$0xf]  ;;  %v2117_v58 = vmax.f32 %v1909_v53, 0.0  ;;  %v9024_v7 = vld [vmem:[%s13576_s4 + $0x1a4] sm:$0xf] }
 0x3d9   :  { %v2330_v61 = vpack.c.bf16 %v2324_v63, %v2323_v5  ;;  %v1708_v22 = vadd.f32 %v1707_v55, %v10442_v43  ;;  %v3066_v25 = vpop.f32.mrf.mxu1  ;;  %v11621_v34 = vor.u32 %v8961_v41, %v7440_v57  ;;  %v7483_v32 = vor.u32 %v9024_v7, %v7480_v14  ;;  %v8966_v55 = vld [vmem:[#allocation2 + $0x14c] sm:$0xf0]  ;;  %v8967_v57 = vld [vmem:[#allocation2 + $0x154] sm:$0xf0]  ;;  %v7456_v26 = vld [vmem:[#allocation2 + $0x158] sm:$0xf0] }
 0x3da   :  { %v2331_v44 = vpack.c.bf16 %v2326_v30, %v2325_v29  ;;  %v1916_v17 = vmax.f32 %v893_v28, %v1569_v45  ;;  %v3067_v2 = vadd.f32 %v3066_v25, %v3002_v40  ;;  %v7544_v30 = vld [vmem:[%s13576_s4 + $0x228] sm:$0xf0]  ;;  %v7446_v25 = vld [vmem:[#allocation2 + $0x140] sm:$0xf] }
 0x3db   :  { %2334 = vst.msk [vmem:[#allocation2 + $0x188] sm:$0xff] %vm10500_vm3, %v2330_v61  ;;  %v1917_v21 = vmax.f32 %v1032_v12, %v1708_v22  ;;  %3041 = vmatmul.bf16.gmra.mxu0 %v11611_v49  ;;  %v7547_v45 = vor.u32 %v9040_v39, %v7544_v30  ;;  %v11643_v46 = vor.u32 %v8966_v55, %v7446_v25  ;;  %v9022_v30 = vld [vmem:[#allocation2 + $0x16c] sm:$0xf0]  ;;  %v7464_v55 = vld [vmem:[#allocation2 + $0x170] sm:$0xf0] }
 0x3dc   :  { %2335 = vst [vmem:[#allocation2 + $0x190] sm:$0xff] %v2331_v44  ;;  %v2124_v43 = vmax.f32 %v1916_v17, 0.0  ;;  %3105 = vmatmul.bf16.gmra.mxu1 %v11614_v8  ;;  %3169 = vmatmul.bf16.gmra.mxu2 %v11616_v50  ;;  %v8964_v17 = vld [vmem:[#allocation2 + $0x144] sm:$0xf] }
 0x3dd   :  { %v2125_v4 = vmax.f32 %v1917_v21, 0.0  ;;  %7692 = vmatmul.msk.bf16.gmra.mxu3 %vm2959_vm4, %v11621_v34  ;;  %3256 = vmatpush.bf16.msrb.mxu0 %v7483_v32 }
 0x3de   :  { %v2327_v19 = vmax.f32 %v2116_v9, %v2124_v43  ;;  %3320 = vmatpush.bf16.msrb.mxu1 %v7547_v45  ;;  %v11647_v9 = vor.u32 %v8964_v17, %v7448_v36  ;;  %v7470_v17 = vld [vmem:[#allocation2 + $0x168] sm:$0xf] }
 0x3df   :  { %v2328_v5 = vmax.f32 %v2117_v58, %v2125_v4  ;;  %v3130_v0 = vpop.f32.mrf.mxu2  ;;  %v8965_v58 = vld [vmem:[#allocation2 + $0x14c] sm:$0xf] }
 0x3e0   :  { %v3131_v51 = vadd.f32 %v3130_v0, %v3067_v2  ;;  %v3194_v56 = vpop.f32.mrf.mxu3  ;;  %v3004_v28 = vpop.f32.mrf.mxu0  ;;  %v7454_v2 = vld [vmem:[#allocation2 + $0x148] sm:$0xf]  ;;  %13969 = vst [vmem:[#allocation6_spill] sm:$0xff] %v11647_v9  ;;  %v11652_v4 = vor.u32 %v8965_v58, %v7456_v26  ;;  %v7924_v0 = vld [vmem:[%s13576_s4 + $0x190] sm:$0xf] }
 0x3e1   :  { %v2332_v60 = vpack.c.bf16 %v2328_v5, %v2327_v19  ;;  %v3068_v12 = vpop.f32.mrf.mxu1  ;;  %v11649_v43 = vor.u32 %v8967_v57, %v7454_v2  ;;  %v7908_v19 = vld [vmem:[%s13576_s4 + $0x170] sm:$0xf]  ;;  %v9015_v5 = vld [vmem:[%s13576_s4 + $0x174] sm:$0xf0]  ;;  %v9021_v2 = vld [vmem:[#allocation2 + $0x16c] sm:$0xf] }
 0x3e2   :  { %v11627_v63 = vadd.f32 %v3194_v56, %v3131_v51  ;;  %v3069_v29 = vadd.f32 %v3068_v12, %v3004_v28  ;;  %13971 = vst [vmem:[#allocation12_spill] sm:$0xff] %v11652_v4  ;;  %v7909_v51 = vor.u32 %v9015_v5, %v7908_v19  ;;  %v9019_v56 = vld [vmem:[%s13576_s4 + $0x194] sm:$0xf0] }
 0x3e3   :  { %2336 = vst.msk [vmem:[#allocation2 + $0x198] sm:$0xff] %vm10500_vm3, %v2332_v60  ;;  %v7925_v60 = vor.u32 %v9019_v56, %v7924_v0  ;;  %v7780_v0 = vld [vmem:[%s13576_s4 + $0x70] sm:$0xf] }
 0x3e4   :  { %13970 = vst [vmem:[#allocation11_spill] sm:$0xff] %v11649_v43  ;;  %3915 = vmatpush.bf16.msra.mxu2 %v7909_v51  ;;  %v8983_v51 = vld [vmem:[%s13576_s4 + $0x74] sm:$0xf0]  ;;  %v7844_v56 = vld [vmem:[%s13576_s4 + $0xf0] sm:$0xf] }
 0x3e5   :  { %3985 = vmatpush.bf16.msra.mxu3 %v7925_v60  ;;  %v7781_v60 = vor.u32 %v8983_v51, %v7780_v0  ;;  %v7772_v0 = vld [vmem:[%s13576_s4 + $0x60] sm:$0xf]  ;;  %v8981_v51 = vld [vmem:[%s13576_s4 + $0x64] sm:$0xf0] }
 0x3e7   :  { %v3132_v40 = vpop.f32.mrf.mxu2  ;;  %3787 = vmatpush.bf16.msra.mxu0 %v7781_v60  ;;  %v7773_v60 = vor.u32 %v8981_v51, %v7772_v0  ;;  %v9011_v0 = vld [vmem:[%s13576_s4 + $0x154] sm:$0xf0] }
 0x3e8   :  { %v3133_v53 = vadd.f32 %v3132_v40, %v3069_v29  ;;  %v3196_v61 = vpop.f32.mrf.mxu3  ;;  %v3007_v22 = vpop.f32.mrf.mxu0  ;;  %v9023_v40 = vld [vmem:[#allocation2 + $0x174] sm:$0xf0] }
 0x3e9   :  { %v3071_v44 = vpop.f32.mrf.mxu1  ;;  %v11678_v5 = vor.u32 %v9023_v40, %v7470_v17 }
 0x3ea   :  { %v11645_v41 = vadd.f32 %v3196_v61, %v3133_v53  ;;  %v3072_v21 = vadd.f32 %v3071_v44, %v3007_v22  ;;  %v7462_v61 = vld [vmem:[#allocation2 + $0x160] sm:$0xf]  ;;  %v7472_v22 = vld [vmem:[#allocation2 + $0x178] sm:$0xf0]  ;;  %v9020_v44 = vld [vmem:[#allocation2 + $0x164] sm:$0xf] }
 0x3eb   :  { %3046 = vmatmul.bf16.gmra.mxu0 %v11643_v46  ;;  %v11672_v26 = vor.u32 %v9022_v30, %v7462_v61  ;;  %v11676_v19 = vor.u32 %v9020_v44, %v7464_v55 }
 0x3ec   :  { %3110 = vmatmul.bf16.gmra.mxu1 %v11647_v9  ;;  %3174 = vmatmul.bf16.gmra.mxu2 %v11649_v43 }
 0x3ed   :  { %7693 = vmatmul.msk.bf16.gmra.mxu3 %vm2959_vm4, %v11652_v4  ;;  %3788 = vmatpush.bf16.msra.mxu0 %v7773_v60 }
 0x3ef   :  { %v3135_v28 = vpop.f32.mrf.mxu2 }
 0x3f0   :  { %v3136_v12 = vadd.f32 %v3135_v28, %v3072_v21  ;;  %v3199_v29 = vpop.f32.mrf.mxu3  ;;  %v3009_v7 = vpop.f32.mrf.mxu0  ;;  %v11690_v28 = vor.u32 %v9021_v2, %v7472_v22 }
 0x3f1   :  { %v3073_v14 = vpop.f32.mrf.mxu1 }
 0x3f2   :  { %v11670_v39 = vadd.f32 %v3199_v29, %v3136_v12  ;;  %v3074_v32 = vadd.f32 %v3073_v14, %v3009_v7  ;;  %v8999_v12 = vld [vmem:[%s13576_s4 + $0xf4] sm:$0xf0] }
 0x3f3   :  { %v7845_v29 = vor.u32 %v8999_v12, %v7844_v56  ;;  %v7836_v56 = vld [vmem:[%s13576_s4 + $0xe0] sm:$0xf]  ;;  %v8997_v12 = vld [vmem:[%s13576_s4 + $0xe4] sm:$0xf0] }
 0x3f5   :  { %3851 = vmatpush.bf16.msra.mxu1 %v7845_v29 }
 0x3f7   :  { %v3137_v45 = vpop.f32.mrf.mxu2 }
 0x3f8   :  { %v3138_v36 = vadd.f32 %v3137_v45, %v3074_v32  ;;  %v3201_v57 = vpop.f32.mrf.mxu3  ;;  %v3012_v53 = vpop.f32.mrf.mxu0 }
 0x3f9   :  { %v3076_v25 = vpop.f32.mrf.mxu1 }
 0x3fa   :  { %v11674_v21 = vadd.f32 %v3201_v57, %v3138_v36  ;;  %v3077_v58 = vadd.f32 %v3076_v25, %v3012_v53  ;;  %v7900_v36 = vld [vmem:[%s13576_s4 + $0x160] sm:$0xf]  ;;  %v9013_v57 = vld [vmem:[%s13576_s4 + $0x164] sm:$0xf0] }
 0x3fb   :  { %3051 = vmatmul.bf16.gmra.mxu0 %v11672_v26  ;;  %v7901_v53 = vor.u32 %v9013_v57, %v7900_v36 }
 0x3fc   :  { %3115 = vmatmul.bf16.gmra.mxu1 %v11676_v19  ;;  %3179 = vmatmul.bf16.gmra.mxu2 %v11678_v5 }
 0x3fd   :  { %7694 = vmatmul.msk.bf16.gmra.mxu3 %vm2959_vm4, %v11690_v28  ;;  %3916 = vmatpush.bf16.msra.mxu2 %v7901_v53 }
 0x3ff   :  { %v3140_v7 = vpop.f32.mrf.mxu2 }
 0x400   :  { %v3141_v14 = vadd.f32 %v3140_v7, %v3077_v58  ;;  %v3204_v32 = vpop.f32.mrf.mxu3  ;;  %v3014_v30 = vpop.f32.mrf.mxu0  ;;  %v7837_v7 = vor.u32 %v8997_v12, %v7836_v56 }
 0x401   :  { %v3078_v45 = vpop.f32.mrf.mxu1 }
 0x402   :  { %v11699_v55 = vadd.f32 %v3204_v32, %v3141_v14  ;;  %v3079_v40 = vadd.f32 %v3078_v45, %v3014_v30  ;;  %3852 = vmatpush.bf16.msra.mxu1 %v7837_v7 }
 0x404   :  { %13972 = vst [vmem:[#allocation13_spill] sm:$0xff] %v11699_v55 }
 0x407   :  { %v3142_v61 = vpop.f32.mrf.mxu2 }
 0x408   :  { %v3143_v22 = vadd.f32 %v3142_v61, %v3079_v40  ;;  %v3206_v25 = vpop.f32.mrf.mxu3  ;;  %v3017_v44 = vpop.f32.mrf.mxu0 }
 0x409   :  { %v3081_v17 = vpop.f32.mrf.mxu1 }
 0x40a   :  { %v11707_v2 = vadd.f32 %v3206_v25, %v3143_v22  ;;  %v3082_v58 = vadd.f32 %v3081_v17, %v3017_v44 }
 0x40b   :  { %3257 = vmatmul.bf16.vlgmr.msrb.gmra.mxu0 %v11140_v52 }
 0x40c   :  { %13973 = vst [vmem:[#allocation14_spill] sm:$0xff] %v11707_v2  ;;  %3321 = vmatmul.bf16.vlgmr.msrb.gmra.mxu1 %v11143_v48  ;;  %3385 = vmatmul.bf16.vlgmr.msrb.gmra.mxu2 %v11145_v10  ;;  %v7852_v2 = vld [vmem:[%s13576_s4 + $0x100] sm:$0xf] }
 0x40d   :  { %7695 = vmatmul.msk.bf16.vlgmr.msrb.gmra.mxu3 %vm2959_vm4, %v11150_v16 }
 0x40f   :  { %v3145_v29 = vpop.f32.mrf.mxu2 }
 0x410   :  { %v3146_v14 = vadd.f32 %v3145_v29, %v3082_v58  ;;  %v3209_v32 = vpop.f32.mrf.mxu3  ;;  %v3019_v30 = vpop.f32.mrf.mxu0  ;;  %v7892_v58 = vld [vmem:[%s13576_s4 + $0x150] sm:$0xf] }
 0x411   :  { %v3083_v45 = vpop.f32.mrf.mxu1  ;;  %v7893_v51 = vor.u32 %v9011_v0, %v7892_v58 }
 0x412   :  { %v11726_v40 = vadd.f32 %v3209_v32, %v3146_v14  ;;  %v3084_v36 = vadd.f32 %v3083_v45, %v3019_v30  ;;  %v7764_v30 = vld [vmem:[%s13576_s4 + $0x50] sm:$0xf]  ;;  %v8979_v45 = vld [vmem:[%s13576_s4 + $0x54] sm:$0xf0] }
 0x413   :  { %3917 = vmatpush.bf16.msra.mxu2 %v7893_v51 }
 0x414   :  { %13974 = vst [vmem:[#allocation21_spill] sm:$0xff] %v11726_v40 }
 0x417   :  { %v3147_v57 = vpop.f32.mrf.mxu2 }
 0x418   :  { %v3148_v53 = vadd.f32 %v3147_v57, %v3084_v36  ;;  %v3211_v61 = vpop.f32.mrf.mxu3  ;;  %v3022_v22 = vpop.f32.mrf.mxu0  ;;  %v7828_v36 = vld [vmem:[%s13576_s4 + $0xd0] sm:$0xf]  ;;  %v7765_v57 = vor.u32 %v8979_v45, %v7764_v30 }
 0x419   :  { %v3086_v25 = vpop.f32.mrf.mxu1 }
 0x41a   :  { %v11728_v44 = vadd.f32 %v3211_v61, %v3148_v53  ;;  %v3087_v17 = vadd.f32 %v3086_v25, %v3022_v22  ;;  %v8995_v53 = vld [vmem:[%s13576_s4 + $0xd4] sm:$0xf0]  ;;  %3789 = vmatpush.bf16.msra.mxu0 %v7765_v57 }
 0x41b   :  { %3262 = vmatmul.bf16.gmra.mxu0 %v11195_v47  ;;  %v7829_v61 = vor.u32 %v8995_v53, %v7828_v36 }
 0x41c   :  { %13975 = vst [vmem:[#allocation22_spill] sm:$0xff] %v11728_v44  ;;  %3326 = vmatmul.bf16.gmra.mxu1 %v11198_v27  ;;  %3390 = vmatmul.bf16.gmra.mxu2 %v11200_v33 }
 0x41d   :  { %7696 = vmatmul.msk.bf16.gmra.mxu3 %vm2959_vm4, %v11207_v6  ;;  %3853 = vmatpush.bf16.msra.mxu1 %v7829_v61 }
 0x41f   :  { %v3150_v56 = vpop.f32.mrf.mxu2 }
 0x420   :  { %v3151_v60 = vadd.f32 %v3150_v56, %v3087_v17  ;;  %v3214_v12 = vpop.f32.mrf.mxu3  ;;  %v3024_v29 = vpop.f32.mrf.mxu0 }
 0x421   :  { %v3088_v7 = vpop.f32.mrf.mxu1 }
 0x422   :  { %v11741_v14 = vadd.f32 %v3214_v12, %v3151_v60  ;;  %v3089_v32 = vadd.f32 %v3088_v7, %v3024_v29  ;;  %v7884_v60 = vld [vmem:[%s13576_s4 + $0x140] sm:$0xf]  ;;  %v9009_v12 = vld [vmem:[%s13576_s4 + $0x144] sm:$0xf0] }
 0x423   :  { %v7885_v29 = vor.u32 %v9009_v12, %v7884_v60  ;;  %v7756_v60 = vld [vmem:[%s13576_s4 + $0x40] sm:$0xf] }
 0x424   :  { %13976 = vst [vmem:[#allocation15_spill] sm:$0xff] %v11741_v14  ;;  %v7820_v12 = vld [vmem:[%s13576_s4 + $0xc0] sm:$0xf] }
 0x425   :  { %3918 = vmatpush.bf16.msra.mxu2 %v7885_v29 }
 0x427   :  { %v3152_v22 = vpop.f32.mrf.mxu2 }
 0x428   :  { %v3153_v25 = vadd.f32 %v3152_v22, %v3089_v32  ;;  %v3216_v17 = vpop.f32.mrf.mxu3  ;;  %v3027_v58 = vpop.f32.mrf.mxu0 }
 0x429   :  { %v3091_v0 = vpop.f32.mrf.mxu1 }
 0x42a   :  { %v11755_v51 = vadd.f32 %v3216_v17, %v3153_v25  ;;  %v3092_v56 = vadd.f32 %v3091_v0, %v3027_v58 }
 0x42b   :  { %3267 = vmatmul.bf16.gmra.mxu0 %v11252_v31 }
 0x42c   :  { %13977 = vst [vmem:[#allocation16_spill] sm:$0xff] %v11755_v51  ;;  %3331 = vmatmul.bf16.gmra.mxu1 %v11254_v37  ;;  %3395 = vmatmul.bf16.gmra.mxu2 %v11256_v24 }
 0x42d   :  { %7697 = vmatmul.msk.bf16.gmra.mxu3 %vm2959_vm4, %v11261_v20 }
 0x42f   :  { %v3155_v7 = vpop.f32.mrf.mxu2 }
 0x430   :  { %v3156_v32 = vadd.f32 %v3155_v7, %v3092_v56  ;;  %v3219_v30 = vpop.f32.mrf.mxu3  ;;  %v3029_v45 = vpop.f32.mrf.mxu0  ;;  %v8977_v56 = vld [vmem:[%s13576_s4 + $0x44] sm:$0xf0] }
 0x431   :  { %v3093_v36 = vpop.f32.mrf.mxu1  ;;  %v7757_v29 = vor.u32 %v8977_v56, %v7756_v60  ;;  %v8993_v7 = vld [vmem:[%s13576_s4 + $0xc4] sm:$0xf0]  ;;  %v7916_v60 = vld [vmem:[%s13576_s4 + $0x180] sm:$0xf] }
 0x432   :  { %v11768_v57 = vadd.f32 %v3219_v30, %v3156_v32  ;;  %v3094_v53 = vadd.f32 %v3093_v36, %v3029_v45  ;;  %v7821_v32 = vor.u32 %v8993_v7, %v7820_v12 }
 0x433   :  { %3790 = vmatpush.bf16.msra.mxu0 %v7757_v29 }
 0x434   :  { %13978 = vst [vmem:[#allocation17_spill] sm:$0xff] %v11768_v57  ;;  %3854 = vmatpush.bf16.msra.mxu1 %v7821_v32 }
 0x437   :  { %v3157_v61 = vpop.f32.mrf.mxu2 }
 0x438   :  { %v3158_v22 = vadd.f32 %v3157_v61, %v3094_v53  ;;  %v3221_v25 = vpop.f32.mrf.mxu3  ;;  %v3032_v17 = vpop.f32.mrf.mxu0 }
 0x439   :  { %v3096_v58 = vpop.f32.mrf.mxu1 }
 0x43a   :  { %v11770_v0 = vadd.f32 %v3221_v25, %v3158_v22  ;;  %v3097_v51 = vadd.f32 %v3096_v58, %v3032_v17  ;;  %v7876_v17 = vld [vmem:[%s13576_s4 + $0x130] sm:$0xf]  ;;  %v9007_v58 = vld [vmem:[%s13576_s4 + $0x134] sm:$0xf0] }
 0x43b   :  { %3272 = vmatmul.bf16.gmra.mxu0 %v11299_v35  ;;  %v7877_v56 = vor.u32 %v9007_v58, %v7876_v17 }
 0x43c   :  { %13979 = vst [vmem:[#allocation18_spill] sm:$0xff] %v11770_v0  ;;  %3336 = vmatmul.bf16.gmra.mxu1 %v11303_v38  ;;  %3400 = vmatmul.bf16.gmra.mxu2 %v11307_v18 }
 0x43d   :  { %7698 = vmatmul.msk.bf16.gmra.mxu3 %vm2959_vm4, %v11313_v1  ;;  %3919 = vmatpush.bf16.msra.mxu2 %v7877_v56 }
 0x43f   :  { %v3160_v30 = vpop.f32.mrf.mxu2 }
 0x440   :  { %v3161_v45 = vadd.f32 %v3160_v30, %v3097_v51  ;;  %v3224_v36 = vpop.f32.mrf.mxu3  ;;  %v3034_v53 = vpop.f32.mrf.mxu0  ;;  %v9017_v51 = vld [vmem:[%s13576_s4 + $0x184] sm:$0xf0] }
 0x441   :  { %v3098_v61 = vpop.f32.mrf.mxu1  ;;  %v7917_v12 = vor.u32 %v9017_v51, %v7916_v60 }
 0x442   :  { %v11789_v22 = vadd.f32 %v3224_v36, %v3161_v45  ;;  %v3099_v25 = vadd.f32 %v3098_v61, %v3034_v53 }
 0x443   :  { %3986 = vmatpush.bf16.msra.mxu3 %v7917_v12  ;;  %v7748_v12 = vld [vmem:[%s13576_s4 + $0x30] sm:$0xf] }
 0x444   :  { %13980 = vst [vmem:[#allocation23_spill] sm:$0xff] %v11789_v22  ;;  %v13987_v22 = vld [vmem:[#allocation4_spill] sm:$0xff] }
 0x447   :  { %v3162_v29 = vpop.f32.mrf.mxu2 }
 0x448   :  { %v3163_v7 = vadd.f32 %v3162_v29, %v3099_v25  ;;  %v3226_v32 = vpop.f32.mrf.mxu3  ;;  %v3037_v30 = vpop.f32.mrf.mxu0  ;;  %v8975_v29 = vld [vmem:[%s13576_s4 + $0x34] sm:$0xf0] }
 0x449   :  { %v3101_v45 = vpop.f32.mrf.mxu1 }
 0x44a   :  { %v11803_v36 = vadd.f32 %v3226_v32, %v3163_v7  ;;  %v3102_v53 = vadd.f32 %v3101_v45, %v3037_v30  ;;  %v7812_v7 = vld [vmem:[%s13576_s4 + $0xb0] sm:$0xf]  ;;  %v7749_v32 = vor.u32 %v8975_v29, %v7748_v12  ;;  %v8991_v30 = vld [vmem:[%s13576_s4 + $0xb4] sm:$0xf0]  ;;  %v9005_v12 = vld [vmem:[%s13576_s4 + $0x124] sm:$0xf0] }
 0x44b   :  { %3277 = vmatmul.bf16.gmra.mxu0 %v11363_v23  ;;  %v7813_v45 = vor.u32 %v8991_v30, %v7812_v7 }
 0x44c   :  { %13981 = vst [vmem:[#allocation24_spill] sm:$0xff] %v11803_v36  ;;  %3341 = vmatmul.bf16.gmra.mxu1 %v11365_v54  ;;  %3405 = vmatmul.bf16.gmra.mxu2 %v11367_v62  ;;  %v7868_v36 = vld [vmem:[%s13576_s4 + $0x120] sm:$0xf] }
 0x44d   :  { %7699 = vmatmul.msk.bf16.gmra.mxu3 %vm2959_vm4, %v11372_v11  ;;  %3791 = vmatpush.bf16.msra.mxu0 %v7749_v32  ;;  %v7869_v29 = vor.u32 %v9005_v12, %v7868_v36  ;;  %v7740_v36 = vld [vmem:[%s13576_s4 + $0x20] sm:$0xf] }
 0x44e   :  { %3855 = vmatpush.bf16.msra.mxu1 %v7813_v45 }
 0x44f   :  { %v3165_v61 = vpop.f32.mrf.mxu2  ;;  %3920 = vmatpush.bf16.msra.mxu2 %v7869_v29 }
 0x450   :  { %v3166_v17 = vadd.f32 %v3165_v61, %v3102_v53  ;;  %v3229_v58 = vpop.f32.mrf.mxu3  ;;  %v3039_v60 = vpop.f32.mrf.mxu0 }
 0x451   :  { %v3103_v25 = vpop.f32.mrf.mxu1 }
 0x452   :  { %v11810_v56 = vadd.f32 %v3229_v58, %v3166_v17  ;;  %v3104_v51 = vadd.f32 %v3103_v25, %v3039_v60 }
 0x454   :  { %13982 = vst [vmem:[#allocation25_spill] sm:$0xff] %v11810_v56 }
 0x457   :  { %v3167_v53 = vpop.f32.mrf.mxu2 }
 0x458   :  { %v3168_v61 = vadd.f32 %v3167_v53, %v3104_v51  ;;  %v3231_v17 = vpop.f32.mrf.mxu3  ;;  %v3042_v58 = vpop.f32.mrf.mxu0 }
 0x459   :  { %v3106_v60 = vpop.f32.mrf.mxu1 }
 0x45a   :  { %v11824_v25 = vadd.f32 %v3231_v17, %v3168_v61  ;;  %v3107_v56 = vadd.f32 %v3106_v60, %v3042_v58  ;;  %v8973_v17 = vld [vmem:[%s13576_s4 + $0x24] sm:$0xf0]  ;;  %v7804_v58 = vld [vmem:[%s13576_s4 + $0xa0] sm:$0xf] }
 0x45b   :  { %3282 = vmatmul.bf16.gmra.mxu0 %v11418_v59  ;;  %v7741_v60 = vor.u32 %v8973_v17, %v7740_v36  ;;  %v13988_v36 = vld [vmem:[#allocation7_spill] sm:$0xff]  ;;  %v13989_v17 = vld [vmem:[#allocation8_spill] sm:$0xff] }
 0x45c   :  { %13983 = vst [vmem:[#allocation26_spill] sm:$0xff] %v11824_v25  ;;  %3346 = vmatmul.bf16.gmra.mxu1 %v11422_v42  ;;  %3410 = vmatmul.bf16.gmra.mxu2 %v11426_v13  ;;  %v13986_v25 = vld [vmem:[#allocation3_spill] sm:$0xff] }
 0x45d   :  { %7700 = vmatmul.msk.bf16.gmra.mxu3 %vm2959_vm4, %v11432_v3  ;;  %3792 = vmatpush.bf16.msra.mxu0 %v7741_v60 }
 0x45f   :  { %v3170_v51 = vpop.f32.mrf.mxu2 }
 0x460   :  { %v3171_v7 = vadd.f32 %v3170_v51, %v3107_v56  ;;  %v3234_v32 = vpop.f32.mrf.mxu3  ;;  %v3044_v30 = vpop.f32.mrf.mxu0  ;;  %v8989_v56 = vld [vmem:[%s13576_s4 + $0xa4] sm:$0xf0] }
 0x461   :  { %v3108_v45 = vpop.f32.mrf.mxu1  ;;  %v7805_v12 = vor.u32 %v8989_v56, %v7804_v58 }
 0x462   :  { %v11837_v53 = vadd.f32 %v3234_v32, %v3171_v7  ;;  %v3109_v61 = vadd.f32 %v3108_v45, %v3044_v30 }
 0x463   :  { %3856 = vmatpush.bf16.msra.mxu1 %v7805_v12 }
 0x464   :  { %13984 = vst [vmem:[#allocation19_spill] sm:$0xff] %v11837_v53 }
 0x467   :  { %v3172_v29 = vpop.f32.mrf.mxu2 }
 0x468   :  { %v3173_v51 = vadd.f32 %v3172_v29, %v3109_v61  ;;  %v3236_v7 = vpop.f32.mrf.mxu3  ;;  %v3047_v32 = vpop.f32.mrf.mxu0 }
 0x469   :  { %v3111_v30 = vpop.f32.mrf.mxu1 }
 0x46a   :  { %v11851_v45 = vadd.f32 %v3236_v7, %v3173_v51  ;;  %v3112_v53 = vadd.f32 %v3111_v30, %v3047_v32  ;;  %v7860_v51 = vld [vmem:[%s13576_s4 + $0x110] sm:$0xf]  ;;  %v9003_v7 = vld [vmem:[%s13576_s4 + $0x114] sm:$0xf0] }
 0x46b   :  { %3287 = vmatmul.bf16.gmra.mxu0 %v13986_v25  ;;  %v7861_v32 = vor.u32 %v9003_v7, %v7860_v51  ;;  %v7732_v51 = vld [vmem:[%s13576_s4 + $0x10] sm:$0xf]  ;;  %v8987_v7 = vld [vmem:[%s13576_s4 + $0x94] sm:$0xf0] }
 0x46c   :  { %13985 = vst [vmem:[#allocation20_spill] sm:$0xff] %v11851_v45  ;;  %3351 = vmatmul.bf16.gmra.mxu1 %v13987_v22  ;;  %3415 = vmatmul.bf16.gmra.mxu2 %v13988_v36 }
 0x46d   :  { %7701 = vmatmul.msk.bf16.gmra.mxu3 %vm2959_vm4, %v13989_v17  ;;  %3921 = vmatpush.bf16.msra.mxu2 %v7861_v32 }
 0x46f   :  { %v3175_v58 = vpop.f32.mrf.mxu2 }
 0x470   :  { %v3176_v60 = vadd.f32 %v3175_v58, %v3112_v53  ;;  %v3239_v56 = vpop.f32.mrf.mxu3  ;;  %v3049_v12 = vpop.f32.mrf.mxu0 }
 0x471   :  { %v3113_v61 = vpop.f32.mrf.mxu1 }
 0x472   :  { %v11858_v29 = vadd.f32 %v3239_v56, %v3176_v60  ;;  %v3114_v0 = vadd.f32 %v3113_v61, %v3049_v12  ;;  %v13992_v56 = vld [vmem:[#allocation9_spill] sm:$0xff]  ;;  %v13993_v12 = vld [vmem:[#allocation10_spill] sm:$0xff] }
 0x473   :  { %v13994_v61 = vld [vmem:[#allocation5_spill] sm:$0xff] }
 0x474   :  { %13990 = vst [vmem:[#allocation27_spill] sm:$0xff] %v11858_v29 }
 0x477   :  { %v3177_v30 = vpop.f32.mrf.mxu2 }
 0x478   :  { %v3178_v45 = vadd.f32 %v3177_v30, %v3114_v0  ;;  %v3241_v57 = vpop.f32.mrf.mxu3  ;;  %v3052_v53 = vpop.f32.mrf.mxu0  ;;  %v8971_v0 = vld [vmem:[%s13576_s4 + $0x14] sm:$0xf0] }
 0x479   :  { %v3116_v58 = vpop.f32.mrf.mxu1 }
 0x47a   :  { %v11866_v14 = vadd.f32 %v3241_v57, %v3178_v45  ;;  %v3117_v60 = vadd.f32 %v3116_v58, %v3052_v53  ;;  %v7796_v57 = vld [vmem:[%s13576_s4 + $0x90] sm:$0xf]  ;;  %v7733_v45 = vor.u32 %v8971_v0, %v7732_v51  ;;  %v9001_v51 = vld [vmem:[%s13576_s4 + $0x104] sm:$0xf0] }
 0x47b   :  { %3292 = vmatmul.bf16.gmra.mxu0 %v11539_v15  ;;  %v7797_v30 = vor.u32 %v8987_v7, %v7796_v57  ;;  %v7853_v0 = vor.u32 %v9001_v51, %v7852_v2 }
 0x47c   :  { %13991 = vst [vmem:[#allocation28_spill] sm:$0xff] %v11866_v14  ;;  %3356 = vmatmul.bf16.gmra.mxu1 %v13992_v56  ;;  %3420 = vmatmul.bf16.gmra.mxu2 %v13993_v12 }
 0x47d   :  { %7702 = vmatmul.msk.bf16.gmra.mxu3 %vm2959_vm4, %v13994_v61  ;;  %3793 = vmatpush.bf16.msra.mxu0 %v7733_v45 }
 0x47e   :  { %3857 = vmatpush.bf16.msra.mxu1 %v7797_v30  ;;  %3922 = vmatpush.bf16.msra.mxu2 %v7853_v0  ;;  %v7724_v0 = vld [vmem:[%s13576_s4] sm:$0xf] }
 0x47f   :  { %v3180_v32 = vpop.f32.mrf.mxu2 }
 0x480   :  { %v3181_v53 = vadd.f32 %v3180_v32, %v3117_v60  ;;  %v3244_v58 = vpop.f32.mrf.mxu3  ;;  %v3054_v14 = vpop.f32.mrf.mxu0 }
 0x481   :  { %v3118_v29 = vpop.f32.mrf.mxu1 }
 0x482   :  { %v11885_v44 = vadd.f32 %v3244_v58, %v3181_v53  ;;  %v3119_v40 = vadd.f32 %v3118_v29, %v3054_v14 }
 0x484   :  { %13995 = vst [vmem:[#allocation29_spill] sm:$0xff] %v11885_v44 }
 0x487   :  { %v3182_v57 = vpop.f32.mrf.mxu2 }
 0x488   :  { %v3183_v60 = vadd.f32 %v3182_v57, %v3119_v40  ;;  %v3246_v7 = vpop.f32.mrf.mxu3  ;;  %v3258_v32 = vpop.f32.mrf.mxu0  ;;  %v8969_v57 = vld [vmem:[%s13576_s4 + $0x4] sm:$0xf0] }
 0x489   :  { %v3322_v45 = vpop.f32.mrf.mxu1 }
 0x48a   :  { %v11893_v55 = vadd.f32 %v3246_v7, %v3183_v60  ;;  %v3323_v30 = vadd.f32 %v3322_v45, %v3258_v32  ;;  %v7788_v60 = vld [vmem:[%s13576_s4 + $0x80] sm:$0xf]  ;;  %v7725_v7 = vor.u32 %v8969_v57, %v7724_v0  ;;  %v8985_v32 = vld [vmem:[%s13576_s4 + $0x84] sm:$0xf0]  ;;  %v9014_v0 = vld [vmem:[%s13576_s4 + $0x174] sm:$0xf] }
 0x48b   :  { %3297 = vmatmul.bf16.gmra.mxu0 %v11611_v49  ;;  %v7789_v45 = vor.u32 %v8985_v32, %v7788_v60  ;;  %v9018_v57 = vld [vmem:[%s13576_s4 + $0x194] sm:$0xf] }
 0x48c   :  { %13996 = vst [vmem:[#allocation30_spill] sm:$0xff] %v11893_v55  ;;  %3361 = vmatmul.bf16.gmra.mxu1 %v11614_v8  ;;  %3425 = vmatmul.bf16.gmra.mxu2 %v11616_v50 }
 0x48d   :  { %7703 = vmatmul.msk.bf16.gmra.mxu3 %vm2959_vm4, %v11621_v34  ;;  %3794 = vmatpush.bf16.msra.mxu0 %v7725_v7  ;;  %v7926_v7 = vld [vmem:[%s13576_s4 + $0x198] sm:$0xf0] }
 0x48e   :  { %3858 = vmatpush.bf16.msra.mxu1 %v7789_v45  ;;  %v7929_v45 = vor.u32 %v9018_v57, %v7926_v7  ;;  %v7782_v57 = vld [vmem:[%s13576_s4 + $0x78] sm:$0xf0] }
 0x48f   :  { %v3386_v14 = vpop.f32.mrf.mxu2 }
 0x490   :  { %v3387_v2 = vadd.f32 %v3386_v14, %v3323_v30  ;;  %v3450_v29 = vpop.f32.mrf.mxu3  ;;  %v3260_v53 = vpop.f32.mrf.mxu0  ;;  %4241 = vmatpush.bf16.msrb.mxu3 %v7929_v45 }
 0x491   :  { %v3324_v40 = vpop.f32.mrf.mxu1 }
 0x492   :  { %v11900_v58 = vadd.f32 %v3450_v29, %v3387_v2  ;;  %v3325_v51 = vadd.f32 %v3324_v40, %v3260_v53 }
 0x494   :  { %13997 = vst [vmem:[#allocation37_spill] sm:$0xff] %v11900_v58 }
 0x497   :  { %v3388_v30 = vpop.f32.mrf.mxu2 }
 0x498   :  { %v3389_v14 = vadd.f32 %v3388_v30, %v3325_v51  ;;  %v3452_v2 = vpop.f32.mrf.mxu3  ;;  %v3263_v29 = vpop.f32.mrf.mxu0  ;;  %v7910_v51 = vld [vmem:[%s13576_s4 + $0x178] sm:$0xf0] }
 0x499   :  { %v3327_v53 = vpop.f32.mrf.mxu1  ;;  %v7913_v60 = vor.u32 %v9014_v0, %v7910_v51 }
 0x49a   :  { %v11914_v40 = vadd.f32 %v3452_v2, %v3389_v14  ;;  %v3328_v58 = vadd.f32 %v3327_v53, %v3263_v29 }
 0x49b   :  { %3302 = vmatmul.bf16.gmra.mxu0 %v11643_v46  ;;  %4171 = vmatpush.bf16.msrb.mxu2 %v7913_v60  ;;  %v8998_v60 = vld [vmem:[%s13576_s4 + $0xf4] sm:$0xf] }
 0x49c   :  { %13998 = vst [vmem:[#allocation38_spill] sm:$0xff] %v11914_v40  ;;  %3366 = vmatmul.bf16.gmra.mxu1 %v11647_v9  ;;  %3430 = vmatmul.bf16.gmra.mxu2 %v11649_v43 }
 0x49d   :  { %7704 = vmatmul.msk.bf16.gmra.mxu3 %vm2959_vm4, %v11652_v4 }
 0x49f   :  { %v3391_v32 = vpop.f32.mrf.mxu2 }
 0x4a0   :  { %v3392_v30 = vadd.f32 %v3391_v32, %v3328_v58  ;;  %v3455_v14 = vpop.f32.mrf.mxu3  ;;  %v3265_v2 = vpop.f32.mrf.mxu0  ;;  %v8982_v58 = vld [vmem:[%s13576_s4 + $0x74] sm:$0xf] }
 0x4a1   :  { %v3329_v29 = vpop.f32.mrf.mxu1 }
 0x4a2   :  { %v11933_v53 = vadd.f32 %v3455_v14, %v3392_v30  ;;  %v3330_v40 = vadd.f32 %v3329_v29, %v3265_v2  ;;  %v7710_v29 = vld [vmem:[#allocation2 + $0x10] sm:$0xf0] }
 0x4a4   :  { %13999 = vst [vmem:[#allocation31_spill] sm:$0xff] %v11933_v53 }
 0x4a7   :  { %v3393_v55 = vpop.f32.mrf.mxu2 }
 0x4a8   :  { %v3394_v44 = vadd.f32 %v3393_v55, %v3330_v40  ;;  %v3457_v4 = vpop.f32.mrf.mxu3  ;;  %v3268_v43 = vpop.f32.mrf.mxu0  ;;  %v7785_v55 = vor.u32 %v8982_v58, %v7782_v57 }
 0x4a9   :  { %v3332_v0 = vpop.f32.mrf.mxu1 }
 0x4aa   :  { %v11935_v51 = vadd.f32 %v3457_v4, %v3394_v44  ;;  %v3333_v9 = vadd.f32 %v3332_v0, %v3268_v43  ;;  %v7846_v4 = vld [vmem:[%s13576_s4 + $0xf8] sm:$0xf0]  ;;  %4043 = vmatpush.bf16.msrb.mxu0 %v7785_v55 }
 0x4ab   :  { %3307 = vmatmul.bf16.gmra.mxu0 %v11672_v26  ;;  %v7849_v43 = vor.u32 %v8998_v60, %v7846_v4  ;;  %v7708_v60 = vld [vmem:[#allocation2] sm:$0xf]  ;;  %v7718_v55 = vld [vmem:[#allocation2 + $0x18] sm:$0xf0] }
 0x4ac   :  { %14000 = vst [vmem:[#allocation32_spill] sm:$0xff] %v11935_v51  ;;  %3371 = vmatmul.bf16.gmra.mxu1 %v11676_v19  ;;  %3435 = vmatmul.bf16.gmra.mxu2 %v11678_v5  ;;  %v9012_v19 = vld [vmem:[%s13576_s4 + $0x164] sm:$0xf]  ;;  %v7902_v5 = vld [vmem:[%s13576_s4 + $0x168] sm:$0xf0] }
 0x4ad   :  { %7705 = vmatmul.msk.bf16.gmra.mxu3 %vm2959_vm4, %v11690_v28  ;;  %4107 = vmatpush.bf16.msrb.mxu1 %v7849_v43  ;;  %v7905_v14 = vor.u32 %v9012_v19, %v7902_v5  ;;  %v8926_v28 = vld [vmem:[#allocation2 + $0xc] sm:$0xf0]  ;;  %v8925_v5 = vld [vmem:[#allocation2 + $0xc] sm:$0xf] }
 0x4ae   :  { %v11962_v43 = vor.u32 %v8926_v28, %v7708_v60  ;;  %v7774_v28 = vld [vmem:[%s13576_s4 + $0x68] sm:$0xf0] }
 0x4af   :  { %v3396_v44 = vpop.f32.mrf.mxu2  ;;  %4172 = vmatpush.bf16.msrb.mxu2 %v7905_v14  ;;  %v8980_v14 = vld [vmem:[%s13576_s4 + $0x64] sm:$0xf] }
 0x4b0   :  { %v3397_v40 = vadd.f32 %v3396_v44, %v3333_v9  ;;  %v3460_v7 = vpop.f32.mrf.mxu3  ;;  %v3270_v32 = vpop.f32.mrf.mxu0  ;;  %v8927_v9 = vld [vmem:[#allocation2 + $0x14] sm:$0xf0]  ;;  %v8924_v44 = vld [vmem:[#allocation2 + $0x4] sm:$0xf] }
 0x4b1   :  { %v3334_v26 = vpop.f32.mrf.mxu1 }
 0x4b2   :  { %v11954_v45 = vadd.f32 %v3460_v7, %v3397_v40  ;;  %v3335_v30 = vadd.f32 %v3334_v26, %v3270_v32  ;;  %v7716_v40 = vld [vmem:[#allocation2 + $0x8] sm:$0xf]  ;;  %v11966_v26 = vor.u32 %v8924_v44, %v7710_v29  ;;  %v7777_v29 = vor.u32 %v8980_v14, %v7774_v28 }
 0x4b3   :  { %v11968_v19 = vor.u32 %v8927_v9, %v7716_v40  ;;  %v7838_v9 = vld [vmem:[%s13576_s4 + $0xe8] sm:$0xf0] }
 0x4b4   :  { %14001 = vst [vmem:[#allocation33_spill] sm:$0xff] %v11954_v45  ;;  %4044 = vmatpush.bf16.msrb.mxu0 %v7777_v29 }
 0x4b7   :  { %v3398_v2 = vpop.f32.mrf.mxu2 }
 0x4b8   :  { %v3399_v0 = vadd.f32 %v3398_v2, %v3335_v30  ;;  %v3462_v58 = vpop.f32.mrf.mxu3  ;;  %v3273_v57 = vpop.f32.mrf.mxu0  ;;  %v11971_v30 = vor.u32 %v8925_v5, %v7718_v55  ;;  %v8996_v2 = vld [vmem:[%s13576_s4 + $0xe4] sm:$0xf] }
 0x4b9   :  { %v3337_v4 = vpop.f32.mrf.mxu1 }
 0x4ba   :  { %v11964_v7 = vadd.f32 %v3462_v58, %v3399_v0  ;;  %v3338_v32 = vadd.f32 %v3337_v4, %v3273_v57  ;;  %v7841_v58 = vor.u32 %v8996_v2, %v7838_v9  ;;  %v7894_v2 = vld [vmem:[%s13576_s4 + $0x158] sm:$0xf0] }
 0x4bb   :  { %3795 = vmatmul.bf16.vlgmr.msra.gmra.mxu0 %v11962_v43 }
 0x4bc   :  { %14002 = vst [vmem:[#allocation34_spill] sm:$0xff] %v11964_v7  ;;  %3859 = vmatmul.bf16.vlgmr.msra.gmra.mxu1 %v11966_v26  ;;  %3923 = vmatmul.bf16.vlgmr.msra.gmra.mxu2 %v11968_v19 }
 0x4bd   :  { %7930 = vmatmul.msk.bf16.vlgmr.msra.gmra.mxu3 %vm2959_vm4, %v11971_v30  ;;  %4108 = vmatpush.bf16.msrb.mxu1 %v7841_v58 }
 0x4bf   :  { %v3401_v0 = vpop.f32.mrf.mxu2 }
 0x4c0   :  { %v3402_v57 = vadd.f32 %v3401_v0, %v3338_v32  ;;  %v3465_v60 = vpop.f32.mrf.mxu3  ;;  %v3275_v55 = vpop.f32.mrf.mxu0  ;;  %v9010_v32 = vld [vmem:[%s13576_s4 + $0x154] sm:$0xf] }
 0x4c1   :  { %v3339_v4 = vpop.f32.mrf.mxu1  ;;  %v7897_v29 = vor.u32 %v9010_v32, %v7894_v2 }
 0x4c2   :  { %v11989_v44 = vadd.f32 %v3465_v60, %v3402_v57  ;;  %v3340_v40 = vadd.f32 %v3339_v4, %v3275_v55  ;;  %v8978_v60 = vld [vmem:[%s13576_s4 + $0x54] sm:$0xf]  ;;  %v7766_v55 = vld [vmem:[%s13576_s4 + $0x58] sm:$0xf0] }
 0x4c3   :  { %4173 = vmatpush.bf16.msrb.mxu2 %v7897_v29  ;;  %v8994_v4 = vld [vmem:[%s13576_s4 + $0xd4] sm:$0xf] }
 0x4c7   :  { %v3403_v5 = vpop.f32.mrf.mxu2 }
 0x4c8   :  { %v3404_v7 = vadd.f32 %v3403_v5, %v3340_v40  ;;  %v3467_v45 = vpop.f32.mrf.mxu3  ;;  %v3278_v51 = vpop.f32.mrf.mxu0  ;;  %v7769_v40 = vor.u32 %v8978_v60, %v7766_v55 }
 0x4c9   :  { %v3342_v14 = vpop.f32.mrf.mxu1 }
 0x4ca   :  { %v11991_v28 = vadd.f32 %v3467_v45, %v3404_v7  ;;  %v3343_v53 = vadd.f32 %v3342_v14, %v3278_v51  ;;  %4045 = vmatpush.bf16.msrb.mxu0 %v7769_v40 }
 0x4cb   :  { %3800 = vmatmul.bf16.gmra.mxu0 %v11140_v52 }
 0x4cc   :  { %14003 = vst [vmem:[#allocation39_spill] sm:$0xff] %v11991_v28  ;;  %3864 = vmatmul.bf16.gmra.mxu1 %v11143_v48  ;;  %3928 = vmatmul.bf16.gmra.mxu2 %v11145_v10 }
 0x4cd   :  { %7931 = vmatmul.msk.bf16.gmra.mxu3 %vm2959_vm4, %v11150_v16 }
 0x4cf   :  { %v3406_v51 = vpop.f32.mrf.mxu2 }
 0x4d0   :  { %v3407_v45 = vadd.f32 %v3406_v51, %v3343_v53  ;;  %v3470_v7 = vpop.f32.mrf.mxu3  ;;  %v3280_v9 = vpop.f32.mrf.mxu0  ;;  %v7830_v53 = vld [vmem:[%s13576_s4 + $0xd8] sm:$0xf0] }
 0x4d1   :  { %v3344_v0 = vpop.f32.mrf.mxu1  ;;  %v7833_v5 = vor.u32 %v8994_v4, %v7830_v53 }
 0x4d2   :  { %v12004_v58 = vadd.f32 %v3470_v7, %v3407_v45  ;;  %v3345_v57 = vadd.f32 %v3344_v0, %v3280_v9  ;;  %v9008_v9 = vld [vmem:[%s13576_s4 + $0x144] sm:$0xf]  ;;  %v7886_v0 = vld [vmem:[%s13576_s4 + $0x148] sm:$0xf0] }
 0x4d3   :  { %4109 = vmatpush.bf16.msrb.mxu1 %v7833_v5 }
 0x4d4   :  { %14004 = vst [vmem:[#allocation40_spill] sm:$0xff] %v12004_v58 }
 0x4d7   :  { %v3408_v14 = vpop.f32.mrf.mxu2 }
 0x4d8   :  { %v3409_v32 = vadd.f32 %v3408_v14, %v3345_v57  ;;  %v3472_v2 = vpop.f32.mrf.mxu3  ;;  %v3283_v29 = vpop.f32.mrf.mxu0  ;;  %v7889_v57 = vor.u32 %v9008_v9, %v7886_v0  ;;  %v8976_v9 = vld [vmem:[%s13576_s4 + $0x44] sm:$0xf] }
 0x4d9   :  { %v3347_v51 = vpop.f32.mrf.mxu1  ;;  %v8992_v0 = vld [vmem:[%s13576_s4 + $0xc4] sm:$0xf] }
 0x4da   :  { %v12018_v45 = vadd.f32 %v3472_v2, %v3409_v32  ;;  %v3348_v7 = vadd.f32 %v3347_v51, %v3283_v29  ;;  %4174 = vmatpush.bf16.msrb.mxu2 %v7889_v57 }
 0x4db   :  { %3805 = vmatmul.bf16.gmra.mxu0 %v11195_v47 }
 0x4dc   :  { %14005 = vst [vmem:[#allocation41_spill] sm:$0xff] %v12018_v45  ;;  %3869 = vmatmul.bf16.gmra.mxu1 %v11198_v27  ;;  %3933 = vmatmul.bf16.gmra.mxu2 %v11200_v33 }
 0x4dd   :  { %7932 = vmatmul.msk.bf16.gmra.mxu3 %vm2959_vm4, %v11207_v6 }
 0x4df   :  { %v3411_v60 = vpop.f32.mrf.mxu2 }
 0x4e0   :  { %v3412_v55 = vadd.f32 %v3411_v60, %v3348_v7  ;;  %v3475_v4 = vpop.f32.mrf.mxu3  ;;  %v3285_v40 = vpop.f32.mrf.mxu0  ;;  %v7758_v7 = vld [vmem:[%s13576_s4 + $0x48] sm:$0xf0] }
 0x4e1   :  { %v3349_v53 = vpop.f32.mrf.mxu1  ;;  %v7761_v57 = vor.u32 %v8976_v9, %v7758_v7  ;;  %v7822_v60 = vld [vmem:[%s13576_s4 + $0xc8] sm:$0xf0]  ;;  %v9016_v9 = vld [vmem:[%s13576_s4 + $0x184] sm:$0xf] }
 0x4e2   :  { %v12031_v5 = vadd.f32 %v3475_v4, %v3412_v55  ;;  %v3350_v14 = vadd.f32 %v3349_v53, %v3285_v40 }
 0x4e3   :  { %4046 = vmatpush.bf16.msrb.mxu0 %v7761_v57 }
 0x4e4   :  { %14006 = vst [vmem:[#allocation42_spill] sm:$0xff] %v12031_v5 }
 0x4e7   :  { %v3413_v32 = vpop.f32.mrf.mxu2 }
 0x4e8   :  { %v3414_v2 = vadd.f32 %v3413_v32, %v3350_v14  ;;  %v3477_v29 = vpop.f32.mrf.mxu3  ;;  %v3288_v51 = vpop.f32.mrf.mxu0 }
 0x4e9   :  { %v3352_v45 = vpop.f32.mrf.mxu1 }
 0x4ea   :  { %v12033_v58 = vadd.f32 %v3477_v29, %v3414_v2  ;;  %v3353_v28 = vadd.f32 %v3352_v45, %v3288_v51  ;;  %v7825_v45 = vor.u32 %v8992_v0, %v7822_v60  ;;  %v9006_v29 = vld [vmem:[%s13576_s4 + $0x134] sm:$0xf]  ;;  %v7878_v51 = vld [vmem:[%s13576_s4 + $0x138] sm:$0xf0] }
 0x4eb   :  { %3810 = vmatmul.bf16.gmra.mxu0 %v11252_v31  ;;  %v7881_v7 = vor.u32 %v9006_v29, %v7878_v51 }
 0x4ec   :  { %14007 = vst [vmem:[#allocation35_spill] sm:$0xff] %v12033_v58  ;;  %3874 = vmatmul.bf16.gmra.mxu1 %v11254_v37  ;;  %3938 = vmatmul.bf16.gmra.mxu2 %v11256_v24 }
 0x4ed   :  { %7933 = vmatmul.msk.bf16.gmra.mxu3 %vm2959_vm4, %v11261_v20  ;;  %4110 = vmatpush.bf16.msrb.mxu1 %v7825_v45 }
 0x4ee   :  { %4175 = vmatpush.bf16.msrb.mxu2 %v7881_v7 }
 0x4ef   :  { %v3416_v55 = vpop.f32.mrf.mxu2 }
 0x4f0   :  { %v3417_v4 = vadd.f32 %v3416_v55, %v3353_v28  ;;  %v3480_v40 = vpop.f32.mrf.mxu3  ;;  %v3290_v53 = vpop.f32.mrf.mxu0  ;;  %v7918_v28 = vld [vmem:[%s13576_s4 + $0x188] sm:$0xf0] }
 0x4f1   :  { %v3354_v14 = vpop.f32.mrf.mxu1  ;;  %v7921_v0 = vor.u32 %v9016_v9, %v7918_v28 }
 0x4f2   :  { %v12052_v32 = vadd.f32 %v3480_v40, %v3417_v4  ;;  %v3355_v2 = vadd.f32 %v3354_v14, %v3290_v53 }
 0x4f3   :  { %4242 = vmatpush.bf16.msrb.mxu3 %v7921_v0  ;;  %v8974_v0 = vld [vmem:[%s13576_s4 + $0x34] sm:$0xf] }
 0x4f4   :  { %14008 = vst [vmem:[#allocation36_spill] sm:$0xff] %v12052_v32 }
 0x4f7   :  { %v3418_v57 = vpop.f32.mrf.mxu2 }
 0x4f8   :  { %v3419_v60 = vadd.f32 %v3418_v57, %v3355_v2  ;;  %v3482_v45 = vpop.f32.mrf.mxu3  ;;  %v3293_v55 = vpop.f32.mrf.mxu0  ;;  %v7750_v57 = vld [vmem:[%s13576_s4 + $0x38] sm:$0xf0] }
 0x4f9   :  { %v3357_v4 = vpop.f32.mrf.mxu1 }
 0x4fa   :  { %v12066_v40 = vadd.f32 %v3482_v45, %v3419_v60  ;;  %v3358_v53 = vadd.f32 %v3357_v4, %v3293_v55  ;;  %v8990_v60 = vld [vmem:[%s13576_s4 + $0xb4] sm:$0xf]  ;;  %v7753_v45 = vor.u32 %v8974_v0, %v7750_v57  ;;  %v7814_v55 = vld [vmem:[%s13576_s4 + $0xb8] sm:$0xf0]  ;;  %v7870_v0 = vld [vmem:[%s13576_s4 + $0x128] sm:$0xf0] }
 0x4fb   :  { %3815 = vmatmul.bf16.gmra.mxu0 %v11299_v35  ;;  %v7817_v4 = vor.u32 %v8990_v60, %v7814_v55 }
 0x4fc   :  { %14009 = vst [vmem:[#allocation43_spill] sm:$0xff] %v12066_v40  ;;  %3879 = vmatmul.bf16.gmra.mxu1 %v11303_v38  ;;  %3943 = vmatmul.bf16.gmra.mxu2 %v11307_v18  ;;  %v9004_v40 = vld [vmem:[%s13576_s4 + $0x124] sm:$0xf] }
 0x4fd   :  { %7934 = vmatmul.msk.bf16.gmra.mxu3 %vm2959_vm4, %v11313_v1  ;;  %4047 = vmatpush.bf16.msrb.mxu0 %v7753_v45  ;;  %v7873_v57 = vor.u32 %v9004_v40, %v7870_v0  ;;  %v8972_v40 = vld [vmem:[%s13576_s4 + $0x24] sm:$0xf] }
 0x4fe   :  { %4111 = vmatpush.bf16.msrb.mxu1 %v7817_v4 }
 0x4ff   :  { %v3421_v14 = vpop.f32.mrf.mxu2  ;;  %4176 = vmatpush.bf16.msrb.mxu2 %v7873_v57 }
 0x500   :  { %v3422_v29 = vadd.f32 %v3421_v14, %v3358_v53  ;;  %v3485_v51 = vpop.f32.mrf.mxu3  ;;  %v3295_v9 = vpop.f32.mrf.mxu0 }
 0x501   :  { %v3359_v2 = vpop.f32.mrf.mxu1 }
 0x502   :  { %v12073_v7 = vadd.f32 %v3485_v51, %v3422_v29  ;;  %v3360_v28 = vadd.f32 %v3359_v2, %v3295_v9 }
 0x504   :  { %14010 = vst [vmem:[#allocation44_spill] sm:$0xff] %v12073_v7 }
 0x507   :  { %v3423_v53 = vpop.f32.mrf.mxu2 }
 0x508   :  { %v3424_v14 = vadd.f32 %v3423_v53, %v3360_v28  ;;  %v3487_v29 = vpop.f32.mrf.mxu3  ;;  %v3298_v51 = vpop.f32.mrf.mxu0 }
 0x509   :  { %v3362_v9 = vpop.f32.mrf.mxu1 }
 0x50a   :  { %v12087_v2 = vadd.f32 %v3487_v29, %v3424_v14  ;;  %v3363_v7 = vadd.f32 %v3362_v9, %v3298_v51  ;;  %v7742_v29 = vld [vmem:[%s13576_s4 + $0x28] sm:$0xf0]  ;;  %v8988_v51 = vld [vmem:[%s13576_s4 + $0xa4] sm:$0xf] }
 0x50b   :  { %3820 = vmatmul.bf16.gmra.mxu0 %v11363_v23  ;;  %v7745_v9 = vor.u32 %v8972_v40, %v7742_v29 }
 0x50c   :  { %14011 = vst [vmem:[#allocation45_spill] sm:$0xff] %v12087_v2  ;;  %3884 = vmatmul.bf16.gmra.mxu1 %v11365_v54  ;;  %3948 = vmatmul.bf16.gmra.mxu2 %v11367_v62 }
 0x50d   :  { %7935 = vmatmul.msk.bf16.gmra.mxu3 %vm2959_vm4, %v11372_v11  ;;  %4048 = vmatpush.bf16.msrb.mxu0 %v7745_v9 }
 0x50f   :  { %v3426_v28 = vpop.f32.mrf.mxu2 }
 0x510   :  { %v3427_v60 = vadd.f32 %v3426_v28, %v3363_v7  ;;  %v3490_v45 = vpop.f32.mrf.mxu3  ;;  %v3300_v55 = vpop.f32.mrf.mxu0  ;;  %v7806_v7 = vld [vmem:[%s13576_s4 + $0xa8] sm:$0xf0] }
 0x511   :  { %v3364_v4 = vpop.f32.mrf.mxu1  ;;  %v7809_v0 = vor.u32 %v8988_v51, %v7806_v7 }
 0x512   :  { %v12100_v53 = vadd.f32 %v3490_v45, %v3427_v60  ;;  %v3365_v14 = vadd.f32 %v3364_v4, %v3300_v55 }
 0x513   :  { %4112 = vmatpush.bf16.msrb.mxu1 %v7809_v0 }
 0x514   :  { %14012 = vst [vmem:[#allocation46_spill] sm:$0xff] %v12100_v53 }
 0x517   :  { %v3428_v57 = vpop.f32.mrf.mxu2 }
 0x518   :  { %v3429_v28 = vadd.f32 %v3428_v57, %v3365_v14  ;;  %v3492_v60 = vpop.f32.mrf.mxu3  ;;  %v3303_v45 = vpop.f32.mrf.mxu0  ;;  %v9002_v57 = vld [vmem:[%s13576_s4 + $0x114] sm:$0xf] }
 0x519   :  { %v3367_v55 = vpop.f32.mrf.mxu1 }
 0x51a   :  { %v12114_v4 = vadd.f32 %v3492_v60, %v3429_v28  ;;  %v3368_v53 = vadd.f32 %v3367_v55, %v3303_v45  ;;  %v7862_v28 = vld [vmem:[%s13576_s4 + $0x118] sm:$0xf0] }
 0x51b   :  { %3825 = vmatmul.bf16.gmra.mxu0 %v11418_v59  ;;  %v7865_v60 = vor.u32 %v9002_v57, %v7862_v28 }
 0x51c   :  { %14013 = vst [vmem:[#allocation53_spill] sm:$0xff] %v12114_v4  ;;  %3889 = vmatmul.bf16.gmra.mxu1 %v11422_v42  ;;  %3953 = vmatmul.bf16.gmra.mxu2 %v11426_v13 }
 0x51d   :  { %7936 = vmatmul.msk.bf16.gmra.mxu3 %vm2959_vm4, %v11432_v3  ;;  %4177 = vmatpush.bf16.msrb.mxu2 %v7865_v60 }
 0x51f   :  { %v3431_v40 = vpop.f32.mrf.mxu2 }
 0x520   :  { %v3432_v29 = vadd.f32 %v3431_v40, %v3368_v53  ;;  %v3495_v51 = vpop.f32.mrf.mxu3  ;;  %v3305_v9 = vpop.f32.mrf.mxu0 }
 0x521   :  { %v3369_v14 = vpop.f32.mrf.mxu1 }
 0x522   :  { %v12121_v7 = vadd.f32 %v3495_v51, %v3432_v29  ;;  %v3370_v0 = vadd.f32 %v3369_v14, %v3305_v9  ;;  %v8970_v51 = vld [vmem:[%s13576_s4 + $0x14] sm:$0xf]  ;;  %v7734_v9 = vld [vmem:[%s13576_s4 + $0x18] sm:$0xf0] }
 0x523   :  { %v7737_v14 = vor.u32 %v8970_v51, %v7734_v9  ;;  %v7854_v51 = vld [vmem:[%s13576_s4 + $0x108] sm:$0xf0] }
 0x524   :  { %14014 = vst [vmem:[#allocation54_spill] sm:$0xff] %v12121_v7  ;;  %v9000_v7 = vld [vmem:[%s13576_s4 + $0x104] sm:$0xf] }
 0x525   :  { %4049 = vmatpush.bf16.msrb.mxu0 %v7737_v14  ;;  %v7857_v9 = vor.u32 %v9000_v7, %v7854_v51 }
 0x527   :  { %v3433_v45 = vpop.f32.mrf.mxu2  ;;  %4178 = vmatpush.bf16.msrb.mxu2 %v7857_v9 }
 0x528   :  { %v3434_v55 = vadd.f32 %v3433_v45, %v3370_v0  ;;  %v3497_v4 = vpop.f32.mrf.mxu3  ;;  %v3308_v53 = vpop.f32.mrf.mxu0  ;;  %v7798_v0 = vld [vmem:[%s13576_s4 + $0x98] sm:$0xf0] }
 0x529   :  { %v3372_v40 = vpop.f32.mrf.mxu1 }
 0x52a   :  { %v12129_v2 = vadd.f32 %v3497_v4, %v3434_v55  ;;  %v3373_v29 = vadd.f32 %v3372_v40, %v3308_v53  ;;  %v8986_v4 = vld [vmem:[%s13576_s4 + $0x94] sm:$0xf] }
 0x52b   :  { %3830 = vmatmul.bf16.gmra.mxu0 %v13986_v25  ;;  %v7801_v28 = vor.u32 %v8986_v4, %v7798_v0 }
 0x52c   :  { %14015 = vst [vmem:[#allocation47_spill] sm:$0xff] %v12129_v2  ;;  %3894 = vmatmul.bf16.gmra.mxu1 %v13987_v22  ;;  %3958 = vmatmul.bf16.gmra.mxu2 %v13988_v36 }
 0x52d   :  { %7937 = vmatmul.msk.bf16.gmra.mxu3 %vm2959_vm4, %v13989_v17  ;;  %4113 = vmatpush.bf16.msrb.mxu1 %v7801_v28 }
 0x52f   :  { %v3436_v57 = vpop.f32.mrf.mxu2 }
 0x530   :  { %v3437_v60 = vadd.f32 %v3436_v57, %v3373_v29  ;;  %v3500_v45 = vpop.f32.mrf.mxu3  ;;  %v3310_v55 = vpop.f32.mrf.mxu0 }
 0x531   :  { %v3374_v53 = vpop.f32.mrf.mxu1 }
 0x532   :  { %v12148_v40 = vadd.f32 %v3500_v45, %v3437_v60  ;;  %v3375_v2 = vadd.f32 %v3374_v53, %v3310_v55 }
 0x534   :  { %14016 = vst [vmem:[#allocation48_spill] sm:$0xff] %v12148_v40  ;;  %v14020_v40 = vld [vmem:[#allocation13_spill] sm:$0xff] }
 0x537   :  { %v3438_v4 = vpop.f32.mrf.mxu2 }
 0x538   :  { %v3439_v29 = vadd.f32 %v3438_v4, %v3375_v2  ;;  %v3502_v0 = vpop.f32.mrf.mxu3  ;;  %v3796_v57 = vpop.f32.mrf.mxu0 }
 0x539   :  { %v3797_v14 = vadd.f32 %v3796_v57, %v11627_v63  ;;  %v3860_v28 = vpop.f32.mrf.mxu1  ;;  %v8984_v57 = vld [vmem:[%s13576_s4 + $0x84] sm:$0xf] }
 0x53a   :  { %v12157_v60 = vadd.f32 %v3502_v0, %v3439_v29  ;;  %v8968_v29 = vld [vmem:[%s13576_s4 + $0x4] sm:$0xf]  ;;  %v7726_v0 = vld [vmem:[%s13576_s4 + $0x8] sm:$0xf0] }
 0x53b   :  { %v3861_v45 = vadd.f32 %v3860_v28, %v3797_v14  ;;  %3835 = vmatmul.bf16.gmra.mxu0 %v11539_v15  ;;  %v7729_v14 = vor.u32 %v8968_v29, %v7726_v0  ;;  %v8382_v29 = vld [vmem:[%s13576_s4 + $0x4d0] sm:$0xf] }
 0x53c   :  { %14017 = vst [vmem:[#allocation49_spill] sm:$0xff] %v12157_v60  ;;  %3899 = vmatmul.bf16.gmra.mxu1 %v13992_v56  ;;  %3963 = vmatmul.bf16.gmra.mxu2 %v13993_v12 }
 0x53d   :  { %7938 = vmatmul.msk.bf16.gmra.mxu3 %vm2959_vm4, %v13994_v61  ;;  %4050 = vmatpush.bf16.msrb.mxu0 %v7729_v14 }
 0x53f   :  { %v3924_v7 = vpop.f32.mrf.mxu2 }
 0x540   :  { %v3925_v55 = vadd.f32 %v3924_v7, %v3861_v45  ;;  %v3988_v2 = vpop.f32.mrf.mxu3  ;;  %v3798_v53 = vpop.f32.mrf.mxu0 }
 0x541   :  { %v3799_v51 = vadd.f32 %v3798_v53, %v11645_v41  ;;  %v3862_v63 = vpop.f32.mrf.mxu1  ;;  %v7790_v41 = vld [vmem:[%s13576_s4 + $0x88] sm:$0xf0] }
 0x542   :  { %v12165_v9 = vadd.f32 %v3988_v2, %v3925_v55  ;;  %v7793_v28 = vor.u32 %v8984_v57, %v7790_v41  ;;  %v9171_v57 = vld [vmem:[%s13576_s4 + $0x4d4] sm:$0xf0] }
 0x543   :  { %v3863_v4 = vadd.f32 %v3862_v63, %v3799_v51  ;;  %v8383_v41 = vor.u32 %v9171_v57, %v8382_v29  ;;  %v8302_v29 = vld [vmem:[%s13576_s4 + $0x430] sm:$0xf]  ;;  %v14023_v57 = vld [vmem:[#allocation11_spill] sm:$0xff] }
 0x544   :  { %14018 = vst [vmem:[#allocation50_spill] sm:$0xff] %v12165_v9  ;;  %4114 = vmatpush.bf16.msrb.mxu1 %v7793_v28 }
 0x545   :  { %5096 = vmatpush.bf16.msra.mxu3 %v8383_v41  ;;  %v14024_v41 = vld [vmem:[#allocation12_spill] sm:$0xff] }
 0x547   :  { %v3926_v45 = vpop.f32.mrf.mxu2 }
 0x548   :  { %v3927_v7 = vadd.f32 %v3926_v45, %v3863_v4  ;;  %v3990_v55 = vpop.f32.mrf.mxu3  ;;  %v3801_v2 = vpop.f32.mrf.mxu0  ;;  %v8366_v4 = vld [vmem:[%s13576_s4 + $0x4b0] sm:$0xf] }
 0x549   :  { %v3802_v53 = vadd.f32 %v3801_v2, %v11670_v39  ;;  %v3865_v51 = vpop.f32.mrf.mxu1  ;;  %v9167_v39 = vld [vmem:[%s13576_s4 + $0x4b4] sm:$0xf0] }
 0x54a   :  { %v12180_v63 = vadd.f32 %v3990_v55, %v3927_v7  ;;  %v8367_v0 = vor.u32 %v9167_v39, %v8366_v4 }
 0x54b   :  { %v3866_v9 = vadd.f32 %v3865_v51, %v3802_v53  ;;  %3840 = vmatmul.bf16.gmra.mxu0 %v11611_v49 }
 0x54c   :  { %14019 = vst [vmem:[#allocation55_spill] sm:$0xff] %v12180_v63  ;;  %3904 = vmatmul.bf16.gmra.mxu1 %v11614_v8  ;;  %3968 = vmatmul.bf16.gmra.mxu2 %v11616_v50 }
 0x54d   :  { %7939 = vmatmul.msk.bf16.gmra.mxu3 %vm2959_vm4, %v11621_v34  ;;  %5026 = vmatpush.bf16.msra.mxu2 %v8367_v0 }
 0x54f   :  { %v3929_v14 = vpop.f32.mrf.mxu2 }
 0x550   :  { %v3930_v28 = vadd.f32 %v3929_v14, %v3866_v9  ;;  %v3993_v45 = vpop.f32.mrf.mxu3  ;;  %v3803_v7 = vpop.f32.mrf.mxu0  ;;  %v8238_v9 = vld [vmem:[%s13576_s4 + $0x3b0] sm:$0xf] }
 0x551   :  { %v3804_v55 = vadd.f32 %v3803_v7, %v11674_v21  ;;  %v3867_v2 = vpop.f32.mrf.mxu1  ;;  %v9135_v21 = vld [vmem:[%s13576_s4 + $0x3b4] sm:$0xf0] }
 0x552   :  { %v12200_v53 = vadd.f32 %v3993_v45, %v3930_v28  ;;  %v8239_v0 = vor.u32 %v9135_v21, %v8238_v9  ;;  %v14025_v7 = vld [vmem:[#allocation14_spill] sm:$0xff]  ;;  %v9165_v9 = vld [vmem:[%s13576_s4 + $0x4a4] sm:$0xf0] }
 0x553   :  { %v3868_v51 = vadd.f32 %v3867_v2, %v3804_v55 }
 0x554   :  { %4898 = vmatpush.bf16.msra.mxu0 %v8239_v0 }
 0x557   :  { %v3931_v63 = vpop.f32.mrf.mxu2 }
 0x558   :  { %v3932_v60 = vadd.f32 %v3931_v63, %v3868_v51  ;;  %v3995_v4 = vpop.f32.mrf.mxu3  ;;  %v3806_v39 = vpop.f32.mrf.mxu0 }
 0x559   :  { %v3807_v32 = vadd.f32 %v3806_v39, %v14020_v40  ;;  %v3870_v58 = vpop.f32.mrf.mxu1  ;;  %v9151_v40 = vld [vmem:[%s13576_s4 + $0x434] sm:$0xf0]  ;;  %v8358_v39 = vld [vmem:[%s13576_s4 + $0x4a0] sm:$0xf] }
 0x55a   :  { %v12203_v5 = vadd.f32 %v3995_v4, %v3932_v60  ;;  %v14022_v60 = vld [vmem:[#allocation6_spill] sm:$0xff]  ;;  %v8303_v14 = vor.u32 %v9151_v40, %v8302_v29  ;;  %v8359_v21 = vor.u32 %v9165_v9, %v8358_v39 }
 0x55b   :  { %v3871_v63 = vadd.f32 %v3870_v58, %v3807_v32  ;;  %3845 = vmatmul.bf16.gmra.mxu0 %v11643_v46 }
 0x55c   :  { %14021 = vst [vmem:[#allocation56_spill] sm:$0xff] %v12203_v5  ;;  %3909 = vmatmul.bf16.gmra.mxu1 %v14022_v60  ;;  %3973 = vmatmul.bf16.gmra.mxu2 %v14023_v57 }
 0x55d   :  { %7940 = vmatmul.msk.bf16.gmra.mxu3 %vm2959_vm4, %v14024_v41  ;;  %4962 = vmatpush.bf16.msra.mxu1 %v8303_v14  ;;  %v14027_v14 = vld [vmem:[#allocation21_spill] sm:$0xff] }
 0x55e   :  { %5027 = vmatpush.bf16.msra.mxu2 %v8359_v21  ;;  %v14029_v21 = vld [vmem:[#allocation22_spill] sm:$0xff] }
 0x55f   :  { %v3934_v28 = vpop.f32.mrf.mxu2 }
 0x560   :  { %v3935_v45 = vadd.f32 %v3934_v28, %v3871_v63  ;;  %v3998_v58 = vpop.f32.mrf.mxu3  ;;  %v3808_v32 = vpop.f32.mrf.mxu0 }
 0x561   :  { %v3809_v55 = vadd.f32 %v3808_v32, %v14025_v7  ;;  %v3872_v2 = vpop.f32.mrf.mxu1  ;;  %v8230_v7 = vld [vmem:[%s13576_s4 + $0x3a0] sm:$0xf] }
 0x562   :  { %v12223_v51 = vadd.f32 %v3998_v58, %v3935_v45 }
 0x563   :  { %v3873_v4 = vadd.f32 %v3872_v2, %v3809_v55  ;;  %v9133_v55 = vld [vmem:[%s13576_s4 + $0x3a4] sm:$0xf0]  ;;  %v8294_v2 = vld [vmem:[%s13576_s4 + $0x420] sm:$0xf] }
 0x564   :  { %14026 = vst [vmem:[#allocation57_spill] sm:$0xff] %v12223_v51 }
 0x567   :  { %v3936_v29 = vpop.f32.mrf.mxu2 }
 0x568   :  { %v3937_v63 = vadd.f32 %v3936_v29, %v3873_v4  ;;  %v4000_v0 = vpop.f32.mrf.mxu3  ;;  %v3811_v40 = vpop.f32.mrf.mxu0 }
 0x569   :  { %v3812_v28 = vadd.f32 %v3811_v40, %v14027_v14  ;;  %v3875_v32 = vpop.f32.mrf.mxu1 }
 0x56a   :  { %v12232_v45 = vadd.f32 %v4000_v0, %v3937_v63 }
 0x56b   :  { %v3876_v58 = vadd.f32 %v3875_v32, %v3812_v28  ;;  %4051 = vmatmul.bf16.vlgmr.msrb.gmra.mxu0 %v11962_v43  ;;  %v8231_v43 = vor.u32 %v9133_v55, %v8230_v7  ;;  %v14030_v55 = vld [vmem:[#allocation15_spill] sm:$0xff] }
 0x56c   :  { %14028 = vst [vmem:[#allocation58_spill] sm:$0xff] %v12232_v45  ;;  %4115 = vmatmul.bf16.vlgmr.msrb.gmra.mxu1 %v11966_v26  ;;  %4179 = vmatmul.bf16.vlgmr.msrb.gmra.mxu2 %v11968_v19  ;;  %v9149_v26 = vld [vmem:[%s13576_s4 + $0x424] sm:$0xf0] }
 0x56d   :  { %7941 = vmatmul.msk.bf16.vlgmr.msrb.gmra.mxu3 %vm2959_vm4, %v11971_v30  ;;  %v8295_v4 = vor.u32 %v9149_v26, %v8294_v2  ;;  %4899 = vmatpush.bf16.msra.mxu0 %v8231_v43  ;;  %v9163_v2 = vld [vmem:[%s13576_s4 + $0x494] sm:$0xf0] }
 0x56f   :  { %v3939_v19 = vpop.f32.mrf.mxu2  ;;  %4963 = vmatpush.bf16.msra.mxu1 %v8295_v4 }
 0x570   :  { %v3940_v30 = vadd.f32 %v3939_v19, %v3876_v58  ;;  %v4003_v39 = vpop.f32.mrf.mxu3  ;;  %v3813_v9 = vpop.f32.mrf.mxu0  ;;  %v8350_v58 = vld [vmem:[%s13576_s4 + $0x490] sm:$0xf] }
 0x571   :  { %v3814_v29 = vadd.f32 %v3813_v9, %v14029_v21  ;;  %v3877_v63 = vpop.f32.mrf.mxu1  ;;  %v8351_v26 = vor.u32 %v9163_v2, %v8350_v58  ;;  %v14031_v9 = vld [vmem:[#allocation16_spill] sm:$0xff] }
 0x572   :  { %v12252_v0 = vadd.f32 %v4003_v39, %v3940_v30 }
 0x573   :  { %v3878_v40 = vadd.f32 %v3877_v63, %v3814_v29  ;;  %5028 = vmatpush.bf16.msra.mxu2 %v8351_v26 }
 0x577   :  { %v3941_v14 = vpop.f32.mrf.mxu2 }
 0x578   :  { %v3942_v28 = vadd.f32 %v3941_v14, %v3878_v40  ;;  %v4005_v32 = vpop.f32.mrf.mxu3  ;;  %v3816_v7 = vpop.f32.mrf.mxu0 }
 0x579   :  { %v3817_v45 = vadd.f32 %v3816_v7, %v14030_v55  ;;  %v3880_v51 = vpop.f32.mrf.mxu1  ;;  %v14032_v55 = vld [vmem:[#allocation17_spill] sm:$0xff] }
 0x57a   :  { %v12255_v5 = vadd.f32 %v4005_v32, %v3942_v28 }
 0x57b   :  { %v3881_v43 = vadd.f32 %v3880_v51, %v3817_v45  ;;  %4056 = vmatmul.bf16.gmra.mxu0 %v11140_v52  ;;  %v8222_v52 = vld [vmem:[%s13576_s4 + $0x390] sm:$0xf]  ;;  %v9147_v45 = vld [vmem:[%s13576_s4 + $0x414] sm:$0xf0] }
 0x57c   :  { %4120 = vmatmul.bf16.gmra.mxu1 %v11143_v48  ;;  %4184 = vmatmul.bf16.gmra.mxu2 %v11145_v10  ;;  %v9131_v48 = vld [vmem:[%s13576_s4 + $0x394] sm:$0xf0]  ;;  %v8286_v10 = vld [vmem:[%s13576_s4 + $0x410] sm:$0xf] }
 0x57d   :  { %7942 = vmatmul.msk.bf16.gmra.mxu3 %vm2959_vm4, %v11150_v16  ;;  %v8223_v16 = vor.u32 %v9131_v48, %v8222_v52  ;;  %v8287_v40 = vor.u32 %v9147_v45, %v8286_v10  ;;  %v14034_v45 = vld [vmem:[#allocation23_spill] sm:$0xff] }
 0x57f   :  { %v3944_v19 = vpop.f32.mrf.mxu2  ;;  %4900 = vmatpush.bf16.msra.mxu0 %v8223_v16  ;;  %4964 = vmatpush.bf16.msra.mxu1 %v8287_v40 }
 0x580   :  { %v3945_v4 = vadd.f32 %v3944_v19, %v3881_v43  ;;  %v4008_v30 = vpop.f32.mrf.mxu3  ;;  %v3818_v39 = vpop.f32.mrf.mxu0  ;;  %v8342_v19 = vld [vmem:[%s13576_s4 + $0x480] sm:$0xf] }
 0x581   :  { %v3819_v21 = vadd.f32 %v3818_v39, %v14031_v9  ;;  %v3882_v29 = vpop.f32.mrf.mxu1 }
 0x582   :  { %v12269_v63 = vadd.f32 %v4008_v30, %v3945_v4  ;;  %v9161_v4 = vld [vmem:[%s13576_s4 + $0x484] sm:$0xf0] }
 0x583   :  { %v3883_v51 = vadd.f32 %v3882_v29, %v3819_v21  ;;  %v8343_v30 = vor.u32 %v9161_v4, %v8342_v19 }
 0x585   :  { %5029 = vmatpush.bf16.msra.mxu2 %v8343_v30 }
 0x587   :  { %v3946_v14 = vpop.f32.mrf.mxu2 }
 0x588   :  { %v3947_v28 = vadd.f32 %v3946_v14, %v3883_v51  ;;  %v4010_v32 = vpop.f32.mrf.mxu3  ;;  %v3821_v7 = vpop.f32.mrf.mxu0 }
 0x589   :  { %v3822_v58 = vadd.f32 %v3821_v7, %v14032_v55  ;;  %v3885_v2 = vpop.f32.mrf.mxu1  ;;  %v8214_v7 = vld [vmem:[%s13576_s4 + $0x380] sm:$0xf]  ;;  %v9129_v55 = vld [vmem:[%s13576_s4 + $0x384] sm:$0xf0] }
 0x58a   :  { %v12284_v43 = vadd.f32 %v4010_v32, %v3947_v28 }
 0x58b   :  { %v3886_v26 = vadd.f32 %v3885_v2, %v3822_v58  ;;  %4061 = vmatmul.bf16.gmra.mxu0 %v11195_v47  ;;  %v8278_v58 = vld [vmem:[%s13576_s4 + $0x400] sm:$0xf]  ;;  %v8215_v2 = vor.u32 %v9129_v55, %v8214_v7 }
 0x58c   :  { %4125 = vmatmul.bf16.gmra.mxu1 %v11198_v27  ;;  %4189 = vmatmul.bf16.gmra.mxu2 %v11200_v33  ;;  %v14033_v27 = vld [vmem:[#allocation18_spill] sm:$0xff] }
 0x58d   :  { %7943 = vmatmul.msk.bf16.gmra.mxu3 %vm2959_vm4, %v11207_v6  ;;  %4901 = vmatpush.bf16.msra.mxu0 %v8215_v2 }
 0x58f   :  { %v3949_v39 = vpop.f32.mrf.mxu2 }
 0x590   :  { %v3950_v9 = vadd.f32 %v3949_v39, %v3886_v26  ;;  %v4013_v21 = vpop.f32.mrf.mxu3  ;;  %v3823_v47 = vpop.f32.mrf.mxu0 }
 0x591   :  { %v3824_v29 = vadd.f32 %v3823_v47, %v14033_v27  ;;  %v3887_v33 = vpop.f32.mrf.mxu1  ;;  %v8334_v27 = vld [vmem:[%s13576_s4 + $0x470] sm:$0xf] }
 0x592   :  { %v12298_v51 = vadd.f32 %v4013_v21, %v3950_v9  ;;  %v14035_v9 = vld [vmem:[#allocation24_spill] sm:$0xff] }
 0x593   :  { %v3888_v6 = vadd.f32 %v3887_v33, %v3824_v29  ;;  %v8374_v29 = vld [vmem:[%s13576_s4 + $0x4c0] sm:$0xf] }
 0x597   :  { %v3951_v52 = vpop.f32.mrf.mxu2 }
 0x598   :  { %v3952_v48 = vadd.f32 %v3951_v52, %v3888_v6  ;;  %v4015_v10 = vpop.f32.mrf.mxu3  ;;  %v3826_v16 = vpop.f32.mrf.mxu0  ;;  %v9169_v6 = vld [vmem:[%s13576_s4 + $0x4c4] sm:$0xf0] }
 0x599   :  { %v3827_v40 = vadd.f32 %v3826_v16, %v14034_v45  ;;  %v3890_v14 = vpop.f32.mrf.mxu1  ;;  %v8375_v52 = vor.u32 %v9169_v6, %v8374_v29 }
 0x59a   :  { %v12301_v28 = vadd.f32 %v4015_v10, %v3952_v48 }
 0x59b   :  { %v3891_v32 = vadd.f32 %v3890_v14, %v3827_v40  ;;  %4066 = vmatmul.bf16.gmra.mxu0 %v11252_v31  ;;  %v9145_v31 = vld [vmem:[%s13576_s4 + $0x404] sm:$0xf0]  ;;  %5097 = vmatpush.bf16.msra.mxu3 %v8375_v52  ;;  %v14036_v40 = vld [vmem:[#allocation25_spill] sm:$0xff] }
 0x59c   :  { %4130 = vmatmul.bf16.gmra.mxu1 %v11254_v37  ;;  %4194 = vmatmul.bf16.gmra.mxu2 %v11256_v24  ;;  %v8279_v26 = vor.u32 %v9145_v31, %v8278_v58 }
 0x59d   :  { %7944 = vmatmul.msk.bf16.gmra.mxu3 %vm2959_vm4, %v11261_v20  ;;  %v9159_v20 = vld [vmem:[%s13576_s4 + $0x474] sm:$0xf0] }
 0x59e   :  { %4965 = vmatpush.bf16.msra.mxu1 %v8279_v26  ;;  %v8335_v33 = vor.u32 %v9159_v20, %v8334_v27 }
 0x59f   :  { %v3954_v19 = vpop.f32.mrf.mxu2 }
 0x5a0   :  { %v3955_v4 = vadd.f32 %v3954_v19, %v3891_v32  ;;  %v4018_v30 = vpop.f32.mrf.mxu3  ;;  %v3828_v39 = vpop.f32.mrf.mxu0  ;;  %5030 = vmatpush.bf16.msra.mxu2 %v8335_v33  ;;  %v14037_v19 = vld [vmem:[#allocation26_spill] sm:$0xff]  ;;  %v14038_v33 = vld [vmem:[#allocation19_spill] sm:$0xff] }
 0x5a1   :  { %v3829_v21 = vadd.f32 %v3828_v39, %v14035_v9  ;;  %v3892_v37 = vpop.f32.mrf.mxu1 }
 0x5a2   :  { %v12321_v47 = vadd.f32 %v4018_v30, %v3955_v4 }
 0x5a3   :  { %v3893_v24 = vadd.f32 %v3892_v37, %v3829_v21  ;;  %v9143_v21 = vld [vmem:[%s13576_s4 + $0x3f4] sm:$0xf0] }
 0x5a7   :  { %v3956_v48 = vpop.f32.mrf.mxu2 }
 0x5a8   :  { %v3957_v10 = vadd.f32 %v3956_v48, %v3893_v24  ;;  %v4020_v16 = vpop.f32.mrf.mxu3  ;;  %v3831_v45 = vpop.f32.mrf.mxu0 }
 0x5a9   :  { %v3832_v14 = vadd.f32 %v3831_v45, %v14036_v40  ;;  %v3895_v32 = vpop.f32.mrf.mxu1  ;;  %v9157_v45 = vld [vmem:[%s13576_s4 + $0x464] sm:$0xf0] }
 0x5aa   :  { %v12336_v7 = vadd.f32 %v4020_v16, %v3957_v10  ;;  %v8326_v16 = vld [vmem:[%s13576_s4 + $0x460] sm:$0xf] }
 0x5ab   :  { %v3896_v55 = vadd.f32 %v3895_v32, %v3832_v14  ;;  %4071 = vmatmul.bf16.gmra.mxu0 %v11299_v35  ;;  %v8206_v35 = vld [vmem:[%s13576_s4 + $0x370] sm:$0xf]  ;;  %v8327_v40 = vor.u32 %v9157_v45, %v8326_v16 }
 0x5ac   :  { %4135 = vmatmul.bf16.gmra.mxu1 %v11303_v38  ;;  %4199 = vmatmul.bf16.gmra.mxu2 %v11307_v18  ;;  %v9127_v38 = vld [vmem:[%s13576_s4 + $0x374] sm:$0xf0]  ;;  %v8270_v18 = vld [vmem:[%s13576_s4 + $0x3f0] sm:$0xf] }
 0x5ad   :  { %7945 = vmatmul.msk.bf16.gmra.mxu3 %vm2959_vm4, %v11313_v1  ;;  %v8207_v9 = vor.u32 %v9127_v38, %v8206_v35  ;;  %v8271_v37 = vor.u32 %v9143_v21, %v8270_v18  ;;  %5031 = vmatpush.bf16.msra.mxu2 %v8327_v40  ;;  %v14040_v21 = vld [vmem:[#allocation27_spill] sm:$0xff] }
 0x5af   :  { %v3959_v58 = vpop.f32.mrf.mxu2  ;;  %4902 = vmatpush.bf16.msra.mxu0 %v8207_v9  ;;  %4966 = vmatpush.bf16.msra.mxu1 %v8271_v37 }
 0x5b0   :  { %v3960_v2 = vadd.f32 %v3959_v58, %v3896_v55  ;;  %v4023_v31 = vpop.f32.mrf.mxu3  ;;  %v3833_v26 = vpop.f32.mrf.mxu0  ;;  %v14039_v58 = vld [vmem:[#allocation20_spill] sm:$0xff] }
 0x5b1   :  { %v3834_v4 = vadd.f32 %v3833_v26, %v14037_v19  ;;  %v3897_v30 = vpop.f32.mrf.mxu1 }
 0x5b2   :  { %v12344_v39 = vadd.f32 %v4023_v31, %v3960_v2 }
 0x5b3   :  { %v3898_v1 = vadd.f32 %v3897_v30, %v3834_v4  ;;  %v9141_v30 = vld [vmem:[%s13576_s4 + $0x3e4] sm:$0xf0] }
 0x5b7   :  { %v3961_v24 = vpop.f32.mrf.mxu2 }
 0x5b8   :  { %v3962_v27 = vadd.f32 %v3961_v24, %v3898_v1  ;;  %v4025_v20 = vpop.f32.mrf.mxu3  ;;  %v3836_v29 = vpop.f32.mrf.mxu0 }
 0x5b9   :  { %v3837_v6 = vadd.f32 %v3836_v29, %v14038_v33  ;;  %v3900_v52 = vpop.f32.mrf.mxu1 }
 0x5ba   :  { %v12359_v48 = vadd.f32 %v4025_v20, %v3962_v27 }
 0x5bb   :  { %v3901_v10 = vadd.f32 %v3900_v52, %v3837_v6  ;;  %4076 = vmatmul.bf16.gmra.mxu0 %v11363_v23 }
 0x5bc   :  { %4140 = vmatmul.bf16.gmra.mxu1 %v11365_v54  ;;  %4204 = vmatmul.bf16.gmra.mxu2 %v11367_v62  ;;  %v8198_v54 = vld [vmem:[%s13576_s4 + $0x360] sm:$0xf]  ;;  %v9125_v62 = vld [vmem:[%s13576_s4 + $0x364] sm:$0xf0] }
 0x5bd   :  { %7946 = vmatmul.msk.bf16.gmra.mxu3 %vm2959_vm4, %v11372_v11  ;;  %v8262_v11 = vld [vmem:[%s13576_s4 + $0x3e0] sm:$0xf]  ;;  %v8199_v4 = vor.u32 %v9125_v62, %v8198_v54  ;;  %v8190_v62 = vld [vmem:[%s13576_s4 + $0x350] sm:$0xf] }
 0x5be   :  { %v8263_v35 = vor.u32 %v9141_v30, %v8262_v11  ;;  %v9123_v11 = vld [vmem:[%s13576_s4 + $0x354] sm:$0xf0] }
 0x5bf   :  { %v3964_v14 = vpop.f32.mrf.mxu2  ;;  %4903 = vmatpush.bf16.msra.mxu0 %v8199_v4  ;;  %v8254_v4 = vld [vmem:[%s13576_s4 + $0x3d0] sm:$0xf] }
 0x5c0   :  { %v3965_v32 = vadd.f32 %v3964_v14, %v3901_v10  ;;  %v4028_v23 = vpop.f32.mrf.mxu3  ;;  %v3838_v55 = vpop.f32.mrf.mxu0  ;;  %4967 = vmatpush.bf16.msra.mxu1 %v8263_v35  ;;  %v14041_v10 = vld [vmem:[#allocation28_spill] sm:$0xff] }
 0x5c1   :  { %v3839_v2 = vadd.f32 %v3838_v55, %v14039_v58  ;;  %v3902_v31 = vpop.f32.mrf.mxu1  ;;  %v14043_v58 = vld [vmem:[#allocation29_spill] sm:$0xff] }
 0x5c2   :  { %v12373_v26 = vadd.f32 %v4028_v23, %v3965_v32 }
 0x5c3   :  { %v3903_v19 = vadd.f32 %v3902_v31, %v3839_v2 }
 0x5c7   :  { %v3966_v38 = vpop.f32.mrf.mxu2 }
 0x5c8   :  { %v3967_v18 = vadd.f32 %v3966_v38, %v3903_v19  ;;  %v4030_v1 = vpop.f32.mrf.mxu3  ;;  %v3841_v9 = vpop.f32.mrf.mxu0 }
 0x5c9   :  { %v3842_v37 = vadd.f32 %v3841_v9, %v14040_v21  ;;  %v3905_v24 = vpop.f32.mrf.mxu1 }
 0x5ca   :  { %v12388_v27 = vadd.f32 %v4030_v1, %v3967_v18  ;;  %v14045_v18 = vld [vmem:[#allocation30_spill] sm:$0xff] }
 0x5cb   :  { %v3906_v20 = vadd.f32 %v3905_v24, %v3842_v37  ;;  %4081 = vmatmul.bf16.gmra.mxu0 %v11418_v59  ;;  %v8318_v59 = vld [vmem:[%s13576_s4 + $0x450] sm:$0xf]  ;;  %v8310_v24 = vld [vmem:[%s13576_s4 + $0x440] sm:$0xf] }
 0x5cc   :  { %4145 = vmatmul.bf16.gmra.mxu1 %v11422_v42  ;;  %4209 = vmatmul.bf16.gmra.mxu2 %v11426_v13  ;;  %v9155_v42 = vld [vmem:[%s13576_s4 + $0x454] sm:$0xf0] }
 0x5cd   :  { %7947 = vmatmul.msk.bf16.gmra.mxu3 %vm2959_vm4, %v11432_v3  ;;  %v8319_v14 = vor.u32 %v9155_v42, %v8318_v59 }
 0x5cf   :  { %v3969_v29 = vpop.f32.mrf.mxu2  ;;  %5032 = vmatpush.bf16.msra.mxu2 %v8319_v14 }
 0x5d0   :  { %v3970_v33 = vadd.f32 %v3969_v29, %v3906_v20  ;;  %v4033_v6 = vpop.f32.mrf.mxu3  ;;  %v3843_v52 = vpop.f32.mrf.mxu0  ;;  %v9153_v20 = vld [vmem:[%s13576_s4 + $0x444] sm:$0xf0] }
 0x5d1   :  { %v3844_v16 = vadd.f32 %v3843_v52, %v14041_v10  ;;  %v3907_v45 = vpop.f32.mrf.mxu1  ;;  %v8311_v29 = vor.u32 %v9153_v20, %v8310_v24 }
 0x5d2   :  { %v12396_v40 = vadd.f32 %v4033_v6, %v3970_v33 }
 0x5d3   :  { %v3908_v13 = vadd.f32 %v3907_v45, %v3844_v16  ;;  %5033 = vmatpush.bf16.msra.mxu2 %v8311_v29  ;;  %v14047_v16 = vld [vmem:[#allocation37_spill] sm:$0xff] }
 0x5d4   :  { %14042 = vst [vmem:[#allocation51_spill] sm:$0xff] %v12396_v40 }
 0x5d7   :  { %v3971_v3 = vpop.f32.mrf.mxu2 }
 0x5d8   :  { %v3972_v32 = vadd.f32 %v3971_v3, %v3908_v13  ;;  %v4035_v23 = vpop.f32.mrf.mxu3  ;;  %v3846_v55 = vpop.f32.mrf.mxu0 }
 0x5d9   :  { %v3847_v2 = vadd.f32 %v3846_v55, %v14043_v58  ;;  %v3910_v31 = vpop.f32.mrf.mxu1  ;;  %v14049_v55 = vld [vmem:[#allocation38_spill] sm:$0xff] }
 0x5da   :  { %v12405_v19 = vadd.f32 %v4035_v23, %v3972_v32 }
 0x5db   :  { %v3911_v54 = vadd.f32 %v3910_v31, %v3847_v2  ;;  %4086 = vmatmul.bf16.gmra.mxu0 %v13986_v25  ;;  %v8191_v25 = vor.u32 %v9123_v11, %v8190_v62  ;;  %v9137_v62 = vld [vmem:[%s13576_s4 + $0x3c4] sm:$0xf0] }
 0x5dc   :  { %14044 = vst [vmem:[#allocation52_spill] sm:$0xff] %v12405_v19  ;;  %4150 = vmatmul.bf16.gmra.mxu1 %v13987_v22  ;;  %4214 = vmatmul.bf16.gmra.mxu2 %v13988_v36  ;;  %v9139_v22 = vld [vmem:[%s13576_s4 + $0x3d4] sm:$0xf0] }
 0x5dd   :  { %7948 = vmatmul.msk.bf16.gmra.mxu3 %vm2959_vm4, %v13989_v17  ;;  %v8255_v30 = vor.u32 %v9139_v22, %v8254_v4  ;;  %4904 = vmatpush.bf16.msra.mxu0 %v8191_v25 }
 0x5df   :  { %v3974_v36 = vpop.f32.mrf.mxu2  ;;  %4968 = vmatpush.bf16.msra.mxu1 %v8255_v30  ;;  %v14051_v30 = vld [vmem:[#allocation31_spill] sm:$0xff] }
 0x5e0   :  { %v3975_v17 = vadd.f32 %v3974_v36, %v3911_v54  ;;  %v4038_v35 = vpop.f32.mrf.mxu3  ;;  %v3848_v38 = vpop.f32.mrf.mxu0 }
 0x5e1   :  { %v3849_v1 = vadd.f32 %v3848_v38, %v14045_v18  ;;  %v3912_v9 = vpop.f32.mrf.mxu1 }
 0x5e2   :  { %v12425_v21 = vadd.f32 %v4038_v35, %v3975_v17 }
 0x5e3   :  { %v3913_v37 = vadd.f32 %v3912_v9, %v3849_v1  ;;  %v9166_v1 = vld [vmem:[%s13576_s4 + $0x4b4] sm:$0xf]  ;;  %v8368_v9 = vld [vmem:[%s13576_s4 + $0x4b8] sm:$0xf0] }
 0x5e4   :  { %14046 = vst [vmem:[#allocation59_spill] sm:$0xff] %v12425_v21 }
 0x5e7   :  { %v3976_v33 = vpop.f32.mrf.mxu2 }
 0x5e8   :  { %v3977_v6 = vadd.f32 %v3976_v33, %v3913_v37  ;;  %v4040_v52 = vpop.f32.mrf.mxu3  ;;  %v4052_v10 = vpop.f32.mrf.mxu0  ;;  %v9170_v37 = vld [vmem:[%s13576_s4 + $0x4d4] sm:$0xf]  ;;  %v14053_v33 = vld [vmem:[#allocation32_spill] sm:$0xff] }
 0x5e9   :  { %v4053_v45 = vadd.f32 %v4052_v10, %v14047_v16  ;;  %v4116_v59 = vpop.f32.mrf.mxu1 }
 0x5ea   :  { %v12434_v42 = vadd.f32 %v4040_v52, %v3977_v6 }
 0x5eb   :  { %v4117_v13 = vadd.f32 %v4116_v59, %v4053_v45  ;;  %4091 = vmatmul.bf16.gmra.mxu0 %v11539_v15  ;;  %v8182_v15 = vld [vmem:[%s13576_s4 + $0x340] sm:$0xf] }
 0x5ec   :  { %14048 = vst [vmem:[#allocation60_spill] sm:$0xff] %v12434_v42  ;;  %4155 = vmatmul.bf16.gmra.mxu1 %v13992_v56  ;;  %4219 = vmatmul.bf16.gmra.mxu2 %v13993_v12  ;;  %v9121_v56 = vld [vmem:[%s13576_s4 + $0x344] sm:$0xf0]  ;;  %v8246_v12 = vld [vmem:[%s13576_s4 + $0x3c0] sm:$0xf] }
 0x5ed   :  { %7949 = vmatmul.msk.bf16.gmra.mxu3 %vm2959_vm4, %v13994_v61  ;;  %v8183_v61 = vor.u32 %v9121_v56, %v8182_v15  ;;  %v8247_v11 = vor.u32 %v9137_v62, %v8246_v12  ;;  %v8304_v12 = vld [vmem:[%s13576_s4 + $0x438] sm:$0xf0] }
 0x5ef   :  { %v4180_v14 = vpop.f32.mrf.mxu2  ;;  %4905 = vmatpush.bf16.msra.mxu0 %v8183_v61  ;;  %4969 = vmatpush.bf16.msra.mxu1 %v8247_v11 }
 0x5f0   :  { %v4181_v3 = vadd.f32 %v4180_v14, %v4117_v13  ;;  %v4244_v32 = vpop.f32.mrf.mxu3  ;;  %v4054_v23 = vpop.f32.mrf.mxu0 }
 0x5f1   :  { %v4055_v58 = vadd.f32 %v4054_v23, %v14049_v55  ;;  %v4118_v2 = vpop.f32.mrf.mxu1 }
 0x5f2   :  { %v12442_v31 = vadd.f32 %v4244_v32, %v4181_v3  ;;  %v14055_v3 = vld [vmem:[#allocation33_spill] sm:$0xff] }
 0x5f3   :  { %v4119_v54 = vadd.f32 %v4118_v2, %v4055_v58  ;;  %v9134_v58 = vld [vmem:[%s13576_s4 + $0x3b4] sm:$0xf]  ;;  %v8240_v2 = vld [vmem:[%s13576_s4 + $0x3b8] sm:$0xf0] }
 0x5f4   :  { %14050 = vst [vmem:[#allocation61_spill] sm:$0xff] %v12442_v31  ;;  %v8243_v56 = vor.u32 %v9134_v58, %v8240_v2  ;;  %v8296_v58 = vld [vmem:[%s13576_s4 + $0x428] sm:$0xf0]  ;;  %v9104_v31 = vld [vmem:[#allocation2 + $0x124] sm:$0xf] }
 0x5f6   :  { %5154 = vmatpush.bf16.msrb.mxu0 %v8243_v56 }
 0x5f7   :  { %v4182_v4 = vpop.f32.mrf.mxu2 }
 0x5f8   :  { %v4183_v25 = vadd.f32 %v4182_v4, %v4119_v54  ;;  %v4246_v22 = vpop.f32.mrf.mxu3  ;;  %v4057_v36 = vpop.f32.mrf.mxu0  ;;  %v9150_v54 = vld [vmem:[%s13576_s4 + $0x434] sm:$0xf] }
 0x5f9   :  { %v4058_v17 = vadd.f32 %v4057_v36, %v14051_v30  ;;  %v4121_v35 = vpop.f32.mrf.mxu1  ;;  %v8307_v61 = vor.u32 %v9150_v54, %v8304_v12 }
 0x5fa   :  { %v12457_v38 = vadd.f32 %v4246_v22, %v4183_v25 }
 0x5fb   :  { %v4122_v18 = vadd.f32 %v4121_v35, %v4058_v17  ;;  %4096 = vmatmul.bf16.gmra.mxu0 %v11611_v49  ;;  %v8371_v49 = vor.u32 %v9166_v1, %v8368_v9  ;;  %5218 = vmatpush.bf16.msrb.mxu1 %v8307_v61  ;;  %v9078_v35 = vld [vmem:[#allocation2 + $0x4c] sm:$0xf0]  ;;  %v8008_v1 = vld [vmem:[#allocation2 + $0x50] sm:$0xf0]  ;;  %v9079_v9 = vld [vmem:[#allocation2 + $0x54] sm:$0xf0] }
 0x5fc   :  { %14052 = vst [vmem:[#allocation62_spill] sm:$0xff] %v12457_v38  ;;  %4160 = vmatmul.bf16.gmra.mxu1 %v11614_v8  ;;  %4224 = vmatmul.bf16.gmra.mxu2 %v11616_v50  ;;  %v8384_v8 = vld [vmem:[%s13576_s4 + $0x4d8] sm:$0xf0]  ;;  %v14060_v61 = vld [vmem:[#allocation39_spill] sm:$0xff]  ;;  %v8126_v38 = vld [vmem:[#allocation2 + $0x128] sm:$0xf] }
 0x5fd   :  { %7950 = vmatmul.msk.bf16.gmra.mxu3 %vm2959_vm4, %v11621_v34  ;;  %v8387_v24 = vor.u32 %v9170_v37, %v8384_v8  ;;  %5282 = vmatpush.bf16.msrb.mxu2 %v8371_v49 }
 0x5ff   :  { %v4185_v50 = vpop.f32.mrf.mxu2  ;;  %5352 = vmatpush.bf16.msrb.mxu3 %v8387_v24  ;;  %v8016_v24 = vld [vmem:[#allocation2 + $0x58] sm:$0xf0] }
 0x600   :  { %v4186_v34 = vadd.f32 %v4185_v50, %v4122_v18  ;;  %v4249_v20 = vpop.f32.mrf.mxu3  ;;  %v4059_v29 = vpop.f32.mrf.mxu0  ;;  %v8006_v50 = vld [vmem:[#allocation2 + $0x40] sm:$0xf] }
 0x601   :  { %v4060_v6 = vadd.f32 %v4059_v29, %v14053_v33  ;;  %v4123_v52 = vpop.f32.mrf.mxu1  ;;  %v12509_v29 = vor.u32 %v9078_v35, %v8006_v50  ;;  %v9076_v33 = vld [vmem:[#allocation2 + $0x44] sm:$0xf]  ;;  %v8022_v35 = vld [vmem:[#allocation2 + $0x60] sm:$0xf]  ;;  %v8030_v50 = vld [vmem:[#allocation2 + $0x68] sm:$0xf] }
 0x602   :  { %v12477_v10 = vadd.f32 %v4249_v20, %v4186_v34 }
 0x603   :  { %v4124_v16 = vadd.f32 %v4123_v52, %v4060_v6  ;;  %v8014_v6 = vld [vmem:[#allocation2 + $0x48] sm:$0xf] }
 0x604   :  { %14054 = vst [vmem:[#allocation69_spill] sm:$0xff] %v12477_v10  ;;  %v8110_v10 = vld [vmem:[#allocation2 + $0x108] sm:$0xf] }
 0x607   :  { %v4187_v45 = vpop.f32.mrf.mxu2 }
 0x608   :  { %v4188_v59 = vadd.f32 %v4187_v45, %v4124_v16  ;;  %v4251_v13 = vpop.f32.mrf.mxu3  ;;  %v4062_v14 = vpop.f32.mrf.mxu0  ;;  %v12513_v16 = vor.u32 %v9076_v33, %v8008_v1  ;;  %v12515_v45 = vor.u32 %v9079_v9, %v8014_v6  ;;  %v14062_v1 = vld [vmem:[#allocation40_spill] sm:$0xff]  ;;  %v9162_v6 = vld [vmem:[%s13576_s4 + $0x494] sm:$0xf] }
 0x609   :  { %v4063_v32 = vadd.f32 %v4062_v14, %v14055_v3  ;;  %v4126_v23 = vpop.f32.mrf.mxu1  ;;  %v8232_v3 = vld [vmem:[%s13576_s4 + $0x3a8] sm:$0xf0] }
 0x60a   :  { %v12480_v55 = vadd.f32 %v4251_v13, %v4188_v59  ;;  %v9077_v59 = vld [vmem:[#allocation2 + $0x4c] sm:$0xf] }
 0x60b   :  { %v4127_v15 = vadd.f32 %v4126_v23, %v4063_v32  ;;  %4101 = vmatmul.bf16.gmra.mxu0 %v11643_v46  ;;  %v14057_v46 = vld [vmem:[#allocation34_spill] sm:$0xff]  ;;  %v12518_v14 = vor.u32 %v9077_v59, %v8016_v24  ;;  %v9148_v32 = vld [vmem:[%s13576_s4 + $0x424] sm:$0xf]  ;;  %v9081_v33 = vld [vmem:[#allocation2 + $0x6c] sm:$0xf] }
 0x60c   :  { %14056 = vst [vmem:[#allocation70_spill] sm:$0xff] %v12480_v55  ;;  %4165 = vmatmul.bf16.gmra.mxu1 %v14022_v60  ;;  %4229 = vmatmul.bf16.gmra.mxu2 %v14023_v57  ;;  %v9164_v60 = vld [vmem:[%s13576_s4 + $0x4a4] sm:$0xf]  ;;  %v8360_v57 = vld [vmem:[%s13576_s4 + $0x4a8] sm:$0xf0]  ;;  %v8299_v54 = vor.u32 %v9148_v32, %v8296_v58 }
 0x60d   :  { %7951 = vmatmul.msk.bf16.gmra.mxu3 %vm2959_vm4, %v14024_v41  ;;  %v8363_v41 = vor.u32 %v9164_v60, %v8360_v57  ;;  %v8352_v59 = vld [vmem:[%s13576_s4 + $0x498] sm:$0xf0] }
 0x60e   :  { %5219 = vmatpush.bf16.msrb.mxu1 %v8299_v54  ;;  %v14064_v54 = vld [vmem:[#allocation41_spill] sm:$0xff] }
 0x60f   :  { %v4190_v62 = vpop.f32.mrf.mxu2  ;;  %5283 = vmatpush.bf16.msrb.mxu2 %v8363_v41 }
 0x610   :  { %v4191_v11 = vadd.f32 %v4190_v62, %v4127_v15  ;;  %v4254_v4 = vpop.f32.mrf.mxu3  ;;  %v4064_v25 = vpop.f32.mrf.mxu0 }
 0x611   :  { %v4065_v22 = vadd.f32 %v4064_v25, %v14057_v46  ;;  %v4128_v36 = vpop.f32.mrf.mxu1  ;;  %v9082_v46 = vld [vmem:[#allocation2 + $0x6c] sm:$0xf0] }
 0x612   :  { %v12500_v30 = vadd.f32 %v4254_v4, %v4191_v11 }
 0x613   :  { %v4129_v17 = vadd.f32 %v4128_v36, %v4065_v22  ;;  %v8024_v36 = vld [vmem:[#allocation2 + $0x70] sm:$0xf0] }
 0x614   :  { %14058 = vst [vmem:[#allocation63_spill] sm:$0xff] %v12500_v30 }
 0x617   :  { %v4192_v18 = vpop.f32.mrf.mxu2 }
 0x618   :  { %v4193_v37 = vadd.f32 %v4192_v18, %v4129_v17  ;;  %v4256_v49 = vpop.f32.mrf.mxu3  ;;  %v4067_v8 = vpop.f32.mrf.mxu0  ;;  %v9083_v17 = vld [vmem:[#allocation2 + $0x74] sm:$0xf0]  ;;  %v8032_v18 = vld [vmem:[#allocation2 + $0x78] sm:$0xf0] }
 0x619   :  { %v4068_v34 = vadd.f32 %v4067_v8, %v11989_v44  ;;  %v4131_v20 = vpop.f32.mrf.mxu1  ;;  %v9132_v44 = vld [vmem:[%s13576_s4 + $0x3a4] sm:$0xf] }
 0x61a   :  { %v12511_v52 = vadd.f32 %v4256_v49, %v4193_v37  ;;  %v8235_v23 = vor.u32 %v9132_v44, %v8232_v3  ;;  %v12540_v49 = vor.u32 %v9082_v46, %v8022_v35  ;;  %v9080_v8 = vld [vmem:[#allocation2 + $0x64] sm:$0xf]  ;;  %v12555_v44 = vor.u32 %v9081_v33, %v8032_v18 }
 0x61b   :  { %v4132_v13 = vadd.f32 %v4131_v20, %v4068_v34  ;;  %4906 = vmatmul.bf16.vlgmr.msra.gmra.mxu0 %v12509_v29  ;;  %v12544_v34 = vor.u32 %v9080_v8, %v8024_v36  ;;  %v12546_v20 = vor.u32 %v9083_v17, %v8030_v50  ;;  %v8355_v3 = vor.u32 %v9162_v6, %v8352_v59  ;;  %v9086_v17 = vld [vmem:[#allocation2 + $0x8c] sm:$0xf0]  ;;  %v14066_v8 = vld [vmem:[#allocation42_spill] sm:$0xff]  ;;  %v9084_v59 = vld [vmem:[#allocation2 + $0x84] sm:$0xf] }
 0x61c   :  { %14059 = vst [vmem:[#allocation64_spill] sm:$0xff] %v12511_v52  ;;  %4970 = vmatmul.bf16.vlgmr.msra.gmra.mxu1 %v12513_v16  ;;  %5034 = vmatmul.bf16.vlgmr.msra.gmra.mxu2 %v12515_v45 }
 0x61d   :  { %8388 = vmatmul.msk.bf16.vlgmr.msra.gmra.mxu3 %vm2959_vm4, %v12518_v14  ;;  %5155 = vmatpush.bf16.msrb.mxu0 %v8235_v23 }
 0x61e   :  { %5284 = vmatpush.bf16.msrb.mxu2 %v8355_v3 }
 0x61f   :  { %v4195_v2 = vpop.f32.mrf.mxu2 }
 0x620   :  { %v4196_v15 = vadd.f32 %v4195_v2, %v4132_v13  ;;  %v4259_v56 = vpop.f32.mrf.mxu3  ;;  %v4069_v12 = vpop.f32.mrf.mxu0 }
 0x621   :  { %v4070_v62 = vadd.f32 %v4069_v12, %v14060_v61  ;;  %v4133_v11 = vpop.f32.mrf.mxu1 }
 0x622   :  { %v12537_v4 = vadd.f32 %v4259_v56, %v4196_v15 }
 0x623   :  { %v4134_v25 = vadd.f32 %v4133_v11, %v4070_v62  ;;  %v9130_v62 = vld [vmem:[%s13576_s4 + $0x394] sm:$0xf]  ;;  %v8224_v11 = vld [vmem:[%s13576_s4 + $0x398] sm:$0xf0] }
 0x624   :  { %14061 = vst [vmem:[#allocation65_spill] sm:$0xff] %v12537_v4  ;;  %v8227_v46 = vor.u32 %v9130_v62, %v8224_v11 }
 0x626   :  { %5156 = vmatpush.bf16.msrb.mxu0 %v8227_v46 }
 0x627   :  { %v4197_v22 = vpop.f32.mrf.mxu2 }
 0x628   :  { %v4198_v60 = vadd.f32 %v4197_v22, %v4134_v25  ;;  %v4261_v57 = vpop.f32.mrf.mxu3  ;;  %v4072_v41 = vpop.f32.mrf.mxu0  ;;  %v9146_v25 = vld [vmem:[%s13576_s4 + $0x414] sm:$0xf]  ;;  %v8288_v22 = vld [vmem:[%s13576_s4 + $0x418] sm:$0xf0] }
 0x629   :  { %v4073_v9 = vadd.f32 %v4072_v41, %v14062_v1  ;;  %v4136_v37 = vpop.f32.mrf.mxu1  ;;  %v8291_v36 = vor.u32 %v9146_v25, %v8288_v22  ;;  %v9087_v41 = vld [vmem:[#allocation2 + $0x94] sm:$0xf0]  ;;  %v14068_v22 = vld [vmem:[#allocation35_spill] sm:$0xff] }
 0x62a   :  { %v12542_v24 = vadd.f32 %v4261_v57, %v4198_v60  ;;  %v8040_v57 = vld [vmem:[#allocation2 + $0x90] sm:$0xf0] }
 0x62b   :  { %v4137_v13 = vadd.f32 %v4136_v37, %v4073_v9  ;;  %4911 = vmatmul.bf16.gmra.mxu0 %v12540_v49  ;;  %5220 = vmatpush.bf16.msrb.mxu1 %v8291_v36  ;;  %v8038_v9 = vld [vmem:[#allocation2 + $0x80] sm:$0xf]  ;;  %v8048_v37 = vld [vmem:[#allocation2 + $0x98] sm:$0xf0] }
 0x62c   :  { %14063 = vst [vmem:[#allocation66_spill] sm:$0xff] %v12542_v24  ;;  %4975 = vmatmul.bf16.gmra.mxu1 %v12544_v34  ;;  %5039 = vmatmul.bf16.gmra.mxu2 %v12546_v20  ;;  %v12577_v6 = vor.u32 %v9086_v17, %v8038_v9 }
 0x62d   :  { %8389 = vmatmul.msk.bf16.gmra.mxu3 %vm2959_vm4, %v12555_v44 }
 0x62f   :  { %v4200_v32 = vpop.f32.mrf.mxu2 }
 0x630   :  { %v4201_v23 = vadd.f32 %v4200_v32, %v4137_v13  ;;  %v4264_v58 = vpop.f32.mrf.mxu3  ;;  %v4074_v2 = vpop.f32.mrf.mxu0  ;;  %v8046_v13 = vld [vmem:[#allocation2 + $0x88] sm:$0xf]  ;;  %v12581_v32 = vor.u32 %v9084_v59, %v8040_v57 }
 0x631   :  { %v4075_v15 = vadd.f32 %v4074_v2, %v14064_v54  ;;  %v4138_v56 = vpop.f32.mrf.mxu1  ;;  %v14070_v59 = vld [vmem:[#allocation36_spill] sm:$0xff] }
 0x632   :  { %v12562_v12 = vadd.f32 %v4264_v58, %v4201_v23  ;;  %v12583_v23 = vor.u32 %v9087_v41, %v8046_v13  ;;  %v9085_v58 = vld [vmem:[#allocation2 + $0x8c] sm:$0xf]  ;;  %v9090_v41 = vld [vmem:[#allocation2 + $0xac] sm:$0xf0] }
 0x633   :  { %v4139_v61 = vadd.f32 %v4138_v56, %v4075_v15  ;;  %v12586_v54 = vor.u32 %v9085_v58, %v8048_v37  ;;  %v9160_v15 = vld [vmem:[%s13576_s4 + $0x484] sm:$0xf]  ;;  %v8344_v56 = vld [vmem:[%s13576_s4 + $0x488] sm:$0xf0] }
 0x634   :  { %14065 = vst [vmem:[#allocation71_spill] sm:$0xff] %v12562_v12  ;;  %v8096_v12 = vld [vmem:[#allocation2 + $0xf8] sm:$0xf0] }
 0x637   :  { %v4202_v60 = vpop.f32.mrf.mxu2 }
 0x638   :  { %v4203_v35 = vadd.f32 %v4202_v60, %v4139_v61  ;;  %v4266_v18 = vpop.f32.mrf.mxu3  ;;  %v4077_v1 = vpop.f32.mrf.mxu0  ;;  %v8347_v61 = vor.u32 %v9160_v15, %v8344_v56  ;;  %v9088_v15 = vld [vmem:[#allocation2 + $0xa4] sm:$0xf]  ;;  %v8062_v56 = vld [vmem:[#allocation2 + $0xa8] sm:$0xf] }
 0x639   :  { %v4078_v50 = vadd.f32 %v4077_v1, %v14066_v8  ;;  %v4141_v33 = vpop.f32.mrf.mxu1  ;;  %v9091_v1 = vld [vmem:[#allocation2 + $0xb4] sm:$0xf0] }
 0x63a   :  { %v12579_v3 = vadd.f32 %v4266_v18, %v4203_v35  ;;  %5285 = vmatpush.bf16.msrb.mxu2 %v8347_v61  ;;  %v8056_v18 = vld [vmem:[#allocation2 + $0xb0] sm:$0xf0] }
 0x63b   :  { %v4142_v2 = vadd.f32 %v4141_v33, %v4078_v50  ;;  %4916 = vmatmul.bf16.gmra.mxu0 %v12577_v6  ;;  %v8054_v50 = vld [vmem:[#allocation2 + $0xa0] sm:$0xf]  ;;  %v8064_v33 = vld [vmem:[#allocation2 + $0xb8] sm:$0xf0] }
 0x63c   :  { %14067 = vst [vmem:[#allocation72_spill] sm:$0xff] %v12579_v3  ;;  %4980 = vmatmul.bf16.gmra.mxu1 %v12581_v32  ;;  %5044 = vmatmul.bf16.gmra.mxu2 %v12583_v23  ;;  %v14078_v3 = vld [vmem:[#allocation46_spill] sm:$0xff] }
 0x63d   :  { %8390 = vmatmul.msk.bf16.gmra.mxu3 %vm2959_vm4, %v12586_v54 }
 0x63f   :  { %v4205_v62 = vpop.f32.mrf.mxu2 }
 0x640   :  { %v4206_v11 = vadd.f32 %v4205_v62, %v4142_v2  ;;  %v4269_v25 = vpop.f32.mrf.mxu3  ;;  %v4079_v46 = vpop.f32.mrf.mxu0  ;;  %v12602_v2 = vor.u32 %v9090_v41, %v8054_v50  ;;  %v12606_v62 = vor.u32 %v9088_v15, %v8056_v18  ;;  %v14072_v50 = vld [vmem:[#allocation43_spill] sm:$0xff]  ;;  %v9158_v15 = vld [vmem:[%s13576_s4 + $0x474] sm:$0xf] }
 0x641   :  { %v4080_v36 = vadd.f32 %v4079_v46, %v14068_v22  ;;  %v4143_v17 = vpop.f32.mrf.mxu1 }
 0x642   :  { %v12599_v60 = vadd.f32 %v4269_v25, %v4206_v11  ;;  %v12608_v11 = vor.u32 %v9091_v1, %v8062_v56  ;;  %v9089_v25 = vld [vmem:[#allocation2 + $0xac] sm:$0xf]  ;;  %v8336_v56 = vld [vmem:[%s13576_s4 + $0x478] sm:$0xf0] }
 0x643   :  { %v4144_v57 = vadd.f32 %v4143_v17, %v4080_v36  ;;  %v12611_v22 = vor.u32 %v9089_v25, %v8064_v33  ;;  %v9128_v36 = vld [vmem:[%s13576_s4 + $0x384] sm:$0xf]  ;;  %v8216_v17 = vld [vmem:[%s13576_s4 + $0x388] sm:$0xf0] }
 0x644   :  { %14069 = vst [vmem:[#allocation73_spill] sm:$0xff] %v12599_v60  ;;  %v8219_v41 = vor.u32 %v9128_v36, %v8216_v17  ;;  %v9168_v25 = vld [vmem:[%s13576_s4 + $0x4c4] sm:$0xf]  ;;  %v8376_v36 = vld [vmem:[%s13576_s4 + $0x4c8] sm:$0xf0] }
 0x645   :  { %v8379_v17 = vor.u32 %v9168_v25, %v8376_v36  ;;  %v8078_v60 = vld [vmem:[#allocation2 + $0xc8] sm:$0xf]  ;;  %v9093_v36 = vld [vmem:[#allocation2 + $0xcc] sm:$0xf] }
 0x646   :  { %5157 = vmatpush.bf16.msrb.mxu0 %v8219_v41 }
 0x647   :  { %v4207_v35 = vpop.f32.mrf.mxu2  ;;  %5353 = vmatpush.bf16.msrb.mxu3 %v8379_v17 }
 0x648   :  { %v4208_v9 = vadd.f32 %v4207_v35, %v4144_v57  ;;  %v4271_v37 = vpop.f32.mrf.mxu3  ;;  %v4082_v8 = vpop.f32.mrf.mxu0  ;;  %v9144_v57 = vld [vmem:[%s13576_s4 + $0x404] sm:$0xf]  ;;  %v8280_v35 = vld [vmem:[%s13576_s4 + $0x408] sm:$0xf0] }
 0x649   :  { %v4083_v13 = vadd.f32 %v4082_v8, %v14070_v59  ;;  %v4146_v58 = vpop.f32.mrf.mxu1  ;;  %v8283_v18 = vor.u32 %v9144_v57, %v8280_v35  ;;  %v9094_v57 = vld [vmem:[#allocation2 + $0xcc] sm:$0xf0]  ;;  %v8072_v35 = vld [vmem:[#allocation2 + $0xd0] sm:$0xf0] }
 0x64a   :  { %v12604_v61 = vadd.f32 %v4271_v37, %v4208_v9 }
 0x64b   :  { %v4147_v46 = vadd.f32 %v4146_v58, %v4083_v13  ;;  %4921 = vmatmul.bf16.gmra.mxu0 %v12602_v2  ;;  %5221 = vmatpush.bf16.msrb.mxu1 %v8283_v18  ;;  %v9095_v18 = vld [vmem:[#allocation2 + $0xd4] sm:$0xf0] }
 0x64c   :  { %14071 = vst [vmem:[#allocation74_spill] sm:$0xff] %v12604_v61  ;;  %4985 = vmatmul.bf16.gmra.mxu1 %v12606_v62  ;;  %5049 = vmatmul.bf16.gmra.mxu2 %v12608_v11 }
 0x64d   :  { %8391 = vmatmul.msk.bf16.gmra.mxu3 %vm2959_vm4, %v12611_v22 }
 0x64f   :  { %v4210_v1 = vpop.f32.mrf.mxu2 }
 0x650   :  { %v4211_v9 = vadd.f32 %v4210_v1, %v4147_v46  ;;  %v4274_v37 = vpop.f32.mrf.mxu3  ;;  %v4084_v8 = vpop.f32.mrf.mxu0  ;;  %v8339_v46 = vor.u32 %v9158_v15, %v8336_v56  ;;  %v9092_v56 = vld [vmem:[#allocation2 + $0xc4] sm:$0xf] }
 0x651   :  { %v4085_v33 = vadd.f32 %v4084_v8, %v14072_v50  ;;  %v4148_v59 = vpop.f32.mrf.mxu1  ;;  %v8070_v8 = vld [vmem:[#allocation2 + $0xc0] sm:$0xf]  ;;  %v8080_v50 = vld [vmem:[#allocation2 + $0xd8] sm:$0xf0]  ;;  %v12649_v25 = vor.u32 %v9092_v56, %v8072_v35 }
 0x652   :  { %v12630_v13 = vadd.f32 %v4274_v37, %v4211_v9  ;;  %5286 = vmatpush.bf16.msrb.mxu2 %v8339_v46  ;;  %v12645_v15 = vor.u32 %v9094_v57, %v8070_v8  ;;  %v12651_v46 = vor.u32 %v9095_v18, %v8078_v60  ;;  %v8208_v8 = vld [vmem:[%s13576_s4 + $0x378] sm:$0xf0] }
 0x653   :  { %v4149_v58 = vadd.f32 %v4148_v59, %v4085_v33  ;;  %v14074_v33 = vld [vmem:[#allocation44_spill] sm:$0xff]  ;;  %v8272_v56 = vld [vmem:[%s13576_s4 + $0x3f8] sm:$0xf0] }
 0x654   :  { %14073 = vst [vmem:[#allocation67_spill] sm:$0xff] %v12630_v13 }
 0x657   :  { %v4212_v41 = vpop.f32.mrf.mxu2 }
 0x658   :  { %v4213_v1 = vadd.f32 %v4212_v41, %v4149_v58  ;;  %v4276_v9 = vpop.f32.mrf.mxu3  ;;  %v4087_v37 = vpop.f32.mrf.mxu0  ;;  %v12654_v58 = vor.u32 %v9093_v36, %v8080_v50  ;;  %v9142_v50 = vld [vmem:[%s13576_s4 + $0x3f4] sm:$0xf] }
 0x659   :  { %v4088_v59 = vadd.f32 %v4087_v37, %v14074_v33  ;;  %v4151_v13 = vpop.f32.mrf.mxu1  ;;  %v8275_v36 = vor.u32 %v9142_v50, %v8272_v56  ;;  %v9097_v56 = vld [vmem:[#allocation2 + $0xec] sm:$0xf] }
 0x65a   :  { %v12647_v61 = vadd.f32 %v4276_v9, %v4213_v1  ;;  %v14076_v9 = vld [vmem:[#allocation45_spill] sm:$0xff] }
 0x65b   :  { %v4152_v17 = vadd.f32 %v4151_v13, %v4088_v59  ;;  %4926 = vmatmul.bf16.gmra.mxu0 %v12645_v15  ;;  %v9126_v13 = vld [vmem:[%s13576_s4 + $0x374] sm:$0xf]  ;;  %5222 = vmatpush.bf16.msrb.mxu1 %v8275_v36 }
 0x65c   :  { %14075 = vst [vmem:[#allocation68_spill] sm:$0xff] %v12647_v61  ;;  %4990 = vmatmul.bf16.gmra.mxu1 %v12649_v25  ;;  %5054 = vmatmul.bf16.gmra.mxu2 %v12651_v46  ;;  %v8211_v59 = vor.u32 %v9126_v13, %v8208_v8  ;;  %v8086_v61 = vld [vmem:[#allocation2 + $0xe0] sm:$0xf]  ;;  %v9096_v13 = vld [vmem:[#allocation2 + $0xe4] sm:$0xf] }
 0x65d   :  { %8392 = vmatmul.msk.bf16.gmra.mxu3 %vm2959_vm4, %v12654_v58  ;;  %v8094_v8 = vld [vmem:[#allocation2 + $0xe8] sm:$0xf] }
 0x65e   :  { %5158 = vmatpush.bf16.msrb.mxu0 %v8211_v59 }
 0x65f   :  { %v4215_v57 = vpop.f32.mrf.mxu2 }
 0x660   :  { %v4216_v41 = vadd.f32 %v4215_v57, %v4152_v17  ;;  %v4279_v1 = vpop.f32.mrf.mxu3  ;;  %v4089_v35 = vpop.f32.mrf.mxu0  ;;  %v9098_v17 = vld [vmem:[#allocation2 + $0xec] sm:$0xf0] }
 0x661   :  { %v4090_v60 = vadd.f32 %v4089_v35, %v14076_v9  ;;  %v4153_v18 = vpop.f32.mrf.mxu1 }
 0x662   :  { %v12661_v37 = vadd.f32 %v4279_v1, %v4216_v41  ;;  %v8088_v41 = vld [vmem:[#allocation2 + $0xf0] sm:$0xf0]  ;;  %v9099_v1 = vld [vmem:[#allocation2 + $0xf4] sm:$0xf0] }
 0x663   :  { %v4154_v33 = vadd.f32 %v4153_v18, %v4090_v60  ;;  %v12676_v18 = vor.u32 %v9098_v17, %v8086_v61  ;;  %v12680_v50 = vor.u32 %v9096_v13, %v8088_v41  ;;  %v12682_v59 = vor.u32 %v9099_v1, %v8094_v8  ;;  %v8328_v61 = vld [vmem:[%s13576_s4 + $0x468] sm:$0xf0]  ;;  %v14080_v41 = vld [vmem:[#allocation53_spill] sm:$0xff]  ;;  %v9124_v13 = vld [vmem:[%s13576_s4 + $0x364] sm:$0xf] }
 0x664   :  { %14077 = vst [vmem:[#allocation75_spill] sm:$0xff] %v12661_v37  ;;  %v8200_v8 = vld [vmem:[%s13576_s4 + $0x368] sm:$0xf0] }
 0x667   :  { %v4217_v57 = vpop.f32.mrf.mxu2 }
 0x668   :  { %v4218_v35 = vadd.f32 %v4217_v57, %v4154_v33  ;;  %v4281_v9 = vpop.f32.mrf.mxu3  ;;  %v4092_v37 = vpop.f32.mrf.mxu0  ;;  %v12685_v33 = vor.u32 %v9097_v56, %v8096_v12  ;;  %v9140_v56 = vld [vmem:[%s13576_s4 + $0x3e4] sm:$0xf] }
 0x669   :  { %v4093_v4 = vadd.f32 %v4092_v37, %v14078_v3  ;;  %v4156_v60 = vpop.f32.mrf.mxu1  ;;  %v9156_v3 = vld [vmem:[%s13576_s4 + $0x464] sm:$0xf] }
 0x66a   :  { %v12678_v24 = vadd.f32 %v4281_v9, %v4218_v35  ;;  %v8331_v37 = vor.u32 %v9156_v3, %v8328_v61  ;;  %v8264_v3 = vld [vmem:[%s13576_s4 + $0x3e8] sm:$0xf0] }
 0x66b   :  { %v4157_v36 = vadd.f32 %v4156_v60, %v4093_v4  ;;  %4931 = vmatmul.bf16.gmra.mxu0 %v12676_v18  ;;  %v8267_v61 = vor.u32 %v9140_v56, %v8264_v3  ;;  %v9101_v3 = vld [vmem:[#allocation2 + $0x10c] sm:$0xf] }
 0x66c   :  { %14079 = vst [vmem:[#allocation76_spill] sm:$0xff] %v12678_v24  ;;  %4995 = vmatmul.bf16.gmra.mxu1 %v12680_v50  ;;  %5059 = vmatmul.bf16.gmra.mxu2 %v12682_v59  ;;  %v14082_v24 = vld [vmem:[#allocation54_spill] sm:$0xff] }
 0x66d   :  { %8393 = vmatmul.msk.bf16.gmra.mxu3 %vm2959_vm4, %v12685_v33  ;;  %5287 = vmatpush.bf16.msrb.mxu2 %v8331_v37  ;;  %v9102_v37 = vld [vmem:[#allocation2 + $0x10c] sm:$0xf0] }
 0x66e   :  { %5223 = vmatpush.bf16.msrb.mxu1 %v8267_v61 }
 0x66f   :  { %v4220_v4 = vpop.f32.mrf.mxu2 }
 0x670   :  { %v4221_v12 = vadd.f32 %v4220_v4, %v4157_v36  ;;  %v4284_v17 = vpop.f32.mrf.mxu3  ;;  %v4094_v57 = vpop.f32.mrf.mxu0  ;;  %v8203_v36 = vor.u32 %v9124_v13, %v8200_v8  ;;  %v9100_v8 = vld [vmem:[#allocation2 + $0x104] sm:$0xf] }
 0x671   :  { %v4095_v1 = vadd.f32 %v4094_v57, %v14080_v41  ;;  %v4158_v35 = vpop.f32.mrf.mxu1 }
 0x672   :  { %v12698_v9 = vadd.f32 %v4284_v17, %v4221_v12  ;;  %5159 = vmatpush.bf16.msrb.mxu0 %v8203_v36  ;;  %v8104_v12 = vld [vmem:[#allocation2 + $0x110] sm:$0xf0]  ;;  %v9103_v17 = vld [vmem:[#allocation2 + $0x114] sm:$0xf0] }
 0x673   :  { %v4159_v60 = vadd.f32 %v4158_v35, %v4095_v1  ;;  %v8102_v35 = vld [vmem:[#allocation2 + $0x100] sm:$0xf]  ;;  %v12717_v56 = vor.u32 %v9100_v8, %v8104_v12  ;;  %v12719_v36 = vor.u32 %v9103_v17, %v8110_v10  ;;  %v8120_v8 = vld [vmem:[#allocation2 + $0x130] sm:$0xf0] }
 0x674   :  { %14081 = vst [vmem:[#allocation77_spill] sm:$0xff] %v12698_v9  ;;  %v8112_v9 = vld [vmem:[#allocation2 + $0x118] sm:$0xf0]  ;;  %v12713_v13 = vor.u32 %v9102_v37, %v8102_v35  ;;  %v12742_v21 = vor.u32 %v9104_v31, %v8120_v8 }
 0x675   :  { %v8192_v8 = vld [vmem:[%s13576_s4 + $0x358] sm:$0xf0] }
 0x676   :  { %14089 = vst [vmem:[#allocation80_spill] sm:$0xff] %v12742_v21 }
 0x677   :  { %v4222_v4 = vpop.f32.mrf.mxu2 }
 0x678   :  { %v4223_v57 = vadd.f32 %v4222_v4, %v4159_v60  ;;  %v4286_v41 = vpop.f32.mrf.mxu3  ;;  %v4097_v1 = vpop.f32.mrf.mxu0  ;;  %v12722_v60 = vor.u32 %v9101_v3, %v8112_v9  ;;  %v9154_v9 = vld [vmem:[%s13576_s4 + $0x454] sm:$0xf]  ;;  %v9107_v3 = vld [vmem:[#allocation2 + $0x134] sm:$0xf0] }
 0x679   :  { %v4098_v30 = vadd.f32 %v4097_v1, %v14082_v24  ;;  %v4161_v52 = vpop.f32.mrf.mxu1  ;;  %v8320_v1 = vld [vmem:[%s13576_s4 + $0x458] sm:$0xf0]  ;;  %v12744_v19 = vor.u32 %v9107_v3, %v8126_v38  ;;  %v9122_v38 = vld [vmem:[%s13576_s4 + $0x354] sm:$0xf] }
 0x67a   :  { %v12715_v55 = vadd.f32 %v4286_v41, %v4223_v57  ;;  %v14084_v57 = vld [vmem:[#allocation47_spill] sm:$0xff]  ;;  %v9138_v3 = vld [vmem:[%s13576_s4 + $0x3d4] sm:$0xf] }
 0x67b   :  { %v4162_v61 = vadd.f32 %v4161_v52, %v4098_v30  ;;  %4936 = vmatmul.bf16.gmra.mxu0 %v12713_v13  ;;  %v9106_v52 = vld [vmem:[#allocation2 + $0x12c] sm:$0xf0]  ;;  %14090 = vst [vmem:[#allocation81_spill] sm:$0xff] %v12744_v19 }
 0x67c   :  { %14083 = vst [vmem:[#allocation78_spill] sm:$0xff] %v12715_v55  ;;  %5000 = vmatmul.bf16.gmra.mxu1 %v12717_v56  ;;  %5064 = vmatmul.bf16.gmra.mxu2 %v12719_v36 }
 0x67d   :  { %8394 = vmatmul.msk.bf16.gmra.mxu3 %vm2959_vm4, %v12722_v60 }
 0x67f   :  { %v4225_v24 = vpop.f32.mrf.mxu2 }
 0x680   :  { %v4226_v37 = vadd.f32 %v4225_v24, %v4162_v61  ;;  %v4289_v4 = vpop.f32.mrf.mxu3  ;;  %v4099_v12 = vpop.f32.mrf.mxu0  ;;  %v8323_v61 = vor.u32 %v9154_v9, %v8320_v1  ;;  %v9105_v9 = vld [vmem:[#allocation2 + $0x12c] sm:$0xf] }
 0x681   :  { %v4100_v10 = vadd.f32 %v4099_v12, %v14084_v57  ;;  %v4163_v17 = vpop.f32.mrf.mxu1  ;;  %v8118_v57 = vld [vmem:[#allocation2 + $0x120] sm:$0xf] }
 0x682   :  { %v12729_v41 = vadd.f32 %v4289_v4, %v4226_v37  ;;  %v8128_v37 = vld [vmem:[#allocation2 + $0x138] sm:$0xf0]  ;;  %v14086_v4 = vld [vmem:[#allocation48_spill] sm:$0xff]  ;;  %5288 = vmatpush.bf16.msrb.mxu2 %v8323_v61  ;;  %v14092_v61 = vld [vmem:[#allocation49_spill] sm:$0xff] }
 0x683   :  { %v4164_v30 = vadd.f32 %v4163_v17, %v4100_v10  ;;  %v12747_v1 = vor.u32 %v9105_v9, %v8128_v37  ;;  %v8256_v37 = vld [vmem:[%s13576_s4 + $0x3d8] sm:$0xf0]  ;;  %v9110_v9 = vld [vmem:[#allocation2 + $0x14c] sm:$0xf0] }
 0x684   :  { %14085 = vst [vmem:[#allocation85_spill] sm:$0xff] %v12729_v41  ;;  %v12738_v41 = vor.u32 %v9106_v52, %v8118_v57  ;;  %v8195_v57 = vor.u32 %v9122_v38, %v8192_v8  ;;  %v8136_v38 = vld [vmem:[#allocation2 + $0x150] sm:$0xf0]  ;;  %v9111_v8 = vld [vmem:[#allocation2 + $0x154] sm:$0xf0] }
 0x685   :  { %14091 = vst [vmem:[#allocation82_spill] sm:$0xff] %v12747_v1 }
 0x686   :  { %14087 = vst [vmem:[#allocation86_spill] sm:$0xff] %v12738_v41  ;;  %5160 = vmatpush.bf16.msrb.mxu0 %v8195_v57 }
 0x687   :  { %v4227_v35 = vpop.f32.mrf.mxu2 }
 0x688   :  { %v4228_v24 = vadd.f32 %v4227_v35, %v4164_v30  ;;  %v4291_v55 = vpop.f32.mrf.mxu3  ;;  %v4102_v12 = vpop.f32.mrf.mxu0 }
 0x689   :  { %v4103_v10 = vadd.f32 %v4102_v12, %v14086_v4  ;;  %v4166_v17 = vpop.f32.mrf.mxu1 }
 0x68a   :  { %v12740_v42 = vadd.f32 %v4291_v55, %v4228_v24 }
 0x68b   :  { %v4167_v30 = vadd.f32 %v4166_v17, %v4103_v10  ;;  %4941 = vmatmul.bf16.gmra.mxu0 %v12738_v41  ;;  %v8259_v10 = vor.u32 %v9138_v3, %v8256_v37  ;;  %v8134_v3 = vld [vmem:[#allocation2 + $0x140] sm:$0xf]  ;;  %v9108_v37 = vld [vmem:[#allocation2 + $0x144] sm:$0xf]  ;;  %v9109_v41 = vld [vmem:[#allocation2 + $0x14c] sm:$0xf] }
 0x68c   :  { %14088 = vst [vmem:[#allocation79_spill] sm:$0xff] %v12740_v42  ;;  %5005 = vmatmul.bf16.gmra.mxu1 %v12742_v21  ;;  %5069 = vmatmul.bf16.gmra.mxu2 %v12744_v19  ;;  %v12774_v57 = vor.u32 %v9110_v9, %v8134_v3  ;;  %v12778_v19 = vor.u32 %v9108_v37, %v8136_v38  ;;  %v8184_v3 = vld [vmem:[%s13576_s4 + $0x348] sm:$0xf0]  ;;  %v9115_v37 = vld [vmem:[#allocation2 + $0x174] sm:$0xf0] }
 0x68d   :  { %8395 = vmatmul.msk.bf16.gmra.mxu3 %vm2959_vm4, %v12747_v1  ;;  %5224 = vmatpush.bf16.msrb.mxu1 %v8259_v10  ;;  %v8142_v10 = vld [vmem:[#allocation2 + $0x148] sm:$0xf] }
 0x68e   :  { %14094 = vst [vmem:[#allocation88_spill] sm:$0xff] %v12774_v57  ;;  %v12780_v21 = vor.u32 %v9111_v8, %v8142_v10 }
 0x68f   :  { %v4230_v52 = vpop.f32.mrf.mxu2  ;;  %14096 = vst [vmem:[#allocation90_spill] sm:$0xff] %v12778_v19 }
 0x690   :  { %v4231_v55 = vadd.f32 %v4230_v52, %v4167_v30  ;;  %v4294_v35 = vpop.f32.mrf.mxu3  ;;  %v4104_v31 = vpop.f32.mrf.mxu0  ;;  %v9152_v30 = vld [vmem:[%s13576_s4 + $0x444] sm:$0xf]  ;;  %v8312_v52 = vld [vmem:[%s13576_s4 + $0x448] sm:$0xf0]  ;;  %14097 = vst [vmem:[#allocation83_spill] sm:$0xff] %v12780_v21 }
 0x691   :  { %v4105_v24 = vadd.f32 %v4104_v31, %v14092_v61  ;;  %v4168_v12 = vpop.f32.mrf.mxu1  ;;  %v8315_v61 = vor.u32 %v9152_v30, %v8312_v52 }
 0x692   :  { %v12766_v4 = vadd.f32 %v4294_v35, %v4231_v55 }
 0x693   :  { %v4169_v17 = vadd.f32 %v4168_v12, %v4105_v24  ;;  %v8144_v24 = vld [vmem:[#allocation2 + $0x158] sm:$0xf0]  ;;  %5289 = vmatpush.bf16.msrb.mxu2 %v8315_v61 }
 0x694   :  { %14093 = vst [vmem:[#allocation87_spill] sm:$0xff] %v12766_v4  ;;  %v14099_v61 = vld [vmem:[#allocation50_spill] sm:$0xff] }
 0x697   :  { %v4232_v31 = vpop.f32.mrf.mxu2 }
 0x698   :  { %v4233_v42 = vadd.f32 %v4232_v31, %v4169_v17  ;;  %v4296_v55 = vpop.f32.mrf.mxu3  ;;  %v4907_v35 = vpop.f32.mrf.mxu0  ;;  %v12783_v17 = vor.u32 %v9109_v41, %v8144_v24  ;;  %v9120_v41 = vld [vmem:[%s13576_s4 + $0x344] sm:$0xf] }
 0x699   :  { %v4971_v12 = vpop.f32.mrf.mxu1  ;;  %v8187_v10 = vor.u32 %v9120_v41, %v8184_v3  ;;  %v9113_v3 = vld [vmem:[#allocation2 + $0x16c] sm:$0xf] }
 0x69a   :  { %v12776_v4 = vadd.f32 %v4296_v55, %v4233_v42  ;;  %v4972_v1 = vadd.f32 %v4971_v12, %v4907_v35  ;;  %14098 = vst [vmem:[#allocation84_spill] sm:$0xff] %v12783_v17  ;;  %v9114_v35 = vld [vmem:[#allocation2 + $0x16c] sm:$0xf0]  ;;  %v8152_v12 = vld [vmem:[#allocation2 + $0x170] sm:$0xf0] }
 0x69b   :  { %4946 = vmatmul.bf16.gmra.mxu0 %v12774_v57 }
 0x69c   :  { %14095 = vst [vmem:[#allocation89_spill] sm:$0xff] %v12776_v4  ;;  %5010 = vmatmul.bf16.gmra.mxu1 %v12778_v19  ;;  %5074 = vmatmul.bf16.gmra.mxu2 %v12780_v21  ;;  %v8158_v21 = vld [vmem:[#allocation2 + $0x168] sm:$0xf] }
 0x69d   :  { %8396 = vmatmul.msk.bf16.gmra.mxu3 %vm2959_vm4, %v12783_v17  ;;  %v9112_v17 = vld [vmem:[#allocation2 + $0x164] sm:$0xf]  ;;  %5161 = vmatpush.bf16.msrb.mxu0 %v8187_v10  ;;  %v12808_v41 = vor.u32 %v9115_v37, %v8158_v21  ;;  %v9186_v21 = vld [vmem:[%s13578_s5 + $0x74] sm:$0xf] }
 0x69e   :  { %v12806_v40 = vor.u32 %v9112_v17, %v8152_v12  ;;  %v8494_v12 = vld [vmem:[%s13578_s5 + $0xa8] sm:$0xf0] }
 0x69f   :  { %v5035_v9 = vpop.f32.mrf.mxu2  ;;  %14102 = vst [vmem:[#allocation93_spill] sm:$0xff] %v12808_v41 }
 0x6a0   :  { %v5036_v42 = vadd.f32 %v5035_v9, %v4972_v1  ;;  %v5099_v30 = vpop.f32.mrf.mxu3  ;;  %v4909_v52 = vpop.f32.mrf.mxu0  ;;  %v9136_v1 = vld [vmem:[%s13576_s4 + $0x3c4] sm:$0xf]  ;;  %v8248_v9 = vld [vmem:[%s13576_s4 + $0x3c8] sm:$0xf0]  ;;  %14101 = vst [vmem:[#allocation92_spill] sm:$0xff] %v12806_v40 }
 0x6a1   :  { %v4973_v31 = vpop.f32.mrf.mxu1 }
 0x6a2   :  { %v5100_v38 = vadd.f32 %v5099_v30, %v5036_v42  ;;  %v4974_v8 = vadd.f32 %v4973_v31, %v4909_v52  ;;  %v8150_v31 = vld [vmem:[#allocation2 + $0x160] sm:$0xf] }
 0x6a4   :  { %v12790_v55 = vadd.f32 %v5100_v38, %v14099_v61  ;;  %v8160_v38 = vld [vmem:[#allocation2 + $0x178] sm:$0xf0]  ;;  %v8251_v61 = vor.u32 %v9136_v1, %v8248_v9 }
 0x6a6   :  { %14100 = vst [vmem:[#allocation91_spill] sm:$0xff] %v12790_v55  ;;  %v12804_v55 = vor.u32 %v9114_v35, %v8150_v31  ;;  %5225 = vmatpush.bf16.msrb.mxu1 %v8251_v61  ;;  %v9118_v61 = vld [vmem:[#allocation2 + $0x18c] sm:$0xf0] }
 0x6a7   :  { %v5037_v24 = vpop.f32.mrf.mxu2 }
 0x6a8   :  { %v5038_v42 = vadd.f32 %v5037_v24, %v4974_v8  ;;  %v5101_v30 = vpop.f32.mrf.mxu3  ;;  %v4912_v52 = vpop.f32.mrf.mxu0  ;;  %v12811_v8 = vor.u32 %v9113_v3, %v8160_v38  ;;  %v14104_v24 = vld [vmem:[#allocation55_spill] sm:$0xff] }
 0x6a9   :  { %v4976_v4 = vpop.f32.mrf.mxu1 }
 0x6aa   :  { %v5102_v19 = vadd.f32 %v5101_v30, %v5038_v42  ;;  %v4977_v57 = vadd.f32 %v4976_v4, %v4912_v52  ;;  %14103 = vst [vmem:[#allocation94_spill] sm:$0xff] %v12811_v8  ;;  %v8470_v4 = vld [vmem:[%s13578_s5 + $0x78] sm:$0xf0] }
 0x6ab   :  { %4951 = vmatmul.bf16.gmra.mxu0 %v12804_v55  ;;  %v8473_v35 = vor.u32 %v9186_v21, %v8470_v4  ;;  %v9119_v21 = vld [vmem:[#allocation2 + $0x194] sm:$0xf0] }
 0x6ac   :  { %v12814_v1 = vadd.f32 %v5102_v19, %v14104_v24  ;;  %5015 = vmatmul.bf16.gmra.mxu1 %v12806_v40  ;;  %5079 = vmatmul.bf16.gmra.mxu2 %v12808_v41  ;;  %v9192_v19 = vld [vmem:[%s13578_s5 + $0xa4] sm:$0xf]  ;;  %v8168_v24 = vld [vmem:[#allocation2 + $0x190] sm:$0xf0]  ;;  %v8166_v41 = vld [vmem:[#allocation2 + $0x180] sm:$0xf] }
 0x6ad   :  { %8397 = vmatmul.msk.bf16.gmra.mxu3 %vm2959_vm4, %v12811_v8  ;;  %v8497_v42 = vor.u32 %v9192_v19, %v8494_v12  ;;  %5816 = vmatpush.bf16.msra.mxu2 %v8473_v35  ;;  %v12835_v40 = vor.u32 %v9118_v61, %v8166_v41  ;;  %v9116_v19 = vld [vmem:[#allocation2 + $0x184] sm:$0xf]  ;;  %v8174_v35 = vld [vmem:[#allocation2 + $0x188] sm:$0xf]  ;;  %v8468_v41 = vld [vmem:[%s13578_s5 + $0x70] sm:$0xf] }
 0x6ae   :  { %14105 = vst [vmem:[#allocation101_spill] sm:$0xff] %v12814_v1 }
 0x6af   :  { %v5040_v17 = vpop.f32.mrf.mxu2  ;;  %5883 = vmatpush.bf16.msra.mxu3 %v8497_v42 }
 0x6b0   :  { %v5041_v37 = vadd.f32 %v5040_v17, %v4977_v57  ;;  %v5104_v10 = vpop.f32.mrf.mxu3  ;;  %v4914_v9 = vpop.f32.mrf.mxu0  ;;  %v8176_v57 = vld [vmem:[#allocation2 + $0x198] sm:$0xf0] }
 0x6b1   :  { %v4978_v30 = vpop.f32.mrf.mxu1 }
 0x6b2   :  { %v5105_v52 = vadd.f32 %v5104_v10, %v5041_v37  ;;  %v4979_v31 = vadd.f32 %v4978_v30, %v4914_v9  ;;  %v12837_v10 = vor.u32 %v9116_v19, %v8168_v24  ;;  %v9117_v9 = vld [vmem:[#allocation2 + $0x18c] sm:$0xf] }
 0x6b3   :  { %v12842_v42 = vor.u32 %v9117_v9, %v8176_v57  ;;  %v14106_v30 = vld [vmem:[#allocation56_spill] sm:$0xff] }
 0x6b4   :  { %v12833_v38 = vadd.f32 %v5105_v52, %v12200_v53  ;;  %v12839_v53 = vor.u32 %v9119_v21, %v8174_v35 }
 0x6b7   :  { %v5042_v3 = vpop.f32.mrf.mxu2 }
 0x6b8   :  { %v5043_v4 = vadd.f32 %v5042_v3, %v4979_v31  ;;  %v5106_v1 = vpop.f32.mrf.mxu3  ;;  %v4917_v8 = vpop.f32.mrf.mxu0  ;;  %v9193_v3 = vld [vmem:[%s13578_s5 + $0xa4] sm:$0xf0] }
 0x6b9   :  { %v4981_v17 = vpop.f32.mrf.mxu1 }
 0x6ba   :  { %v5107_v12 = vadd.f32 %v5106_v1, %v5043_v4  ;;  %v4982_v37 = vadd.f32 %v4981_v17, %v4917_v8  ;;  %v9187_v8 = vld [vmem:[%s13578_s5 + $0x74] sm:$0xf0]  ;;  %v8492_v1 = vld [vmem:[%s13578_s5 + $0xa0] sm:$0xf] }
 0x6bb   :  { %4956 = vmatmul.bf16.gmra.mxu0 %v12835_v40  ;;  %v8469_v61 = vor.u32 %v9187_v8, %v8468_v41  ;;  %v8493_v57 = vor.u32 %v9193_v3, %v8492_v1  ;;  %v8462_v41 = vld [vmem:[%s13578_s5 + $0x68] sm:$0xf0] }
 0x6bc   :  { %v12845_v52 = vadd.f32 %v5107_v12, %v14106_v30  ;;  %5020 = vmatmul.bf16.gmra.mxu1 %v12837_v10  ;;  %5084 = vmatmul.bf16.gmra.mxu2 %v12839_v53  ;;  %v14107_v12 = vld [vmem:[#allocation57_spill] sm:$0xff]  ;;  %v9184_v30 = vld [vmem:[%s13578_s5 + $0x64] sm:$0xf] }
 0x6bd   :  { %8398 = vmatmul.msk.bf16.gmra.mxu3 %vm2959_vm4, %v12842_v42  ;;  %5692 = vmatpush.bf16.msra.mxu0 %v8469_v61  ;;  %v8465_v8 = vor.u32 %v9184_v30, %v8462_v41 }
 0x6be   :  { %5759 = vmatpush.bf16.msra.mxu1 %v8493_v57 }
 0x6bf   :  { %v5045_v31 = vpop.f32.mrf.mxu2  ;;  %5817 = vmatpush.bf16.msra.mxu2 %v8465_v8 }
 0x6c0   :  { %v5046_v24 = vadd.f32 %v5045_v31, %v4982_v37  ;;  %v5109_v21 = vpop.f32.mrf.mxu3  ;;  %v4919_v4 = vpop.f32.mrf.mxu0 }
 0x6c1   :  { %v4983_v17 = vpop.f32.mrf.mxu1 }
 0x6c2   :  { %v5110_v19 = vadd.f32 %v5109_v21, %v5046_v24  ;;  %v4984_v35 = vadd.f32 %v4983_v17, %v4919_v4  ;;  %v14108_v4 = vld [vmem:[#allocation58_spill] sm:$0xff]  ;;  %v8460_v17 = vld [vmem:[%s13578_s5 + $0x60] sm:$0xf] }
 0x6c4   :  { %v12864_v9 = vadd.f32 %v5110_v19, %v14107_v12  ;;  %v9185_v19 = vld [vmem:[%s13578_s5 + $0x64] sm:$0xf0] }
 0x6c7   :  { %v5047_v37 = vpop.f32.mrf.mxu2 }
 0x6c8   :  { %v5048_v31 = vadd.f32 %v5047_v37, %v4984_v35  ;;  %v5111_v1 = vpop.f32.mrf.mxu3  ;;  %v4922_v3 = vpop.f32.mrf.mxu0 }
 0x6c9   :  { %v4986_v61 = vpop.f32.mrf.mxu1 }
 0x6ca   :  { %v5112_v24 = vadd.f32 %v5111_v1, %v5048_v31  ;;  %v4987_v21 = vadd.f32 %v4986_v61, %v4922_v3 }
 0x6cb   :  { %5162 = vmatmul.bf16.vlgmr.msrb.gmra.mxu0 %v12509_v29  ;;  %v8461_v29 = vor.u32 %v9185_v19, %v8460_v17  ;;  %v8454_v17 = vld [vmem:[%s13578_s5 + $0x58] sm:$0xf0] }
 0x6cc   :  { %v12874_v57 = vadd.f32 %v5112_v24, %v14108_v4  ;;  %5226 = vmatmul.bf16.vlgmr.msrb.gmra.mxu1 %v12513_v16  ;;  %5290 = vmatmul.bf16.vlgmr.msrb.gmra.mxu2 %v12515_v45 }
 0x6cd   :  { %8399 = vmatmul.msk.bf16.vlgmr.msrb.gmra.mxu3 %vm2959_vm4, %v12518_v14  ;;  %5693 = vmatpush.bf16.msra.mxu0 %v8461_v29 }
 0x6cf   :  { %v5050_v35 = vpop.f32.mrf.mxu2 }
 0x6d0   :  { %v5051_v12 = vadd.f32 %v5050_v35, %v4987_v21  ;;  %v5114_v30 = vpop.f32.mrf.mxu3  ;;  %v4924_v41 = vpop.f32.mrf.mxu0 }
 0x6d1   :  { %v4988_v37 = vpop.f32.mrf.mxu1 }
 0x6d2   :  { %v5115_v16 = vadd.f32 %v5114_v30, %v5051_v12  ;;  %v4989_v45 = vadd.f32 %v4988_v37, %v4924_v41  ;;  %v9183_v41 = vld [vmem:[%s13578_s5 + $0x54] sm:$0xf0] }
 0x6d4   :  { %v12887_v8 = vadd.f32 %v5115_v16, %v12252_v0  ;;  %v9182_v0 = vld [vmem:[%s13578_s5 + $0x54] sm:$0xf] }
 0x6d7   :  { %v5052_v14 = vpop.f32.mrf.mxu2 }
 0x6d8   :  { %v5053_v31 = vadd.f32 %v5052_v14, %v4989_v45  ;;  %v5116_v1 = vpop.f32.mrf.mxu3  ;;  %v4927_v3 = vpop.f32.mrf.mxu0 }
 0x6d9   :  { %v4991_v61 = vpop.f32.mrf.mxu1 }
 0x6da   :  { %v5117_v24 = vadd.f32 %v5116_v1, %v5053_v31  ;;  %v4992_v4 = vadd.f32 %v4991_v61, %v4927_v3 }
 0x6db   :  { %5167 = vmatmul.bf16.gmra.mxu0 %v12540_v49  ;;  %v8457_v49 = vor.u32 %v9182_v0, %v8454_v17 }
 0x6dc   :  { %v12891_v21 = vadd.f32 %v5117_v24, %v12255_v5  ;;  %5231 = vmatmul.bf16.gmra.mxu1 %v12544_v34  ;;  %5295 = vmatmul.bf16.gmra.mxu2 %v12546_v20  ;;  %v9190_v24 = vld [vmem:[%s13578_s5 + $0x94] sm:$0xf] }
 0x6dd   :  { %8400 = vmatmul.msk.bf16.gmra.mxu3 %vm2959_vm4, %v12555_v44  ;;  %5818 = vmatpush.bf16.msra.mxu2 %v8457_v49  ;;  %v8452_v44 = vld [vmem:[%s13578_s5 + $0x50] sm:$0xf] }
 0x6de   :  { %v8453_v16 = vor.u32 %v9183_v41, %v8452_v44 }
 0x6df   :  { %v5055_v19 = vpop.f32.mrf.mxu2 }
 0x6e0   :  { %v5056_v35 = vadd.f32 %v5055_v19, %v4992_v4  ;;  %v5119_v5 = vpop.f32.mrf.mxu3  ;;  %v4929_v29 = vpop.f32.mrf.mxu0  ;;  %5694 = vmatpush.bf16.msra.mxu0 %v8453_v16  ;;  %v8486_v4 = vld [vmem:[%s13578_s5 + $0x98] sm:$0xf0] }
 0x6e1   :  { %v4993_v12 = vpop.f32.mrf.mxu1  ;;  %v8489_v0 = vor.u32 %v9190_v24, %v8486_v4 }
 0x6e2   :  { %v5120_v34 = vadd.f32 %v5119_v5, %v5056_v35  ;;  %v4994_v20 = vadd.f32 %v4993_v12, %v4929_v29  ;;  %v8484_v12 = vld [vmem:[%s13578_s5 + $0x90] sm:$0xf] }
 0x6e3   :  { %5884 = vmatpush.bf16.msra.mxu3 %v8489_v0  ;;  %v8438_v0 = vld [vmem:[%s13578_s5 + $0x38] sm:$0xf0] }
 0x6e4   :  { %v12904_v30 = vadd.f32 %v5120_v34, %v12269_v63  ;;  %v9191_v34 = vld [vmem:[%s13578_s5 + $0x94] sm:$0xf0] }
 0x6e5   :  { %v8485_v44 = vor.u32 %v9191_v34, %v8484_v12 }
 0x6e7   :  { %v5057_v37 = vpop.f32.mrf.mxu2  ;;  %5760 = vmatpush.bf16.msra.mxu1 %v8485_v44 }
 0x6e8   :  { %v5058_v45 = vadd.f32 %v5057_v37, %v4994_v20  ;;  %v5121_v14 = vpop.f32.mrf.mxu3  ;;  %v4932_v31 = vpop.f32.mrf.mxu0 }
 0x6e9   :  { %v4996_v1 = vpop.f32.mrf.mxu1 }
 0x6ea   :  { %v5122_v3 = vadd.f32 %v5121_v14, %v5058_v45  ;;  %v4997_v61 = vadd.f32 %v4996_v1, %v4932_v31  ;;  %v8444_v1 = vld [vmem:[%s13578_s5 + $0x40] sm:$0xf] }
 0x6eb   :  { %5172 = vmatmul.bf16.gmra.mxu0 %v12577_v6 }
 0x6ec   :  { %v12914_v63 = vadd.f32 %v5122_v3, %v12284_v43  ;;  %5236 = vmatmul.bf16.gmra.mxu1 %v12581_v32  ;;  %5300 = vmatmul.bf16.gmra.mxu2 %v12583_v23  ;;  %v9180_v43 = vld [vmem:[%s13578_s5 + $0x44] sm:$0xf]  ;;  %v8446_v32 = vld [vmem:[%s13578_s5 + $0x48] sm:$0xf0]  ;;  %v9181_v3 = vld [vmem:[%s13578_s5 + $0x44] sm:$0xf0] }
 0x6ed   :  { %8401 = vmatmul.msk.bf16.gmra.mxu3 %vm2959_vm4, %v12586_v54  ;;  %v8449_v19 = vor.u32 %v9180_v43, %v8446_v32 }
 0x6ef   :  { %v5060_v6 = vpop.f32.mrf.mxu2  ;;  %5819 = vmatpush.bf16.msra.mxu2 %v8449_v19 }
 0x6f0   :  { %v5061_v23 = vadd.f32 %v5060_v6, %v4997_v61  ;;  %v5124_v54 = vpop.f32.mrf.mxu3  ;;  %v4934_v17 = vpop.f32.mrf.mxu0 }
 0x6f1   :  { %v4998_v49 = vpop.f32.mrf.mxu1 }
 0x6f2   :  { %v5125_v35 = vadd.f32 %v5124_v54, %v5061_v23  ;;  %v4999_v5 = vadd.f32 %v4998_v49, %v4934_v17 }
 0x6f4   :  { %v12933_v29 = vadd.f32 %v5125_v35, %v12298_v51 }
 0x6f7   :  { %v5062_v20 = vpop.f32.mrf.mxu2 }
 0x6f8   :  { %v5063_v41 = vadd.f32 %v5062_v20, %v4999_v5  ;;  %v5126_v37 = vpop.f32.mrf.mxu3  ;;  %v4937_v16 = vpop.f32.mrf.mxu0 }
 0x6f9   :  { %v5001_v45 = vpop.f32.mrf.mxu1 }
 0x6fa   :  { %v5127_v14 = vadd.f32 %v5126_v37, %v5063_v41  ;;  %v5002_v31 = vadd.f32 %v5001_v45, %v4937_v16 }
 0x6fb   :  { %5177 = vmatmul.bf16.gmra.mxu0 %v12602_v2  ;;  %v8445_v2 = vor.u32 %v9181_v3, %v8444_v1 }
 0x6fc   :  { %v12943_v51 = vadd.f32 %v5127_v14, %v12301_v28  ;;  %5241 = vmatmul.bf16.gmra.mxu1 %v12606_v62  ;;  %5305 = vmatmul.bf16.gmra.mxu2 %v12608_v11 }
 0x6fd   :  { %8402 = vmatmul.msk.bf16.gmra.mxu3 %vm2959_vm4, %v12611_v22  ;;  %5695 = vmatpush.bf16.msra.mxu0 %v8445_v2  ;;  %v9178_v22 = vld [vmem:[%s13578_s5 + $0x34] sm:$0xf]  ;;  %v9176_v2 = vld [vmem:[%s13578_s5 + $0x24] sm:$0xf] }
 0x6fe   :  { %v8441_v23 = vor.u32 %v9178_v22, %v8438_v0  ;;  %v8478_v22 = vld [vmem:[%s13578_s5 + $0x88] sm:$0xf0]  ;;  %v8428_v0 = vld [vmem:[%s13578_s5 + $0x20] sm:$0xf] }
 0x6ff   :  { %v5065_v61 = vpop.f32.mrf.mxu2 }
 0x700   :  { %v5066_v24 = vadd.f32 %v5065_v61, %v5002_v31  ;;  %v5129_v28 = vpop.f32.mrf.mxu3  ;;  %v4939_v4 = vpop.f32.mrf.mxu0  ;;  %5820 = vmatpush.bf16.msra.mxu2 %v8441_v23 }
 0x701   :  { %v5003_v43 = vpop.f32.mrf.mxu1 }
 0x702   :  { %v5130_v62 = vadd.f32 %v5129_v28, %v5066_v24  ;;  %v5004_v11 = vadd.f32 %v5003_v43, %v4939_v4  ;;  %v8430_v24 = vld [vmem:[%s13578_s5 + $0x28] sm:$0xf0] }
 0x704   :  { %v12956_v6 = vadd.f32 %v5130_v62, %v12321_v47 }
 0x707   :  { %v5067_v32 = vpop.f32.mrf.mxu2 }
 0x708   :  { %v5068_v54 = vadd.f32 %v5067_v32, %v5004_v11  ;;  %v5131_v17 = vpop.f32.mrf.mxu3  ;;  %v4942_v19 = vpop.f32.mrf.mxu0 }
 0x709   :  { %v5006_v49 = vpop.f32.mrf.mxu1 }
 0x70a   :  { %v5132_v35 = vadd.f32 %v5131_v17, %v5068_v54  ;;  %v5007_v5 = vadd.f32 %v5006_v49, %v4942_v19  ;;  %v9177_v54 = vld [vmem:[%s13578_s5 + $0x24] sm:$0xf0] }
 0x70b   :  { %5182 = vmatmul.bf16.gmra.mxu0 %v12645_v15  ;;  %v9179_v15 = vld [vmem:[%s13578_s5 + $0x34] sm:$0xf0]  ;;  %v8429_v49 = vor.u32 %v9177_v54, %v8428_v0  ;;  %v8420_v0 = vld [vmem:[%s13578_s5 + $0x10] sm:$0xf] }
 0x70c   :  { %v12966_v47 = vadd.f32 %v5132_v35, %v12336_v7  ;;  %5246 = vmatmul.bf16.gmra.mxu1 %v12649_v25  ;;  %5310 = vmatmul.bf16.gmra.mxu2 %v12651_v46  ;;  %v8436_v7 = vld [vmem:[%s13578_s5 + $0x30] sm:$0xf] }
 0x70d   :  { %8403 = vmatmul.msk.bf16.gmra.mxu3 %vm2959_vm4, %v12654_v58  ;;  %v8437_v46 = vor.u32 %v9179_v15, %v8436_v7  ;;  %v14109_v15 = vld [vmem:[#allocation51_spill] sm:$0xff] }
 0x70f   :  { %v5070_v12 = vpop.f32.mrf.mxu2  ;;  %5696 = vmatpush.bf16.msra.mxu0 %v8437_v46  ;;  %v8422_v46 = vld [vmem:[%s13578_s5 + $0x18] sm:$0xf0] }
 0x710   :  { %v5071_v34 = vadd.f32 %v5070_v12, %v5007_v5  ;;  %v5134_v20 = vpop.f32.mrf.mxu3  ;;  %v4944_v44 = vpop.f32.mrf.mxu0 }
 0x711   :  { %v5008_v41 = vpop.f32.mrf.mxu1 }
 0x712   :  { %v5135_v37 = vadd.f32 %v5134_v20, %v5071_v34  ;;  %v5009_v16 = vadd.f32 %v5008_v41, %v4944_v44  ;;  %v8476_v20 = vld [vmem:[%s13578_s5 + $0x80] sm:$0xf]  ;;  %v9189_v44 = vld [vmem:[%s13578_s5 + $0x84] sm:$0xf0] }
 0x713   :  { %5697 = vmatpush.bf16.msra.mxu0 %v8429_v49 }
 0x714   :  { %v12973_v45 = vadd.f32 %v5135_v37, %v12344_v39 }
 0x717   :  { %v5072_v25 = vpop.f32.mrf.mxu2 }
 0x718   :  { %v5073_v58 = vadd.f32 %v5072_v25, %v5009_v16  ;;  %v5136_v14 = vpop.f32.mrf.mxu3  ;;  %v4947_v31 = vpop.f32.mrf.mxu0 }
 0x719   :  { %v5011_v1 = vpop.f32.mrf.mxu1 }
 0x71a   :  { %v5137_v3 = vadd.f32 %v5136_v14, %v5073_v58  ;;  %v5012_v61 = vadd.f32 %v5011_v1, %v4947_v31 }
 0x71b   :  { %5187 = vmatmul.bf16.gmra.mxu0 %v12676_v18  ;;  %v8433_v18 = vor.u32 %v9176_v2, %v8430_v24 }
 0x71c   :  { %v12983_v39 = vadd.f32 %v5137_v3, %v12359_v48  ;;  %5251 = vmatmul.bf16.gmra.mxu1 %v12680_v50  ;;  %5315 = vmatmul.bf16.gmra.mxu2 %v12682_v59 }
 0x71d   :  { %8404 = vmatmul.msk.bf16.gmra.mxu3 %vm2959_vm4, %v12685_v33  ;;  %5821 = vmatpush.bf16.msra.mxu2 %v8433_v18  ;;  %v9188_v33 = vld [vmem:[%s13578_s5 + $0x84] sm:$0xf]  ;;  %v14111_v18 = vld [vmem:[#allocation52_spill] sm:$0xff] }
 0x71e   :  { %v8481_v23 = vor.u32 %v9188_v33, %v8478_v22 }
 0x71f   :  { %v5075_v28 = vpop.f32.mrf.mxu2 }
 0x720   :  { %v5076_v4 = vadd.f32 %v5075_v28, %v5012_v61  ;;  %v5139_v48 = vpop.f32.mrf.mxu3  ;;  %v4949_v43 = vpop.f32.mrf.mxu0  ;;  %5885 = vmatpush.bf16.msra.mxu3 %v8481_v23  ;;  %v14110_v28 = vld [vmem:[#allocation86_spill] sm:$0xff] }
 0x721   :  { %v5013_v62 = vpop.f32.mrf.mxu1 }
 0x722   :  { %v5140_v50 = vadd.f32 %v5139_v48, %v5076_v4  ;;  %v5014_v59 = vadd.f32 %v5013_v62, %v4949_v43  ;;  %v14112_v48 = vld [vmem:[#allocation80_spill] sm:$0xff]  ;;  %v14113_v43 = vld [vmem:[#allocation81_spill] sm:$0xff]  ;;  %v14114_v62 = vld [vmem:[#allocation82_spill] sm:$0xff] }
 0x724   :  { %v12996_v11 = vadd.f32 %v5140_v50, %v12373_v26 }
 0x727   :  { %v5077_v32 = vpop.f32.mrf.mxu2 }
 0x728   :  { %v5078_v26 = vadd.f32 %v5077_v32, %v5014_v59  ;;  %v5141_v17 = vpop.f32.mrf.mxu3  ;;  %v4952_v19 = vpop.f32.mrf.mxu0  ;;  %v9175_v32 = vld [vmem:[%s13578_s5 + $0x14] sm:$0xf0] }
 0x729   :  { %v5016_v35 = vpop.f32.mrf.mxu1  ;;  %v8421_v54 = vor.u32 %v9175_v32, %v8420_v0  ;;  %v14123_v0 = vld [vmem:[#allocation94_spill] sm:$0xff] }
 0x72a   :  { %v5142_v5 = vadd.f32 %v5141_v17, %v5078_v26  ;;  %v5017_v12 = vadd.f32 %v5016_v35, %v4952_v19  ;;  %v14115_v19 = vld [vmem:[#allocation59_spill] sm:$0xff] }
 0x72b   :  { %5192 = vmatmul.bf16.gmra.mxu0 %v12713_v13  ;;  %v8477_v13 = vor.u32 %v9189_v44, %v8476_v20  ;;  %v9172_v35 = vld [vmem:[%s13578_s5 + $0x4] sm:$0xf] }
 0x72c   :  { %v13012_v34 = vadd.f32 %v5142_v5, %v12388_v27  ;;  %5256 = vmatmul.bf16.gmra.mxu1 %v12717_v56  ;;  %5320 = vmatmul.bf16.gmra.mxu2 %v12719_v36  ;;  %v8414_v5 = vld [vmem:[%s13578_s5 + $0x8] sm:$0xf0] }
 0x72d   :  { %8405 = vmatmul.msk.bf16.gmra.mxu3 %vm2959_vm4, %v12722_v60  ;;  %5761 = vmatpush.bf16.msra.mxu1 %v8477_v13  ;;  %v9174_v60 = vld [vmem:[%s13578_s5 + $0x14] sm:$0xf]  ;;  %v8417_v20 = vor.u32 %v9172_v35, %v8414_v5 }
 0x72e   :  { %v8425_v14 = vor.u32 %v9174_v60, %v8422_v46  ;;  %5698 = vmatpush.bf16.msra.mxu0 %v8421_v54  ;;  %v14118_v60 = vld [vmem:[#allocation90_spill] sm:$0xff]  ;;  %v14119_v46 = vld [vmem:[#allocation83_spill] sm:$0xff] }
 0x72f   :  { %v5080_v41 = vpop.f32.mrf.mxu2 }
 0x730   :  { %v5081_v37 = vadd.f32 %v5080_v41, %v5017_v12  ;;  %v5144_v27 = vpop.f32.mrf.mxu3  ;;  %v4954_v16 = vpop.f32.mrf.mxu0  ;;  %5822 = vmatpush.bf16.msra.mxu2 %v8425_v14 }
 0x731   :  { %v5018_v7 = vpop.f32.mrf.mxu1 }
 0x732   :  { %v5145_v56 = vadd.f32 %v5144_v27, %v5081_v37  ;;  %v5019_v36 = vadd.f32 %v5018_v7, %v4954_v16  ;;  %v5454_v37 = vld [vmem:[%s13579_s6] sm:$0x3]  ;;  %v14116_v7 = vld [vmem:[#allocation88_spill] sm:$0xff] }
 0x734   :  { %v13025_v25 = vadd.f32 %v5145_v56, %v14109_v15  ;;  %5823 = vmatpush.bf16.msra.mxu2 %v8417_v20  ;;  %v13058_v56 = vperm.slane %v5454_v37, 0 }
 0x737   :  { %v5082_v58 = vpop.f32.mrf.mxu2 }
 0x738   :  { %v5083_v31 = vadd.f32 %v5082_v58, %v5019_v36  ;;  %v5146_v1 = vpop.f32.mrf.mxu3  ;;  %v4957_v3 = vpop.f32.mrf.mxu0  ;;  %v14117_v36 = vld [vmem:[#allocation60_spill] sm:$0xff] }
 0x739   :  { %v5021_v61 = vpop.f32.mrf.mxu1  ;;  %v14120_v58 = vld [vmem:[#allocation84_spill] sm:$0xff] }
 0x73a   :  { %v5147_v2 = vadd.f32 %v5146_v1, %v5083_v31  ;;  %v5022_v24 = vadd.f32 %v5021_v61, %v4957_v3 }
 0x73b   :  { %5197 = vmatmul.bf16.gmra.mxu0 %v14110_v28  ;;  %v8412_v28 = vld [vmem:[%s13578_s5] sm:$0xf] }
 0x73c   :  { %v13035_v4 = vadd.f32 %v5147_v2, %v14111_v18  ;;  %5261 = vmatmul.bf16.gmra.mxu1 %v14112_v48  ;;  %5325 = vmatmul.bf16.gmra.mxu2 %v14113_v43  ;;  %v9173_v18 = vld [vmem:[%s13578_s5 + $0x4] sm:$0xf0] }
 0x73d   :  { %8406 = vmatmul.msk.bf16.gmra.mxu3 %vm2959_vm4, %v14114_v62  ;;  %v8413_v43 = vor.u32 %v9173_v18, %v8412_v28 }
 0x73f   :  { %v5085_v50 = vpop.f32.mrf.mxu2  ;;  %5699 = vmatpush.bf16.msra.mxu0 %v8413_v43 }
 0x740   :  { %v5086_v59 = vadd.f32 %v5085_v50, %v5022_v24  ;;  %v5149_v33 = vpop.f32.mrf.mxu3  ;;  %v4959_v22 = vpop.f32.mrf.mxu0 }
 0x741   :  { %v5023_v23 = vpop.f32.mrf.mxu1 }
 0x742   :  { %v5150_v26 = vadd.f32 %v5149_v33, %v5086_v59  ;;  %v5024_v17 = vadd.f32 %v5023_v23, %v4959_v22  ;;  %v14121_v33 = vld [vmem:[#allocation92_spill] sm:$0xff]  ;;  %v14122_v22 = vld [vmem:[#allocation93_spill] sm:$0xff] }
 0x744   :  { %v5450_v49 = vadd.f32 %v5150_v26, %v14115_v19 }
 0x746   :  { %v5500_v14 = vadd.f32 %v13058_v56, %v5450_v49 }
 0x747   :  { %v5087_v12 = vpop.f32.mrf.mxu2 }
 0x748   :  { %v5088_v44 = vadd.f32 %v5087_v12, %v5024_v17  ;;  %v5151_v41 = vpop.f32.mrf.mxu3  ;;  %v5163_v13 = vpop.f32.mrf.mxu0 }
 0x749   :  { %v5227_v27 = vpop.f32.mrf.mxu1 }
 0x74a   :  { %v5152_v16 = vadd.f32 %v5151_v41, %v5088_v44  ;;  %v5228_v12 = vadd.f32 %v5227_v27, %v5163_v13  ;;  %v14125_v13 = vld [vmem:[#allocation61_spill] sm:$0xff] }
 0x74b   :  { %5202 = vmatmul.bf16.gmra.mxu0 %v14116_v7 }
 0x74c   :  { %v5452_v15 = vadd.f32 %v5152_v16, %v14117_v36  ;;  %5266 = vmatmul.bf16.gmra.mxu1 %v14118_v60  ;;  %5330 = vmatmul.bf16.gmra.mxu2 %v14119_v46  ;;  %v14124_v60 = vld [vmem:[#allocation62_spill] sm:$0xff] }
 0x74d   :  { %8407 = vmatmul.msk.bf16.gmra.mxu3 %vm2959_vm4, %v14120_v58  ;;  %v13087_v58 = vperm.slane %v5454_v37, 1 }
 0x74e   :  { %v5502_v31 = vadd.f32 %v13058_v56, %v5452_v15 }
 0x74f   :  { %v5291_v1 = vpop.f32.mrf.mxu2 }
 0x750   :  { %v5355_v3 = vpop.f32.mrf.mxu3  ;;  %v5165_v61 = vpop.f32.mrf.mxu0  ;;  %v13067_v2 = vpack.c.bf16 %v5502_v31, %v5500_v14 }
 0x751   :  { %v5229_v24 = vpop.f32.mrf.mxu1 }
 0x752   :  { %v5230_v19 = vadd.f32 %v5229_v24, %v5165_v61 }
 0x757   :  { %v5293_v48 = vpop.f32.mrf.mxu2 }
 0x758   :  { %v5357_v62 = vpop.f32.mrf.mxu3  ;;  %v5168_v50 = vpop.f32.mrf.mxu0  ;;  %v5294_v20 = vadd.f32 %v5293_v48, %v5230_v19 }
 0x759   :  { %v5232_v59 = vpop.f32.mrf.mxu1 }
 0x75a   :  { %v5358_v44 = vadd.f32 %v5357_v62, %v5294_v20  ;;  %v5233_v48 = vadd.f32 %v5232_v59, %v5168_v50  ;;  %v13113_v50 = vadd.f32 %v13058_v56, %v12845_v52 }
 0x75b   :  { %5207 = vmatmul.bf16.gmra.mxu0 %v12804_v55  ;;  %v5292_v55 = vadd.f32 %v5291_v1, %v5228_v12  ;;  %v14128_v12 = vld [vmem:[#allocation70_spill] sm:$0xff] }
 0x75c   :  { %5271 = vmatmul.bf16.gmra.mxu1 %v14121_v33  ;;  %5335 = vmatmul.bf16.gmra.mxu2 %v14122_v22  ;;  %v5413_v46 = vadd.f32 %v5358_v44, %v14124_v60 }
 0x75d   :  { %8408 = vmatmul.msk.bf16.gmra.mxu3 %vm2959_vm4, %v14123_v0  ;;  %v5356_v16 = vadd.f32 %v5355_v3, %v5292_v55  ;;  %v14129_v55 = vld [vmem:[#allocation69_spill] sm:$0xff] }
 0x75f   :  { %v5296_v32 = vpop.f32.mrf.mxu2  ;;  %v5411_v27 = vadd.f32 %v5356_v16, %v14125_v13 }
 0x760   :  { %v5360_v23 = vpop.f32.mrf.mxu3  ;;  %v5170_v54 = vpop.f32.mrf.mxu0  ;;  %v5297_v62 = vadd.f32 %v5296_v32, %v5233_v48  ;;  %v13120_v32 = vadd.f32 %v13058_v56, %v12833_v38  ;;  %v14130_v48 = vld [vmem:[#allocation64_spill] sm:$0xff] }
 0x761   :  { %v5234_v26 = vpop.f32.mrf.mxu1  ;;  %v13101_v1 = vadd.f32 %v13087_v58, %v5411_v27 }
 0x762   :  { %v5235_v3 = vadd.f32 %v5234_v26, %v5170_v54  ;;  %v5361_v0 = vadd.f32 %v5360_v23, %v5297_v62  ;;  %v5506_v13 = vpack.c.bf16 %v13113_v50, %v13120_v32  ;;  %v13142_v62 = vadd.f32 %v13058_v56, %v12864_v9 }
 0x764   :  { %v5415_v44 = vadd.f32 %v5361_v0, %v14129_v55 }
 0x766   :  { %v13123_v23 = vadd.f32 %v13087_v58, %v5415_v44 }
 0x767   :  { %v5298_v17 = vpop.f32.mrf.mxu2 }
 0x768   :  { %v5362_v49 = vpop.f32.mrf.mxu3  ;;  %v5173_v35 = vpop.f32.mrf.mxu0  ;;  %v5299_v43 = vadd.f32 %v5298_v17, %v5235_v3 }
 0x769   :  { %v5237_v5 = vpop.f32.mrf.mxu1 }
 0x76a   :  { %v5363_v33 = vadd.f32 %v5362_v49, %v5299_v43  ;;  %v5238_v52 = vadd.f32 %v5237_v5, %v5173_v35  ;;  %v14131_v35 = vld [vmem:[#allocation63_spill] sm:$0xff] }
 0x76b   :  { %5212 = vmatmul.bf16.gmra.mxu0 %v12835_v40  ;;  %v14126_v40 = vld [vmem:[#allocation101_spill] sm:$0xff] }
 0x76c   :  { %5276 = vmatmul.bf16.gmra.mxu1 %v12837_v10  ;;  %5340 = vmatmul.bf16.gmra.mxu2 %v12839_v53  ;;  %v13091_v10 = vadd.f32 %v13058_v56, %v14126_v40  ;;  %v13094_v53 = vadd.f32 %v13087_v58, %v5413_v46  ;;  %v5417_v20 = vadd.f32 %v5363_v33, %v14128_v12 }
 0x76d   :  { %8409 = vmatmul.msk.bf16.gmra.mxu3 %vm2959_vm4, %v12842_v42  ;;  %v14127_v42 = vld [vmem:[#allocation91_spill] sm:$0xff] }
 0x76e   :  { %v13098_v14 = vadd.f32 %v13058_v56, %v14127_v42  ;;  %v5505_v18 = vpack.c.bf16 %v13094_v53, %v13101_v1  ;;  %v13116_v59 = vadd.f32 %v13087_v58, %v5417_v20 }
 0x76f   :  { %v5301_v41 = vpop.f32.mrf.mxu2 }
 0x770   :  { %v5365_v7 = vpop.f32.mrf.mxu3  ;;  %v5175_v36 = vpop.f32.mrf.mxu0  ;;  %v5504_v37 = vpack.c.bf16 %v13091_v10, %v13098_v14  ;;  %v5507_v40 = vpack.c.bf16 %v13116_v59, %v13123_v23  ;;  %v5302_v42 = vadd.f32 %v5301_v41, %v5238_v52 }
 0x771   :  { %v5239_v15 = vpop.f32.mrf.mxu1 }
 0x772   :  { %v5240_v49 = vadd.f32 %v5239_v15, %v5175_v36  ;;  %v5366_v15 = vadd.f32 %v5365_v7, %v5302_v42  ;;  %v14132_v42 = vld [vmem:[#allocation66_spill] sm:$0xff] }
 0x774   :  { %v5419_v5 = vadd.f32 %v5366_v15, %v14131_v35  ;;  %v13164_v15 = vadd.f32 %v13058_v56, %v12887_v8 }
 0x776   :  { %v13145_v7 = vadd.f32 %v13087_v58, %v5419_v5 }
 0x777   :  { %v5303_v31 = vpop.f32.mrf.mxu2 }
 0x778   :  { %v5367_v61 = vpop.f32.mrf.mxu3  ;;  %v5178_v24 = vpop.f32.mrf.mxu0  ;;  %v5304_v27 = vadd.f32 %v5303_v31, %v5240_v49  ;;  %v13135_v31 = vadd.f32 %v13058_v56, %v12874_v57 }
 0x779   :  { %v5242_v28 = vpop.f32.mrf.mxu1 }
 0x77a   :  { %v5368_v38 = vadd.f32 %v5367_v61, %v5304_v27  ;;  %v5508_v55 = vpack.c.bf16 %v13135_v31, %v13142_v62  ;;  %v5243_v57 = vadd.f32 %v5242_v28, %v5178_v24  ;;  %v14133_v24 = vld [vmem:[#allocation65_spill] sm:$0xff] }
 0x77b   :  { %5700 = vmatmul.bf16.vlgmr.msra.gmra.mxu0 %v5504_v37 }
 0x77c   :  { %8498 = vmatmul.msk.bf16.vlgmr.msra.gmra.mxu1 %vm5658_vm5, %v5505_v18  ;;  %5824 = vmatmul.bf16.vlgmr.msra.gmra.mxu2 %v5504_v37  ;;  %v5421_v43 = vadd.f32 %v5368_v38, %v14130_v48 }
 0x77d   :  { %8509 = vmatmul.msk.bf16.vlgmr.msra.gmra.mxu3 %vm5658_vm5, %v5505_v18 }
 0x77e   :  { %v13138_v41 = vadd.f32 %v13087_v58, %v5421_v43 }
 0x77f   :  { %v5306_v22 = vpop.f32.mrf.mxu2 }
 0x780   :  { %v5370_v54 = vpop.f32.mrf.mxu3  ;;  %v5180_v26 = vpop.f32.mrf.mxu0  ;;  %v5509_v49 = vpack.c.bf16 %v13138_v41, %v13145_v7 }
 0x781   :  { %v5244_v19 = vpop.f32.mrf.mxu1 }
 0x782   :  { %v5245_v33 = vadd.f32 %v5244_v19, %v5180_v26 }
 0x787   :  { %v5308_v17 = vpop.f32.mrf.mxu2 }
 0x788   :  { %v5372_v16 = vpop.f32.mrf.mxu3  ;;  %v5183_v60 = vpop.f32.mrf.mxu0  ;;  %v5309_v44 = vadd.f32 %v5308_v17, %v5245_v33  ;;  %v13157_v17 = vadd.f32 %v13058_v56, %v12891_v21 }
 0x789   :  { %v5247_v46 = vpop.f32.mrf.mxu1 }
 0x78a   :  { %v5373_v9 = vadd.f32 %v5372_v16, %v5309_v44  ;;  %v5510_v21 = vpack.c.bf16 %v13157_v17, %v13164_v15  ;;  %v5248_v33 = vadd.f32 %v5247_v46, %v5183_v60  ;;  %v14135_v60 = vld [vmem:[#allocation71_spill] sm:$0xff] }
 0x78b   :  { %5705 = vmatmul.bf16.gmra.mxu0 %v5506_v13 }
 0x78c   :  { %8499 = vmatmul.msk.bf16.gmra.mxu1 %vm5658_vm5, %v5507_v40  ;;  %5829 = vmatmul.bf16.gmra.mxu2 %v5506_v13  ;;  %v5307_v13 = vadd.f32 %v5306_v22, %v5243_v57  ;;  %v5425_v38 = vadd.f32 %v5373_v9, %v14132_v42 }
 0x78d   :  { %8510 = vmatmul.msk.bf16.gmra.mxu3 %vm5658_vm5, %v5507_v40 }
 0x78e   :  { %v5371_v19 = vadd.f32 %v5370_v54, %v5307_v13  ;;  %v13160_v22 = vadd.f32 %v13087_v58, %v5425_v38 }
 0x78f   :  { %v5311_v36 = vpop.f32.mrf.mxu2 }
 0x790   :  { %v5375_v3 = vpop.f32.mrf.mxu3  ;;  %v5185_v37 = vpop.f32.mrf.mxu0  ;;  %v5423_v28 = vadd.f32 %v5371_v19, %v14133_v24  ;;  %v5312_v8 = vadd.f32 %v5311_v36, %v5248_v33  ;;  %v14134_v19 = vld [vmem:[#allocation72_spill] sm:$0xff] }
 0x791   :  { %v5249_v18 = vpop.f32.mrf.mxu1 }
 0x792   :  { %v13167_v54 = vadd.f32 %v13087_v58, %v5423_v28  ;;  %v5250_v48 = vadd.f32 %v5249_v18, %v5185_v37  ;;  %v5376_v44 = vadd.f32 %v5375_v3, %v5312_v8  ;;  %v13193_v3 = vadd.f32 %v13058_v56, %v12904_v30 }
 0x794   :  { %v5511_v57 = vpack.c.bf16 %v13160_v22, %v13167_v54  ;;  %v5427_v46 = vadd.f32 %v5376_v44, %v14135_v60  ;;  %v14138_v60 = vld [vmem:[#allocation73_spill] sm:$0xff] }
 0x796   :  { %v13196_v24 = vadd.f32 %v13087_v58, %v5427_v46  ;;  %v13213_v46 = vadd.f32 %v13058_v56, %v12943_v51 }
 0x797   :  { %v5313_v61 = vpop.f32.mrf.mxu2 }
 0x798   :  { %v5377_v0 = vpop.f32.mrf.mxu3  ;;  %v5188_v12 = vpop.f32.mrf.mxu0 }
 0x799   :  { %v5252_v20 = vpop.f32.mrf.mxu1 }
 0x79b   :  { %5710 = vmatmul.bf16.gmra.mxu0 %v5508_v55 }
 0x79c   :  { %8500 = vmatmul.msk.bf16.gmra.mxu1 %vm5658_vm5, %v5509_v49  ;;  %5834 = vmatmul.bf16.gmra.mxu2 %v5508_v55  ;;  %v5314_v55 = vadd.f32 %v5313_v61, %v5250_v48  ;;  %v13183_v61 = vadd.f32 %v13058_v56, %v12914_v63 }
 0x79d   :  { %8511 = vmatmul.msk.bf16.gmra.mxu3 %vm5658_vm5, %v5509_v49 }
 0x79e   :  { %v5378_v37 = vadd.f32 %v5377_v0, %v5314_v55  ;;  %v9204_v0 = vld [vmem:[%s13580_s7 + $0x50] sm:$0xff]  ;;  %v5512_v33 = vpack.c.bf16 %v13183_v61, %v13193_v3  ;;  %v5253_v55 = vadd.f32 %v5252_v20, %v5188_v12 }
 0x79f   :  { %v5316_v26 = vpop.f32.mrf.mxu2  ;;  %6262 = vmatpush.bf16.msrb.mxu3 %v9204_v0  ;;  %v9201_v0 = vld [vmem:[%s13580_s7 + $0x38] sm:$0xff] }
 0x7a0   :  { %v5380_v52 = vpop.f32.mrf.mxu3  ;;  %v5190_v27 = vpop.f32.mrf.mxu0  ;;  %v5429_v42 = vadd.f32 %v5378_v37, %v14134_v19  ;;  %v5317_v30 = vadd.f32 %v5316_v26, %v5253_v55  ;;  %6243 = vmatpush.bf16.msrb.mxu2 %v9201_v0 }
 0x7a1   :  { %v5254_v40 = vpop.f32.mrf.mxu1 }
 0x7a2   :  { %v13186_v36 = vadd.f32 %v13087_v58, %v5429_v42  ;;  %v5255_v28 = vadd.f32 %v5254_v40, %v5190_v27  ;;  %v9215_v40 = vld [vmem:[%s13580_s7 + $0xa8] sm:$0xff]  ;;  %v5381_v44 = vadd.f32 %v5380_v52, %v5317_v30  ;;  %v9212_v52 = vld [vmem:[%s13580_s7 + $0x90] sm:$0xff] }
 0x7a3   :  { %6165 = vmatpush.bf16.msrb.mxu1 %v9215_v40  ;;  %6146 = vmatpush.bf16.msrb.mxu0 %v9212_v52  ;;  %v14139_v52 = vld [vmem:[#allocation68_spill] sm:$0xff] }
 0x7a4   :  { %14136 = vst [vmem:[#allocation95_spill] sm:$0xff] %v13186_v36  ;;  %v5513_v8 = vpack.c.bf16 %v13186_v36, %v13196_v24  ;;  %v5431_v26 = vadd.f32 %v5381_v44, %v14138_v60 }
 0x7a6   :  { %v13229_v55 = vadd.f32 %v13087_v58, %v5431_v26 }
 0x7a7   :  { %v5318_v16 = vpop.f32.mrf.mxu2 }
 0x7a8   :  { %v5382_v43 = vpop.f32.mrf.mxu3  ;;  %v13169_v35 = vpop.f32.mrf.mxu0 }
 0x7a9   :  { %v13171_v5 = vpop.f32.mrf.mxu1 }
 0x7aa   :  { %v5258_v40 = vadd.f32 %v13171_v5, %v13169_v35  ;;  %v14140_v35 = vld [vmem:[#allocation67_spill] sm:$0xff] }
 0x7ab   :  { %5715 = vmatmul.bf16.gmra.mxu0 %v5510_v21 }
 0x7ac   :  { %8501 = vmatmul.msk.bf16.gmra.mxu1 %vm5658_vm5, %v5511_v57  ;;  %5839 = vmatmul.bf16.gmra.mxu2 %v5510_v21 }
 0x7ad   :  { %8512 = vmatmul.msk.bf16.gmra.mxu3 %vm5658_vm5, %v5511_v57  ;;  %v5319_v57 = vadd.f32 %v5318_v16, %v5255_v28  ;;  %v14137_v16 = vld [vmem:[#allocation74_spill] sm:$0xff]  ;;  %v13226_v28 = vadd.f32 %v13058_v56, %v12933_v29 }
 0x7af   :  { %v5321_v18 = vpop.f32.mrf.mxu2  ;;  %v5383_v27 = vadd.f32 %v5382_v43, %v5319_v57 }
 0x7b0   :  { %v5385_v49 = vpop.f32.mrf.mxu3  ;;  %v5195_v13 = vpop.f32.mrf.mxu0 }
 0x7b1   :  { %v5259_v9 = vpop.f32.mrf.mxu1  ;;  %v5433_v42 = vadd.f32 %v5383_v27, %v14137_v16  ;;  %v5514_v27 = vpack.c.bf16 %v13213_v46, %v13226_v28  ;;  %v5322_v16 = vadd.f32 %v5321_v18, %v5258_v40 }
 0x7b2   :  { %v5260_v51 = vadd.f32 %v5259_v9, %v5195_v13 }
 0x7b3   :  { %v13216_v43 = vadd.f32 %v13087_v58, %v5433_v42  ;;  %v5386_v42 = vadd.f32 %v5385_v49, %v5322_v16  ;;  %v13253_v49 = vadd.f32 %v13058_v56, %v12956_v6 }
 0x7b5   :  { %v5515_v29 = vpack.c.bf16 %v13216_v43, %v13229_v55  ;;  %v5435_v5 = vadd.f32 %v5386_v42, %v14140_v35 }
 0x7b7   :  { %v5323_v38 = vpop.f32.mrf.mxu2 }
 0x7b8   :  { %v5387_v48 = vpop.f32.mrf.mxu3  ;;  %v13198_v21 = vpop.f32.mrf.mxu0  ;;  %v5324_v44 = vadd.f32 %v5323_v38, %v5260_v51  ;;  %v13243_v38 = vadd.f32 %v13058_v56, %v12966_v47 }
 0x7b9   :  { %v5262_v63 = vpop.f32.mrf.mxu1 }
 0x7ba   :  { %v5388_v13 = vadd.f32 %v5387_v48, %v5324_v44  ;;  %v9200_v48 = vld [vmem:[%s13580_s7 + $0x30] sm:$0xff]  ;;  %v5263_v16 = vadd.f32 %v5262_v63, %v13198_v21 }
 0x7bb   :  { %5720 = vmatmul.bf16.gmra.mxu0 %v5512_v33  ;;  %6244 = vmatpush.bf16.msrb.mxu2 %v9200_v48 }
 0x7bc   :  { %8502 = vmatmul.msk.bf16.gmra.mxu1 %vm5658_vm5, %v5513_v8  ;;  %5844 = vmatmul.bf16.gmra.mxu2 %v5512_v33  ;;  %v5437_v36 = vadd.f32 %v5388_v13, %v14139_v52 }
 0x7bd   :  { %8513 = vmatmul.msk.bf16.gmra.mxu3 %vm5658_vm5, %v5513_v8 }
 0x7be   :  { %v13246_v18 = vadd.f32 %v13087_v58, %v5437_v36  ;;  %v5516_v36 = vpack.c.bf16 %v13243_v38, %v13253_v49 }
 0x7bf   :  { %v5326_v37 = vpop.f32.mrf.mxu2 }
 0x7c0   :  { %v5390_v19 = vpop.f32.mrf.mxu3  ;;  %v5200_v12 = vpop.f32.mrf.mxu0  ;;  %14141 = vst [vmem:[#allocation102_spill] sm:$0xff] %v13246_v18  ;;  %v5327_v42 = vadd.f32 %v5326_v37, %v5263_v16  ;;  %v14144_v37 = vld [vmem:[#allocation75_spill] sm:$0xff]  ;;  %v13285_v16 = vadd.f32 %v13058_v56, %v12973_v45 }
 0x7c1   :  { %v5264_v20 = vpop.f32.mrf.mxu1 }
 0x7c2   :  { %v5265_v40 = vadd.f32 %v5264_v20, %v5200_v12  ;;  %v9211_v20 = vld [vmem:[%s13580_s7 + $0x88] sm:$0xff]  ;;  %v5391_v35 = vadd.f32 %v5390_v19, %v5327_v42 }
 0x7c3   :  { %6147 = vmatpush.bf16.msrb.mxu0 %v9211_v20 }
 0x7c7   :  { %v5328_v33 = vpop.f32.mrf.mxu2 }
 0x7c8   :  { %v5392_v57 = vpop.f32.mrf.mxu3  ;;  %v5203_v8 = vpop.f32.mrf.mxu0  ;;  %v5329_v13 = vadd.f32 %v5328_v33, %v5265_v40  ;;  %v14143_v33 = vld [vmem:[#allocation76_spill] sm:$0xff]  ;;  %v5439_v40 = vadd.f32 %v5391_v35, %v14144_v37 }
 0x7c9   :  { %v5267_v30 = vpop.f32.mrf.mxu1 }
 0x7ca   :  { %v5393_v12 = vadd.f32 %v5392_v57, %v5329_v13  ;;  %v13288_v13 = vadd.f32 %v13087_v58, %v5439_v40 }
 0x7cb   :  { %5725 = vmatmul.bf16.gmra.mxu0 %v5514_v27 }
 0x7cc   :  { %8503 = vmatmul.msk.bf16.gmra.mxu1 %vm5658_vm5, %v5515_v29  ;;  %5849 = vmatmul.bf16.gmra.mxu2 %v5514_v27  ;;  %v13256_v27 = vadd.f32 %v13087_v58, %v5435_v5  ;;  %v5441_v48 = vadd.f32 %v5393_v12, %v14143_v33 }
 0x7cd   :  { %8514 = vmatmul.msk.bf16.gmra.mxu3 %vm5658_vm5, %v5515_v29 }
 0x7ce   :  { %14142 = vst [vmem:[#allocation96_spill] sm:$0xff] %v13256_v27  ;;  %v5517_v6 = vpack.c.bf16 %v13246_v18, %v13256_v27  ;;  %v13281_v57 = vadd.f32 %v13087_v58, %v5441_v48 }
 0x7cf   :  { %v5331_v9 = vpop.f32.mrf.mxu2 }
 0x7d0   :  { %v5395_v60 = vpop.f32.mrf.mxu3  ;;  %v5205_v26 = vpop.f32.mrf.mxu0  ;;  %v5519_v48 = vpack.c.bf16 %v13281_v57, %v13288_v13 }
 0x7d1   :  { %v5269_v0 = vpop.f32.mrf.mxu1 }
 0x7d7   :  { %v5333_v51 = vpop.f32.mrf.mxu2 }
 0x7d8   :  { %v5397_v44 = vpop.f32.mrf.mxu3  ;;  %v13258_v29 = vpop.f32.mrf.mxu0 }
 0x7d9   :  { %v13260_v47 = vpop.f32.mrf.mxu1 }
 0x7db   :  { %5730 = vmatmul.bf16.gmra.mxu0 %v5516_v36 }
 0x7dc   :  { %8504 = vmatmul.msk.bf16.gmra.mxu1 %vm5658_vm5, %v5517_v6  ;;  %5854 = vmatmul.bf16.gmra.mxu2 %v5516_v36  ;;  %v13278_v36 = vadd.f32 %v13058_v56, %v12983_v39  ;;  %v5268_v39 = vadd.f32 %v5267_v30, %v5203_v8  ;;  %v9199_v8 = vld [vmem:[%s13580_s7 + $0x28] sm:$0xff] }
 0x7dd   :  { %8515 = vmatmul.msk.bf16.gmra.mxu3 %vm5658_vm5, %v5517_v6  ;;  %v5270_v6 = vadd.f32 %v5269_v0, %v5205_v26  ;;  %v9203_v30 = vld [vmem:[%s13580_s7 + $0x48] sm:$0xff]  ;;  %6245 = vmatpush.bf16.msrb.mxu2 %v9199_v8 }
 0x7de   :  { %v5518_v35 = vpack.c.bf16 %v13278_v36, %v13285_v16  ;;  %v5332_v37 = vadd.f32 %v5331_v9, %v5268_v39  ;;  %6263 = vmatpush.bf16.msrb.mxu3 %v9203_v30 }
 0x7df   :  { %v5336_v52 = vpop.f32.mrf.mxu2  ;;  %v5334_v33 = vadd.f32 %v5333_v51, %v5270_v6  ;;  %v14145_v51 = vld [vmem:[#allocation78_spill] sm:$0xff] }
 0x7e0   :  { %v13272_v5 = vpop.f32.mrf.mxu3  ;;  %v5210_v21 = vpop.f32.mrf.mxu0  ;;  %v5396_v0 = vadd.f32 %v5395_v60, %v5332_v37  ;;  %v13306_v60 = vadd.f32 %v13058_v56, %v13012_v34 }
 0x7e1   :  { %v5274_v63 = vpop.f32.mrf.mxu1  ;;  %v5398_v45 = vadd.f32 %v5397_v44, %v5334_v33  ;;  %v14146_v44 = vld [vmem:[#allocation77_spill] sm:$0xff] }
 0x7e2   :  { %v5443_v39 = vadd.f32 %v5396_v0, %v14146_v44  ;;  %v5275_v0 = vadd.f32 %v5274_v63, %v5210_v21  ;;  %v9214_v63 = vld [vmem:[%s13580_s7 + $0xa0] sm:$0xff] }
 0x7e3   :  { %v5445_v6 = vadd.f32 %v5398_v45, %v14145_v51  ;;  %v9210_v45 = vld [vmem:[%s13580_s7 + $0x80] sm:$0xff]  ;;  %6166 = vmatpush.bf16.msrb.mxu1 %v9214_v63 }
 0x7e4   :  { %6148 = vmatpush.bf16.msrb.mxu0 %v9210_v45 }
 0x7e7   :  { %v5338_v19 = vpop.f32.mrf.mxu2 }
 0x7e8   :  { %v5402_v42 = vpop.f32.mrf.mxu3  ;;  %v5213_v12 = vpop.f32.mrf.mxu0  ;;  %v5339_v30 = vadd.f32 %v5338_v19, %v5275_v0  ;;  %v9198_v19 = vld [vmem:[%s13580_s7 + $0x20] sm:$0xff] }
 0x7e9   :  { %v5277_v20 = vpop.f32.mrf.mxu1  ;;  %6246 = vmatpush.bf16.msrb.mxu2 %v9198_v19 }
 0x7ea   :  { %v5278_v40 = vadd.f32 %v5277_v20, %v5213_v12  ;;  %v13309_v12 = vadd.f32 %v13087_v58, %v5445_v6  ;;  %v5403_v44 = vadd.f32 %v5402_v42, %v5339_v30  ;;  %v14150_v42 = vld [vmem:[#allocation85_spill] sm:$0xff] }
 0x7eb   :  { %5735 = vmatmul.bf16.gmra.mxu0 %v5518_v35 }
 0x7ec   :  { %8505 = vmatmul.msk.bf16.gmra.mxu1 %vm5658_vm5, %v5519_v48  ;;  %5859 = vmatmul.bf16.gmra.mxu2 %v5518_v35 }
 0x7ed   :  { %8516 = vmatmul.msk.bf16.gmra.mxu3 %vm5658_vm5, %v5519_v48  ;;  %v13313_v48 = vadd.f32 %v13058_v56, %v12996_v11 }
 0x7ef   :  { %v5341_v26 = vpop.f32.mrf.mxu2  ;;  %v5520_v11 = vpack.c.bf16 %v13306_v60, %v13313_v48 }
 0x7f0   :  { %v5405_v18 = vpop.f32.mrf.mxu3  ;;  %v5215_v27 = vpop.f32.mrf.mxu0  ;;  %v5342_v35 = vadd.f32 %v5341_v26, %v5278_v40  ;;  %v13319_v26 = vadd.f32 %v13087_v58, %v5443_v39 }
 0x7f1   :  { %v5279_v9 = vpop.f32.mrf.mxu1 }
 0x7f2   :  { %v5406_v20 = vadd.f32 %v5405_v18, %v5342_v35  ;;  %v5280_v33 = vadd.f32 %v5279_v9, %v5215_v27  ;;  %v5273_v18 = vadd.f32 %v13260_v47, %v13258_v29  ;;  %v14147_v9 = vld [vmem:[#allocation87_spill] sm:$0xff]  ;;  %v5521_v21 = vpack.c.bf16 %v13309_v12, %v13319_v26  ;;  %v14148_v29 = vld [vmem:[#allocation89_spill] sm:$0xff] }
 0x7f4   :  { %v5451_v51 = vadd.f32 %v5406_v20, %v14147_v9  ;;  %v5337_v35 = vadd.f32 %v5336_v52, %v5273_v18  ;;  %v14149_v18 = vld [vmem:[#allocation79_spill] sm:$0xff]  ;;  %v13351_v9 = vadd.f32 %v13058_v56, %v13035_v4  ;;  %v9195_v4 = vld [vmem:[%s13580_s7 + $0x8] sm:$0xff] }
 0x7f6   :  { %v5501_v39 = vadd.f32 %v13087_v58, %v5451_v51  ;;  %v5401_v52 = vadd.f32 %v13272_v5, %v5337_v35  ;;  %v9196_v5 = vld [vmem:[%s13580_s7 + $0x10] sm:$0xff] }
 0x7f7   :  { %v5343_v37 = vpop.f32.mrf.mxu2 }
 0x7f8   :  { %v5344_v34 = vadd.f32 %v5343_v37, %v5280_v33  ;;  %v5407_v40 = vpop.f32.mrf.mxu3  ;;  %v13321_v8 = vpop.f32.mrf.mxu0  ;;  %v5447_v30 = vadd.f32 %v5401_v52, %v14150_v42 }
 0x7f9   :  { %v13325_v27 = vpop.f32.mrf.mxu1 }
 0x7fa   :  { %v5408_v6 = vadd.f32 %v5407_v40, %v5344_v34  ;;  %v9197_v40 = vld [vmem:[%s13580_s7 + $0x18] sm:$0xff]  ;;  %v13370_v35 = vadd.f32 %v13087_v58, %v5447_v30 }
 0x7fb   :  { %5740 = vmatmul.bf16.gmra.mxu0 %v5520_v11  ;;  %6247 = vmatpush.bf16.msrb.mxu2 %v9197_v40  ;;  %v9208_v40 = vld [vmem:[%s13580_s7 + $0x70] sm:$0xff] }
 0x7fc   :  { %v5453_v47 = vadd.f32 %v5408_v6, %v14148_v29  ;;  %8506 = vmatmul.msk.bf16.gmra.mxu1 %vm5658_vm5, %v5521_v21  ;;  %5864 = vmatmul.bf16.gmra.mxu2 %v5520_v11  ;;  %v5449_v11 = vadd.f32 %v5403_v44, %v14149_v18  ;;  %v9209_v6 = vld [vmem:[%s13580_s7 + $0x78] sm:$0xff] }
 0x7fd   :  { %8517 = vmatmul.msk.bf16.gmra.mxu3 %vm5658_vm5, %v5521_v21  ;;  %v13364_v21 = vadd.f32 %v13058_v56, %v13025_v25  ;;  %6149 = vmatpush.bf16.msrb.mxu0 %v9209_v6  ;;  %v9194_v56 = vld [vmem:[%s13580_s7] sm:$0xff] }
 0x7fe   :  { %v5503_v20 = vadd.f32 %v13087_v58, %v5453_v47  ;;  %v13357_v51 = vadd.f32 %v13087_v58, %v5449_v11  ;;  %v9202_v58 = vld [vmem:[%s13580_s7 + $0x40] sm:$0xff]  ;;  %v9207_v11 = vld [vmem:[%s13580_s7 + $0x68] sm:$0xff] }
 0x7ff   :  { %v5825_v33 = vpop.f32.mrf.mxu2  ;;  %6248 = vmatpush.bf16.msrb.mxu2 %v9196_v5  ;;  %v5522_v44 = vpack.c.bf16 %v13351_v9, %v13364_v21  ;;  %6264 = vmatpush.bf16.msrb.mxu3 %v9202_v58 }
 0x800   :  { %v5887_v37 = vpop.f32.mrf.mxu3  ;;  %v5703_v45 = vpop.f32.mrf.mxu0  ;;  %v5525_v0 = vpack.c.bf16 %v5503_v20, %v5501_v39  ;;  %14151 = vst [vmem:[#allocation97_spill] sm:$0xff] %v13357_v51  ;;  %v5523_v25 = vpack.c.bf16 %v13357_v51, %v13370_v35 }
 0x801   :  { %v5765_v34 = vpop.f32.mrf.mxu1  ;;  %6150 = vmatpush.bf16.msrb.mxu0 %v9208_v40 }
 0x803   :  { %6249 = vmatpush.bf16.msrb.mxu2 %v9195_v4  ;;  %v9206_v4 = vld [vmem:[%s13580_s7 + $0x60] sm:$0xff] }
 0x805   :  { %6151 = vmatpush.bf16.msrb.mxu0 %v9207_v11  ;;  %v9205_v11 = vld [vmem:[%s13580_s7 + $0x58] sm:$0xff] }
 0x807   :  { %v5827_v63 = vpop.f32.mrf.mxu2  ;;  %6250 = vmatpush.bf16.msrb.mxu2 %v9194_v56  ;;  %v5766_v56 = vadd.f32 %v5765_v34, %v5703_v45  ;;  %v5888_v45 = vadd.f32 %v5887_v37, %v5825_v33 }
 0x808   :  { %v5889_v29 = vpop.f32.mrf.mxu3  ;;  %v5706_v47 = vpop.f32.mrf.mxu0 }
 0x809   :  { %v5768_v19 = vpop.f32.mrf.mxu1  ;;  %v5890_v40 = vadd.f32 %v5889_v29, %v5827_v63  ;;  %6152 = vmatpush.bf16.msrb.mxu0 %v9206_v4 }
 0x80a   :  { %v5769_v58 = vadd.f32 %v5768_v19, %v5706_v47 }
 0x80b   :  { %5745 = vmatmul.bf16.gmra.mxu0 %v5522_v44  ;;  %v5943_v19 = vmax.f32 %v13094_v53, %v5890_v40 }
 0x80c   :  { %8507 = vmatmul.msk.bf16.gmra.mxu1 %vm5658_vm5, %v5523_v25  ;;  %5869 = vmatmul.bf16.gmra.mxu2 %v5522_v44  ;;  %v5944_v63 = vmax.f32 %v13120_v32, %v5769_v58  ;;  %v9213_v32 = vld [vmem:[%s13580_s7 + $0x98] sm:$0xff] }
 0x80d   :  { %8518 = vmatmul.msk.bf16.gmra.mxu3 %vm5658_vm5, %v5523_v25  ;;  %6153 = vmatpush.bf16.msrb.mxu0 %v9205_v11 }
 0x80e   :  { %v5984_v33 = vmax.f32 %v5944_v63, 0.0  ;;  %6167 = vmatpush.bf16.msrb.mxu1 %v9213_v32 }
 0x80f   :  { %v5830_v39 = vpop.f32.mrf.mxu2 }
 0x810   :  { %v5892_v20 = vpop.f32.mrf.mxu3  ;;  %v5708_v52 = vpop.f32.mrf.mxu0 }
 0x811   :  { %v5770_v18 = vpop.f32.mrf.mxu1  ;;  %v5893_v51 = vadd.f32 %v5892_v20, %v5830_v39 }
 0x812   :  { %v5771_v44 = vadd.f32 %v5770_v18, %v5708_v52  ;;  %v5764_v52 = vadd.f32 %v13325_v27, %v13321_v8  ;;  %v5941_v27 = vmax.f32 %v13101_v1, %v5888_v45 }
 0x813   :  { %v5945_v39 = vmax.f32 %v13123_v23, %v5893_v51  ;;  %v5983_v23 = vmax.f32 %v5943_v19, 0.0  ;;  %v9222_v51 = vld [vmem:[%s13580_s7 + $0xe0] sm:$0xff] }
 0x814   :  { %v5946_v18 = vmax.f32 %v13113_v50, %v5771_v44  ;;  %v9223_v50 = vld [vmem:[%s13580_s7 + $0xe8] sm:$0xff]  ;;  %v5940_v8 = vmax.f32 %v13098_v14, %v5764_v52  ;;  %v9221_v44 = vld [vmem:[%s13580_s7 + $0xd8] sm:$0xff] }
 0x815   :  { %6369 = vmatpush.bf16.msra.mxu0 %v9223_v50  ;;  %v5985_v37 = vmax.f32 %v5945_v39, 0.0 }
 0x817   :  { %v5832_v42 = vpop.f32.mrf.mxu2 }
 0x818   :  { %v5894_v30 = vpop.f32.mrf.mxu3  ;;  %v5711_v5 = vpop.f32.mrf.mxu0 }
 0x819   :  { %v5773_v6 = vpop.f32.mrf.mxu1  ;;  %v5895_v25 = vadd.f32 %v5894_v30, %v5832_v42  ;;  %v5980_v42 = vmax.f32 %v5940_v8, 0.0  ;;  %v5981_v30 = vmax.f32 %v5941_v27, 0.0  ;;  %6370 = vmatpush.bf16.msra.mxu0 %v9222_v51 }
 0x81b   :  { %5750 = vmatmul.bf16.gmra.mxu0 %v13067_v2  ;;  %v5947_v34 = vmax.f32 %v13116_v59, %v5895_v25  ;;  %v5986_v59 = vmax.f32 %v5946_v18, 0.0  ;;  %v6020_v25 = vmax.f32 %v5980_v42, %v5984_v33  ;;  %v6021_v40 = vmax.f32 %v5981_v30, %v5985_v37 }
 0x81c   :  { %8508 = vmatmul.msk.bf16.gmra.mxu1 %vm5658_vm5, %v5525_v0  ;;  %5874 = vmatmul.bf16.gmra.mxu2 %v13067_v2  ;;  %v5942_v2 = vmax.f32 %v13091_v10, %v5766_v56 }
 0x81d   :  { %8519 = vmatmul.msk.bf16.gmra.mxu3 %vm5658_vm5, %v5525_v0  ;;  %v5987_v10 = vmax.f32 %v5947_v34, 0.0  ;;  %6371 = vmatpush.bf16.msra.mxu0 %v9221_v44  ;;  %v9220_v34 = vld [vmem:[%s13580_s7 + $0xd0] sm:$0xff] }
 0x81e   :  { %v5982_v53 = vmax.f32 %v5942_v2, 0.0  ;;  %v5774_v2 = vadd.f32 %v5773_v6, %v5711_v5 }
 0x81f   :  { %v5835_v47 = vpop.f32.mrf.mxu2  ;;  %v6023_v4 = vmax.f32 %v5983_v23, %v5987_v10 }
 0x820   :  { %v5897_v29 = vpop.f32.mrf.mxu3  ;;  %v5713_v0 = vpop.f32.mrf.mxu0  ;;  %v6022_v14 = vmax.f32 %v5982_v53, %v5986_v59  ;;  %v9219_v59 = vld [vmem:[%s13580_s7 + $0xc8] sm:$0xff]  ;;  %v5948_v10 = vmax.f32 %v13142_v62, %v5774_v2 }
 0x821   :  { %v5775_v20 = vpop.f32.mrf.mxu1  ;;  %v6025_v18 = vpack.c.bf16 %v6023_v4, %v6021_v40  ;;  %6372 = vmatpush.bf16.msra.mxu0 %v9220_v34 }
 0x822   :  { %v6024_v52 = vpack.c.bf16 %v6022_v14, %v6020_v25  ;;  %v5776_v63 = vadd.f32 %v5775_v20, %v5713_v0  ;;  %v5898_v0 = vadd.f32 %v5897_v29, %v5835_v47  ;;  %v5988_v23 = vmax.f32 %v5948_v10, 0.0 }
 0x824   :  { %v5950_v32 = vmax.f32 %v13135_v31, %v5776_v63  ;;  %v5949_v44 = vmax.f32 %v13145_v7, %v5898_v0 }
 0x825   :  { %6373 = vmatpush.bf16.msra.mxu0 %v9219_v59 }
 0x826   :  { %v5990_v37 = vmax.f32 %v5950_v32, 0.0  ;;  %v5989_v40 = vmax.f32 %v5949_v44, 0.0 }
 0x827   :  { %v5837_v1 = vpop.f32.mrf.mxu2 }
 0x828   :  { %v5899_v56 = vpop.f32.mrf.mxu3  ;;  %v5716_v58 = vpop.f32.mrf.mxu0 }
 0x829   :  { %v5778_v11 = vpop.f32.mrf.mxu1  ;;  %v5900_v20 = vadd.f32 %v5899_v56, %v5837_v1  ;;  %v9217_v1 = vld [vmem:[%s13580_s7 + $0xb8] sm:$0xff] }
 0x82a   :  { %v5779_v45 = vadd.f32 %v5778_v11, %v5716_v58  ;;  %v9226_v58 = vld [vmem:[%s13580_s7 + $0x100] sm:$0xff] }
 0x82b   :  { %6388 = vmatpush.bf16.msra.mxu1 %v9226_v58 }
 0x82c   :  { %6251 = vmatmul.bf16.vlgmr.msrb.gmra.mxu2 %v6024_v52  ;;  %v5952_v39 = vmax.f32 %v13164_v15, %v5779_v45  ;;  %v9218_v15 = vld [vmem:[%s13580_s7 + $0xc0] sm:$0xff] }
 0x82d   :  { %8631 = vmatmul.msk.bf16.vlgmr.msrb.gmra.mxu3 %vm5658_vm5, %v6025_v18  ;;  %6374 = vmatpush.bf16.msra.mxu0 %v9218_v15 }
 0x82e   :  { %v5992_v5 = vmax.f32 %v5952_v39, 0.0  ;;  %v9234_v39 = vld [vmem:[%s13580_s7 + $0x140] sm:$0xff] }
 0x82f   :  { %v5840_v19 = vpop.f32.mrf.mxu2  ;;  %6497 = vmatpush.bf16.msra.mxu2 %v9234_v39 }
 0x830   :  { %v5902_v50 = vpop.f32.mrf.mxu3  ;;  %v5718_v8 = vpop.f32.mrf.mxu0  ;;  %v6048_v31 = vmax.f32 %v5988_v23, %v5992_v5  ;;  %v9231_v5 = vld [vmem:[%s13580_s7 + $0x128] sm:$0xff] }
 0x831   :  { %v5780_v27 = vpop.f32.mrf.mxu1  ;;  %v5903_v33 = vadd.f32 %v5902_v50, %v5840_v19  ;;  %6375 = vmatpush.bf16.msra.mxu0 %v9217_v1  ;;  %v9224_v50 = vld [vmem:[%s13580_s7 + $0xf0] sm:$0xff] }
 0x832   :  { %v5781_v53 = vadd.f32 %v5780_v27, %v5718_v8  ;;  %v9233_v8 = vld [vmem:[%s13580_s7 + $0x138] sm:$0xff]  ;;  %v9232_v27 = vld [vmem:[%s13580_s7 + $0x130] sm:$0xff] }
 0x833   :  { %v5953_v42 = vmax.f32 %v13167_v54, %v5903_v33  ;;  %6498 = vmatpush.bf16.msra.mxu2 %v9233_v8 }
 0x834   :  { %v5954_v6 = vmax.f32 %v13157_v17, %v5781_v53  ;;  %v5951_v17 = vmax.f32 %v13138_v41, %v5900_v20  ;;  %v9216_v41 = vld [vmem:[%s13580_s7 + $0xb0] sm:$0xff] }
 0x835   :  { %v5993_v56 = vmax.f32 %v5953_v42, 0.0  ;;  %6376 = vmatpush.bf16.msra.mxu0 %v9216_v41 }
 0x836   :  { %v5994_v51 = vmax.f32 %v5954_v6, 0.0  ;;  %v5991_v7 = vmax.f32 %v5951_v17, 0.0 }
 0x837   :  { %v5842_v62 = vpop.f32.mrf.mxu2  ;;  %v6049_v52 = vmax.f32 %v5989_v40, %v5993_v56  ;;  %6499 = vmatpush.bf16.msra.mxu2 %v9232_v27 }
 0x838   :  { %v6050_v14 = vmax.f32 %v5990_v37, %v5994_v51  ;;  %v5904_v30 = vpop.f32.mrf.mxu3  ;;  %v5721_v4 = vpop.f32.mrf.mxu0  ;;  %v9230_v51 = vld [vmem:[%s13580_s7 + $0x120] sm:$0xff] }
 0x839   :  { %v5905_v47 = vadd.f32 %v5904_v30, %v5842_v62  ;;  %v5783_v29 = vpop.f32.mrf.mxu1 }
 0x83a   :  { %v6052_v25 = vpack.c.bf16 %v6050_v14, %v6048_v31  ;;  %v5784_v6 = vadd.f32 %v5783_v29, %v5721_v4 }
 0x83b   :  { %v5955_v54 = vmax.f32 %v13160_v22, %v5905_v47  ;;  %v9225_v22 = vld [vmem:[%s13580_s7 + $0xf8] sm:$0xff]  ;;  %6500 = vmatpush.bf16.msra.mxu2 %v9231_v5  ;;  %v9244_v5 = vld [vmem:[%s13580_s7 + $0x190] sm:$0xff] }
 0x83c   :  { %6154 = vmatmul.bf16.vlgmr.msrb.gmra.mxu0 %v6052_v25  ;;  %6389 = vmatpush.bf16.msra.mxu1 %v9225_v22  ;;  %v5956_v62 = vmax.f32 %v13193_v3, %v5784_v6 }
 0x83d   :  { %v5995_v11 = vmax.f32 %v5955_v54, 0.0 }
 0x83e   :  { %v5996_v29 = vmax.f32 %v5956_v62, 0.0 }
 0x83f   :  { %v6051_v18 = vmax.f32 %v5991_v7, %v5995_v11  ;;  %v5845_v45 = vpop.f32.mrf.mxu2  ;;  %6501 = vmatpush.bf16.msra.mxu2 %v9230_v51  ;;  %v9242_v51 = vld [vmem:[%s13580_s7 + $0x180] sm:$0xff] }
 0x840   :  { %v5907_v34 = vpop.f32.mrf.mxu3  ;;  %v5723_v2 = vpop.f32.mrf.mxu0  ;;  %6390 = vmatpush.bf16.msra.mxu1 %v9224_v50 }
 0x841   :  { %v6053_v63 = vpack.c.bf16 %v6051_v18, %v6049_v52  ;;  %v5785_v19 = vpop.f32.mrf.mxu1  ;;  %v5908_v17 = vadd.f32 %v5907_v34, %v5845_v45  ;;  %v9228_v18 = vld [vmem:[%s13580_s7 + $0x110] sm:$0xff]  ;;  %v9237_v34 = vld [vmem:[%s13580_s7 + $0x158] sm:$0xff] }
 0x842   :  { %v5786_v0 = vadd.f32 %v5785_v19, %v5723_v2  ;;  %6516 = vmatpush.bf16.msra.mxu3 %v9237_v34  ;;  %v9227_v19 = vld [vmem:[%s13580_s7 + $0x108] sm:$0xff] }
 0x843   :  { %8586 = vmatmul.msk.bf16.vlgmr.msrb.gmra.mxu1 %vm5658_vm5, %v6053_v63  ;;  %v5957_v7 = vmax.f32 %v13196_v24, %v5908_v17  ;;  %v9239_v34 = vld [vmem:[%s13580_s7 + $0x168] sm:$0xff] }
 0x844   :  { %v5958_v31 = vmax.f32 %v13183_v61, %v5786_v0 }
 0x845   :  { %v5997_v2 = vmax.f32 %v5957_v7, 0.0 }
 0x846   :  { %v5998_v1 = vmax.f32 %v5958_v31, 0.0 }
 0x847   :  { %v5847_v59 = vpop.f32.mrf.mxu2 }
 0x848   :  { %v5909_v10 = vpop.f32.mrf.mxu3  ;;  %v5726_v32 = vpop.f32.mrf.mxu0 }
 0x849   :  { %v5788_v53 = vpop.f32.mrf.mxu1  ;;  %v5910_v47 = vadd.f32 %v5909_v10, %v5847_v59 }
 0x84a   :  { %v5789_v33 = vadd.f32 %v5788_v53, %v5726_v32  ;;  %v9245_v53 = vld [vmem:[%s13580_s7 + $0x198] sm:$0xff] }
 0x84b   :  { %6625 = vmatpush.bf16.msrb.mxu1 %v9245_v53 }
 0x84c   :  { %v5960_v15 = vmax.f32 %v13226_v28, %v5789_v33  ;;  %v9229_v28 = vld [vmem:[%s13580_s7 + $0x118] sm:$0xff]  ;;  %v9235_v33 = vld [vmem:[%s13580_s7 + $0x148] sm:$0xff] }
 0x84d   :  { %6502 = vmatpush.bf16.msra.mxu2 %v9229_v28 }
 0x84e   :  { %v6000_v4 = vmax.f32 %v5960_v15, 0.0  ;;  %v9243_v15 = vld [vmem:[%s13580_s7 + $0x188] sm:$0xff] }
 0x84f   :  { %v5850_v20 = vpop.f32.mrf.mxu2  ;;  %6626 = vmatpush.bf16.msrb.mxu1 %v9244_v5  ;;  %v9246_v5 = vld [vmem:[%s13580_s7 + $0x1a0] sm:$0xff] }
 0x850   :  { %v5912_v23 = vpop.f32.mrf.mxu3  ;;  %v5728_v37 = vpop.f32.mrf.mxu0  ;;  %v6271_v61 = vmax.f32 %v5996_v29, %v6000_v4 }
 0x851   :  { %v5790_v42 = vpop.f32.mrf.mxu1  ;;  %v5913_v30 = vadd.f32 %v5912_v23, %v5850_v20  ;;  %6503 = vmatpush.bf16.msra.mxu2 %v9228_v18  ;;  %v14154_v18 = vld [vmem:[#allocation102_spill] sm:$0xff] }
 0x852   :  { %v5791_v14 = vadd.f32 %v5790_v42, %v5728_v37 }
 0x853   :  { %v5961_v56 = vmax.f32 %v13229_v55, %v5913_v30  ;;  %6627 = vmatpush.bf16.msrb.mxu1 %v9243_v15 }
 0x854   :  { %v5962_v44 = vmax.f32 %v13213_v46, %v5791_v14  ;;  %v14152_v46 = vld [vmem:[#allocation95_spill] sm:$0xff] }
 0x855   :  { %v5959_v11 = vmax.f32 %v14152_v46, %v5910_v47  ;;  %v6001_v22 = vmax.f32 %v5961_v56, 0.0  ;;  %6504 = vmatpush.bf16.msra.mxu2 %v9227_v19 }
 0x856   :  { %v6002_v25 = vmax.f32 %v5962_v44, 0.0  ;;  %v9241_v44 = vld [vmem:[%s13580_s7 + $0x178] sm:$0xff] }
 0x857   :  { %v5852_v3 = vpop.f32.mrf.mxu2  ;;  %v5999_v24 = vmax.f32 %v5959_v11, 0.0  ;;  %v6272_v39 = vmax.f32 %v5997_v2, %v6001_v22  ;;  %6628 = vmatpush.bf16.msrb.mxu1 %v9242_v51 }
 0x858   :  { %v6273_v54 = vmax.f32 %v5998_v1, %v6002_v25  ;;  %v5914_v58 = vpop.f32.mrf.mxu3  ;;  %v5731_v40 = vpop.f32.mrf.mxu0 }
 0x859   :  { %v5915_v41 = vadd.f32 %v5914_v58, %v5852_v3  ;;  %v5793_v52 = vpop.f32.mrf.mxu1 }
 0x85a   :  { %v6275_v45 = vpack.c.bf16 %v6273_v54, %v6271_v61  ;;  %v5794_v42 = vadd.f32 %v5793_v52, %v5731_v40  ;;  %v9240_v61 = vld [vmem:[%s13580_s7 + $0x170] sm:$0xff]  ;;  %v14153_v52 = vld [vmem:[#allocation96_spill] sm:$0xff] }
 0x85b   :  { %v5963_v55 = vmax.f32 %v13216_v43, %v5915_v41  ;;  %v9236_v43 = vld [vmem:[%s13580_s7 + $0x150] sm:$0xff]  ;;  %6629 = vmatpush.bf16.msrb.mxu1 %v9241_v44 }
 0x85c   :  { %6377 = vmatmul.bf16.vlgmr.msra.gmra.mxu0 %v6275_v45  ;;  %6517 = vmatpush.bf16.msra.mxu3 %v9236_v43  ;;  %v5964_v47 = vmax.f32 %v13253_v49, %v5794_v42 }
 0x85d   :  { %v6003_v63 = vmax.f32 %v5963_v55, 0.0 }
 0x85e   :  { %v6004_v54 = vmax.f32 %v5964_v47, 0.0 }
 0x85f   :  { %v6274_v50 = vmax.f32 %v5999_v24, %v6003_v63  ;;  %v5855_v8 = vpop.f32.mrf.mxu2  ;;  %6630 = vmatpush.bf16.msrb.mxu1 %v9240_v61 }
 0x860   :  { %v5917_v59 = vpop.f32.mrf.mxu3  ;;  %v5733_v27 = vpop.f32.mrf.mxu0  ;;  %6518 = vmatpush.bf16.msra.mxu3 %v9235_v33 }
 0x861   :  { %v6276_v10 = vpack.c.bf16 %v6274_v50, %v6272_v39  ;;  %v5795_v32 = vpop.f32.mrf.mxu1  ;;  %v5918_v3 = vadd.f32 %v5917_v59, %v5855_v8  ;;  %v9238_v8 = vld [vmem:[%s13580_s7 + $0x160] sm:$0xff] }
 0x862   :  { %v5796_v62 = vadd.f32 %v5795_v32, %v5733_v27 }
 0x863   :  { %8698 = vmatmul.msk.bf16.vlgmr.msra.gmra.mxu1 %vm5658_vm5, %v6276_v10  ;;  %v9247_v10 = vld [vmem:[%s13580_s7 + $0x1a8] sm:$0xff] }
 0x864   :  { %v5966_v28 = vmax.f32 %v13243_v38, %v5796_v62  ;;  %6631 = vmatpush.bf16.msrb.mxu1 %v9239_v34 }
 0x866   :  { %v6006_v58 = vmax.f32 %v5966_v28, 0.0 }
 0x867   :  { %v5857_v6 = vpop.f32.mrf.mxu2 }
 0x868   :  { %v5919_v0 = vpop.f32.mrf.mxu3  ;;  %v5736_v20 = vpop.f32.mrf.mxu0  ;;  %6632 = vmatpush.bf16.msrb.mxu1 %v9238_v8  ;;  %v9252_v8 = vld [vmem:[%s13583_s9 + $0x18] sm:$0xff] }
 0x869   :  { %v5798_v23 = vpop.f32.mrf.mxu1  ;;  %6708 = vmatpush.bf16.msrb.mxu0 %v9252_v8 }
 0x86a   :  { %v5799_v37 = vadd.f32 %v5798_v23, %v5736_v20 }
 0x86c   :  { %v5968_v14 = vmax.f32 %v13285_v16, %v5799_v37  ;;  %v5920_v16 = vadd.f32 %v5919_v0, %v5857_v6 }
 0x86e   :  { %v6008_v25 = vmax.f32 %v5968_v14, 0.0  ;;  %v5967_v45 = vmax.f32 %v14154_v18, %v5920_v16 }
 0x86f   :  { %v5860_v31 = vpop.f32.mrf.mxu2 }
 0x870   :  { %v5922_v30 = vpop.f32.mrf.mxu3  ;;  %v5738_v4 = vpop.f32.mrf.mxu0  ;;  %v6399_v46 = vmax.f32 %v6004_v54, %v6008_v25  ;;  %v6007_v39 = vmax.f32 %v5967_v45, 0.0 }
 0x871   :  { %v5800_v17 = vpop.f32.mrf.mxu1  ;;  %v5923_v1 = vadd.f32 %v5922_v30, %v5860_v31 }
 0x872   :  { %v5801_v29 = vadd.f32 %v5800_v17, %v5738_v4 }
 0x873   :  { %v5969_v7 = vmax.f32 %v13288_v13, %v5923_v1  ;;  %v9248_v13 = vld [vmem:[%s13580_s7 + $0x1b0] sm:$0xff] }
 0x874   :  { %v5970_v56 = vmax.f32 %v13278_v36, %v5801_v29  ;;  %v5965_v36 = vmax.f32 %v14153_v52, %v5918_v3  ;;  %6644 = vmatpush.bf16.msrb.mxu3 %v9248_v13 }
 0x875   :  { %v6009_v24 = vmax.f32 %v5969_v7, 0.0 }
 0x876   :  { %v6010_v40 = vmax.f32 %v5970_v56, 0.0  ;;  %v6005_v19 = vmax.f32 %v5965_v36, 0.0 }
 0x877   :  { %v5862_v49 = vpop.f32.mrf.mxu2 }
 0x878   :  { %v6401_v38 = vmax.f32 %v6006_v58, %v6010_v40  ;;  %v5924_v11 = vpop.f32.mrf.mxu3  ;;  %v5741_v41 = vpop.f32.mrf.mxu0  ;;  %v6400_v43 = vmax.f32 %v6005_v19, %v6009_v24  ;;  %6645 = vmatpush.bf16.msrb.mxu3 %v9247_v10 }
 0x879   :  { %v5925_v22 = vadd.f32 %v5924_v11, %v5862_v49  ;;  %v5803_v55 = vpop.f32.mrf.mxu1  ;;  %v14155_v11 = vld [vmem:[#allocation97_spill] sm:$0xff] }
 0x87a   :  { %v6403_v2 = vpack.c.bf16 %v6401_v38, %v6399_v46  ;;  %v5804_v37 = vadd.f32 %v5803_v55, %v5741_v41 }
 0x87b   :  { %v5971_v63 = vmax.f32 %v13281_v57, %v5925_v22 }
 0x87c   :  { %6505 = vmatmul.bf16.vlgmr.msra.gmra.mxu2 %v6403_v2  ;;  %6646 = vmatpush.bf16.msrb.mxu3 %v9246_v5  ;;  %v5972_v4 = vmax.f32 %v13313_v48, %v5804_v37 }
 0x87d   :  { %v6011_v50 = vmax.f32 %v5971_v63, 0.0 }
 0x87e   :  { %v6012_v56 = vmax.f32 %v5972_v4, 0.0 }
 0x87f   :  { %v6402_v59 = vmax.f32 %v6007_v39, %v6011_v50  ;;  %v5865_v27 = vpop.f32.mrf.mxu2 }
 0x880   :  { %v5927_v32 = vpop.f32.mrf.mxu3  ;;  %v5743_v53 = vpop.f32.mrf.mxu0 }
 0x881   :  { %v6404_v57 = vpack.c.bf16 %v6402_v59, %v6400_v43  ;;  %v5805_v33 = vpop.f32.mrf.mxu1  ;;  %v5928_v1 = vadd.f32 %v5927_v32, %v5865_v27  ;;  %v9251_v59 = vld [vmem:[%s13583_s9 + $0x10] sm:$0xff]  ;;  %v9250_v32 = vld [vmem:[%s13583_s9 + $0x8] sm:$0xff] }
 0x882   :  { %v5806_v51 = vadd.f32 %v5805_v33, %v5743_v53  ;;  %6709 = vmatpush.bf16.msrb.mxu0 %v9251_v59 }
 0x883   :  { %8765 = vmatmul.msk.bf16.vlgmr.msra.gmra.mxu3 %vm5658_vm5, %v6404_v57  ;;  %v5973_v48 = vmax.f32 %v13319_v26, %v5928_v1  ;;  %v9249_v57 = vld [vmem:[%s13583_s9] sm:$0xff] }
 0x884   :  { %v5974_v44 = vmax.f32 %v13306_v60, %v5806_v51 }
 0x885   :  { %v6013_v52 = vmax.f32 %v5973_v48, 0.0 }
 0x886   :  { %v6014_v3 = vmax.f32 %v5974_v44, 0.0  ;;  %6710 = vmatpush.bf16.msrb.mxu0 %v9250_v32 }
 0x887   :  { %v5867_v6 = vpop.f32.mrf.mxu2 }
 0x888   :  { %v5929_v0 = vpop.f32.mrf.mxu3  ;;  %v5746_v20 = vpop.f32.mrf.mxu0 }
 0x889   :  { %v5808_v15 = vpop.f32.mrf.mxu1  ;;  %v5930_v25 = vadd.f32 %v5929_v0, %v5867_v6 }
 0x88a   :  { %v5809_v23 = vadd.f32 %v5808_v15, %v5746_v20  ;;  %6711 = vmatpush.bf16.msrb.mxu0 %v9249_v57 }
 0x88b   :  { %v5975_v60 = vmax.f32 %v13309_v12, %v5930_v25 }
 0x88c   :  { %v5976_v62 = vmax.f32 %v13364_v21, %v5809_v23 }
 0x88d   :  { %v6015_v36 = vmax.f32 %v5975_v60, 0.0 }
 0x88e   :  { %v6016_v28 = vmax.f32 %v5976_v62, 0.0 }
 0x88f   :  { %v5870_v42 = vpop.f32.mrf.mxu2 }
 0x890   :  { %v5932_v31 = vpop.f32.mrf.mxu3  ;;  %v5748_v14 = vpop.f32.mrf.mxu0  ;;  %v6527_v54 = vmax.f32 %v6012_v56, %v6016_v28 }
 0x891   :  { %v5810_v30 = vpop.f32.mrf.mxu1  ;;  %v5933_v47 = vadd.f32 %v5932_v31, %v5870_v42 }
 0x892   :  { %v5811_v17 = vadd.f32 %v5810_v30, %v5748_v14 }
 0x893   :  { %v5977_v61 = vmax.f32 %v13370_v35, %v5933_v47 }
 0x894   :  { %v5978_v29 = vmax.f32 %v13351_v9, %v5811_v17 }
 0x895   :  { %v6017_v9 = vmax.f32 %v5977_v61, 0.0 }
 0x896   :  { %v6018_v16 = vmax.f32 %v5978_v29, 0.0 }
 0x897   :  { %v5872_v21 = vpop.f32.mrf.mxu2  ;;  %v6528_v35 = vmax.f32 %v6013_v52, %v6017_v9 }
 0x898   :  { %v6529_v58 = vmax.f32 %v6014_v3, %v6018_v16  ;;  %v5934_v40 = vpop.f32.mrf.mxu3  ;;  %v5751_v7 = vpop.f32.mrf.mxu0  ;;  %v9253_v16 = vld [vmem:[%s13581_s8] ss:$0 sm:$0xff] }
 0x899   :  { %v5935_v49 = vadd.f32 %v5934_v40, %v5872_v21  ;;  %v5813_v46 = vpop.f32.mrf.mxu1 }
 0x89a   :  { %v6531_v38 = vpack.c.bf16 %v6529_v58, %v6527_v54 }
 0x89b   :  { %v5979_v41 = vmax.f32 %v14155_v11, %v5935_v49 }
 0x89c   :  { %6633 = vmatmul.bf16.vlgmr.msrb.gmra.mxu1 %v6531_v38  ;;  %v9254_v38 = vld [vmem:[%s13582_s10] ss:$0 sm:$0xff] }
 0x89d   :  { %v6019_v18 = vmax.f32 %v5979_v41, 0.0 }
 0x89f   :  { %v6530_v45 = vmax.f32 %v6015_v36, %v6019_v18  ;;  %v5875_v22 = vpop.f32.mrf.mxu2 }
 0x8a0   :  { %v5937_v55 = vpop.f32.mrf.mxu3  ;;  %v5752_v34 = vpop.f32.mrf.mxu0 }
 0x8a1   :  { %v6532_v2 = vpack.c.bf16 %v6530_v45, %v6528_v35  ;;  %v5814_v13 = vpop.f32.mrf.mxu1 }
 0x8a3   :  { %8832 = vmatmul.msk.bf16.vlgmr.msrb.gmra.mxu3 %vm5658_vm5, %v6532_v2 }
 0x8a7   :  { %v5876_v12 = vpop.f32.mrf.mxu2 }
 0x8a8   :  { %v5938_v26 = vpop.f32.mrf.mxu3 }
 0x8af   :  { %v6252_v43 = vpop.f32.mrf.mxu2 }
 0x8b0   :  { %v6266_v63 = vpop.f32.mrf.mxu3 }
 0x8b7   :  { %v6254_v33 = vpop.f32.mrf.mxu2 }
 0x8b8   :  { %v6268_v39 = vpop.f32.mrf.mxu3 }
 0x8b9   :  { %v6155_v50 = vpop.f32.mrf.mxu0 }
 0x8c0   :  { %v6169_v24 = vpop.f32.mrf.mxu1 }
 0x8c1   :  { %v6157_v53 = vpop.f32.mrf.mxu0  ;;  %v6170_v20 = vadd.f32 %v6169_v24, %v6155_v50 }
 0x8c3   :  { %v6253_v23 = vadd.f32 %v6252_v43, %v6170_v20 }
 0x8c5   :  { %v6267_v14 = vadd.f32 %v6266_v63, %v6253_v23 }
 0x8c8   :  { %v6171_v19 = vpop.f32.mrf.mxu1 }
 0x8c9   :  { %v6172_v37 = vadd.f32 %v6171_v19, %v6157_v53 }
 0x8cb   :  { %v6255_v31 = vadd.f32 %v6254_v33, %v6172_v37 }
 0x8cd   :  { %v6269_v29 = vadd.f32 %v6268_v39, %v6255_v31 }
 0x8d9   :  { %v6378_v6 = vpop.f32.mrf.mxu0 }
 0x8e0   :  { %v6392_v27 = vpop.f32.mrf.mxu1 }
 0x8e1   :  { %v6393_v42 = vadd.f32 %v6392_v27, %v6378_v6  ;;  %v6380_v4 = vpop.f32.mrf.mxu0 }
 0x8e3   :  { %v6397_v44 = vadd.f32 %v6393_v42, %v6267_v14 }
 0x8e8   :  { %v6394_v5 = vpop.f32.mrf.mxu1 }
 0x8e9   :  { %v6395_v17 = vadd.f32 %v6394_v5, %v6380_v4 }
 0x8eb   :  { %v6398_v56 = vadd.f32 %v6395_v17, %v6269_v29 }
 0x8ff   :  { %v6506_v15 = vpop.f32.mrf.mxu2 }
 0x906   :  { %v6520_v10 = vpop.f32.mrf.mxu3 }
 0x907   :  { %v6521_v30 = vadd.f32 %v6520_v10, %v6506_v15  ;;  %v6508_v28 = vpop.f32.mrf.mxu2 }
 0x909   :  { %v6525_v1 = vadd.f32 %v6521_v30, %v6397_v44 }
 0x90e   :  { %v6522_v0 = vpop.f32.mrf.mxu3 }
 0x90f   :  { %v6523_v25 = vadd.f32 %v6522_v0, %v6508_v28 }
 0x911   :  { %v6526_v54 = vadd.f32 %v6523_v25, %v6398_v56 }
 0x919   :  { %v6634_v51 = vpop.f32.mrf.mxu1 }
 0x921   :  { %v6636_v61 = vpop.f32.mrf.mxu1 }
 0x926   :  { %v6648_v62 = vpop.f32.mrf.mxu3 }
 0x927   :  { %v6649_v47 = vadd.f32 %v6648_v62, %v6634_v51 }
 0x929   :  { %v6653_v3 = vadd.f32 %v6649_v47, %v6525_v1 }
 0x92b   :  { %v6659_v40 = vadd.f32 %v9253_v16, %v6653_v3 }
 0x92d   :  { %v6661_v60 = vmax.f32 %v6659_v40, 0.0 }
 0x92e   :  { %v6650_v21 = vpop.f32.mrf.mxu3 }
 0x92f   :  { %v6651_v58 = vadd.f32 %v6650_v21, %v6636_v61 }
 0x931   :  { %v6654_v7 = vadd.f32 %v6651_v58, %v6526_v54 }
 0x933   :  { %v6660_v48 = vadd.f32 %v9253_v16, %v6654_v7 }
 0x935   :  { %v6662_v49 = vmax.f32 %v6660_v48, 0.0 }
 0x937   :  { %v6663_v46 = vpack.c.bf16 %v6662_v49, %v6661_v60 }
 0x939   :  { %8849 = vmatmul.msk.bf16.vlgmr.msrb.gmra.mxu0 %vm6700_vm6, %v6663_v46 }
 0x9b6   :  { %v6713_v9 = vpop.f32.mrf.mxu0 }
 0x9b7   :  { %v6714_v11 = vadd.f32 %v9254_v38, %v6713_v9 }
 0x9b9   :  { %6718 = vmax.xlane.f32.xlu0 %v6714_v11 }
 0x9be   :  { %v6715_v41 = vpop.f32.mrf.mxu0 }
 0x9bf   :  { %v6716_v52 = vadd.f32 %v9254_v38, %v6715_v41 }
 0x9c1   :  { %6720 = vmax.xlane.f32.xlu0 %v6716_v52 }
 0xa2c   :  { %v6719_v36 = vpop.xlane.xlu0 %6718 }
 0xa2d   :  { %v6722_v18 = vsub.f32 %v6714_v11, %v6719_v36 }
 0xa2f   :  { %v6724_v35 = vmul.f32 1.442695, %v6722_v18 }
 0xa31   :  { %9255 = vpow2.f32 %v6724_v35 }
 0xa34   :  { %v6721_v45 = vpop.xlane.xlu0 %6720 }
 0xa35   :  { %v6723_v22 = vsub.f32 %v6716_v52, %v6721_v45 }
 0xa37   :  { %v9256_v55 = vpop.eup %9255  ;;  %v6726_v34 = vmul.f32 1.442695, %v6723_v22 }
 0xa38   :  { %6728 = vadd.xlane.f32.xlu1 %v9256_v55 }
 0xa39   :  { %9257 = vpow2.f32 %v6726_v34 }
 0xa3f   :  { %v9258_v2 = vpop.eup %9257 }
 0xa40   :  { %6730 = vadd.xlane.f32.xlu1 %v9258_v2 }
 0xaab   :  { %v6729_v13 = vpop.xlane.xlu1 %6728 }
 0xaac   :  { %9259 = vlog2.f32 %v6729_v13 }
 0xab2   :  { %v9260_v12 = vpop.eup %9259 }
 0xab3   :  { %v6733_v26 = vmul.f32 0.6931472, %v9260_v12  ;;  %v6731_v24 = vpop.xlane.xlu1 %6730 }
 0xab4   :  { %9261 = vlog2.f32 %v6731_v24 }
 0xab5   :  { %v6736_v63 = vsub.f32 %v6722_v18, %v6733_v26 }
 0xab7   :  { %6738 = vst [vmem:[%s13584_s11] sm:$0xff] %v6736_v63 }
 0xaba   :  { %v9262_v19 = vpop.eup %9261 }
 0xabb   :  { %v6735_v39 = vmul.f32 0.6931472, %v9262_v19 }
 0xabd   :  { %v6737_v50 = vsub.f32 %v6723_v22, %v6735_v39 }
 0xabf   :  { %6739 = vst [vmem:[%s13584_s11 + $0x8] sm:$0xff] %v6737_v50 }

</bundles_post_ra>
